<compile_context>
chip_gen: v7x
topology: tpu7x:2x2x1
jax: 0.10.0
libtpu: 0.0.40
codegen_flags: <defaults>
</compile_context>

<pallas_src>
import functools

import jax
import jax.numpy as jnp
from jax import lax
from jax.experimental import pallas as pl
from jax.experimental.pallas import tpu as pltpu


# ----------------------------------------------------------------------------
# Batch-block selection
# ----------------------------------------------------------------------------
def _pick_batch_block(B):
    """Return (Bb, B_pad).

    Bb is always a multiple of 8 so the (T, Bb, .) blocks are sublane-aligned
    (free reshapes, dense stores).  Prefer >=2 grid steps (v7x dual TC) and
    grow Bb so T*Bb rows feed the MXU better when the batch allows it.
    """
    B_pad = max(8, ((B + 7) // 8) * 8)
    Bb = 8
    for cand in (32, 16):
        if B_pad % cand == 0 and B_pad // cand >= 2:
            Bb = cand
            break
    return Bb, B_pad


# ----------------------------------------------------------------------------
# Fused kernel factory
# ----------------------------------------------------------------------------
def _make_fused_kernel(T, Bb, D, E, H, L):
    """Fused forward for one (Bb sequences x T steps) batch block.

    Ref order:
      inputs : x(T,Bb,D), fc1_wt(D,E), fc1_b(1,E),
               L x enc layer [w_ih(in,3H), w_hh(H,3H), b(1,4H)],
               L x dec layer [w_ih(in,3E), w_hh(E,3E), b(1,4E)],
               fc2_wt(E,D), fc2_b(1,D)
      outputs: out_enc(T,Bb,H), out_dec(T,Bb,D)
      scratch: seq_h(T,Bb,H) f32, seq_e(T,Bb,E) f32
    Bias packing (prepare_params): [b_ir+b_hr | b_iz+b_hz | b_in | b_hn].
    """
    PER = 3  # refs per GRU layer

    def gru_layer(x_flat, w_ih_ref, w_hh_ref, b_ref, seq_ref):
        Hh = w_hh_ref.shape[0]
        w_ih = w_ih_ref[...]
        w_hh = w_hh_ref[...]
        b = b_ref[...]                                    # (1, 4H)
        b_i = b[:, :3 * Hh]                               # r/z hidden bias folded
        b_hn = jnp.broadcast_to(b[:, 3 * Hh:], (Bb, Hh))  # hoisted out of the loop

        # Hoisted input projection: ONE (T*Bb, in) @ (in, 3H) matmul for all
        # timesteps and all three gates.
        gi = jnp.dot(x_flat.astype(w_ih.dtype), w_ih,
                     preferred_element_type=jnp.float32) + b_i      # (T*Bb, 3H)
        gi = gi.reshape(T, Bb, 3 * Hh)

        h = jnp.zeros((Bb, Hh), jnp.float32)
        # Statically unrolled recurrence (T small & static): only ONE fused
        # h @ W_hh matmul + one sigmoid + one tanh sit on the serial path.
        for t in range(T):
            gh = jnp.dot(h.astype(w_hh.dtype), w_hh,
                         preferred_element_type=jnp.float32)        # (Bb, 3H)
            gi_t = gi[t]                                            # free leading slice
            rz = jax.nn.sigmoid(gi_t[:, :2 * Hh] + gh[:, :2 * Hh])  # fused r|z sigmoid
            r = rz[:, :Hh]
            z = rz[:, Hh:]
            n = jnp.tanh(gi_t[:, 2 * Hh:] + r * (gh[:, 2 * Hh:] + b_hn))
            h = (1.0 - z) * n + z * h
            seq_ref[t] = h                 # dense (Bb, H) store, overlaps recurrence
        # Caller reads seq_ref for the next layer / output.

    def kernel(*refs):
        x_ref, fc1_wt, fc1_b = refs[0], refs[1], refs[2]
        pos = 3
        enc = [refs[pos + PER * l: pos + PER * (l + 1)] for l in range(L)]
        pos += PER * L
        dec = [refs[pos + PER * l: pos + PER * (l + 1)] for l in range(L)]
        pos += PER * L
        fc2_wt, fc2_b = refs[pos], refs[pos + 1]
        out_enc, out_dec = refs[pos + 2], refs[pos + 3]
        seq_h, seq_e = refs[pos + 4], refs[pos + 5]

        # fc1 (mask1 folded into weights/bias) + ReLU: one (T*Bb, D)@(D, E).
        x = x_ref[...].astype(jnp.float32).reshape(T * Bb, D)
        w1 = fc1_wt[...]
        cur = jnp.maximum(
            jnp.dot(x.astype(w1.dtype), w1, preferred_element_type=jnp.float32)
            + fc1_b[...], 0.0)                                       # (T*Bb, E)

        # GRU encoder stack (all layers write the (T, Bb, H) scratch).
        for l in range(L):
            gru_layer(cur, *enc[l], seq_h)
            cur = seq_h[...].reshape(T * Bb, H)
        out_enc[...] = seq_h[...].astype(out_enc.dtype)              # dense bulk store

        # GRU decoder stack (writes the (T, Bb, E) scratch).
        for l in range(L):
            gru_layer(cur, *dec[l], seq_e)
            cur = seq_e[...].reshape(T * Bb, E)

        # (mask2 folded) fc2 + ReLU: one (T*Bb, E)@(E, D).
        w2 = fc2_wt[...]
        y = jnp.dot(cur.astype(w2.dtype), w2,
                    preferred_element_type=jnp.float32) + fc2_b[...]
        out_dec[...] = jnp.maximum(y, 0.0).reshape(T, Bb, D).astype(out_dec.dtype)

    return kernel


# ----------------------------------------------------------------------------
# Wrapper
# ----------------------------------------------------------------------------
def netd_masked_forward(kparams, X, *, single_buffer_weights=True):
    B, T = X.shape[0], X.shape[1]
    X = X.reshape(B, T, -1)                                  # flatten(2)
    D = X.shape[-1]
    E = kparams["fc1_wt"].shape[1]
    H = kparams["enc_layers"][-1][1].shape[0]                # w_hh packed: (H, 3H)
    L = len(kparams["enc_layers"])
    out_dtype = X.dtype

    Bb, B_pad = _pick_batch_block(B)
    if B_pad != B:
        X = jnp.pad(X, ((0, B_pad - B), (0, 0), (0, 0)))
    # Time-major layout for the kernel: per-timestep slices/stores hit the
    # leading (untiled) axis, so the recurrence only does dense (Bb, .) tiles.
    Xt = jnp.transpose(X, (1, 0, 2))                         # (T, B_pad, D)

    flat = [Xt, kparams["fc1_wt"], kparams["fc1_b"]]
    for lp in kparams["enc_layers"]:
        flat += list(lp)
    for lp in kparams["dec_layers"]:
        flat += list(lp)
    flat += [kparams["fc2_wt"], kparams["fc2_b"]]

    def const_spec(a):
        nd = a.ndim
        idx = lambda b, _nd=nd: (0,) * _nd
        if single_buffer_weights:
            try:
                # Weights never change across the batch grid: single-buffer
                # them (halves weight VMEM; matters on v7x's 64 MiB VMEM).
                return pl.BlockSpec(a.shape, idx, pipeline_mode=pl.Buffered(1))
            except (TypeError, AttributeError):
                pass
        return pl.BlockSpec(a.shape, idx)

    in_specs = [pl.BlockSpec((T, Bb, D), lambda b: (0, b, 0))]
    in_specs += [const_spec(a) for a in flat[1:]]

    kernel = _make_fused_kernel(T, Bb, D, E, H, L)
    enc_t, dec_t = pl.pallas_call(
        kernel,
        out_shape=(jax.ShapeDtypeStruct((T, B_pad, H), out_dtype),
                   jax.ShapeDtypeStruct((T, B_pad, D), out_dtype)),
        grid_spec=pltpu.PrefetchScalarGridSpec(
            num_scalar_prefetch=0,
            grid=(B_pad // Bb,),
            in_specs=in_specs,
            out_specs=[pl.BlockSpec((T, Bb, H), lambda b: (0, b, 0)),
                       pl.BlockSpec((T, Bb, D), lambda b: (0, b, 0))],
            scratch_shapes=[pltpu.VMEM((T, Bb, H), jnp.float32),
                            pltpu.VMEM((T, Bb, E), jnp.float32)]),
        compiler_params=pltpu.CompilerParams(
            dimension_semantics=("parallel",)),
    )(*flat)

    # Back to batch-first, drop batch padding.
    X_enc = jnp.transpose(enc_t, (1, 0, 2))[:B]
    X_dec = jnp.transpose(dec_t, (1, 0, 2))[:B]
    return X_enc, X_dec


# ----------------------------------------------------------------------------
# Parameter construction (raw = PyTorch layout) and kernel-ready prep
# ----------------------------------------------------------------------------
def init_params(args, key):
    D = args["data_dim"]
    E = args["emb_dim"]
    H = args["RNN_hid_dim"]
    L = args["num_layers"]

    def rnd(k, shape):
        return 0.1 * jax.random.normal(k, shape, dtype=jnp.float32)

    keys = iter(jax.random.split(key, 8 + 8 * L))
    params = {
        "fc1_w": rnd(next(keys), (E, D)),
        "fc1_b": rnd(next(keys), (E,)),
        "fc2_w": rnd(next(keys), (D, E)),
        "fc2_b": rnd(next(keys), (D,)),
        # Module initializes the masks to ones; non-trivial values here just
        # exercise the mask-folding path (any values supported).
        "mask1": 0.5 + jax.random.uniform(next(keys), (E,), dtype=jnp.float32),
        "mask2": 0.5 + jax.random.uniform(next(keys), (E,), dtype=jnp.float32),
    }

    def gru_stack(in_dim, hid_dim):
        layers = []
        for layer in range(L):
            i_dim = in_dim if layer == 0 else hid_dim
            layers.append((
                rnd(next(keys), (3 * hid_dim, i_dim)),    # W_ih
                rnd(next(keys), (3 * hid_dim, hid_dim)),  # W_hh
                rnd(next(keys), (3 * hid_dim,)),          # b_ih
                rnd(next(keys), (3 * hid_dim,)),          # b_hh
            ))
        return layers

    params["enc_layers"] = gru_stack(E, H)   # rnn_enc_layer: emb -> hid
    params["dec_layers"] = gru_stack(H, E)   # rnn_dec_layer: hid -> emb
    return params


def prepare_params(raw, param_dtype=jnp.float32):
    """Fold masks/biases, pack gate weights, pre-transpose for the kernel.

    param_dtype=jnp.bfloat16 feeds the MXU natively on v6e/v7x (accumulation
    stays f32 in-kernel); only worthwhile once E/H reach ~128.
    """
    E, D = raw["fc1_w"].shape
    kp = {
        # Module does relu(fc1(x)*m1): mask applied BEFORE the ReLU, so
        # relu((x@W1.T+b1)*m1) == relu(x@(W1.T*m1) + b1*m1) exactly.
        "fc1_wt": (raw["fc1_w"].T * raw["mask1"][None, :]).astype(param_dtype),
        "fc1_b": (raw["fc1_b"] * raw["mask1"]).reshape(1, E).astype(jnp.float32),
        # (x*m2)@W2.T + b2 == x@(m2[:,None]*W2.T) + b2
        "fc2_wt": (raw["mask2"][:, None] * raw["fc2_w"].T).astype(param_dtype),
        "fc2_b": raw["fc2_b"].reshape(1, D).astype(jnp.float32),
    }

    def prep_gru(layers):
        out = []
        for (w_ih, w_hh, b_ih, b_hh) in layers:
            H = w_ih.shape[0] // 3
            w_ih_p = w_ih.T.astype(param_dtype)            # (in, 3H), cols = r|z|n
            w_hh_p = w_hh.T.astype(param_dtype)            # (H, 3H),  cols = r|z|n
            b_all = jnp.concatenate([
                b_ih[:2 * H] + b_hh[:2 * H],               # r,z: fold hidden bias
                b_ih[2 * H:],                              # n: input bias
                b_hh[2 * H:],                              # n: hidden bias (stays in r*(.))
            ]).reshape(1, 4 * H).astype(jnp.float32)
            out.append((w_ih_p, w_hh_p, b_all))
        return out

    kp["enc_layers"] = prep_gru(raw["enc_layers"])
    kp["dec_layers"] = prep_gru(raw["dec_layers"])
    return kp


# ----------------------------------------------------------------------------
# Pure-JAX reference (PyTorch semantics, raw params) for correctness check
# ----------------------------------------------------------------------------
def _gru_ref(x, layers):
    for (w_ih, w_hh, b_ih, b_hh) in layers:
        H = w_hh.shape[1]
        B = x.shape[0]

        def step(h, x_t):
            gi = x_t @ w_ih.T + b_ih
            gh = h @ w_hh.T + b_hh
            r = jax.nn.sigmoid(gi[:, :H] + gh[:, :H])
            z = jax.nn.sigmoid(gi[:, H:2 * H] + gh[:, H:2 * H])
            n = jnp.tanh(gi[:, 2 * H:] + r * gh[:, 2 * H:])
            h = (1.0 - z) * n + z * h
            return h, h

        _, ys = lax.scan(step, jnp.zeros((B, H), x.dtype), jnp.swapaxes(x, 0, 1))
        x = jnp.swapaxes(ys, 0, 1)
    return x


def _ref_forward(params, X):
    B, T = X.shape[0], X.shape[1]
    X = X.reshape(B, T, -1)
    x = jnp.maximum((X @ params["fc1_w"].T + params["fc1_b"]) * params["mask1"], 0.0)
    X_enc = _gru_ref(x, params["enc_layers"])
    X_dec = _gru_ref(X_enc, params["dec_layers"])
    X_dec = (X_dec * params["mask2"]) @ params["fc2_w"].T + params["fc2_b"]
    return X_enc, jnp.maximum(X_dec, 0.0)


# ----------------------------------------------------------------------------
if __name__ == "__main__":
    args = {"data_dim": 16, "emb_dim": 16, "RNN_hid_dim": 32, "num_layers": 2}
    B, T = 16, 8   # B=16 -> Bb=8, grid of 2 batch blocks (both v7x TCs get work)

    key = jax.random.PRNGKey(0)
    k_in, k_par = jax.random.split(key)
    # Input like the PyTorch module sees: (B, T, 4, 4) -> flatten(2) -> data_dim=16
    X = jax.random.normal(k_in, (B, T, 4, 4), dtype=jnp.float32)
    raw_params = init_params(args, k_par)
    kparams = prepare_params(raw_params)

    fwd = jax.jit(functools.partial(netd_masked_forward, kparams))
    try:
        X_enc, X_dec = fwd(X)
        jax.block_until_ready((X_enc, X_dec))
    except Exception:
        # Fallback for JAX versions where single-buffered weight BlockSpecs
        # (pipeline_mode=pl.Buffered(1)) are not supported by the TPU pipeline.
        fwd = jax.jit(functools.partial(netd_masked_forward, kparams,
                                        single_buffer_weights=False))
        X_enc, X_dec = fwd(X)
        jax.block_until_ready((X_enc, X_dec))

    # Correctness check against the pure-JAX reference (raw PyTorch-layout params).
    ref_enc, ref_dec = _ref_forward(raw_params, X)
    assert X_enc.shape == (B, T, args["RNN_hid_dim"])
    assert X_dec.shape == (B, T, args["data_dim"])
    assert jnp.allclose(X_enc, ref_enc, atol=1e-4, rtol=1e-4), \
        float(jnp.max(jnp.abs(X_enc - ref_enc)))
    assert jnp.allclose(X_dec, ref_dec, atol=1e-4, rtol=1e-4), \
        float(jnp.max(jnp.abs(X_dec - ref_dec)))

    print("KERNEL_OK")
</pallas_src>

<mosaic_0001>
module attributes {stable_mosaic.version = 11 : i64} {
  func.func @kernel(%arg0: i32, %arg1: memref<8x8x16xf32, #tpu.memory_space<vmem>>, %arg2: memref<16x16xf32, #tpu.memory_space<vmem>>, %arg3: memref<1x16xf32, #tpu.memory_space<vmem>>, %arg4: memref<16x96xf32, #tpu.memory_space<vmem>>, %arg5: memref<32x96xf32, #tpu.memory_space<vmem>>, %arg6: memref<1x128xf32, #tpu.memory_space<vmem>>, %arg7: memref<32x96xf32, #tpu.memory_space<vmem>>, %arg8: memref<32x96xf32, #tpu.memory_space<vmem>>, %arg9: memref<1x128xf32, #tpu.memory_space<vmem>>, %arg10: memref<32x48xf32, #tpu.memory_space<vmem>>, %arg11: memref<16x48xf32, #tpu.memory_space<vmem>>, %arg12: memref<1x64xf32, #tpu.memory_space<vmem>>, %arg13: memref<16x48xf32, #tpu.memory_space<vmem>>, %arg14: memref<16x48xf32, #tpu.memory_space<vmem>>, %arg15: memref<1x64xf32, #tpu.memory_space<vmem>>, %arg16: memref<16x16xf32, #tpu.memory_space<vmem>>, %arg17: memref<1x16xf32, #tpu.memory_space<vmem>>, %arg18: memref<8x8x32xf32, #tpu.memory_space<vmem>>, %arg19: memref<8x8x16xf32, #tpu.memory_space<vmem>>, %arg20: memref<8x8x32xf32, #tpu.memory_space<vmem>>, %arg21: memref<8x8x16xf32, #tpu.memory_space<vmem>>) attributes {dimension_semantics = [#tpu.dimension_semantics<parallel>], iteration_bounds = array<i64: 2>, scalar_prefetch = 0 : i64, scratch_operands = 2 : i64, tpu.core_type = #tpu.core_type<tc>, window_params = [{transform_indices = @transform_0, window_bounds = array<i64: 8, 8, 16>}, {pipeline_mode = #tpu.pipeline_mode<synchronous>, transform_indices = @transform_1, window_bounds = array<i64: 16, 16>}, {pipeline_mode = #tpu.pipeline_mode<synchronous>, transform_indices = @transform_2, window_bounds = array<i64: 1, 16>}, {pipeline_mode = #tpu.pipeline_mode<synchronous>, transform_indices = @transform_3, window_bounds = array<i64: 16, 96>}, {pipeline_mode = #tpu.pipeline_mode<synchronous>, transform_indices = @transform_4, window_bounds = array<i64: 32, 96>}, {pipeline_mode = #tpu.pipeline_mode<synchronous>, transform_indices = @transform_5, window_bounds = array<i64: 1, 128>}, {pipeline_mode = #tpu.pipeline_mode<synchronous>, transform_indices = @transform_6, window_bounds = array<i64: 32, 96>}, {pipeline_mode = #tpu.pipeline_mode<synchronous>, transform_indices = @transform_7, window_bounds = array<i64: 32, 96>}, {pipeline_mode = #tpu.pipeline_mode<synchronous>, transform_indices = @transform_8, window_bounds = array<i64: 1, 128>}, {pipeline_mode = #tpu.pipeline_mode<synchronous>, transform_indices = @transform_9, window_bounds = array<i64: 32, 48>}, {pipeline_mode = #tpu.pipeline_mode<synchronous>, transform_indices = @transform_10, window_bounds = array<i64: 16, 48>}, {pipeline_mode = #tpu.pipeline_mode<synchronous>, transform_indices = @transform_11, window_bounds = array<i64: 1, 64>}, {pipeline_mode = #tpu.pipeline_mode<synchronous>, transform_indices = @transform_12, window_bounds = array<i64: 16, 48>}, {pipeline_mode = #tpu.pipeline_mode<synchronous>, transform_indices = @transform_13, window_bounds = array<i64: 16, 48>}, {pipeline_mode = #tpu.pipeline_mode<synchronous>, transform_indices = @transform_14, window_bounds = array<i64: 1, 64>}, {pipeline_mode = #tpu.pipeline_mode<synchronous>, transform_indices = @transform_15, window_bounds = array<i64: 16, 16>}, {pipeline_mode = #tpu.pipeline_mode<synchronous>, transform_indices = @transform_16, window_bounds = array<i64: 1, 16>}, {transform_indices = @transform_17, window_bounds = array<i64: 8, 8, 32>}, {transform_indices = @transform_18, window_bounds = array<i64: 8, 8, 16>}]} {
    %c0 = arith.constant 0 : index
    %c0_0 = arith.constant 0 : index
    %c0_1 = arith.constant 0 : index
    %0 = vector.load %arg1[%c0, %c0_0, %c0_1] : memref<8x8x16xf32, #tpu.memory_space<vmem>>, vector<8x8x16xf32>
    %1 = vector.shape_cast %0 : vector<8x8x16xf32> to vector<64x16xf32>
    %c0_2 = arith.constant 0 : index
    %c0_3 = arith.constant 0 : index
    %2 = vector.load %arg2[%c0_2, %c0_3] : memref<16x16xf32, #tpu.memory_space<vmem>>, vector<16x16xf32>
    %cst = arith.constant dense<0.000000e+00> : vector<64x16xf32>
    %3 = tpu.matmul %1, %2, %cst {dimension_numbers = #tpu.dot_dimension_numbers<[1], [0], [0], [1], [0, 0, 1, 1], [], []>} : vector<64x16xf32>, vector<16x16xf32>, vector<64x16xf32> -> vector<64x16xf32>
    %c0_4 = arith.constant 0 : index
    %c0_5 = arith.constant 0 : index
    %4 = vector.load %arg3[%c0_4, %c0_5] : memref<1x16xf32, #tpu.memory_space<vmem>>, vector<1x16xf32>
    %5 = vector.broadcast %4 : vector<1x16xf32> to vector<64x16xf32>
    %6 = arith.addf %3, %5 : vector<64x16xf32>
    %cst_6 = arith.constant 0.000000e+00 : f32
    %7 = vector.broadcast %cst_6 : f32 to vector<64x16xf32>
    %8 = arith.maximumf %6, %7 : vector<64x16xf32>
    %c0_7 = arith.constant 0 : index
    %c0_8 = arith.constant 0 : index
    %9 = vector.load %arg4[%c0_7, %c0_8] : memref<16x96xf32, #tpu.memory_space<vmem>>, vector<16x96xf32>
    %c0_9 = arith.constant 0 : index
    %c0_10 = arith.constant 0 : index
    %10 = vector.load %arg5[%c0_9, %c0_10] : memref<32x96xf32, #tpu.memory_space<vmem>>, vector<32x96xf32>
    %c0_11 = arith.constant 0 : index
    %c0_12 = arith.constant 0 : index
    %11 = vector.load %arg6[%c0_11, %c0_12] : memref<1x128xf32, #tpu.memory_space<vmem>>, vector<1x128xf32>
    %12 = vector.extract_strided_slice %11 {offsets = [0, 0], sizes = [1, 96], strides = [1, 1]} : vector<1x128xf32> to vector<1x96xf32>
    %13 = vector.extract_strided_slice %11 {offsets = [0, 96], sizes = [1, 32], strides = [1, 1]} : vector<1x128xf32> to vector<1x32xf32>
    %14 = vector.shape_cast %13 : vector<1x32xf32> to vector<1x32xf32>
    %15 = vector.broadcast %14 : vector<1x32xf32> to vector<8x32xf32>
    %cst_13 = arith.constant dense<0.000000e+00> : vector<64x96xf32>
    %16 = tpu.matmul %8, %9, %cst_13 {dimension_numbers = #tpu.dot_dimension_numbers<[1], [0], [0], [1], [0, 0, 1, 1], [], []>} : vector<64x16xf32>, vector<16x96xf32>, vector<64x96xf32> -> vector<64x96xf32>
    %17 = vector.broadcast %12 : vector<1x96xf32> to vector<64x96xf32>
    %18 = arith.addf %16, %17 : vector<64x96xf32>
    %19 = vector.shape_cast %18 : vector<64x96xf32> to vector<8x8x96xf32>
    %cst_14 = arith.constant 0.000000e+00 : f32
    %20 = vector.broadcast %cst_14 : f32 to vector<8x32xf32>
    %cst_15 = arith.constant dense<0.000000e+00> : vector<8x96xf32>
    %21 = tpu.matmul %20, %10, %cst_15 {dimension_numbers = #tpu.dot_dimension_numbers<[1], [0], [0], [1], [0, 0, 1, 1], [], []>} : vector<8x32xf32>, vector<32x96xf32>, vector<8x96xf32> -> vector<8x96xf32>
    %22 = vector.extract_strided_slice %19 {offsets = [0, 0, 0], sizes = [1, 8, 96], strides = [1, 1, 1]} : vector<8x8x96xf32> to vector<1x8x96xf32>
    %23 = vector.shape_cast %22 : vector<1x8x96xf32> to vector<8x96xf32>
    %24 = vector.extract_strided_slice %23 {offsets = [0, 0], sizes = [8, 64], strides = [1, 1]} : vector<8x96xf32> to vector<8x64xf32>
    %25 = vector.extract_strided_slice %21 {offsets = [0, 0], sizes = [8, 64], strides = [1, 1]} : vector<8x96xf32> to vector<8x64xf32>
    %26 = arith.addf %24, %25 : vector<8x64xf32>
    %27 = arith.negf %26 : vector<8x64xf32>
    %28 = math.exp %27 : vector<8x64xf32>
    %cst_16 = arith.constant 1.000000e+00 : f32
    %29 = vector.broadcast %cst_16 : f32 to vector<8x64xf32>
    %30 = arith.addf %29, %28 : vector<8x64xf32>
    %31 = arith.divf %29, %30 : vector<8x64xf32>
    %32 = vector.extract_strided_slice %31 {offsets = [0, 0], sizes = [8, 32], strides = [1, 1]} : vector<8x64xf32> to vector<8x32xf32>
    %33 = vector.extract_strided_slice %31 {offsets = [0, 32], sizes = [8, 32], strides = [1, 1]} : vector<8x64xf32> to vector<8x32xf32>
    %34 = vector.extract_strided_slice %23 {offsets = [0, 64], sizes = [8, 32], strides = [1, 1]} : vector<8x96xf32> to vector<8x32xf32>
    %35 = vector.extract_strided_slice %21 {offsets = [0, 64], sizes = [8, 32], strides = [1, 1]} : vector<8x96xf32> to vector<8x32xf32>
    %36 = arith.addf %35, %15 : vector<8x32xf32>
    %37 = arith.mulf %32, %36 : vector<8x32xf32>
    %38 = arith.addf %34, %37 : vector<8x32xf32>
    %39 = math.tanh %38 : vector<8x32xf32>
    %cst_17 = arith.constant 1.000000e+00 : f32
    %40 = vector.broadcast %cst_17 : f32 to vector<8x32xf32>
    %41 = arith.subf %40, %33 : vector<8x32xf32>
    %42 = arith.mulf %41, %39 : vector<8x32xf32>
    %43 = arith.mulf %33, %20 : vector<8x32xf32>
    %44 = arith.addf %42, %43 : vector<8x32xf32>
    %c0_18 = arith.constant 0 : index
    %c0_19 = arith.constant 0 : index
    %c0_20 = arith.constant 0 : index
    %45 = vector.load %arg20[%c0_18, %c0_19, %c0_20] : memref<8x8x32xf32, #tpu.memory_space<vmem>>, vector<1x8x32xf32>
    %46 = vector.shape_cast %45 : vector<1x8x32xf32> to vector<8x32xf32>
    %47 = vector.shape_cast %44 : vector<8x32xf32> to vector<1x8x32xf32>
    tpu.vector_store %arg20[%c0_18, %c0_19, %c0_20], %47 {strides = array<i32>} : memref<8x8x32xf32, #tpu.memory_space<vmem>>, vector<1x8x32xf32>,
    %cst_21 = arith.constant dense<0.000000e+00> : vector<8x96xf32>
    %48 = tpu.matmul %44, %10, %cst_21 {dimension_numbers = #tpu.dot_dimension_numbers<[1], [0], [0], [1], [0, 0, 1, 1], [], []>} : vector<8x32xf32>, vector<32x96xf32>, vector<8x96xf32> -> vector<8x96xf32>
    %49 = vector.extract_strided_slice %19 {offsets = [1, 0, 0], sizes = [1, 8, 96], strides = [1, 1, 1]} : vector<8x8x96xf32> to vector<1x8x96xf32>
    %50 = vector.shape_cast %49 : vector<1x8x96xf32> to vector<8x96xf32>
    %51 = vector.extract_strided_slice %50 {offsets = [0, 0], sizes = [8, 64], strides = [1, 1]} : vector<8x96xf32> to vector<8x64xf32>
    %52 = vector.extract_strided_slice %48 {offsets = [0, 0], sizes = [8, 64], strides = [1, 1]} : vector<8x96xf32> to vector<8x64xf32>
    %53 = arith.addf %51, %52 : vector<8x64xf32>
    %54 = arith.negf %53 : vector<8x64xf32>
    %55 = math.exp %54 : vector<8x64xf32>
    %cst_22 = arith.constant 1.000000e+00 : f32
    %56 = vector.broadcast %cst_22 : f32 to vector<8x64xf32>
    %57 = arith.addf %56, %55 : vector<8x64xf32>
    %58 = arith.divf %56, %57 : vector<8x64xf32>
    %59 = vector.extract_strided_slice %58 {offsets = [0, 0], sizes = [8, 32], strides = [1, 1]} : vector<8x64xf32> to vector<8x32xf32>
    %60 = vector.extract_strided_slice %58 {offsets = [0, 32], sizes = [8, 32], strides = [1, 1]} : vector<8x64xf32> to vector<8x32xf32>
    %61 = vector.extract_strided_slice %50 {offsets = [0, 64], sizes = [8, 32], strides = [1, 1]} : vector<8x96xf32> to vector<8x32xf32>
    %62 = vector.extract_strided_slice %48 {offsets = [0, 64], sizes = [8, 32], strides = [1, 1]} : vector<8x96xf32> to vector<8x32xf32>
    %63 = arith.addf %62, %15 : vector<8x32xf32>
    %64 = arith.mulf %59, %63 : vector<8x32xf32>
    %65 = arith.addf %61, %64 : vector<8x32xf32>
    %66 = math.tanh %65 : vector<8x32xf32>
    %cst_23 = arith.constant 1.000000e+00 : f32
    %67 = vector.broadcast %cst_23 : f32 to vector<8x32xf32>
    %68 = arith.subf %67, %60 : vector<8x32xf32>
    %69 = arith.mulf %68, %66 : vector<8x32xf32>
    %70 = arith.mulf %60, %44 : vector<8x32xf32>
    %71 = arith.addf %69, %70 : vector<8x32xf32>
    %c1 = arith.constant 1 : index
    %c0_24 = arith.constant 0 : index
    %c0_25 = arith.constant 0 : index
    %72 = vector.load %arg20[%c1, %c0_24, %c0_25] : memref<8x8x32xf32, #tpu.memory_space<vmem>>, vector<1x8x32xf32>
    %73 = vector.shape_cast %72 : vector<1x8x32xf32> to vector<8x32xf32>
    %74 = vector.shape_cast %71 : vector<8x32xf32> to vector<1x8x32xf32>
    tpu.vector_store %arg20[%c1, %c0_24, %c0_25], %74 {strides = array<i32>} : memref<8x8x32xf32, #tpu.memory_space<vmem>>, vector<1x8x32xf32>,
    %cst_26 = arith.constant dense<0.000000e+00> : vector<8x96xf32>
    %75 = tpu.matmul %71, %10, %cst_26 {dimension_numbers = #tpu.dot_dimension_numbers<[1], [0], [0], [1], [0, 0, 1, 1], [], []>} : vector<8x32xf32>, vector<32x96xf32>, vector<8x96xf32> -> vector<8x96xf32>
    %76 = vector.extract_strided_slice %19 {offsets = [2, 0, 0], sizes = [1, 8, 96], strides = [1, 1, 1]} : vector<8x8x96xf32> to vector<1x8x96xf32>
    %77 = vector.shape_cast %76 : vector<1x8x96xf32> to vector<8x96xf32>
    %78 = vector.extract_strided_slice %77 {offsets = [0, 0], sizes = [8, 64], strides = [1, 1]} : vector<8x96xf32> to vector<8x64xf32>
    %79 = vector.extract_strided_slice %75 {offsets = [0, 0], sizes = [8, 64], strides = [1, 1]} : vector<8x96xf32> to vector<8x64xf32>
    %80 = arith.addf %78, %79 : vector<8x64xf32>
    %81 = arith.negf %80 : vector<8x64xf32>
    %82 = math.exp %81 : vector<8x64xf32>
    %cst_27 = arith.constant 1.000000e+00 : f32
    %83 = vector.broadcast %cst_27 : f32 to vector<8x64xf32>
    %84 = arith.addf %83, %82 : vector<8x64xf32>
    %85 = arith.divf %83, %84 : vector<8x64xf32>
    %86 = vector.extract_strided_slice %85 {offsets = [0, 0], sizes = [8, 32], strides = [1, 1]} : vector<8x64xf32> to vector<8x32xf32>
    %87 = vector.extract_strided_slice %85 {offsets = [0, 32], sizes = [8, 32], strides = [1, 1]} : vector<8x64xf32> to vector<8x32xf32>
    %88 = vector.extract_strided_slice %77 {offsets = [0, 64], sizes = [8, 32], strides = [1, 1]} : vector<8x96xf32> to vector<8x32xf32>
    %89 = vector.extract_strided_slice %75 {offsets = [0, 64], sizes = [8, 32], strides = [1, 1]} : vector<8x96xf32> to vector<8x32xf32>
    %90 = arith.addf %89, %15 : vector<8x32xf32>
    %91 = arith.mulf %86, %90 : vector<8x32xf32>
    %92 = arith.addf %88, %91 : vector<8x32xf32>
    %93 = math.tanh %92 : vector<8x32xf32>
    %cst_28 = arith.constant 1.000000e+00 : f32
    %94 = vector.broadcast %cst_28 : f32 to vector<8x32xf32>
    %95 = arith.subf %94, %87 : vector<8x32xf32>
    %96 = arith.mulf %95, %93 : vector<8x32xf32>
    %97 = arith.mulf %87, %71 : vector<8x32xf32>
    %98 = arith.addf %96, %97 : vector<8x32xf32>
    %c2 = arith.constant 2 : index
    %c0_29 = arith.constant 0 : index
    %c0_30 = arith.constant 0 : index
    %99 = vector.load %arg20[%c2, %c0_29, %c0_30] : memref<8x8x32xf32, #tpu.memory_space<vmem>>, vector<1x8x32xf32>
    %100 = vector.shape_cast %99 : vector<1x8x32xf32> to vector<8x32xf32>
    %101 = vector.shape_cast %98 : vector<8x32xf32> to vector<1x8x32xf32>
    tpu.vector_store %arg20[%c2, %c0_29, %c0_30], %101 {strides = array<i32>} : memref<8x8x32xf32, #tpu.memory_space<vmem>>, vector<1x8x32xf32>,
    %cst_31 = arith.constant dense<0.000000e+00> : vector<8x96xf32>
    %102 = tpu.matmul %98, %10, %cst_31 {dimension_numbers = #tpu.dot_dimension_numbers<[1], [0], [0], [1], [0, 0, 1, 1], [], []>} : vector<8x32xf32>, vector<32x96xf32>, vector<8x96xf32> -> vector<8x96xf32>
    %103 = vector.extract_strided_slice %19 {offsets = [3, 0, 0], sizes = [1, 8, 96], strides = [1, 1, 1]} : vector<8x8x96xf32> to vector<1x8x96xf32>
    %104 = vector.shape_cast %103 : vector<1x8x96xf32> to vector<8x96xf32>
    %105 = vector.extract_strided_slice %104 {offsets = [0, 0], sizes = [8, 64], strides = [1, 1]} : vector<8x96xf32> to vector<8x64xf32>
    %106 = vector.extract_strided_slice %102 {offsets = [0, 0], sizes = [8, 64], strides = [1, 1]} : vector<8x96xf32> to vector<8x64xf32>
    %107 = arith.addf %105, %106 : vector<8x64xf32>
    %108 = arith.negf %107 : vector<8x64xf32>
    %109 = math.exp %108 : vector<8x64xf32>
    %cst_32 = arith.constant 1.000000e+00 : f32
    %110 = vector.broadcast %cst_32 : f32 to vector<8x64xf32>
    %111 = arith.addf %110, %109 : vector<8x64xf32>
    %112 = arith.divf %110, %111 : vector<8x64xf32>
    %113 = vector.extract_strided_slice %112 {offsets = [0, 0], sizes = [8, 32], strides = [1, 1]} : vector<8x64xf32> to vector<8x32xf32>
    %114 = vector.extract_strided_slice %112 {offsets = [0, 32], sizes = [8, 32], strides = [1, 1]} : vector<8x64xf32> to vector<8x32xf32>
    %115 = vector.extract_strided_slice %104 {offsets = [0, 64], sizes = [8, 32], strides = [1, 1]} : vector<8x96xf32> to vector<8x32xf32>
    %116 = vector.extract_strided_slice %102 {offsets = [0, 64], sizes = [8, 32], strides = [1, 1]} : vector<8x96xf32> to vector<8x32xf32>
    %117 = arith.addf %116, %15 : vector<8x32xf32>
    %118 = arith.mulf %113, %117 : vector<8x32xf32>
    %119 = arith.addf %115, %118 : vector<8x32xf32>
    %120 = math.tanh %119 : vector<8x32xf32>
    %cst_33 = arith.constant 1.000000e+00 : f32
    %121 = vector.broadcast %cst_33 : f32 to vector<8x32xf32>
    %122 = arith.subf %121, %114 : vector<8x32xf32>
    %123 = arith.mulf %122, %120 : vector<8x32xf32>
    %124 = arith.mulf %114, %98 : vector<8x32xf32>
    %125 = arith.addf %123, %124 : vector<8x32xf32>
    %c3 = arith.constant 3 : index
    %c0_34 = arith.constant 0 : index
    %c0_35 = arith.constant 0 : index
    %126 = vector.load %arg20[%c3, %c0_34, %c0_35] : memref<8x8x32xf32, #tpu.memory_space<vmem>>, vector<1x8x32xf32>
    %127 = vector.shape_cast %126 : vector<1x8x32xf32> to vector<8x32xf32>
    %128 = vector.shape_cast %125 : vector<8x32xf32> to vector<1x8x32xf32>
    tpu.vector_store %arg20[%c3, %c0_34, %c0_35], %128 {strides = array<i32>} : memref<8x8x32xf32, #tpu.memory_space<vmem>>, vector<1x8x32xf32>,
    %cst_36 = arith.constant dense<0.000000e+00> : vector<8x96xf32>
    %129 = tpu.matmul %125, %10, %cst_36 {dimension_numbers = #tpu.dot_dimension_numbers<[1], [0], [0], [1], [0, 0, 1, 1], [], []>} : vector<8x32xf32>, vector<32x96xf32>, vector<8x96xf32> -> vector<8x96xf32>
    %130 = vector.extract_strided_slice %19 {offsets = [4, 0, 0], sizes = [1, 8, 96], strides = [1, 1, 1]} : vector<8x8x96xf32> to vector<1x8x96xf32>
    %131 = vector.shape_cast %130 : vector<1x8x96xf32> to vector<8x96xf32>
    %132 = vector.extract_strided_slice %131 {offsets = [0, 0], sizes = [8, 64], strides = [1, 1]} : vector<8x96xf32> to vector<8x64xf32>
    %133 = vector.extract_strided_slice %129 {offsets = [0, 0], sizes = [8, 64], strides = [1, 1]} : vector<8x96xf32> to vector<8x64xf32>
    %134 = arith.addf %132, %133 : vector<8x64xf32>
    %135 = arith.negf %134 : vector<8x64xf32>
    %136 = math.exp %135 : vector<8x64xf32>
    %cst_37 = arith.constant 1.000000e+00 : f32
    %137 = vector.broadcast %cst_37 : f32 to vector<8x64xf32>
    %138 = arith.addf %137, %136 : vector<8x64xf32>
    %139 = arith.divf %137, %138 : vector<8x64xf32>
    %140 = vector.extract_strided_slice %139 {offsets = [0, 0], sizes = [8, 32], strides = [1, 1]} : vector<8x64xf32> to vector<8x32xf32>
    %141 = vector.extract_strided_slice %139 {offsets = [0, 32], sizes = [8, 32], strides = [1, 1]} : vector<8x64xf32> to vector<8x32xf32>
    %142 = vector.extract_strided_slice %131 {offsets = [0, 64], sizes = [8, 32], strides = [1, 1]} : vector<8x96xf32> to vector<8x32xf32>
    %143 = vector.extract_strided_slice %129 {offsets = [0, 64], sizes = [8, 32], strides = [1, 1]} : vector<8x96xf32> to vector<8x32xf32>
    %144 = arith.addf %143, %15 : vector<8x32xf32>
    %145 = arith.mulf %140, %144 : vector<8x32xf32>
    %146 = arith.addf %142, %145 : vector<8x32xf32>
    %147 = math.tanh %146 : vector<8x32xf32>
    %cst_38 = arith.constant 1.000000e+00 : f32
    %148 = vector.broadcast %cst_38 : f32 to vector<8x32xf32>
    %149 = arith.subf %148, %141 : vector<8x32xf32>
    %150 = arith.mulf %149, %147 : vector<8x32xf32>
    %151 = arith.mulf %141, %125 : vector<8x32xf32>
    %152 = arith.addf %150, %151 : vector<8x32xf32>
    %c4 = arith.constant 4 : index
    %c0_39 = arith.constant 0 : index
    %c0_40 = arith.constant 0 : index
    %153 = vector.load %arg20[%c4, %c0_39, %c0_40] : memref<8x8x32xf32, #tpu.memory_space<vmem>>, vector<1x8x32xf32>
    %154 = vector.shape_cast %153 : vector<1x8x32xf32> to vector<8x32xf32>
    %155 = vector.shape_cast %152 : vector<8x32xf32> to vector<1x8x32xf32>
    tpu.vector_store %arg20[%c4, %c0_39, %c0_40], %155 {strides = array<i32>} : memref<8x8x32xf32, #tpu.memory_space<vmem>>, vector<1x8x32xf32>,
    %cst_41 = arith.constant dense<0.000000e+00> : vector<8x96xf32>
    %156 = tpu.matmul %152, %10, %cst_41 {dimension_numbers = #tpu.dot_dimension_numbers<[1], [0], [0], [1], [0, 0, 1, 1], [], []>} : vector<8x32xf32>, vector<32x96xf32>, vector<8x96xf32> -> vector<8x96xf32>
    %157 = vector.extract_strided_slice %19 {offsets = [5, 0, 0], sizes = [1, 8, 96], strides = [1, 1, 1]} : vector<8x8x96xf32> to vector<1x8x96xf32>
    %158 = vector.shape_cast %157 : vector<1x8x96xf32> to vector<8x96xf32>
    %159 = vector.extract_strided_slice %158 {offsets = [0, 0], sizes = [8, 64], strides = [1, 1]} : vector<8x96xf32> to vector<8x64xf32>
    %160 = vector.extract_strided_slice %156 {offsets = [0, 0], sizes = [8, 64], strides = [1, 1]} : vector<8x96xf32> to vector<8x64xf32>
    %161 = arith.addf %159, %160 : vector<8x64xf32>
    %162 = arith.negf %161 : vector<8x64xf32>
    %163 = math.exp %162 : vector<8x64xf32>
    %cst_42 = arith.constant 1.000000e+00 : f32
    %164 = vector.broadcast %cst_42 : f32 to vector<8x64xf32>
    %165 = arith.addf %164, %163 : vector<8x64xf32>
    %166 = arith.divf %164, %165 : vector<8x64xf32>
    %167 = vector.extract_strided_slice %166 {offsets = [0, 0], sizes = [8, 32], strides = [1, 1]} : vector<8x64xf32> to vector<8x32xf32>
    %168 = vector.extract_strided_slice %166 {offsets = [0, 32], sizes = [8, 32], strides = [1, 1]} : vector<8x64xf32> to vector<8x32xf32>
    %169 = vector.extract_strided_slice %158 {offsets = [0, 64], sizes = [8, 32], strides = [1, 1]} : vector<8x96xf32> to vector<8x32xf32>
    %170 = vector.extract_strided_slice %156 {offsets = [0, 64], sizes = [8, 32], strides = [1, 1]} : vector<8x96xf32> to vector<8x32xf32>
    %171 = arith.addf %170, %15 : vector<8x32xf32>
    %172 = arith.mulf %167, %171 : vector<8x32xf32>
    %173 = arith.addf %169, %172 : vector<8x32xf32>
    %174 = math.tanh %173 : vector<8x32xf32>
    %cst_43 = arith.constant 1.000000e+00 : f32
    %175 = vector.broadcast %cst_43 : f32 to vector<8x32xf32>
    %176 = arith.subf %175, %168 : vector<8x32xf32>
    %177 = arith.mulf %176, %174 : vector<8x32xf32>
    %178 = arith.mulf %168, %152 : vector<8x32xf32>
    %179 = arith.addf %177, %178 : vector<8x32xf32>
    %c5 = arith.constant 5 : index
    %c0_44 = arith.constant 0 : index
    %c0_45 = arith.constant 0 : index
    %180 = vector.load %arg20[%c5, %c0_44, %c0_45] : memref<8x8x32xf32, #tpu.memory_space<vmem>>, vector<1x8x32xf32>
    %181 = vector.shape_cast %180 : vector<1x8x32xf32> to vector<8x32xf32>
    %182 = vector.shape_cast %179 : vector<8x32xf32> to vector<1x8x32xf32>
    tpu.vector_store %arg20[%c5, %c0_44, %c0_45], %182 {strides = array<i32>} : memref<8x8x32xf32, #tpu.memory_space<vmem>>, vector<1x8x32xf32>,
    %cst_46 = arith.constant dense<0.000000e+00> : vector<8x96xf32>
    %183 = tpu.matmul %179, %10, %cst_46 {dimension_numbers = #tpu.dot_dimension_numbers<[1], [0], [0], [1], [0, 0, 1, 1], [], []>} : vector<8x32xf32>, vector<32x96xf32>, vector<8x96xf32> -> vector<8x96xf32>
    %184 = vector.extract_strided_slice %19 {offsets = [6, 0, 0], sizes = [1, 8, 96], strides = [1, 1, 1]} : vector<8x8x96xf32> to vector<1x8x96xf32>
    %185 = vector.shape_cast %184 : vector<1x8x96xf32> to vector<8x96xf32>
    %186 = vector.extract_strided_slice %185 {offsets = [0, 0], sizes = [8, 64], strides = [1, 1]} : vector<8x96xf32> to vector<8x64xf32>
    %187 = vector.extract_strided_slice %183 {offsets = [0, 0], sizes = [8, 64], strides = [1, 1]} : vector<8x96xf32> to vector<8x64xf32>
    %188 = arith.addf %186, %187 : vector<8x64xf32>
    %189 = arith.negf %188 : vector<8x64xf32>
    %190 = math.exp %189 : vector<8x64xf32>
    %cst_47 = arith.constant 1.000000e+00 : f32
    %191 = vector.broadcast %cst_47 : f32 to vector<8x64xf32>
    %192 = arith.addf %191, %190 : vector<8x64xf32>
    %193 = arith.divf %191, %192 : vector<8x64xf32>
    %194 = vector.extract_strided_slice %193 {offsets = [0, 0], sizes = [8, 32], strides = [1, 1]} : vector<8x64xf32> to vector<8x32xf32>
    %195 = vector.extract_strided_slice %193 {offsets = [0, 32], sizes = [8, 32], strides = [1, 1]} : vector<8x64xf32> to vector<8x32xf32>
    %196 = vector.extract_strided_slice %185 {offsets = [0, 64], sizes = [8, 32], strides = [1, 1]} : vector<8x96xf32> to vector<8x32xf32>
    %197 = vector.extract_strided_slice %183 {offsets = [0, 64], sizes = [8, 32], strides = [1, 1]} : vector<8x96xf32> to vector<8x32xf32>
    %198 = arith.addf %197, %15 : vector<8x32xf32>
    %199 = arith.mulf %194, %198 : vector<8x32xf32>
    %200 = arith.addf %196, %199 : vector<8x32xf32>
    %201 = math.tanh %200 : vector<8x32xf32>
    %cst_48 = arith.constant 1.000000e+00 : f32
    %202 = vector.broadcast %cst_48 : f32 to vector<8x32xf32>
    %203 = arith.subf %202, %195 : vector<8x32xf32>
    %204 = arith.mulf %203, %201 : vector<8x32xf32>
    %205 = arith.mulf %195, %179 : vector<8x32xf32>
    %206 = arith.addf %204, %205 : vector<8x32xf32>
    %c6 = arith.constant 6 : index
    %c0_49 = arith.constant 0 : index
    %c0_50 = arith.constant 0 : index
    %207 = vector.load %arg20[%c6, %c0_49, %c0_50] : memref<8x8x32xf32, #tpu.memory_space<vmem>>, vector<1x8x32xf32>
    %208 = vector.shape_cast %207 : vector<1x8x32xf32> to vector<8x32xf32>
    %209 = vector.shape_cast %206 : vector<8x32xf32> to vector<1x8x32xf32>
    tpu.vector_store %arg20[%c6, %c0_49, %c0_50], %209 {strides = array<i32>} : memref<8x8x32xf32, #tpu.memory_space<vmem>>, vector<1x8x32xf32>,
    %cst_51 = arith.constant dense<0.000000e+00> : vector<8x96xf32>
    %210 = tpu.matmul %206, %10, %cst_51 {dimension_numbers = #tpu.dot_dimension_numbers<[1], [0], [0], [1], [0, 0, 1, 1], [], []>} : vector<8x32xf32>, vector<32x96xf32>, vector<8x96xf32> -> vector<8x96xf32>
    %211 = vector.extract_strided_slice %19 {offsets = [7, 0, 0], sizes = [1, 8, 96], strides = [1, 1, 1]} : vector<8x8x96xf32> to vector<1x8x96xf32>
    %212 = vector.shape_cast %211 : vector<1x8x96xf32> to vector<8x96xf32>
    %213 = vector.extract_strided_slice %212 {offsets = [0, 0], sizes = [8, 64], strides = [1, 1]} : vector<8x96xf32> to vector<8x64xf32>
    %214 = vector.extract_strided_slice %210 {offsets = [0, 0], sizes = [8, 64], strides = [1, 1]} : vector<8x96xf32> to vector<8x64xf32>
    %215 = arith.addf %213, %214 : vector<8x64xf32>
    %216 = arith.negf %215 : vector<8x64xf32>
    %217 = math.exp %216 : vector<8x64xf32>
    %cst_52 = arith.constant 1.000000e+00 : f32
    %218 = vector.broadcast %cst_52 : f32 to vector<8x64xf32>
    %219 = arith.addf %218, %217 : vector<8x64xf32>
    %220 = arith.divf %218, %219 : vector<8x64xf32>
    %221 = vector.extract_strided_slice %220 {offsets = [0, 0], sizes = [8, 32], strides = [1, 1]} : vector<8x64xf32> to vector<8x32xf32>
    %222 = vector.extract_strided_slice %220 {offsets = [0, 32], sizes = [8, 32], strides = [1, 1]} : vector<8x64xf32> to vector<8x32xf32>
    %223 = vector.extract_strided_slice %212 {offsets = [0, 64], sizes = [8, 32], strides = [1, 1]} : vector<8x96xf32> to vector<8x32xf32>
    %224 = vector.extract_strided_slice %210 {offsets = [0, 64], sizes = [8, 32], strides = [1, 1]} : vector<8x96xf32> to vector<8x32xf32>
    %225 = arith.addf %224, %15 : vector<8x32xf32>
    %226 = arith.mulf %221, %225 : vector<8x32xf32>
    %227 = arith.addf %223, %226 : vector<8x32xf32>
    %228 = math.tanh %227 : vector<8x32xf32>
    %cst_53 = arith.constant 1.000000e+00 : f32
    %229 = vector.broadcast %cst_53 : f32 to vector<8x32xf32>
    %230 = arith.subf %229, %222 : vector<8x32xf32>
    %231 = arith.mulf %230, %228 : vector<8x32xf32>
    %232 = arith.mulf %222, %206 : vector<8x32xf32>
    %233 = arith.addf %231, %232 : vector<8x32xf32>
    %c7 = arith.constant 7 : index
    %c0_54 = arith.constant 0 : index
    %c0_55 = arith.constant 0 : index
    %234 = vector.load %arg20[%c7, %c0_54, %c0_55] : memref<8x8x32xf32, #tpu.memory_space<vmem>>, vector<1x8x32xf32>
    %235 = vector.shape_cast %234 : vector<1x8x32xf32> to vector<8x32xf32>
    %236 = vector.shape_cast %233 : vector<8x32xf32> to vector<1x8x32xf32>
    tpu.vector_store %arg20[%c7, %c0_54, %c0_55], %236 {strides = array<i32>} : memref<8x8x32xf32, #tpu.memory_space<vmem>>, vector<1x8x32xf32>,
    %c0_56 = arith.constant 0 : index
    %c0_57 = arith.constant 0 : index
    %c0_58 = arith.constant 0 : index
    %237 = vector.load %arg20[%c0_56, %c0_57, %c0_58] : memref<8x8x32xf32, #tpu.memory_space<vmem>>, vector<8x8x32xf32>
    %238 = vector.shape_cast %237 : vector<8x8x32xf32> to vector<64x32xf32>
    %c0_59 = arith.constant 0 : index
    %c0_60 = arith.constant 0 : index
    %239 = vector.load %arg7[%c0_59, %c0_60] : memref<32x96xf32, #tpu.memory_space<vmem>>, vector<32x96xf32>
    %c0_61 = arith.constant 0 : index
    %c0_62 = arith.constant 0 : index
    %240 = vector.load %arg8[%c0_61, %c0_62] : memref<32x96xf32, #tpu.memory_space<vmem>>, vector<32x96xf32>
    %c0_63 = arith.constant 0 : index
    %c0_64 = arith.constant 0 : index
    %241 = vector.load %arg9[%c0_63, %c0_64] : memref<1x128xf32, #tpu.memory_space<vmem>>, vector<1x128xf32>
    %242 = vector.extract_strided_slice %241 {offsets = [0, 0], sizes = [1, 96], strides = [1, 1]} : vector<1x128xf32> to vector<1x96xf32>
    %243 = vector.extract_strided_slice %241 {offsets = [0, 96], sizes = [1, 32], strides = [1, 1]} : vector<1x128xf32> to vector<1x32xf32>
    %244 = vector.shape_cast %243 : vector<1x32xf32> to vector<1x32xf32>
    %245 = vector.broadcast %244 : vector<1x32xf32> to vector<8x32xf32>
    %cst_65 = arith.constant dense<0.000000e+00> : vector<64x96xf32>
    %246 = tpu.matmul %238, %239, %cst_65 {dimension_numbers = #tpu.dot_dimension_numbers<[1], [0], [0], [1], [0, 0, 1, 1], [], []>} : vector<64x32xf32>, vector<32x96xf32>, vector<64x96xf32> -> vector<64x96xf32>
    %247 = vector.broadcast %242 : vector<1x96xf32> to vector<64x96xf32>
    %248 = arith.addf %246, %247 : vector<64x96xf32>
    %249 = vector.shape_cast %248 : vector<64x96xf32> to vector<8x8x96xf32>
    %cst_66 = arith.constant 0.000000e+00 : f32
    %250 = vector.broadcast %cst_66 : f32 to vector<8x32xf32>
    %cst_67 = arith.constant dense<0.000000e+00> : vector<8x96xf32>
    %251 = tpu.matmul %250, %240, %cst_67 {dimension_numbers = #tpu.dot_dimension_numbers<[1], [0], [0], [1], [0, 0, 1, 1], [], []>} : vector<8x32xf32>, vector<32x96xf32>, vector<8x96xf32> -> vector<8x96xf32>
    %252 = vector.extract_strided_slice %249 {offsets = [0, 0, 0], sizes = [1, 8, 96], strides = [1, 1, 1]} : vector<8x8x96xf32> to vector<1x8x96xf32>
    %253 = vector.shape_cast %252 : vector<1x8x96xf32> to vector<8x96xf32>
    %254 = vector.extract_strided_slice %253 {offsets = [0, 0], sizes = [8, 64], strides = [1, 1]} : vector<8x96xf32> to vector<8x64xf32>
    %255 = vector.extract_strided_slice %251 {offsets = [0, 0], sizes = [8, 64], strides = [1, 1]} : vector<8x96xf32> to vector<8x64xf32>
    %256 = arith.addf %254, %255 : vector<8x64xf32>
    %257 = arith.negf %256 : vector<8x64xf32>
    %258 = math.exp %257 : vector<8x64xf32>
    %cst_68 = arith.constant 1.000000e+00 : f32
    %259 = vector.broadcast %cst_68 : f32 to vector<8x64xf32>
    %260 = arith.addf %259, %258 : vector<8x64xf32>
    %261 = arith.divf %259, %260 : vector<8x64xf32>
    %262 = vector.extract_strided_slice %261 {offsets = [0, 0], sizes = [8, 32], strides = [1, 1]} : vector<8x64xf32> to vector<8x32xf32>
    %263 = vector.extract_strided_slice %261 {offsets = [0, 32], sizes = [8, 32], strides = [1, 1]} : vector<8x64xf32> to vector<8x32xf32>
    %264 = vector.extract_strided_slice %253 {offsets = [0, 64], sizes = [8, 32], strides = [1, 1]} : vector<8x96xf32> to vector<8x32xf32>
    %265 = vector.extract_strided_slice %251 {offsets = [0, 64], sizes = [8, 32], strides = [1, 1]} : vector<8x96xf32> to vector<8x32xf32>
    %266 = arith.addf %265, %245 : vector<8x32xf32>
    %267 = arith.mulf %262, %266 : vector<8x32xf32>
    %268 = arith.addf %264, %267 : vector<8x32xf32>
    %269 = math.tanh %268 : vector<8x32xf32>
    %cst_69 = arith.constant 1.000000e+00 : f32
    %270 = vector.broadcast %cst_69 : f32 to vector<8x32xf32>
    %271 = arith.subf %270, %263 : vector<8x32xf32>
    %272 = arith.mulf %271, %269 : vector<8x32xf32>
    %273 = arith.mulf %263, %250 : vector<8x32xf32>
    %274 = arith.addf %272, %273 : vector<8x32xf32>
    %c0_70 = arith.constant 0 : index
    %c0_71 = arith.constant 0 : index
    %c0_72 = arith.constant 0 : index
    %275 = vector.load %arg20[%c0_70, %c0_71, %c0_72] : memref<8x8x32xf32, #tpu.memory_space<vmem>>, vector<1x8x32xf32>
    %276 = vector.shape_cast %275 : vector<1x8x32xf32> to vector<8x32xf32>
    %277 = vector.shape_cast %274 : vector<8x32xf32> to vector<1x8x32xf32>
    tpu.vector_store %arg20[%c0_70, %c0_71, %c0_72], %277 {strides = array<i32>} : memref<8x8x32xf32, #tpu.memory_space<vmem>>, vector<1x8x32xf32>,
    %cst_73 = arith.constant dense<0.000000e+00> : vector<8x96xf32>
    %278 = tpu.matmul %274, %240, %cst_73 {dimension_numbers = #tpu.dot_dimension_numbers<[1], [0], [0], [1], [0, 0, 1, 1], [], []>} : vector<8x32xf32>, vector<32x96xf32>, vector<8x96xf32> -> vector<8x96xf32>
    %279 = vector.extract_strided_slice %249 {offsets = [1, 0, 0], sizes = [1, 8, 96], strides = [1, 1, 1]} : vector<8x8x96xf32> to vector<1x8x96xf32>
    %280 = vector.shape_cast %279 : vector<1x8x96xf32> to vector<8x96xf32>
    %281 = vector.extract_strided_slice %280 {offsets = [0, 0], sizes = [8, 64], strides = [1, 1]} : vector<8x96xf32> to vector<8x64xf32>
    %282 = vector.extract_strided_slice %278 {offsets = [0, 0], sizes = [8, 64], strides = [1, 1]} : vector<8x96xf32> to vector<8x64xf32>
    %283 = arith.addf %281, %282 : vector<8x64xf32>
    %284 = arith.negf %283 : vector<8x64xf32>
    %285 = math.exp %284 : vector<8x64xf32>
    %cst_74 = arith.constant 1.000000e+00 : f32
    %286 = vector.broadcast %cst_74 : f32 to vector<8x64xf32>
    %287 = arith.addf %286, %285 : vector<8x64xf32>
    %288 = arith.divf %286, %287 : vector<8x64xf32>
    %289 = vector.extract_strided_slice %288 {offsets = [0, 0], sizes = [8, 32], strides = [1, 1]} : vector<8x64xf32> to vector<8x32xf32>
    %290 = vector.extract_strided_slice %288 {offsets = [0, 32], sizes = [8, 32], strides = [1, 1]} : vector<8x64xf32> to vector<8x32xf32>
    %291 = vector.extract_strided_slice %280 {offsets = [0, 64], sizes = [8, 32], strides = [1, 1]} : vector<8x96xf32> to vector<8x32xf32>
    %292 = vector.extract_strided_slice %278 {offsets = [0, 64], sizes = [8, 32], strides = [1, 1]} : vector<8x96xf32> to vector<8x32xf32>
    %293 = arith.addf %292, %245 : vector<8x32xf32>
    %294 = arith.mulf %289, %293 : vector<8x32xf32>
    %295 = arith.addf %291, %294 : vector<8x32xf32>
    %296 = math.tanh %295 : vector<8x32xf32>
    %cst_75 = arith.constant 1.000000e+00 : f32
    %297 = vector.broadcast %cst_75 : f32 to vector<8x32xf32>
    %298 = arith.subf %297, %290 : vector<8x32xf32>
    %299 = arith.mulf %298, %296 : vector<8x32xf32>
    %300 = arith.mulf %290, %274 : vector<8x32xf32>
    %301 = arith.addf %299, %300 : vector<8x32xf32>
    %c1_76 = arith.constant 1 : index
    %c0_77 = arith.constant 0 : index
    %c0_78 = arith.constant 0 : index
    %302 = vector.load %arg20[%c1_76, %c0_77, %c0_78] : memref<8x8x32xf32, #tpu.memory_space<vmem>>, vector<1x8x32xf32>
    %303 = vector.shape_cast %302 : vector<1x8x32xf32> to vector<8x32xf32>
    %304 = vector.shape_cast %301 : vector<8x32xf32> to vector<1x8x32xf32>
    tpu.vector_store %arg20[%c1_76, %c0_77, %c0_78], %304 {strides = array<i32>} : memref<8x8x32xf32, #tpu.memory_space<vmem>>, vector<1x8x32xf32>,
    %cst_79 = arith.constant dense<0.000000e+00> : vector<8x96xf32>
    %305 = tpu.matmul %301, %240, %cst_79 {dimension_numbers = #tpu.dot_dimension_numbers<[1], [0], [0], [1], [0, 0, 1, 1], [], []>} : vector<8x32xf32>, vector<32x96xf32>, vector<8x96xf32> -> vector<8x96xf32>
    %306 = vector.extract_strided_slice %249 {offsets = [2, 0, 0], sizes = [1, 8, 96], strides = [1, 1, 1]} : vector<8x8x96xf32> to vector<1x8x96xf32>
    %307 = vector.shape_cast %306 : vector<1x8x96xf32> to vector<8x96xf32>
    %308 = vector.extract_strided_slice %307 {offsets = [0, 0], sizes = [8, 64], strides = [1, 1]} : vector<8x96xf32> to vector<8x64xf32>
    %309 = vector.extract_strided_slice %305 {offsets = [0, 0], sizes = [8, 64], strides = [1, 1]} : vector<8x96xf32> to vector<8x64xf32>
    %310 = arith.addf %308, %309 : vector<8x64xf32>
    %311 = arith.negf %310 : vector<8x64xf32>
    %312 = math.exp %311 : vector<8x64xf32>
    %cst_80 = arith.constant 1.000000e+00 : f32
    %313 = vector.broadcast %cst_80 : f32 to vector<8x64xf32>
    %314 = arith.addf %313, %312 : vector<8x64xf32>
    %315 = arith.divf %313, %314 : vector<8x64xf32>
    %316 = vector.extract_strided_slice %315 {offsets = [0, 0], sizes = [8, 32], strides = [1, 1]} : vector<8x64xf32> to vector<8x32xf32>
    %317 = vector.extract_strided_slice %315 {offsets = [0, 32], sizes = [8, 32], strides = [1, 1]} : vector<8x64xf32> to vector<8x32xf32>
    %318 = vector.extract_strided_slice %307 {offsets = [0, 64], sizes = [8, 32], strides = [1, 1]} : vector<8x96xf32> to vector<8x32xf32>
    %319 = vector.extract_strided_slice %305 {offsets = [0, 64], sizes = [8, 32], strides = [1, 1]} : vector<8x96xf32> to vector<8x32xf32>
    %320 = arith.addf %319, %245 : vector<8x32xf32>
    %321 = arith.mulf %316, %320 : vector<8x32xf32>
    %322 = arith.addf %318, %321 : vector<8x32xf32>
    %323 = math.tanh %322 : vector<8x32xf32>
    %cst_81 = arith.constant 1.000000e+00 : f32
    %324 = vector.broadcast %cst_81 : f32 to vector<8x32xf32>
    %325 = arith.subf %324, %317 : vector<8x32xf32>
    %326 = arith.mulf %325, %323 : vector<8x32xf32>
    %327 = arith.mulf %317, %301 : vector<8x32xf32>
    %328 = arith.addf %326, %327 : vector<8x32xf32>
    %c2_82 = arith.constant 2 : index
    %c0_83 = arith.constant 0 : index
    %c0_84 = arith.constant 0 : index
    %329 = vector.load %arg20[%c2_82, %c0_83, %c0_84] : memref<8x8x32xf32, #tpu.memory_space<vmem>>, vector<1x8x32xf32>
    %330 = vector.shape_cast %329 : vector<1x8x32xf32> to vector<8x32xf32>
    %331 = vector.shape_cast %328 : vector<8x32xf32> to vector<1x8x32xf32>
    tpu.vector_store %arg20[%c2_82, %c0_83, %c0_84], %331 {strides = array<i32>} : memref<8x8x32xf32, #tpu.memory_space<vmem>>, vector<1x8x32xf32>,
    %cst_85 = arith.constant dense<0.000000e+00> : vector<8x96xf32>
    %332 = tpu.matmul %328, %240, %cst_85 {dimension_numbers = #tpu.dot_dimension_numbers<[1], [0], [0], [1], [0, 0, 1, 1], [], []>} : vector<8x32xf32>, vector<32x96xf32>, vector<8x96xf32> -> vector<8x96xf32>
    %333 = vector.extract_strided_slice %249 {offsets = [3, 0, 0], sizes = [1, 8, 96], strides = [1, 1, 1]} : vector<8x8x96xf32> to vector<1x8x96xf32>
    %334 = vector.shape_cast %333 : vector<1x8x96xf32> to vector<8x96xf32>
    %335 = vector.extract_strided_slice %334 {offsets = [0, 0], sizes = [8, 64], strides = [1, 1]} : vector<8x96xf32> to vector<8x64xf32>
    %336 = vector.extract_strided_slice %332 {offsets = [0, 0], sizes = [8, 64], strides = [1, 1]} : vector<8x96xf32> to vector<8x64xf32>
    %337 = arith.addf %335, %336 : vector<8x64xf32>
    %338 = arith.negf %337 : vector<8x64xf32>
    %339 = math.exp %338 : vector<8x64xf32>
    %cst_86 = arith.constant 1.000000e+00 : f32
    %340 = vector.broadcast %cst_86 : f32 to vector<8x64xf32>
    %341 = arith.addf %340, %339 : vector<8x64xf32>
    %342 = arith.divf %340, %341 : vector<8x64xf32>
    %343 = vector.extract_strided_slice %342 {offsets = [0, 0], sizes = [8, 32], strides = [1, 1]} : vector<8x64xf32> to vector<8x32xf32>
    %344 = vector.extract_strided_slice %342 {offsets = [0, 32], sizes = [8, 32], strides = [1, 1]} : vector<8x64xf32> to vector<8x32xf32>
    %345 = vector.extract_strided_slice %334 {offsets = [0, 64], sizes = [8, 32], strides = [1, 1]} : vector<8x96xf32> to vector<8x32xf32>
    %346 = vector.extract_strided_slice %332 {offsets = [0, 64], sizes = [8, 32], strides = [1, 1]} : vector<8x96xf32> to vector<8x32xf32>
    %347 = arith.addf %346, %245 : vector<8x32xf32>
    %348 = arith.mulf %343, %347 : vector<8x32xf32>
    %349 = arith.addf %345, %348 : vector<8x32xf32>
    %350 = math.tanh %349 : vector<8x32xf32>
    %cst_87 = arith.constant 1.000000e+00 : f32
    %351 = vector.broadcast %cst_87 : f32 to vector<8x32xf32>
    %352 = arith.subf %351, %344 : vector<8x32xf32>
    %353 = arith.mulf %352, %350 : vector<8x32xf32>
    %354 = arith.mulf %344, %328 : vector<8x32xf32>
    %355 = arith.addf %353, %354 : vector<8x32xf32>
    %c3_88 = arith.constant 3 : index
    %c0_89 = arith.constant 0 : index
    %c0_90 = arith.constant 0 : index
    %356 = vector.load %arg20[%c3_88, %c0_89, %c0_90] : memref<8x8x32xf32, #tpu.memory_space<vmem>>, vector<1x8x32xf32>
    %357 = vector.shape_cast %356 : vector<1x8x32xf32> to vector<8x32xf32>
    %358 = vector.shape_cast %355 : vector<8x32xf32> to vector<1x8x32xf32>
    tpu.vector_store %arg20[%c3_88, %c0_89, %c0_90], %358 {strides = array<i32>} : memref<8x8x32xf32, #tpu.memory_space<vmem>>, vector<1x8x32xf32>,
    %cst_91 = arith.constant dense<0.000000e+00> : vector<8x96xf32>
    %359 = tpu.matmul %355, %240, %cst_91 {dimension_numbers = #tpu.dot_dimension_numbers<[1], [0], [0], [1], [0, 0, 1, 1], [], []>} : vector<8x32xf32>, vector<32x96xf32>, vector<8x96xf32> -> vector<8x96xf32>
    %360 = vector.extract_strided_slice %249 {offsets = [4, 0, 0], sizes = [1, 8, 96], strides = [1, 1, 1]} : vector<8x8x96xf32> to vector<1x8x96xf32>
    %361 = vector.shape_cast %360 : vector<1x8x96xf32> to vector<8x96xf32>
    %362 = vector.extract_strided_slice %361 {offsets = [0, 0], sizes = [8, 64], strides = [1, 1]} : vector<8x96xf32> to vector<8x64xf32>
    %363 = vector.extract_strided_slice %359 {offsets = [0, 0], sizes = [8, 64], strides = [1, 1]} : vector<8x96xf32> to vector<8x64xf32>
    %364 = arith.addf %362, %363 : vector<8x64xf32>
    %365 = arith.negf %364 : vector<8x64xf32>
    %366 = math.exp %365 : vector<8x64xf32>
    %cst_92 = arith.constant 1.000000e+00 : f32
    %367 = vector.broadcast %cst_92 : f32 to vector<8x64xf32>
    %368 = arith.addf %367, %366 : vector<8x64xf32>
    %369 = arith.divf %367, %368 : vector<8x64xf32>
    %370 = vector.extract_strided_slice %369 {offsets = [0, 0], sizes = [8, 32], strides = [1, 1]} : vector<8x64xf32> to vector<8x32xf32>
    %371 = vector.extract_strided_slice %369 {offsets = [0, 32], sizes = [8, 32], strides = [1, 1]} : vector<8x64xf32> to vector<8x32xf32>
    %372 = vector.extract_strided_slice %361 {offsets = [0, 64], sizes = [8, 32], strides = [1, 1]} : vector<8x96xf32> to vector<8x32xf32>
    %373 = vector.extract_strided_slice %359 {offsets = [0, 64], sizes = [8, 32], strides = [1, 1]} : vector<8x96xf32> to vector<8x32xf32>
    %374 = arith.addf %373, %245 : vector<8x32xf32>
    %375 = arith.mulf %370, %374 : vector<8x32xf32>
    %376 = arith.addf %372, %375 : vector<8x32xf32>
    %377 = math.tanh %376 : vector<8x32xf32>
    %cst_93 = arith.constant 1.000000e+00 : f32
    %378 = vector.broadcast %cst_93 : f32 to vector<8x32xf32>
    %379 = arith.subf %378, %371 : vector<8x32xf32>
    %380 = arith.mulf %379, %377 : vector<8x32xf32>
    %381 = arith.mulf %371, %355 : vector<8x32xf32>
    %382 = arith.addf %380, %381 : vector<8x32xf32>
    %c4_94 = arith.constant 4 : index
    %c0_95 = arith.constant 0 : index
    %c0_96 = arith.constant 0 : index
    %383 = vector.load %arg20[%c4_94, %c0_95, %c0_96] : memref<8x8x32xf32, #tpu.memory_space<vmem>>, vector<1x8x32xf32>
    %384 = vector.shape_cast %383 : vector<1x8x32xf32> to vector<8x32xf32>
    %385 = vector.shape_cast %382 : vector<8x32xf32> to vector<1x8x32xf32>
    tpu.vector_store %arg20[%c4_94, %c0_95, %c0_96], %385 {strides = array<i32>} : memref<8x8x32xf32, #tpu.memory_space<vmem>>, vector<1x8x32xf32>,
    %cst_97 = arith.constant dense<0.000000e+00> : vector<8x96xf32>
    %386 = tpu.matmul %382, %240, %cst_97 {dimension_numbers = #tpu.dot_dimension_numbers<[1], [0], [0], [1], [0, 0, 1, 1], [], []>} : vector<8x32xf32>, vector<32x96xf32>, vector<8x96xf32> -> vector<8x96xf32>
    %387 = vector.extract_strided_slice %249 {offsets = [5, 0, 0], sizes = [1, 8, 96], strides = [1, 1, 1]} : vector<8x8x96xf32> to vector<1x8x96xf32>
    %388 = vector.shape_cast %387 : vector<1x8x96xf32> to vector<8x96xf32>
    %389 = vector.extract_strided_slice %388 {offsets = [0, 0], sizes = [8, 64], strides = [1, 1]} : vector<8x96xf32> to vector<8x64xf32>
    %390 = vector.extract_strided_slice %386 {offsets = [0, 0], sizes = [8, 64], strides = [1, 1]} : vector<8x96xf32> to vector<8x64xf32>
    %391 = arith.addf %389, %390 : vector<8x64xf32>
    %392 = arith.negf %391 : vector<8x64xf32>
    %393 = math.exp %392 : vector<8x64xf32>
    %cst_98 = arith.constant 1.000000e+00 : f32
    %394 = vector.broadcast %cst_98 : f32 to vector<8x64xf32>
    %395 = arith.addf %394, %393 : vector<8x64xf32>
    %396 = arith.divf %394, %395 : vector<8x64xf32>
    %397 = vector.extract_strided_slice %396 {offsets = [0, 0], sizes = [8, 32], strides = [1, 1]} : vector<8x64xf32> to vector<8x32xf32>
    %398 = vector.extract_strided_slice %396 {offsets = [0, 32], sizes = [8, 32], strides = [1, 1]} : vector<8x64xf32> to vector<8x32xf32>
    %399 = vector.extract_strided_slice %388 {offsets = [0, 64], sizes = [8, 32], strides = [1, 1]} : vector<8x96xf32> to vector<8x32xf32>
    %400 = vector.extract_strided_slice %386 {offsets = [0, 64], sizes = [8, 32], strides = [1, 1]} : vector<8x96xf32> to vector<8x32xf32>
    %401 = arith.addf %400, %245 : vector<8x32xf32>
    %402 = arith.mulf %397, %401 : vector<8x32xf32>
    %403 = arith.addf %399, %402 : vector<8x32xf32>
    %404 = math.tanh %403 : vector<8x32xf32>
    %cst_99 = arith.constant 1.000000e+00 : f32
    %405 = vector.broadcast %cst_99 : f32 to vector<8x32xf32>
    %406 = arith.subf %405, %398 : vector<8x32xf32>
    %407 = arith.mulf %406, %404 : vector<8x32xf32>
    %408 = arith.mulf %398, %382 : vector<8x32xf32>
    %409 = arith.addf %407, %408 : vector<8x32xf32>
    %c5_100 = arith.constant 5 : index
    %c0_101 = arith.constant 0 : index
    %c0_102 = arith.constant 0 : index
    %410 = vector.load %arg20[%c5_100, %c0_101, %c0_102] : memref<8x8x32xf32, #tpu.memory_space<vmem>>, vector<1x8x32xf32>
    %411 = vector.shape_cast %410 : vector<1x8x32xf32> to vector<8x32xf32>
    %412 = vector.shape_cast %409 : vector<8x32xf32> to vector<1x8x32xf32>
    tpu.vector_store %arg20[%c5_100, %c0_101, %c0_102], %412 {strides = array<i32>} : memref<8x8x32xf32, #tpu.memory_space<vmem>>, vector<1x8x32xf32>,
    %cst_103 = arith.constant dense<0.000000e+00> : vector<8x96xf32>
    %413 = tpu.matmul %409, %240, %cst_103 {dimension_numbers = #tpu.dot_dimension_numbers<[1], [0], [0], [1], [0, 0, 1, 1], [], []>} : vector<8x32xf32>, vector<32x96xf32>, vector<8x96xf32> -> vector<8x96xf32>
    %414 = vector.extract_strided_slice %249 {offsets = [6, 0, 0], sizes = [1, 8, 96], strides = [1, 1, 1]} : vector<8x8x96xf32> to vector<1x8x96xf32>
    %415 = vector.shape_cast %414 : vector<1x8x96xf32> to vector<8x96xf32>
    %416 = vector.extract_strided_slice %415 {offsets = [0, 0], sizes = [8, 64], strides = [1, 1]} : vector<8x96xf32> to vector<8x64xf32>
    %417 = vector.extract_strided_slice %413 {offsets = [0, 0], sizes = [8, 64], strides = [1, 1]} : vector<8x96xf32> to vector<8x64xf32>
    %418 = arith.addf %416, %417 : vector<8x64xf32>
    %419 = arith.negf %418 : vector<8x64xf32>
    %420 = math.exp %419 : vector<8x64xf32>
    %cst_104 = arith.constant 1.000000e+00 : f32
    %421 = vector.broadcast %cst_104 : f32 to vector<8x64xf32>
    %422 = arith.addf %421, %420 : vector<8x64xf32>
    %423 = arith.divf %421, %422 : vector<8x64xf32>
    %424 = vector.extract_strided_slice %423 {offsets = [0, 0], sizes = [8, 32], strides = [1, 1]} : vector<8x64xf32> to vector<8x32xf32>
    %425 = vector.extract_strided_slice %423 {offsets = [0, 32], sizes = [8, 32], strides = [1, 1]} : vector<8x64xf32> to vector<8x32xf32>
    %426 = vector.extract_strided_slice %415 {offsets = [0, 64], sizes = [8, 32], strides = [1, 1]} : vector<8x96xf32> to vector<8x32xf32>
    %427 = vector.extract_strided_slice %413 {offsets = [0, 64], sizes = [8, 32], strides = [1, 1]} : vector<8x96xf32> to vector<8x32xf32>
    %428 = arith.addf %427, %245 : vector<8x32xf32>
    %429 = arith.mulf %424, %428 : vector<8x32xf32>
    %430 = arith.addf %426, %429 : vector<8x32xf32>
    %431 = math.tanh %430 : vector<8x32xf32>
    %cst_105 = arith.constant 1.000000e+00 : f32
    %432 = vector.broadcast %cst_105 : f32 to vector<8x32xf32>
    %433 = arith.subf %432, %425 : vector<8x32xf32>
    %434 = arith.mulf %433, %431 : vector<8x32xf32>
    %435 = arith.mulf %425, %409 : vector<8x32xf32>
    %436 = arith.addf %434, %435 : vector<8x32xf32>
    %c6_106 = arith.constant 6 : index
    %c0_107 = arith.constant 0 : index
    %c0_108 = arith.constant 0 : index
    %437 = vector.load %arg20[%c6_106, %c0_107, %c0_108] : memref<8x8x32xf32, #tpu.memory_space<vmem>>, vector<1x8x32xf32>
    %438 = vector.shape_cast %437 : vector<1x8x32xf32> to vector<8x32xf32>
    %439 = vector.shape_cast %436 : vector<8x32xf32> to vector<1x8x32xf32>
    tpu.vector_store %arg20[%c6_106, %c0_107, %c0_108], %439 {strides = array<i32>} : memref<8x8x32xf32, #tpu.memory_space<vmem>>, vector<1x8x32xf32>,
    %cst_109 = arith.constant dense<0.000000e+00> : vector<8x96xf32>
    %440 = tpu.matmul %436, %240, %cst_109 {dimension_numbers = #tpu.dot_dimension_numbers<[1], [0], [0], [1], [0, 0, 1, 1], [], []>} : vector<8x32xf32>, vector<32x96xf32>, vector<8x96xf32> -> vector<8x96xf32>
    %441 = vector.extract_strided_slice %249 {offsets = [7, 0, 0], sizes = [1, 8, 96], strides = [1, 1, 1]} : vector<8x8x96xf32> to vector<1x8x96xf32>
    %442 = vector.shape_cast %441 : vector<1x8x96xf32> to vector<8x96xf32>
    %443 = vector.extract_strided_slice %442 {offsets = [0, 0], sizes = [8, 64], strides = [1, 1]} : vector<8x96xf32> to vector<8x64xf32>
    %444 = vector.extract_strided_slice %440 {offsets = [0, 0], sizes = [8, 64], strides = [1, 1]} : vector<8x96xf32> to vector<8x64xf32>
    %445 = arith.addf %443, %444 : vector<8x64xf32>
    %446 = arith.negf %445 : vector<8x64xf32>
    %447 = math.exp %446 : vector<8x64xf32>
    %cst_110 = arith.constant 1.000000e+00 : f32
    %448 = vector.broadcast %cst_110 : f32 to vector<8x64xf32>
    %449 = arith.addf %448, %447 : vector<8x64xf32>
    %450 = arith.divf %448, %449 : vector<8x64xf32>
    %451 = vector.extract_strided_slice %450 {offsets = [0, 0], sizes = [8, 32], strides = [1, 1]} : vector<8x64xf32> to vector<8x32xf32>
    %452 = vector.extract_strided_slice %450 {offsets = [0, 32], sizes = [8, 32], strides = [1, 1]} : vector<8x64xf32> to vector<8x32xf32>
    %453 = vector.extract_strided_slice %442 {offsets = [0, 64], sizes = [8, 32], strides = [1, 1]} : vector<8x96xf32> to vector<8x32xf32>
    %454 = vector.extract_strided_slice %440 {offsets = [0, 64], sizes = [8, 32], strides = [1, 1]} : vector<8x96xf32> to vector<8x32xf32>
    %455 = arith.addf %454, %245 : vector<8x32xf32>
    %456 = arith.mulf %451, %455 : vector<8x32xf32>
    %457 = arith.addf %453, %456 : vector<8x32xf32>
    %458 = math.tanh %457 : vector<8x32xf32>
    %cst_111 = arith.constant 1.000000e+00 : f32
    %459 = vector.broadcast %cst_111 : f32 to vector<8x32xf32>
    %460 = arith.subf %459, %452 : vector<8x32xf32>
    %461 = arith.mulf %460, %458 : vector<8x32xf32>
    %462 = arith.mulf %452, %436 : vector<8x32xf32>
    %463 = arith.addf %461, %462 : vector<8x32xf32>
    %c7_112 = arith.constant 7 : index
    %c0_113 = arith.constant 0 : index
    %c0_114 = arith.constant 0 : index
    %464 = vector.load %arg20[%c7_112, %c0_113, %c0_114] : memref<8x8x32xf32, #tpu.memory_space<vmem>>, vector<1x8x32xf32>
    %465 = vector.shape_cast %464 : vector<1x8x32xf32> to vector<8x32xf32>
    %466 = vector.shape_cast %463 : vector<8x32xf32> to vector<1x8x32xf32>
    tpu.vector_store %arg20[%c7_112, %c0_113, %c0_114], %466 {strides = array<i32>} : memref<8x8x32xf32, #tpu.memory_space<vmem>>, vector<1x8x32xf32>,
    %c0_115 = arith.constant 0 : index
    %c0_116 = arith.constant 0 : index
    %c0_117 = arith.constant 0 : index
    %467 = vector.load %arg20[%c0_115, %c0_116, %c0_117] : memref<8x8x32xf32, #tpu.memory_space<vmem>>, vector<8x8x32xf32>
    %468 = vector.shape_cast %467 : vector<8x8x32xf32> to vector<64x32xf32>
    %c0_118 = arith.constant 0 : index
    %c0_119 = arith.constant 0 : index
    %c0_120 = arith.constant 0 : index
    %469 = vector.load %arg20[%c0_118, %c0_119, %c0_120] : memref<8x8x32xf32, #tpu.memory_space<vmem>>, vector<8x8x32xf32>
    %c0_121 = arith.constant 0 : index
    %c0_122 = arith.constant 0 : index
    %c0_123 = arith.constant 0 : index
    %470 = vector.load %arg18[%c0_121, %c0_122, %c0_123] : memref<8x8x32xf32, #tpu.memory_space<vmem>>, vector<8x8x32xf32>
    tpu.vector_store %arg18[%c0_121, %c0_122, %c0_123], %469 {strides = array<i32>} : memref<8x8x32xf32, #tpu.memory_space<vmem>>, vector<8x8x32xf32>,
    %c0_124 = arith.constant 0 : index
    %c0_125 = arith.constant 0 : index
    %471 = vector.load %arg10[%c0_124, %c0_125] : memref<32x48xf32, #tpu.memory_space<vmem>>, vector<32x48xf32>
    %c0_126 = arith.constant 0 : index
    %c0_127 = arith.constant 0 : index
    %472 = vector.load %arg11[%c0_126, %c0_127] : memref<16x48xf32, #tpu.memory_space<vmem>>, vector<16x48xf32>
    %c0_128 = arith.constant 0 : index
    %c0_129 = arith.constant 0 : index
    %473 = vector.load %arg12[%c0_128, %c0_129] : memref<1x64xf32, #tpu.memory_space<vmem>>, vector<1x64xf32>
    %474 = vector.extract_strided_slice %473 {offsets = [0, 0], sizes = [1, 48], strides = [1, 1]} : vector<1x64xf32> to vector<1x48xf32>
    %475 = vector.extract_strided_slice %473 {offsets = [0, 48], sizes = [1, 16], strides = [1, 1]} : vector<1x64xf32> to vector<1x16xf32>
    %476 = vector.shape_cast %475 : vector<1x16xf32> to vector<1x16xf32>
    %477 = vector.broadcast %476 : vector<1x16xf32> to vector<8x16xf32>
    %cst_130 = arith.constant dense<0.000000e+00> : vector<64x48xf32>
    %478 = tpu.matmul %468, %471, %cst_130 {dimension_numbers = #tpu.dot_dimension_numbers<[1], [0], [0], [1], [0, 0, 1, 1], [], []>} : vector<64x32xf32>, vector<32x48xf32>, vector<64x48xf32> -> vector<64x48xf32>
    %479 = vector.broadcast %474 : vector<1x48xf32> to vector<64x48xf32>
    %480 = arith.addf %478, %479 : vector<64x48xf32>
    %481 = vector.shape_cast %480 : vector<64x48xf32> to vector<8x8x48xf32>
    %cst_131 = arith.constant 0.000000e+00 : f32
    %482 = vector.broadcast %cst_131 : f32 to vector<8x16xf32>
    %cst_132 = arith.constant dense<0.000000e+00> : vector<8x48xf32>
    %483 = tpu.matmul %482, %472, %cst_132 {dimension_numbers = #tpu.dot_dimension_numbers<[1], [0], [0], [1], [0, 0, 1, 1], [], []>} : vector<8x16xf32>, vector<16x48xf32>, vector<8x48xf32> -> vector<8x48xf32>
    %484 = vector.extract_strided_slice %481 {offsets = [0, 0, 0], sizes = [1, 8, 48], strides = [1, 1, 1]} : vector<8x8x48xf32> to vector<1x8x48xf32>
    %485 = vector.shape_cast %484 : vector<1x8x48xf32> to vector<8x48xf32>
    %486 = vector.extract_strided_slice %485 {offsets = [0, 0], sizes = [8, 32], strides = [1, 1]} : vector<8x48xf32> to vector<8x32xf32>
    %487 = vector.extract_strided_slice %483 {offsets = [0, 0], sizes = [8, 32], strides = [1, 1]} : vector<8x48xf32> to vector<8x32xf32>
    %488 = arith.addf %486, %487 : vector<8x32xf32>
    %489 = arith.negf %488 : vector<8x32xf32>
    %490 = math.exp %489 : vector<8x32xf32>
    %cst_133 = arith.constant 1.000000e+00 : f32
    %491 = vector.broadcast %cst_133 : f32 to vector<8x32xf32>
    %492 = arith.addf %491, %490 : vector<8x32xf32>
    %493 = arith.divf %491, %492 : vector<8x32xf32>
    %494 = vector.extract_strided_slice %493 {offsets = [0, 0], sizes = [8, 16], strides = [1, 1]} : vector<8x32xf32> to vector<8x16xf32>
    %495 = vector.extract_strided_slice %493 {offsets = [0, 16], sizes = [8, 16], strides = [1, 1]} : vector<8x32xf32> to vector<8x16xf32>
    %496 = vector.extract_strided_slice %485 {offsets = [0, 32], sizes = [8, 16], strides = [1, 1]} : vector<8x48xf32> to vector<8x16xf32>
    %497 = vector.extract_strided_slice %483 {offsets = [0, 32], sizes = [8, 16], strides = [1, 1]} : vector<8x48xf32> to vector<8x16xf32>
    %498 = arith.addf %497, %477 : vector<8x16xf32>
    %499 = arith.mulf %494, %498 : vector<8x16xf32>
    %500 = arith.addf %496, %499 : vector<8x16xf32>
    %501 = math.tanh %500 : vector<8x16xf32>
    %cst_134 = arith.constant 1.000000e+00 : f32
    %502 = vector.broadcast %cst_134 : f32 to vector<8x16xf32>
    %503 = arith.subf %502, %495 : vector<8x16xf32>
    %504 = arith.mulf %503, %501 : vector<8x16xf32>
    %505 = arith.mulf %495, %482 : vector<8x16xf32>
    %506 = arith.addf %504, %505 : vector<8x16xf32>
    %c0_135 = arith.constant 0 : index
    %c0_136 = arith.constant 0 : index
    %c0_137 = arith.constant 0 : index
    %507 = vector.load %arg21[%c0_135, %c0_136, %c0_137] : memref<8x8x16xf32, #tpu.memory_space<vmem>>, vector<1x8x16xf32>
    %508 = vector.shape_cast %507 : vector<1x8x16xf32> to vector<8x16xf32>
    %509 = vector.shape_cast %506 : vector<8x16xf32> to vector<1x8x16xf32>
    tpu.vector_store %arg21[%c0_135, %c0_136, %c0_137], %509 {strides = array<i32>} : memref<8x8x16xf32, #tpu.memory_space<vmem>>, vector<1x8x16xf32>,
    %cst_138 = arith.constant dense<0.000000e+00> : vector<8x48xf32>
    %510 = tpu.matmul %506, %472, %cst_138 {dimension_numbers = #tpu.dot_dimension_numbers<[1], [0], [0], [1], [0, 0, 1, 1], [], []>} : vector<8x16xf32>, vector<16x48xf32>, vector<8x48xf32> -> vector<8x48xf32>
    %511 = vector.extract_strided_slice %481 {offsets = [1, 0, 0], sizes = [1, 8, 48], strides = [1, 1, 1]} : vector<8x8x48xf32> to vector<1x8x48xf32>
    %512 = vector.shape_cast %511 : vector<1x8x48xf32> to vector<8x48xf32>
    %513 = vector.extract_strided_slice %512 {offsets = [0, 0], sizes = [8, 32], strides = [1, 1]} : vector<8x48xf32> to vector<8x32xf32>
    %514 = vector.extract_strided_slice %510 {offsets = [0, 0], sizes = [8, 32], strides = [1, 1]} : vector<8x48xf32> to vector<8x32xf32>
    %515 = arith.addf %513, %514 : vector<8x32xf32>
    %516 = arith.negf %515 : vector<8x32xf32>
    %517 = math.exp %516 : vector<8x32xf32>
    %cst_139 = arith.constant 1.000000e+00 : f32
    %518 = vector.broadcast %cst_139 : f32 to vector<8x32xf32>
    %519 = arith.addf %518, %517 : vector<8x32xf32>
    %520 = arith.divf %518, %519 : vector<8x32xf32>
    %521 = vector.extract_strided_slice %520 {offsets = [0, 0], sizes = [8, 16], strides = [1, 1]} : vector<8x32xf32> to vector<8x16xf32>
    %522 = vector.extract_strided_slice %520 {offsets = [0, 16], sizes = [8, 16], strides = [1, 1]} : vector<8x32xf32> to vector<8x16xf32>
    %523 = vector.extract_strided_slice %512 {offsets = [0, 32], sizes = [8, 16], strides = [1, 1]} : vector<8x48xf32> to vector<8x16xf32>
    %524 = vector.extract_strided_slice %510 {offsets = [0, 32], sizes = [8, 16], strides = [1, 1]} : vector<8x48xf32> to vector<8x16xf32>
    %525 = arith.addf %524, %477 : vector<8x16xf32>
    %526 = arith.mulf %521, %525 : vector<8x16xf32>
    %527 = arith.addf %523, %526 : vector<8x16xf32>
    %528 = math.tanh %527 : vector<8x16xf32>
    %cst_140 = arith.constant 1.000000e+00 : f32
    %529 = vector.broadcast %cst_140 : f32 to vector<8x16xf32>
    %530 = arith.subf %529, %522 : vector<8x16xf32>
    %531 = arith.mulf %530, %528 : vector<8x16xf32>
    %532 = arith.mulf %522, %506 : vector<8x16xf32>
    %533 = arith.addf %531, %532 : vector<8x16xf32>
    %c1_141 = arith.constant 1 : index
    %c0_142 = arith.constant 0 : index
    %c0_143 = arith.constant 0 : index
    %534 = vector.load %arg21[%c1_141, %c0_142, %c0_143] : memref<8x8x16xf32, #tpu.memory_space<vmem>>, vector<1x8x16xf32>
    %535 = vector.shape_cast %534 : vector<1x8x16xf32> to vector<8x16xf32>
    %536 = vector.shape_cast %533 : vector<8x16xf32> to vector<1x8x16xf32>
    tpu.vector_store %arg21[%c1_141, %c0_142, %c0_143], %536 {strides = array<i32>} : memref<8x8x16xf32, #tpu.memory_space<vmem>>, vector<1x8x16xf32>,
    %cst_144 = arith.constant dense<0.000000e+00> : vector<8x48xf32>
    %537 = tpu.matmul %533, %472, %cst_144 {dimension_numbers = #tpu.dot_dimension_numbers<[1], [0], [0], [1], [0, 0, 1, 1], [], []>} : vector<8x16xf32>, vector<16x48xf32>, vector<8x48xf32> -> vector<8x48xf32>
    %538 = vector.extract_strided_slice %481 {offsets = [2, 0, 0], sizes = [1, 8, 48], strides = [1, 1, 1]} : vector<8x8x48xf32> to vector<1x8x48xf32>
    %539 = vector.shape_cast %538 : vector<1x8x48xf32> to vector<8x48xf32>
    %540 = vector.extract_strided_slice %539 {offsets = [0, 0], sizes = [8, 32], strides = [1, 1]} : vector<8x48xf32> to vector<8x32xf32>
    %541 = vector.extract_strided_slice %537 {offsets = [0, 0], sizes = [8, 32], strides = [1, 1]} : vector<8x48xf32> to vector<8x32xf32>
    %542 = arith.addf %540, %541 : vector<8x32xf32>
    %543 = arith.negf %542 : vector<8x32xf32>
    %544 = math.exp %543 : vector<8x32xf32>
    %cst_145 = arith.constant 1.000000e+00 : f32
    %545 = vector.broadcast %cst_145 : f32 to vector<8x32xf32>
    %546 = arith.addf %545, %544 : vector<8x32xf32>
    %547 = arith.divf %545, %546 : vector<8x32xf32>
    %548 = vector.extract_strided_slice %547 {offsets = [0, 0], sizes = [8, 16], strides = [1, 1]} : vector<8x32xf32> to vector<8x16xf32>
    %549 = vector.extract_strided_slice %547 {offsets = [0, 16], sizes = [8, 16], strides = [1, 1]} : vector<8x32xf32> to vector<8x16xf32>
    %550 = vector.extract_strided_slice %539 {offsets = [0, 32], sizes = [8, 16], strides = [1, 1]} : vector<8x48xf32> to vector<8x16xf32>
    %551 = vector.extract_strided_slice %537 {offsets = [0, 32], sizes = [8, 16], strides = [1, 1]} : vector<8x48xf32> to vector<8x16xf32>
    %552 = arith.addf %551, %477 : vector<8x16xf32>
    %553 = arith.mulf %548, %552 : vector<8x16xf32>
    %554 = arith.addf %550, %553 : vector<8x16xf32>
    %555 = math.tanh %554 : vector<8x16xf32>
    %cst_146 = arith.constant 1.000000e+00 : f32
    %556 = vector.broadcast %cst_146 : f32 to vector<8x16xf32>
    %557 = arith.subf %556, %549 : vector<8x16xf32>
    %558 = arith.mulf %557, %555 : vector<8x16xf32>
    %559 = arith.mulf %549, %533 : vector<8x16xf32>
    %560 = arith.addf %558, %559 : vector<8x16xf32>
    %c2_147 = arith.constant 2 : index
    %c0_148 = arith.constant 0 : index
    %c0_149 = arith.constant 0 : index
    %561 = vector.load %arg21[%c2_147, %c0_148, %c0_149] : memref<8x8x16xf32, #tpu.memory_space<vmem>>, vector<1x8x16xf32>
    %562 = vector.shape_cast %561 : vector<1x8x16xf32> to vector<8x16xf32>
    %563 = vector.shape_cast %560 : vector<8x16xf32> to vector<1x8x16xf32>
    tpu.vector_store %arg21[%c2_147, %c0_148, %c0_149], %563 {strides = array<i32>} : memref<8x8x16xf32, #tpu.memory_space<vmem>>, vector<1x8x16xf32>,
    %cst_150 = arith.constant dense<0.000000e+00> : vector<8x48xf32>
    %564 = tpu.matmul %560, %472, %cst_150 {dimension_numbers = #tpu.dot_dimension_numbers<[1], [0], [0], [1], [0, 0, 1, 1], [], []>} : vector<8x16xf32>, vector<16x48xf32>, vector<8x48xf32> -> vector<8x48xf32>
    %565 = vector.extract_strided_slice %481 {offsets = [3, 0, 0], sizes = [1, 8, 48], strides = [1, 1, 1]} : vector<8x8x48xf32> to vector<1x8x48xf32>
    %566 = vector.shape_cast %565 : vector<1x8x48xf32> to vector<8x48xf32>
    %567 = vector.extract_strided_slice %566 {offsets = [0, 0], sizes = [8, 32], strides = [1, 1]} : vector<8x48xf32> to vector<8x32xf32>
    %568 = vector.extract_strided_slice %564 {offsets = [0, 0], sizes = [8, 32], strides = [1, 1]} : vector<8x48xf32> to vector<8x32xf32>
    %569 = arith.addf %567, %568 : vector<8x32xf32>
    %570 = arith.negf %569 : vector<8x32xf32>
    %571 = math.exp %570 : vector<8x32xf32>
    %cst_151 = arith.constant 1.000000e+00 : f32
    %572 = vector.broadcast %cst_151 : f32 to vector<8x32xf32>
    %573 = arith.addf %572, %571 : vector<8x32xf32>
    %574 = arith.divf %572, %573 : vector<8x32xf32>
    %575 = vector.extract_strided_slice %574 {offsets = [0, 0], sizes = [8, 16], strides = [1, 1]} : vector<8x32xf32> to vector<8x16xf32>
    %576 = vector.extract_strided_slice %574 {offsets = [0, 16], sizes = [8, 16], strides = [1, 1]} : vector<8x32xf32> to vector<8x16xf32>
    %577 = vector.extract_strided_slice %566 {offsets = [0, 32], sizes = [8, 16], strides = [1, 1]} : vector<8x48xf32> to vector<8x16xf32>
    %578 = vector.extract_strided_slice %564 {offsets = [0, 32], sizes = [8, 16], strides = [1, 1]} : vector<8x48xf32> to vector<8x16xf32>
    %579 = arith.addf %578, %477 : vector<8x16xf32>
    %580 = arith.mulf %575, %579 : vector<8x16xf32>
    %581 = arith.addf %577, %580 : vector<8x16xf32>
    %582 = math.tanh %581 : vector<8x16xf32>
    %cst_152 = arith.constant 1.000000e+00 : f32
    %583 = vector.broadcast %cst_152 : f32 to vector<8x16xf32>
    %584 = arith.subf %583, %576 : vector<8x16xf32>
    %585 = arith.mulf %584, %582 : vector<8x16xf32>
    %586 = arith.mulf %576, %560 : vector<8x16xf32>
    %587 = arith.addf %585, %586 : vector<8x16xf32>
    %c3_153 = arith.constant 3 : index
    %c0_154 = arith.constant 0 : index
    %c0_155 = arith.constant 0 : index
    %588 = vector.load %arg21[%c3_153, %c0_154, %c0_155] : memref<8x8x16xf32, #tpu.memory_space<vmem>>, vector<1x8x16xf32>
    %589 = vector.shape_cast %588 : vector<1x8x16xf32> to vector<8x16xf32>
    %590 = vector.shape_cast %587 : vector<8x16xf32> to vector<1x8x16xf32>
    tpu.vector_store %arg21[%c3_153, %c0_154, %c0_155], %590 {strides = array<i32>} : memref<8x8x16xf32, #tpu.memory_space<vmem>>, vector<1x8x16xf32>,
    %cst_156 = arith.constant dense<0.000000e+00> : vector<8x48xf32>
    %591 = tpu.matmul %587, %472, %cst_156 {dimension_numbers = #tpu.dot_dimension_numbers<[1], [0], [0], [1], [0, 0, 1, 1], [], []>} : vector<8x16xf32>, vector<16x48xf32>, vector<8x48xf32> -> vector<8x48xf32>
    %592 = vector.extract_strided_slice %481 {offsets = [4, 0, 0], sizes = [1, 8, 48], strides = [1, 1, 1]} : vector<8x8x48xf32> to vector<1x8x48xf32>
    %593 = vector.shape_cast %592 : vector<1x8x48xf32> to vector<8x48xf32>
    %594 = vector.extract_strided_slice %593 {offsets = [0, 0], sizes = [8, 32], strides = [1, 1]} : vector<8x48xf32> to vector<8x32xf32>
    %595 = vector.extract_strided_slice %591 {offsets = [0, 0], sizes = [8, 32], strides = [1, 1]} : vector<8x48xf32> to vector<8x32xf32>
    %596 = arith.addf %594, %595 : vector<8x32xf32>
    %597 = arith.negf %596 : vector<8x32xf32>
    %598 = math.exp %597 : vector<8x32xf32>
    %cst_157 = arith.constant 1.000000e+00 : f32
    %599 = vector.broadcast %cst_157 : f32 to vector<8x32xf32>
    %600 = arith.addf %599, %598 : vector<8x32xf32>
    %601 = arith.divf %599, %600 : vector<8x32xf32>
    %602 = vector.extract_strided_slice %601 {offsets = [0, 0], sizes = [8, 16], strides = [1, 1]} : vector<8x32xf32> to vector<8x16xf32>
    %603 = vector.extract_strided_slice %601 {offsets = [0, 16], sizes = [8, 16], strides = [1, 1]} : vector<8x32xf32> to vector<8x16xf32>
    %604 = vector.extract_strided_slice %593 {offsets = [0, 32], sizes = [8, 16], strides = [1, 1]} : vector<8x48xf32> to vector<8x16xf32>
    %605 = vector.extract_strided_slice %591 {offsets = [0, 32], sizes = [8, 16], strides = [1, 1]} : vector<8x48xf32> to vector<8x16xf32>
    %606 = arith.addf %605, %477 : vector<8x16xf32>
    %607 = arith.mulf %602, %606 : vector<8x16xf32>
    %608 = arith.addf %604, %607 : vector<8x16xf32>
    %609 = math.tanh %608 : vector<8x16xf32>
    %cst_158 = arith.constant 1.000000e+00 : f32
    %610 = vector.broadcast %cst_158 : f32 to vector<8x16xf32>
    %611 = arith.subf %610, %603 : vector<8x16xf32>
    %612 = arith.mulf %611, %609 : vector<8x16xf32>
    %613 = arith.mulf %603, %587 : vector<8x16xf32>
    %614 = arith.addf %612, %613 : vector<8x16xf32>
    %c4_159 = arith.constant 4 : index
    %c0_160 = arith.constant 0 : index
    %c0_161 = arith.constant 0 : index
    %615 = vector.load %arg21[%c4_159, %c0_160, %c0_161] : memref<8x8x16xf32, #tpu.memory_space<vmem>>, vector<1x8x16xf32>
    %616 = vector.shape_cast %615 : vector<1x8x16xf32> to vector<8x16xf32>
    %617 = vector.shape_cast %614 : vector<8x16xf32> to vector<1x8x16xf32>
    tpu.vector_store %arg21[%c4_159, %c0_160, %c0_161], %617 {strides = array<i32>} : memref<8x8x16xf32, #tpu.memory_space<vmem>>, vector<1x8x16xf32>,
    %cst_162 = arith.constant dense<0.000000e+00> : vector<8x48xf32>
    %618 = tpu.matmul %614, %472, %cst_162 {dimension_numbers = #tpu.dot_dimension_numbers<[1], [0], [0], [1], [0, 0, 1, 1], [], []>} : vector<8x16xf32>, vector<16x48xf32>, vector<8x48xf32> -> vector<8x48xf32>
    %619 = vector.extract_strided_slice %481 {offsets = [5, 0, 0], sizes = [1, 8, 48], strides = [1, 1, 1]} : vector<8x8x48xf32> to vector<1x8x48xf32>
    %620 = vector.shape_cast %619 : vector<1x8x48xf32> to vector<8x48xf32>
    %621 = vector.extract_strided_slice %620 {offsets = [0, 0], sizes = [8, 32], strides = [1, 1]} : vector<8x48xf32> to vector<8x32xf32>
    %622 = vector.extract_strided_slice %618 {offsets = [0, 0], sizes = [8, 32], strides = [1, 1]} : vector<8x48xf32> to vector<8x32xf32>
    %623 = arith.addf %621, %622 : vector<8x32xf32>
    %624 = arith.negf %623 : vector<8x32xf32>
    %625 = math.exp %624 : vector<8x32xf32>
    %cst_163 = arith.constant 1.000000e+00 : f32
    %626 = vector.broadcast %cst_163 : f32 to vector<8x32xf32>
    %627 = arith.addf %626, %625 : vector<8x32xf32>
    %628 = arith.divf %626, %627 : vector<8x32xf32>
    %629 = vector.extract_strided_slice %628 {offsets = [0, 0], sizes = [8, 16], strides = [1, 1]} : vector<8x32xf32> to vector<8x16xf32>
    %630 = vector.extract_strided_slice %628 {offsets = [0, 16], sizes = [8, 16], strides = [1, 1]} : vector<8x32xf32> to vector<8x16xf32>
    %631 = vector.extract_strided_slice %620 {offsets = [0, 32], sizes = [8, 16], strides = [1, 1]} : vector<8x48xf32> to vector<8x16xf32>
    %632 = vector.extract_strided_slice %618 {offsets = [0, 32], sizes = [8, 16], strides = [1, 1]} : vector<8x48xf32> to vector<8x16xf32>
    %633 = arith.addf %632, %477 : vector<8x16xf32>
    %634 = arith.mulf %629, %633 : vector<8x16xf32>
    %635 = arith.addf %631, %634 : vector<8x16xf32>
    %636 = math.tanh %635 : vector<8x16xf32>
    %cst_164 = arith.constant 1.000000e+00 : f32
    %637 = vector.broadcast %cst_164 : f32 to vector<8x16xf32>
    %638 = arith.subf %637, %630 : vector<8x16xf32>
    %639 = arith.mulf %638, %636 : vector<8x16xf32>
    %640 = arith.mulf %630, %614 : vector<8x16xf32>
    %641 = arith.addf %639, %640 : vector<8x16xf32>
    %c5_165 = arith.constant 5 : index
    %c0_166 = arith.constant 0 : index
    %c0_167 = arith.constant 0 : index
    %642 = vector.load %arg21[%c5_165, %c0_166, %c0_167] : memref<8x8x16xf32, #tpu.memory_space<vmem>>, vector<1x8x16xf32>
    %643 = vector.shape_cast %642 : vector<1x8x16xf32> to vector<8x16xf32>
    %644 = vector.shape_cast %641 : vector<8x16xf32> to vector<1x8x16xf32>
    tpu.vector_store %arg21[%c5_165, %c0_166, %c0_167], %644 {strides = array<i32>} : memref<8x8x16xf32, #tpu.memory_space<vmem>>, vector<1x8x16xf32>,
    %cst_168 = arith.constant dense<0.000000e+00> : vector<8x48xf32>
    %645 = tpu.matmul %641, %472, %cst_168 {dimension_numbers = #tpu.dot_dimension_numbers<[1], [0], [0], [1], [0, 0, 1, 1], [], []>} : vector<8x16xf32>, vector<16x48xf32>, vector<8x48xf32> -> vector<8x48xf32>
    %646 = vector.extract_strided_slice %481 {offsets = [6, 0, 0], sizes = [1, 8, 48], strides = [1, 1, 1]} : vector<8x8x48xf32> to vector<1x8x48xf32>
    %647 = vector.shape_cast %646 : vector<1x8x48xf32> to vector<8x48xf32>
    %648 = vector.extract_strided_slice %647 {offsets = [0, 0], sizes = [8, 32], strides = [1, 1]} : vector<8x48xf32> to vector<8x32xf32>
    %649 = vector.extract_strided_slice %645 {offsets = [0, 0], sizes = [8, 32], strides = [1, 1]} : vector<8x48xf32> to vector<8x32xf32>
    %650 = arith.addf %648, %649 : vector<8x32xf32>
    %651 = arith.negf %650 : vector<8x32xf32>
    %652 = math.exp %651 : vector<8x32xf32>
    %cst_169 = arith.constant 1.000000e+00 : f32
    %653 = vector.broadcast %cst_169 : f32 to vector<8x32xf32>
    %654 = arith.addf %653, %652 : vector<8x32xf32>
    %655 = arith.divf %653, %654 : vector<8x32xf32>
    %656 = vector.extract_strided_slice %655 {offsets = [0, 0], sizes = [8, 16], strides = [1, 1]} : vector<8x32xf32> to vector<8x16xf32>
    %657 = vector.extract_strided_slice %655 {offsets = [0, 16], sizes = [8, 16], strides = [1, 1]} : vector<8x32xf32> to vector<8x16xf32>
    %658 = vector.extract_strided_slice %647 {offsets = [0, 32], sizes = [8, 16], strides = [1, 1]} : vector<8x48xf32> to vector<8x16xf32>
    %659 = vector.extract_strided_slice %645 {offsets = [0, 32], sizes = [8, 16], strides = [1, 1]} : vector<8x48xf32> to vector<8x16xf32>
    %660 = arith.addf %659, %477 : vector<8x16xf32>
    %661 = arith.mulf %656, %660 : vector<8x16xf32>
    %662 = arith.addf %658, %661 : vector<8x16xf32>
    %663 = math.tanh %662 : vector<8x16xf32>
    %cst_170 = arith.constant 1.000000e+00 : f32
    %664 = vector.broadcast %cst_170 : f32 to vector<8x16xf32>
    %665 = arith.subf %664, %657 : vector<8x16xf32>
    %666 = arith.mulf %665, %663 : vector<8x16xf32>
    %667 = arith.mulf %657, %641 : vector<8x16xf32>
    %668 = arith.addf %666, %667 : vector<8x16xf32>
    %c6_171 = arith.constant 6 : index
    %c0_172 = arith.constant 0 : index
    %c0_173 = arith.constant 0 : index
    %669 = vector.load %arg21[%c6_171, %c0_172, %c0_173] : memref<8x8x16xf32, #tpu.memory_space<vmem>>, vector<1x8x16xf32>
    %670 = vector.shape_cast %669 : vector<1x8x16xf32> to vector<8x16xf32>
    %671 = vector.shape_cast %668 : vector<8x16xf32> to vector<1x8x16xf32>
    tpu.vector_store %arg21[%c6_171, %c0_172, %c0_173], %671 {strides = array<i32>} : memref<8x8x16xf32, #tpu.memory_space<vmem>>, vector<1x8x16xf32>,
    %cst_174 = arith.constant dense<0.000000e+00> : vector<8x48xf32>
    %672 = tpu.matmul %668, %472, %cst_174 {dimension_numbers = #tpu.dot_dimension_numbers<[1], [0], [0], [1], [0, 0, 1, 1], [], []>} : vector<8x16xf32>, vector<16x48xf32>, vector<8x48xf32> -> vector<8x48xf32>
    %673 = vector.extract_strided_slice %481 {offsets = [7, 0, 0], sizes = [1, 8, 48], strides = [1, 1, 1]} : vector<8x8x48xf32> to vector<1x8x48xf32>
    %674 = vector.shape_cast %673 : vector<1x8x48xf32> to vector<8x48xf32>
    %675 = vector.extract_strided_slice %674 {offsets = [0, 0], sizes = [8, 32], strides = [1, 1]} : vector<8x48xf32> to vector<8x32xf32>
    %676 = vector.extract_strided_slice %672 {offsets = [0, 0], sizes = [8, 32], strides = [1, 1]} : vector<8x48xf32> to vector<8x32xf32>
    %677 = arith.addf %675, %676 : vector<8x32xf32>
    %678 = arith.negf %677 : vector<8x32xf32>
    %679 = math.exp %678 : vector<8x32xf32>
    %cst_175 = arith.constant 1.000000e+00 : f32
    %680 = vector.broadcast %cst_175 : f32 to vector<8x32xf32>
    %681 = arith.addf %680, %679 : vector<8x32xf32>
    %682 = arith.divf %680, %681 : vector<8x32xf32>
    %683 = vector.extract_strided_slice %682 {offsets = [0, 0], sizes = [8, 16], strides = [1, 1]} : vector<8x32xf32> to vector<8x16xf32>
    %684 = vector.extract_strided_slice %682 {offsets = [0, 16], sizes = [8, 16], strides = [1, 1]} : vector<8x32xf32> to vector<8x16xf32>
    %685 = vector.extract_strided_slice %674 {offsets = [0, 32], sizes = [8, 16], strides = [1, 1]} : vector<8x48xf32> to vector<8x16xf32>
    %686 = vector.extract_strided_slice %672 {offsets = [0, 32], sizes = [8, 16], strides = [1, 1]} : vector<8x48xf32> to vector<8x16xf32>
    %687 = arith.addf %686, %477 : vector<8x16xf32>
    %688 = arith.mulf %683, %687 : vector<8x16xf32>
    %689 = arith.addf %685, %688 : vector<8x16xf32>
    %690 = math.tanh %689 : vector<8x16xf32>
    %cst_176 = arith.constant 1.000000e+00 : f32
    %691 = vector.broadcast %cst_176 : f32 to vector<8x16xf32>
    %692 = arith.subf %691, %684 : vector<8x16xf32>
    %693 = arith.mulf %692, %690 : vector<8x16xf32>
    %694 = arith.mulf %684, %668 : vector<8x16xf32>
    %695 = arith.addf %693, %694 : vector<8x16xf32>
    %c7_177 = arith.constant 7 : index
    %c0_178 = arith.constant 0 : index
    %c0_179 = arith.constant 0 : index
    %696 = vector.load %arg21[%c7_177, %c0_178, %c0_179] : memref<8x8x16xf32, #tpu.memory_space<vmem>>, vector<1x8x16xf32>
    %697 = vector.shape_cast %696 : vector<1x8x16xf32> to vector<8x16xf32>
    %698 = vector.shape_cast %695 : vector<8x16xf32> to vector<1x8x16xf32>
    tpu.vector_store %arg21[%c7_177, %c0_178, %c0_179], %698 {strides = array<i32>} : memref<8x8x16xf32, #tpu.memory_space<vmem>>, vector<1x8x16xf32>,
    %c0_180 = arith.constant 0 : index
    %c0_181 = arith.constant 0 : index
    %c0_182 = arith.constant 0 : index
    %699 = vector.load %arg21[%c0_180, %c0_181, %c0_182] : memref<8x8x16xf32, #tpu.memory_space<vmem>>, vector<8x8x16xf32>
    %700 = vector.shape_cast %699 : vector<8x8x16xf32> to vector<64x16xf32>
    %c0_183 = arith.constant 0 : index
    %c0_184 = arith.constant 0 : index
    %701 = vector.load %arg13[%c0_183, %c0_184] : memref<16x48xf32, #tpu.memory_space<vmem>>, vector<16x48xf32>
    %c0_185 = arith.constant 0 : index
    %c0_186 = arith.constant 0 : index
    %702 = vector.load %arg14[%c0_185, %c0_186] : memref<16x48xf32, #tpu.memory_space<vmem>>, vector<16x48xf32>
    %c0_187 = arith.constant 0 : index
    %c0_188 = arith.constant 0 : index
    %703 = vector.load %arg15[%c0_187, %c0_188] : memref<1x64xf32, #tpu.memory_space<vmem>>, vector<1x64xf32>
    %704 = vector.extract_strided_slice %703 {offsets = [0, 0], sizes = [1, 48], strides = [1, 1]} : vector<1x64xf32> to vector<1x48xf32>
    %705 = vector.extract_strided_slice %703 {offsets = [0, 48], sizes = [1, 16], strides = [1, 1]} : vector<1x64xf32> to vector<1x16xf32>
    %706 = vector.shape_cast %705 : vector<1x16xf32> to vector<1x16xf32>
    %707 = vector.broadcast %706 : vector<1x16xf32> to vector<8x16xf32>
    %cst_189 = arith.constant dense<0.000000e+00> : vector<64x48xf32>
    %708 = tpu.matmul %700, %701, %cst_189 {dimension_numbers = #tpu.dot_dimension_numbers<[1], [0], [0], [1], [0, 0, 1, 1], [], []>} : vector<64x16xf32>, vector<16x48xf32>, vector<64x48xf32> -> vector<64x48xf32>
    %709 = vector.broadcast %704 : vector<1x48xf32> to vector<64x48xf32>
    %710 = arith.addf %708, %709 : vector<64x48xf32>
    %711 = vector.shape_cast %710 : vector<64x48xf32> to vector<8x8x48xf32>
    %cst_190 = arith.constant 0.000000e+00 : f32
    %712 = vector.broadcast %cst_190 : f32 to vector<8x16xf32>
    %cst_191 = arith.constant dense<0.000000e+00> : vector<8x48xf32>
    %713 = tpu.matmul %712, %702, %cst_191 {dimension_numbers = #tpu.dot_dimension_numbers<[1], [0], [0], [1], [0, 0, 1, 1], [], []>} : vector<8x16xf32>, vector<16x48xf32>, vector<8x48xf32> -> vector<8x48xf32>
    %714 = vector.extract_strided_slice %711 {offsets = [0, 0, 0], sizes = [1, 8, 48], strides = [1, 1, 1]} : vector<8x8x48xf32> to vector<1x8x48xf32>
    %715 = vector.shape_cast %714 : vector<1x8x48xf32> to vector<8x48xf32>
    %716 = vector.extract_strided_slice %715 {offsets = [0, 0], sizes = [8, 32], strides = [1, 1]} : vector<8x48xf32> to vector<8x32xf32>
    %717 = vector.extract_strided_slice %713 {offsets = [0, 0], sizes = [8, 32], strides = [1, 1]} : vector<8x48xf32> to vector<8x32xf32>
    %718 = arith.addf %716, %717 : vector<8x32xf32>
    %719 = arith.negf %718 : vector<8x32xf32>
    %720 = math.exp %719 : vector<8x32xf32>
    %cst_192 = arith.constant 1.000000e+00 : f32
    %721 = vector.broadcast %cst_192 : f32 to vector<8x32xf32>
    %722 = arith.addf %721, %720 : vector<8x32xf32>
    %723 = arith.divf %721, %722 : vector<8x32xf32>
    %724 = vector.extract_strided_slice %723 {offsets = [0, 0], sizes = [8, 16], strides = [1, 1]} : vector<8x32xf32> to vector<8x16xf32>
    %725 = vector.extract_strided_slice %723 {offsets = [0, 16], sizes = [8, 16], strides = [1, 1]} : vector<8x32xf32> to vector<8x16xf32>
    %726 = vector.extract_strided_slice %715 {offsets = [0, 32], sizes = [8, 16], strides = [1, 1]} : vector<8x48xf32> to vector<8x16xf32>
    %727 = vector.extract_strided_slice %713 {offsets = [0, 32], sizes = [8, 16], strides = [1, 1]} : vector<8x48xf32> to vector<8x16xf32>
    %728 = arith.addf %727, %707 : vector<8x16xf32>
    %729 = arith.mulf %724, %728 : vector<8x16xf32>
    %730 = arith.addf %726, %729 : vector<8x16xf32>
    %731 = math.tanh %730 : vector<8x16xf32>
    %cst_193 = arith.constant 1.000000e+00 : f32
    %732 = vector.broadcast %cst_193 : f32 to vector<8x16xf32>
    %733 = arith.subf %732, %725 : vector<8x16xf32>
    %734 = arith.mulf %733, %731 : vector<8x16xf32>
    %735 = arith.mulf %725, %712 : vector<8x16xf32>
    %736 = arith.addf %734, %735 : vector<8x16xf32>
    %c0_194 = arith.constant 0 : index
    %c0_195 = arith.constant 0 : index
    %c0_196 = arith.constant 0 : index
    %737 = vector.load %arg21[%c0_194, %c0_195, %c0_196] : memref<8x8x16xf32, #tpu.memory_space<vmem>>, vector<1x8x16xf32>
    %738 = vector.shape_cast %737 : vector<1x8x16xf32> to vector<8x16xf32>
    %739 = vector.shape_cast %736 : vector<8x16xf32> to vector<1x8x16xf32>
    tpu.vector_store %arg21[%c0_194, %c0_195, %c0_196], %739 {strides = array<i32>} : memref<8x8x16xf32, #tpu.memory_space<vmem>>, vector<1x8x16xf32>,
    %cst_197 = arith.constant dense<0.000000e+00> : vector<8x48xf32>
    %740 = tpu.matmul %736, %702, %cst_197 {dimension_numbers = #tpu.dot_dimension_numbers<[1], [0], [0], [1], [0, 0, 1, 1], [], []>} : vector<8x16xf32>, vector<16x48xf32>, vector<8x48xf32> -> vector<8x48xf32>
    %741 = vector.extract_strided_slice %711 {offsets = [1, 0, 0], sizes = [1, 8, 48], strides = [1, 1, 1]} : vector<8x8x48xf32> to vector<1x8x48xf32>
    %742 = vector.shape_cast %741 : vector<1x8x48xf32> to vector<8x48xf32>
    %743 = vector.extract_strided_slice %742 {offsets = [0, 0], sizes = [8, 32], strides = [1, 1]} : vector<8x48xf32> to vector<8x32xf32>
    %744 = vector.extract_strided_slice %740 {offsets = [0, 0], sizes = [8, 32], strides = [1, 1]} : vector<8x48xf32> to vector<8x32xf32>
    %745 = arith.addf %743, %744 : vector<8x32xf32>
    %746 = arith.negf %745 : vector<8x32xf32>
    %747 = math.exp %746 : vector<8x32xf32>
    %cst_198 = arith.constant 1.000000e+00 : f32
    %748 = vector.broadcast %cst_198 : f32 to vector<8x32xf32>
    %749 = arith.addf %748, %747 : vector<8x32xf32>
    %750 = arith.divf %748, %749 : vector<8x32xf32>
    %751 = vector.extract_strided_slice %750 {offsets = [0, 0], sizes = [8, 16], strides = [1, 1]} : vector<8x32xf32> to vector<8x16xf32>
    %752 = vector.extract_strided_slice %750 {offsets = [0, 16], sizes = [8, 16], strides = [1, 1]} : vector<8x32xf32> to vector<8x16xf32>
    %753 = vector.extract_strided_slice %742 {offsets = [0, 32], sizes = [8, 16], strides = [1, 1]} : vector<8x48xf32> to vector<8x16xf32>
    %754 = vector.extract_strided_slice %740 {offsets = [0, 32], sizes = [8, 16], strides = [1, 1]} : vector<8x48xf32> to vector<8x16xf32>
    %755 = arith.addf %754, %707 : vector<8x16xf32>
    %756 = arith.mulf %751, %755 : vector<8x16xf32>
    %757 = arith.addf %753, %756 : vector<8x16xf32>
    %758 = math.tanh %757 : vector<8x16xf32>
    %cst_199 = arith.constant 1.000000e+00 : f32
    %759 = vector.broadcast %cst_199 : f32 to vector<8x16xf32>
    %760 = arith.subf %759, %752 : vector<8x16xf32>
    %761 = arith.mulf %760, %758 : vector<8x16xf32>
    %762 = arith.mulf %752, %736 : vector<8x16xf32>
    %763 = arith.addf %761, %762 : vector<8x16xf32>
    %c1_200 = arith.constant 1 : index
    %c0_201 = arith.constant 0 : index
    %c0_202 = arith.constant 0 : index
    %764 = vector.load %arg21[%c1_200, %c0_201, %c0_202] : memref<8x8x16xf32, #tpu.memory_space<vmem>>, vector<1x8x16xf32>
    %765 = vector.shape_cast %764 : vector<1x8x16xf32> to vector<8x16xf32>
    %766 = vector.shape_cast %763 : vector<8x16xf32> to vector<1x8x16xf32>
    tpu.vector_store %arg21[%c1_200, %c0_201, %c0_202], %766 {strides = array<i32>} : memref<8x8x16xf32, #tpu.memory_space<vmem>>, vector<1x8x16xf32>,
    %cst_203 = arith.constant dense<0.000000e+00> : vector<8x48xf32>
    %767 = tpu.matmul %763, %702, %cst_203 {dimension_numbers = #tpu.dot_dimension_numbers<[1], [0], [0], [1], [0, 0, 1, 1], [], []>} : vector<8x16xf32>, vector<16x48xf32>, vector<8x48xf32> -> vector<8x48xf32>
    %768 = vector.extract_strided_slice %711 {offsets = [2, 0, 0], sizes = [1, 8, 48], strides = [1, 1, 1]} : vector<8x8x48xf32> to vector<1x8x48xf32>
    %769 = vector.shape_cast %768 : vector<1x8x48xf32> to vector<8x48xf32>
    %770 = vector.extract_strided_slice %769 {offsets = [0, 0], sizes = [8, 32], strides = [1, 1]} : vector<8x48xf32> to vector<8x32xf32>
    %771 = vector.extract_strided_slice %767 {offsets = [0, 0], sizes = [8, 32], strides = [1, 1]} : vector<8x48xf32> to vector<8x32xf32>
    %772 = arith.addf %770, %771 : vector<8x32xf32>
    %773 = arith.negf %772 : vector<8x32xf32>
    %774 = math.exp %773 : vector<8x32xf32>
    %cst_204 = arith.constant 1.000000e+00 : f32
    %775 = vector.broadcast %cst_204 : f32 to vector<8x32xf32>
    %776 = arith.addf %775, %774 : vector<8x32xf32>
    %777 = arith.divf %775, %776 : vector<8x32xf32>
    %778 = vector.extract_strided_slice %777 {offsets = [0, 0], sizes = [8, 16], strides = [1, 1]} : vector<8x32xf32> to vector<8x16xf32>
    %779 = vector.extract_strided_slice %777 {offsets = [0, 16], sizes = [8, 16], strides = [1, 1]} : vector<8x32xf32> to vector<8x16xf32>
    %780 = vector.extract_strided_slice %769 {offsets = [0, 32], sizes = [8, 16], strides = [1, 1]} : vector<8x48xf32> to vector<8x16xf32>
    %781 = vector.extract_strided_slice %767 {offsets = [0, 32], sizes = [8, 16], strides = [1, 1]} : vector<8x48xf32> to vector<8x16xf32>
    %782 = arith.addf %781, %707 : vector<8x16xf32>
    %783 = arith.mulf %778, %782 : vector<8x16xf32>
    %784 = arith.addf %780, %783 : vector<8x16xf32>
    %785 = math.tanh %784 : vector<8x16xf32>
    %cst_205 = arith.constant 1.000000e+00 : f32
    %786 = vector.broadcast %cst_205 : f32 to vector<8x16xf32>
    %787 = arith.subf %786, %779 : vector<8x16xf32>
    %788 = arith.mulf %787, %785 : vector<8x16xf32>
    %789 = arith.mulf %779, %763 : vector<8x16xf32>
    %790 = arith.addf %788, %789 : vector<8x16xf32>
    %c2_206 = arith.constant 2 : index
    %c0_207 = arith.constant 0 : index
    %c0_208 = arith.constant 0 : index
    %791 = vector.load %arg21[%c2_206, %c0_207, %c0_208] : memref<8x8x16xf32, #tpu.memory_space<vmem>>, vector<1x8x16xf32>
    %792 = vector.shape_cast %791 : vector<1x8x16xf32> to vector<8x16xf32>
    %793 = vector.shape_cast %790 : vector<8x16xf32> to vector<1x8x16xf32>
    tpu.vector_store %arg21[%c2_206, %c0_207, %c0_208], %793 {strides = array<i32>} : memref<8x8x16xf32, #tpu.memory_space<vmem>>, vector<1x8x16xf32>,
    %cst_209 = arith.constant dense<0.000000e+00> : vector<8x48xf32>
    %794 = tpu.matmul %790, %702, %cst_209 {dimension_numbers = #tpu.dot_dimension_numbers<[1], [0], [0], [1], [0, 0, 1, 1], [], []>} : vector<8x16xf32>, vector<16x48xf32>, vector<8x48xf32> -> vector<8x48xf32>
    %795 = vector.extract_strided_slice %711 {offsets = [3, 0, 0], sizes = [1, 8, 48], strides = [1, 1, 1]} : vector<8x8x48xf32> to vector<1x8x48xf32>
    %796 = vector.shape_cast %795 : vector<1x8x48xf32> to vector<8x48xf32>
    %797 = vector.extract_strided_slice %796 {offsets = [0, 0], sizes = [8, 32], strides = [1, 1]} : vector<8x48xf32> to vector<8x32xf32>
    %798 = vector.extract_strided_slice %794 {offsets = [0, 0], sizes = [8, 32], strides = [1, 1]} : vector<8x48xf32> to vector<8x32xf32>
    %799 = arith.addf %797, %798 : vector<8x32xf32>
    %800 = arith.negf %799 : vector<8x32xf32>
    %801 = math.exp %800 : vector<8x32xf32>
    %cst_210 = arith.constant 1.000000e+00 : f32
    %802 = vector.broadcast %cst_210 : f32 to vector<8x32xf32>
    %803 = arith.addf %802, %801 : vector<8x32xf32>
    %804 = arith.divf %802, %803 : vector<8x32xf32>
    %805 = vector.extract_strided_slice %804 {offsets = [0, 0], sizes = [8, 16], strides = [1, 1]} : vector<8x32xf32> to vector<8x16xf32>
    %806 = vector.extract_strided_slice %804 {offsets = [0, 16], sizes = [8, 16], strides = [1, 1]} : vector<8x32xf32> to vector<8x16xf32>
    %807 = vector.extract_strided_slice %796 {offsets = [0, 32], sizes = [8, 16], strides = [1, 1]} : vector<8x48xf32> to vector<8x16xf32>
    %808 = vector.extract_strided_slice %794 {offsets = [0, 32], sizes = [8, 16], strides = [1, 1]} : vector<8x48xf32> to vector<8x16xf32>
    %809 = arith.addf %808, %707 : vector<8x16xf32>
    %810 = arith.mulf %805, %809 : vector<8x16xf32>
    %811 = arith.addf %807, %810 : vector<8x16xf32>
    %812 = math.tanh %811 : vector<8x16xf32>
    %cst_211 = arith.constant 1.000000e+00 : f32
    %813 = vector.broadcast %cst_211 : f32 to vector<8x16xf32>
    %814 = arith.subf %813, %806 : vector<8x16xf32>
    %815 = arith.mulf %814, %812 : vector<8x16xf32>
    %816 = arith.mulf %806, %790 : vector<8x16xf32>
    %817 = arith.addf %815, %816 : vector<8x16xf32>
    %c3_212 = arith.constant 3 : index
    %c0_213 = arith.constant 0 : index
    %c0_214 = arith.constant 0 : index
    %818 = vector.load %arg21[%c3_212, %c0_213, %c0_214] : memref<8x8x16xf32, #tpu.memory_space<vmem>>, vector<1x8x16xf32>
    %819 = vector.shape_cast %818 : vector<1x8x16xf32> to vector<8x16xf32>
    %820 = vector.shape_cast %817 : vector<8x16xf32> to vector<1x8x16xf32>
    tpu.vector_store %arg21[%c3_212, %c0_213, %c0_214], %820 {strides = array<i32>} : memref<8x8x16xf32, #tpu.memory_space<vmem>>, vector<1x8x16xf32>,
    %cst_215 = arith.constant dense<0.000000e+00> : vector<8x48xf32>
    %821 = tpu.matmul %817, %702, %cst_215 {dimension_numbers = #tpu.dot_dimension_numbers<[1], [0], [0], [1], [0, 0, 1, 1], [], []>} : vector<8x16xf32>, vector<16x48xf32>, vector<8x48xf32> -> vector<8x48xf32>
    %822 = vector.extract_strided_slice %711 {offsets = [4, 0, 0], sizes = [1, 8, 48], strides = [1, 1, 1]} : vector<8x8x48xf32> to vector<1x8x48xf32>
    %823 = vector.shape_cast %822 : vector<1x8x48xf32> to vector<8x48xf32>
    %824 = vector.extract_strided_slice %823 {offsets = [0, 0], sizes = [8, 32], strides = [1, 1]} : vector<8x48xf32> to vector<8x32xf32>
    %825 = vector.extract_strided_slice %821 {offsets = [0, 0], sizes = [8, 32], strides = [1, 1]} : vector<8x48xf32> to vector<8x32xf32>
    %826 = arith.addf %824, %825 : vector<8x32xf32>
    %827 = arith.negf %826 : vector<8x32xf32>
    %828 = math.exp %827 : vector<8x32xf32>
    %cst_216 = arith.constant 1.000000e+00 : f32
    %829 = vector.broadcast %cst_216 : f32 to vector<8x32xf32>
    %830 = arith.addf %829, %828 : vector<8x32xf32>
    %831 = arith.divf %829, %830 : vector<8x32xf32>
    %832 = vector.extract_strided_slice %831 {offsets = [0, 0], sizes = [8, 16], strides = [1, 1]} : vector<8x32xf32> to vector<8x16xf32>
    %833 = vector.extract_strided_slice %831 {offsets = [0, 16], sizes = [8, 16], strides = [1, 1]} : vector<8x32xf32> to vector<8x16xf32>
    %834 = vector.extract_strided_slice %823 {offsets = [0, 32], sizes = [8, 16], strides = [1, 1]} : vector<8x48xf32> to vector<8x16xf32>
    %835 = vector.extract_strided_slice %821 {offsets = [0, 32], sizes = [8, 16], strides = [1, 1]} : vector<8x48xf32> to vector<8x16xf32>
    %836 = arith.addf %835, %707 : vector<8x16xf32>
    %837 = arith.mulf %832, %836 : vector<8x16xf32>
    %838 = arith.addf %834, %837 : vector<8x16xf32>
    %839 = math.tanh %838 : vector<8x16xf32>
    %cst_217 = arith.constant 1.000000e+00 : f32
    %840 = vector.broadcast %cst_217 : f32 to vector<8x16xf32>
    %841 = arith.subf %840, %833 : vector<8x16xf32>
    %842 = arith.mulf %841, %839 : vector<8x16xf32>
    %843 = arith.mulf %833, %817 : vector<8x16xf32>
    %844 = arith.addf %842, %843 : vector<8x16xf32>
    %c4_218 = arith.constant 4 : index
    %c0_219 = arith.constant 0 : index
    %c0_220 = arith.constant 0 : index
    %845 = vector.load %arg21[%c4_218, %c0_219, %c0_220] : memref<8x8x16xf32, #tpu.memory_space<vmem>>, vector<1x8x16xf32>
    %846 = vector.shape_cast %845 : vector<1x8x16xf32> to vector<8x16xf32>
    %847 = vector.shape_cast %844 : vector<8x16xf32> to vector<1x8x16xf32>
    tpu.vector_store %arg21[%c4_218, %c0_219, %c0_220], %847 {strides = array<i32>} : memref<8x8x16xf32, #tpu.memory_space<vmem>>, vector<1x8x16xf32>,
    %cst_221 = arith.constant dense<0.000000e+00> : vector<8x48xf32>
    %848 = tpu.matmul %844, %702, %cst_221 {dimension_numbers = #tpu.dot_dimension_numbers<[1], [0], [0], [1], [0, 0, 1, 1], [], []>} : vector<8x16xf32>, vector<16x48xf32>, vector<8x48xf32> -> vector<8x48xf32>
    %849 = vector.extract_strided_slice %711 {offsets = [5, 0, 0], sizes = [1, 8, 48], strides = [1, 1, 1]} : vector<8x8x48xf32> to vector<1x8x48xf32>
    %850 = vector.shape_cast %849 : vector<1x8x48xf32> to vector<8x48xf32>
    %851 = vector.extract_strided_slice %850 {offsets = [0, 0], sizes = [8, 32], strides = [1, 1]} : vector<8x48xf32> to vector<8x32xf32>
    %852 = vector.extract_strided_slice %848 {offsets = [0, 0], sizes = [8, 32], strides = [1, 1]} : vector<8x48xf32> to vector<8x32xf32>
    %853 = arith.addf %851, %852 : vector<8x32xf32>
    %854 = arith.negf %853 : vector<8x32xf32>
    %855 = math.exp %854 : vector<8x32xf32>
    %cst_222 = arith.constant 1.000000e+00 : f32
    %856 = vector.broadcast %cst_222 : f32 to vector<8x32xf32>
    %857 = arith.addf %856, %855 : vector<8x32xf32>
    %858 = arith.divf %856, %857 : vector<8x32xf32>
    %859 = vector.extract_strided_slice %858 {offsets = [0, 0], sizes = [8, 16], strides = [1, 1]} : vector<8x32xf32> to vector<8x16xf32>
    %860 = vector.extract_strided_slice %858 {offsets = [0, 16], sizes = [8, 16], strides = [1, 1]} : vector<8x32xf32> to vector<8x16xf32>
    %861 = vector.extract_strided_slice %850 {offsets = [0, 32], sizes = [8, 16], strides = [1, 1]} : vector<8x48xf32> to vector<8x16xf32>
    %862 = vector.extract_strided_slice %848 {offsets = [0, 32], sizes = [8, 16], strides = [1, 1]} : vector<8x48xf32> to vector<8x16xf32>
    %863 = arith.addf %862, %707 : vector<8x16xf32>
    %864 = arith.mulf %859, %863 : vector<8x16xf32>
    %865 = arith.addf %861, %864 : vector<8x16xf32>
    %866 = math.tanh %865 : vector<8x16xf32>
    %cst_223 = arith.constant 1.000000e+00 : f32
    %867 = vector.broadcast %cst_223 : f32 to vector<8x16xf32>
    %868 = arith.subf %867, %860 : vector<8x16xf32>
    %869 = arith.mulf %868, %866 : vector<8x16xf32>
    %870 = arith.mulf %860, %844 : vector<8x16xf32>
    %871 = arith.addf %869, %870 : vector<8x16xf32>
    %c5_224 = arith.constant 5 : index
    %c0_225 = arith.constant 0 : index
    %c0_226 = arith.constant 0 : index
    %872 = vector.load %arg21[%c5_224, %c0_225, %c0_226] : memref<8x8x16xf32, #tpu.memory_space<vmem>>, vector<1x8x16xf32>
    %873 = vector.shape_cast %872 : vector<1x8x16xf32> to vector<8x16xf32>
    %874 = vector.shape_cast %871 : vector<8x16xf32> to vector<1x8x16xf32>
    tpu.vector_store %arg21[%c5_224, %c0_225, %c0_226], %874 {strides = array<i32>} : memref<8x8x16xf32, #tpu.memory_space<vmem>>, vector<1x8x16xf32>,
    %cst_227 = arith.constant dense<0.000000e+00> : vector<8x48xf32>
    %875 = tpu.matmul %871, %702, %cst_227 {dimension_numbers = #tpu.dot_dimension_numbers<[1], [0], [0], [1], [0, 0, 1, 1], [], []>} : vector<8x16xf32>, vector<16x48xf32>, vector<8x48xf32> -> vector<8x48xf32>
    %876 = vector.extract_strided_slice %711 {offsets = [6, 0, 0], sizes = [1, 8, 48], strides = [1, 1, 1]} : vector<8x8x48xf32> to vector<1x8x48xf32>
    %877 = vector.shape_cast %876 : vector<1x8x48xf32> to vector<8x48xf32>
    %878 = vector.extract_strided_slice %877 {offsets = [0, 0], sizes = [8, 32], strides = [1, 1]} : vector<8x48xf32> to vector<8x32xf32>
    %879 = vector.extract_strided_slice %875 {offsets = [0, 0], sizes = [8, 32], strides = [1, 1]} : vector<8x48xf32> to vector<8x32xf32>
    %880 = arith.addf %878, %879 : vector<8x32xf32>
    %881 = arith.negf %880 : vector<8x32xf32>
    %882 = math.exp %881 : vector<8x32xf32>
    %cst_228 = arith.constant 1.000000e+00 : f32
    %883 = vector.broadcast %cst_228 : f32 to vector<8x32xf32>
    %884 = arith.addf %883, %882 : vector<8x32xf32>
    %885 = arith.divf %883, %884 : vector<8x32xf32>
    %886 = vector.extract_strided_slice %885 {offsets = [0, 0], sizes = [8, 16], strides = [1, 1]} : vector<8x32xf32> to vector<8x16xf32>
    %887 = vector.extract_strided_slice %885 {offsets = [0, 16], sizes = [8, 16], strides = [1, 1]} : vector<8x32xf32> to vector<8x16xf32>
    %888 = vector.extract_strided_slice %877 {offsets = [0, 32], sizes = [8, 16], strides = [1, 1]} : vector<8x48xf32> to vector<8x16xf32>
    %889 = vector.extract_strided_slice %875 {offsets = [0, 32], sizes = [8, 16], strides = [1, 1]} : vector<8x48xf32> to vector<8x16xf32>
    %890 = arith.addf %889, %707 : vector<8x16xf32>
    %891 = arith.mulf %886, %890 : vector<8x16xf32>
    %892 = arith.addf %888, %891 : vector<8x16xf32>
    %893 = math.tanh %892 : vector<8x16xf32>
    %cst_229 = arith.constant 1.000000e+00 : f32
    %894 = vector.broadcast %cst_229 : f32 to vector<8x16xf32>
    %895 = arith.subf %894, %887 : vector<8x16xf32>
    %896 = arith.mulf %895, %893 : vector<8x16xf32>
    %897 = arith.mulf %887, %871 : vector<8x16xf32>
    %898 = arith.addf %896, %897 : vector<8x16xf32>
    %c6_230 = arith.constant 6 : index
    %c0_231 = arith.constant 0 : index
    %c0_232 = arith.constant 0 : index
    %899 = vector.load %arg21[%c6_230, %c0_231, %c0_232] : memref<8x8x16xf32, #tpu.memory_space<vmem>>, vector<1x8x16xf32>
    %900 = vector.shape_cast %899 : vector<1x8x16xf32> to vector<8x16xf32>
    %901 = vector.shape_cast %898 : vector<8x16xf32> to vector<1x8x16xf32>
    tpu.vector_store %arg21[%c6_230, %c0_231, %c0_232], %901 {strides = array<i32>} : memref<8x8x16xf32, #tpu.memory_space<vmem>>, vector<1x8x16xf32>,
    %cst_233 = arith.constant dense<0.000000e+00> : vector<8x48xf32>
    %902 = tpu.matmul %898, %702, %cst_233 {dimension_numbers = #tpu.dot_dimension_numbers<[1], [0], [0], [1], [0, 0, 1, 1], [], []>} : vector<8x16xf32>, vector<16x48xf32>, vector<8x48xf32> -> vector<8x48xf32>
    %903 = vector.extract_strided_slice %711 {offsets = [7, 0, 0], sizes = [1, 8, 48], strides = [1, 1, 1]} : vector<8x8x48xf32> to vector<1x8x48xf32>
    %904 = vector.shape_cast %903 : vector<1x8x48xf32> to vector<8x48xf32>
    %905 = vector.extract_strided_slice %904 {offsets = [0, 0], sizes = [8, 32], strides = [1, 1]} : vector<8x48xf32> to vector<8x32xf32>
    %906 = vector.extract_strided_slice %902 {offsets = [0, 0], sizes = [8, 32], strides = [1, 1]} : vector<8x48xf32> to vector<8x32xf32>
    %907 = arith.addf %905, %906 : vector<8x32xf32>
    %908 = arith.negf %907 : vector<8x32xf32>
    %909 = math.exp %908 : vector<8x32xf32>
    %cst_234 = arith.constant 1.000000e+00 : f32
    %910 = vector.broadcast %cst_234 : f32 to vector<8x32xf32>
    %911 = arith.addf %910, %909 : vector<8x32xf32>
    %912 = arith.divf %910, %911 : vector<8x32xf32>
    %913 = vector.extract_strided_slice %912 {offsets = [0, 0], sizes = [8, 16], strides = [1, 1]} : vector<8x32xf32> to vector<8x16xf32>
    %914 = vector.extract_strided_slice %912 {offsets = [0, 16], sizes = [8, 16], strides = [1, 1]} : vector<8x32xf32> to vector<8x16xf32>
    %915 = vector.extract_strided_slice %904 {offsets = [0, 32], sizes = [8, 16], strides = [1, 1]} : vector<8x48xf32> to vector<8x16xf32>
    %916 = vector.extract_strided_slice %902 {offsets = [0, 32], sizes = [8, 16], strides = [1, 1]} : vector<8x48xf32> to vector<8x16xf32>
    %917 = arith.addf %916, %707 : vector<8x16xf32>
    %918 = arith.mulf %913, %917 : vector<8x16xf32>
    %919 = arith.addf %915, %918 : vector<8x16xf32>
    %920 = math.tanh %919 : vector<8x16xf32>
    %cst_235 = arith.constant 1.000000e+00 : f32
    %921 = vector.broadcast %cst_235 : f32 to vector<8x16xf32>
    %922 = arith.subf %921, %914 : vector<8x16xf32>
    %923 = arith.mulf %922, %920 : vector<8x16xf32>
    %924 = arith.mulf %914, %898 : vector<8x16xf32>
    %925 = arith.addf %923, %924 : vector<8x16xf32>
    %c7_236 = arith.constant 7 : index
    %c0_237 = arith.constant 0 : index
    %c0_238 = arith.constant 0 : index
    %926 = vector.load %arg21[%c7_236, %c0_237, %c0_238] : memref<8x8x16xf32, #tpu.memory_space<vmem>>, vector<1x8x16xf32>
    %927 = vector.shape_cast %926 : vector<1x8x16xf32> to vector<8x16xf32>
    %928 = vector.shape_cast %925 : vector<8x16xf32> to vector<1x8x16xf32>
    tpu.vector_store %arg21[%c7_236, %c0_237, %c0_238], %928 {strides = array<i32>} : memref<8x8x16xf32, #tpu.memory_space<vmem>>, vector<1x8x16xf32>,
    %c0_239 = arith.constant 0 : index
    %c0_240 = arith.constant 0 : index
    %c0_241 = arith.constant 0 : index
    %929 = vector.load %arg21[%c0_239, %c0_240, %c0_241] : memref<8x8x16xf32, #tpu.memory_space<vmem>>, vector<8x8x16xf32>
    %930 = vector.shape_cast %929 : vector<8x8x16xf32> to vector<64x16xf32>
    %c0_242 = arith.constant 0 : index
    %c0_243 = arith.constant 0 : index
    %931 = vector.load %arg16[%c0_242, %c0_243] : memref<16x16xf32, #tpu.memory_space<vmem>>, vector<16x16xf32>
    %cst_244 = arith.constant dense<0.000000e+00> : vector<64x16xf32>
    %932 = tpu.matmul %930, %931, %cst_244 {dimension_numbers = #tpu.dot_dimension_numbers<[1], [0], [0], [1], [0, 0, 1, 1], [], []>} : vector<64x16xf32>, vector<16x16xf32>, vector<64x16xf32> -> vector<64x16xf32>
    %c0_245 = arith.constant 0 : index
    %c0_246 = arith.constant 0 : index
    %933 = vector.load %arg17[%c0_245, %c0_246] : memref<1x16xf32, #tpu.memory_space<vmem>>, vector<1x16xf32>
    %934 = vector.broadcast %933 : vector<1x16xf32> to vector<64x16xf32>
    %935 = arith.addf %932, %934 : vector<64x16xf32>
    %cst_247 = arith.constant 0.000000e+00 : f32
    %936 = vector.broadcast %cst_247 : f32 to vector<64x16xf32>
    %937 = arith.maximumf %935, %936 : vector<64x16xf32>
    %938 = vector.shape_cast %937 : vector<64x16xf32> to vector<8x8x16xf32>
    %c0_248 = arith.constant 0 : index
    %c0_249 = arith.constant 0 : index
    %c0_250 = arith.constant 0 : index
    %939 = vector.load %arg19[%c0_248, %c0_249, %c0_250] : memref<8x8x16xf32, #tpu.memory_space<vmem>>, vector<8x8x16xf32>
    tpu.vector_store %arg19[%c0_248, %c0_249, %c0_250], %938 {strides = array<i32>} : memref<8x8x16xf32, #tpu.memory_space<vmem>>, vector<8x8x16xf32>,
    return
  }
  func.func @transform_0(%arg0: i32) -> (i32, i32, i32) {
    %c0_i32 = arith.constant 0 : i32
    %c0_i32_0 = arith.constant 0 : i32
    %c0_i32_1 = arith.constant 0 : i32
    return %c0_i32, %arg0, %c0_i32_0 : i32, i32, i32
  }
  func.func @transform_1(%arg0: i32) -> (i32, i32) {
    %c0_i32 = arith.constant 0 : i32
    %c0_i32_0 = arith.constant 0 : i32
    %c0_i32_1 = arith.constant 0 : i32
    return %c0_i32, %c0_i32_0 : i32, i32
  }
  func.func @transform_2(%arg0: i32) -> (i32, i32) {
    %c0_i32 = arith.constant 0 : i32
    %c0_i32_0 = arith.constant 0 : i32
    %c0_i32_1 = arith.constant 0 : i32
    return %c0_i32, %c0_i32_0 : i32, i32
  }
  func.func @transform_3(%arg0: i32) -> (i32, i32) {
    %c0_i32 = arith.constant 0 : i32
    %c0_i32_0 = arith.constant 0 : i32
    %c0_i32_1 = arith.constant 0 : i32
    return %c0_i32, %c0_i32_0 : i32, i32
  }
  func.func @transform_4(%arg0: i32) -> (i32, i32) {
    %c0_i32 = arith.constant 0 : i32
    %c0_i32_0 = arith.constant 0 : i32
    %c0_i32_1 = arith.constant 0 : i32
    return %c0_i32, %c0_i32_0 : i32, i32
  }
  func.func @transform_5(%arg0: i32) -> (i32, i32) {
    %c0_i32 = arith.constant 0 : i32
    %c0_i32_0 = arith.constant 0 : i32
    %c0_i32_1 = arith.constant 0 : i32
    return %c0_i32, %c0_i32_0 : i32, i32
  }
  func.func @transform_6(%arg0: i32) -> (i32, i32) {
    %c0_i32 = arith.constant 0 : i32
    %c0_i32_0 = arith.constant 0 : i32
    %c0_i32_1 = arith.constant 0 : i32
    return %c0_i32, %c0_i32_0 : i32, i32
  }
  func.func @transform_7(%arg0: i32) -> (i32, i32) {
    %c0_i32 = arith.constant 0 : i32
    %c0_i32_0 = arith.constant 0 : i32
    %c0_i32_1 = arith.constant 0 : i32
    return %c0_i32, %c0_i32_0 : i32, i32
  }
  func.func @transform_8(%arg0: i32) -> (i32, i32) {
    %c0_i32 = arith.constant 0 : i32
    %c0_i32_0 = arith.constant 0 : i32
    %c0_i32_1 = arith.constant 0 : i32
    return %c0_i32, %c0_i32_0 : i32, i32
  }
  func.func @transform_9(%arg0: i32) -> (i32, i32) {
    %c0_i32 = arith.constant 0 : i32
    %c0_i32_0 = arith.constant 0 : i32
    %c0_i32_1 = arith.constant 0 : i32
    return %c0_i32, %c0_i32_0 : i32, i32
  }
  func.func @transform_10(%arg0: i32) -> (i32, i32) {
    %c0_i32 = arith.constant 0 : i32
    %c0_i32_0 = arith.constant 0 : i32
    %c0_i32_1 = arith.constant 0 : i32
    return %c0_i32, %c0_i32_0 : i32, i32
  }
  func.func @transform_11(%arg0: i32) -> (i32, i32) {
    %c0_i32 = arith.constant 0 : i32
    %c0_i32_0 = arith.constant 0 : i32
    %c0_i32_1 = arith.constant 0 : i32
    return %c0_i32, %c0_i32_0 : i32, i32
  }
  func.func @transform_12(%arg0: i32) -> (i32, i32) {
    %c0_i32 = arith.constant 0 : i32
    %c0_i32_0 = arith.constant 0 : i32
    %c0_i32_1 = arith.constant 0 : i32
    return %c0_i32, %c0_i32_0 : i32, i32
  }
  func.func @transform_13(%arg0: i32) -> (i32, i32) {
    %c0_i32 = arith.constant 0 : i32
    %c0_i32_0 = arith.constant 0 : i32
    %c0_i32_1 = arith.constant 0 : i32
    return %c0_i32, %c0_i32_0 : i32, i32
  }
  func.func @transform_14(%arg0: i32) -> (i32, i32) {
    %c0_i32 = arith.constant 0 : i32
    %c0_i32_0 = arith.constant 0 : i32
    %c0_i32_1 = arith.constant 0 : i32
    return %c0_i32, %c0_i32_0 : i32, i32
  }
  func.func @transform_15(%arg0: i32) -> (i32, i32) {
    %c0_i32 = arith.constant 0 : i32
    %c0_i32_0 = arith.constant 0 : i32
    %c0_i32_1 = arith.constant 0 : i32
    return %c0_i32, %c0_i32_0 : i32, i32
  }
  func.func @transform_16(%arg0: i32) -> (i32, i32) {
    %c0_i32 = arith.constant 0 : i32
    %c0_i32_0 = arith.constant 0 : i32
    %c0_i32_1 = arith.constant 0 : i32
    return %c0_i32, %c0_i32_0 : i32, i32
  }
  func.func @transform_17(%arg0: i32) -> (i32, i32, i32) {
    %c0_i32 = arith.constant 0 : i32
    %c0_i32_0 = arith.constant 0 : i32
    %c0_i32_1 = arith.constant 0 : i32
    return %c0_i32, %arg0, %c0_i32_0 : i32, i32, i32
  }
  func.func @transform_18(%arg0: i32) -> (i32, i32, i32) {
    %c0_i32 = arith.constant 0 : i32
    %c0_i32_0 = arith.constant 0 : i32
    %c0_i32_1 = arith.constant 0 : i32
    return %c0_i32, %arg0, %c0_i32_0 : i32, i32, i32
  }
}

module attributes {stable_mosaic.version = 11 : i64} {
  func.func @kernel(%arg0: i32, %arg1: memref<8x8x16xf32, #tpu.memory_space<vmem>>, %arg2: memref<16x16xf32, #tpu.memory_space<vmem>>, %arg3: memref<1x16xf32, #tpu.memory_space<vmem>>, %arg4: memref<16x96xf32, #tpu.memory_space<vmem>>, %arg5: memref<32x96xf32, #tpu.memory_space<vmem>>, %arg6: memref<1x128xf32, #tpu.memory_space<vmem>>, %arg7: memref<32x96xf32, #tpu.memory_space<vmem>>, %arg8: memref<32x96xf32, #tpu.memory_space<vmem>>, %arg9: memref<1x128xf32, #tpu.memory_space<vmem>>, %arg10: memref<32x48xf32, #tpu.memory_space<vmem>>, %arg11: memref<16x48xf32, #tpu.memory_space<vmem>>, %arg12: memref<1x64xf32, #tpu.memory_space<vmem>>, %arg13: memref<16x48xf32, #tpu.memory_space<vmem>>, %arg14: memref<16x48xf32, #tpu.memory_space<vmem>>, %arg15: memref<1x64xf32, #tpu.memory_space<vmem>>, %arg16: memref<16x16xf32, #tpu.memory_space<vmem>>, %arg17: memref<1x16xf32, #tpu.memory_space<vmem>>, %arg18: memref<8x8x32xf32, #tpu.memory_space<vmem>>, %arg19: memref<8x8x16xf32, #tpu.memory_space<vmem>>, %arg20: memref<8x8x32xf32, #tpu.memory_space<vmem>>, %arg21: memref<8x8x16xf32, #tpu.memory_space<vmem>>) attributes {dimension_semantics = [#tpu.dimension_semantics<parallel>], iteration_bounds = array<i64: 2>, scalar_prefetch = 0 : i64, scratch_operands = 2 : i64, tpu.core_type = #tpu.core_type<tc>, window_params = [{transform_indices = @transform_0, window_bounds = array<i64: 8, 8, 16>}, {pipeline_mode = #tpu.pipeline_mode<synchronous>, transform_indices = @transform_1, window_bounds = array<i64: 16, 16>}, {pipeline_mode = #tpu.pipeline_mode<synchronous>, transform_indices = @transform_2, window_bounds = array<i64: 1, 16>}, {pipeline_mode = #tpu.pipeline_mode<synchronous>, transform_indices = @transform_3, window_bounds = array<i64: 16, 96>}, {pipeline_mode = #tpu.pipeline_mode<synchronous>, transform_indices = @transform_4, window_bounds = array<i64: 32, 96>}, {pipeline_mode = #tpu.pipeline_mode<synchronous>, transform_indices = @transform_5, window_bounds = array<i64: 1, 128>}, {pipeline_mode = #tpu.pipeline_mode<synchronous>, transform_indices = @transform_6, window_bounds = array<i64: 32, 96>}, {pipeline_mode = #tpu.pipeline_mode<synchronous>, transform_indices = @transform_7, window_bounds = array<i64: 32, 96>}, {pipeline_mode = #tpu.pipeline_mode<synchronous>, transform_indices = @transform_8, window_bounds = array<i64: 1, 128>}, {pipeline_mode = #tpu.pipeline_mode<synchronous>, transform_indices = @transform_9, window_bounds = array<i64: 32, 48>}, {pipeline_mode = #tpu.pipeline_mode<synchronous>, transform_indices = @transform_10, window_bounds = array<i64: 16, 48>}, {pipeline_mode = #tpu.pipeline_mode<synchronous>, transform_indices = @transform_11, window_bounds = array<i64: 1, 64>}, {pipeline_mode = #tpu.pipeline_mode<synchronous>, transform_indices = @transform_12, window_bounds = array<i64: 16, 48>}, {pipeline_mode = #tpu.pipeline_mode<synchronous>, transform_indices = @transform_13, window_bounds = array<i64: 16, 48>}, {pipeline_mode = #tpu.pipeline_mode<synchronous>, transform_indices = @transform_14, window_bounds = array<i64: 1, 64>}, {pipeline_mode = #tpu.pipeline_mode<synchronous>, transform_indices = @transform_15, window_bounds = array<i64: 16, 16>}, {pipeline_mode = #tpu.pipeline_mode<synchronous>, transform_indices = @transform_16, window_bounds = array<i64: 1, 16>}, {transform_indices = @transform_17, window_bounds = array<i64: 8, 8, 32>}, {transform_indices = @transform_18, window_bounds = array<i64: 8, 8, 16>}]} {
    %c0 = arith.constant 0 : index
    %c0_0 = arith.constant 0 : index
    %c0_1 = arith.constant 0 : index
    %0 = vector.load %arg1[%c0, %c0_0, %c0_1] : memref<8x8x16xf32, #tpu.memory_space<vmem>>, vector<8x8x16xf32>
    %1 = vector.shape_cast %0 : vector<8x8x16xf32> to vector<64x16xf32>
    %c0_2 = arith.constant 0 : index
    %c0_3 = arith.constant 0 : index
    %2 = vector.load %arg2[%c0_2, %c0_3] : memref<16x16xf32, #tpu.memory_space<vmem>>, vector<16x16xf32>
    %cst = arith.constant dense<0.000000e+00> : vector<64x16xf32>
    %3 = tpu.matmul %1, %2, %cst {dimension_numbers = #tpu.dot_dimension_numbers<[1], [0], [0], [1], [0, 0, 1, 1], [], []>} : vector<64x16xf32>, vector<16x16xf32>, vector<64x16xf32> -> vector<64x16xf32>
    %c0_4 = arith.constant 0 : index
    %c0_5 = arith.constant 0 : index
    %4 = vector.load %arg3[%c0_4, %c0_5] : memref<1x16xf32, #tpu.memory_space<vmem>>, vector<1x16xf32>
    %5 = vector.broadcast %4 : vector<1x16xf32> to vector<64x16xf32>
    %6 = arith.addf %3, %5 : vector<64x16xf32>
    %cst_6 = arith.constant 0.000000e+00 : f32
    %7 = vector.broadcast %cst_6 : f32 to vector<64x16xf32>
    %8 = arith.maximumf %6, %7 : vector<64x16xf32>
    %c0_7 = arith.constant 0 : index
    %c0_8 = arith.constant 0 : index
    %9 = vector.load %arg4[%c0_7, %c0_8] : memref<16x96xf32, #tpu.memory_space<vmem>>, vector<16x96xf32>
    %c0_9 = arith.constant 0 : index
    %c0_10 = arith.constant 0 : index
    %10 = vector.load %arg5[%c0_9, %c0_10] : memref<32x96xf32, #tpu.memory_space<vmem>>, vector<32x96xf32>
    %c0_11 = arith.constant 0 : index
    %c0_12 = arith.constant 0 : index
    %11 = vector.load %arg6[%c0_11, %c0_12] : memref<1x128xf32, #tpu.memory_space<vmem>>, vector<1x128xf32>
    %12 = vector.extract_strided_slice %11 {offsets = [0, 0], sizes = [1, 96], strides = [1, 1]} : vector<1x128xf32> to vector<1x96xf32>
    %13 = vector.extract_strided_slice %11 {offsets = [0, 96], sizes = [1, 32], strides = [1, 1]} : vector<1x128xf32> to vector<1x32xf32>
    %14 = vector.shape_cast %13 : vector<1x32xf32> to vector<1x32xf32>
    %15 = vector.broadcast %14 : vector<1x32xf32> to vector<8x32xf32>
    %cst_13 = arith.constant dense<0.000000e+00> : vector<64x96xf32>
    %16 = tpu.matmul %8, %9, %cst_13 {dimension_numbers = #tpu.dot_dimension_numbers<[1], [0], [0], [1], [0, 0, 1, 1], [], []>} : vector<64x16xf32>, vector<16x96xf32>, vector<64x96xf32> -> vector<64x96xf32>
    %17 = vector.broadcast %12 : vector<1x96xf32> to vector<64x96xf32>
    %18 = arith.addf %16, %17 : vector<64x96xf32>
    %19 = vector.shape_cast %18 : vector<64x96xf32> to vector<8x8x96xf32>
    %cst_14 = arith.constant 0.000000e+00 : f32
    %20 = vector.broadcast %cst_14 : f32 to vector<8x32xf32>
    %cst_15 = arith.constant dense<0.000000e+00> : vector<8x96xf32>
    %21 = tpu.matmul %20, %10, %cst_15 {dimension_numbers = #tpu.dot_dimension_numbers<[1], [0], [0], [1], [0, 0, 1, 1], [], []>} : vector<8x32xf32>, vector<32x96xf32>, vector<8x96xf32> -> vector<8x96xf32>
    %22 = vector.extract_strided_slice %19 {offsets = [0, 0, 0], sizes = [1, 8, 96], strides = [1, 1, 1]} : vector<8x8x96xf32> to vector<1x8x96xf32>
    %23 = vector.shape_cast %22 : vector<1x8x96xf32> to vector<8x96xf32>
    %24 = vector.extract_strided_slice %23 {offsets = [0, 0], sizes = [8, 64], strides = [1, 1]} : vector<8x96xf32> to vector<8x64xf32>
    %25 = vector.extract_strided_slice %21 {offsets = [0, 0], sizes = [8, 64], strides = [1, 1]} : vector<8x96xf32> to vector<8x64xf32>
    %26 = arith.addf %24, %25 : vector<8x64xf32>
    %27 = arith.negf %26 : vector<8x64xf32>
    %28 = math.exp %27 : vector<8x64xf32>
    %cst_16 = arith.constant 1.000000e+00 : f32
    %29 = vector.broadcast %cst_16 : f32 to vector<8x64xf32>
    %30 = arith.addf %29, %28 : vector<8x64xf32>
    %31 = arith.divf %29, %30 : vector<8x64xf32>
    %32 = vector.extract_strided_slice %31 {offsets = [0, 0], sizes = [8, 32], strides = [1, 1]} : vector<8x64xf32> to vector<8x32xf32>
    %33 = vector.extract_strided_slice %31 {offsets = [0, 32], sizes = [8, 32], strides = [1, 1]} : vector<8x64xf32> to vector<8x32xf32>
    %34 = vector.extract_strided_slice %23 {offsets = [0, 64], sizes = [8, 32], strides = [1, 1]} : vector<8x96xf32> to vector<8x32xf32>
    %35 = vector.extract_strided_slice %21 {offsets = [0, 64], sizes = [8, 32], strides = [1, 1]} : vector<8x96xf32> to vector<8x32xf32>
    %36 = arith.addf %35, %15 : vector<8x32xf32>
    %37 = arith.mulf %32, %36 : vector<8x32xf32>
    %38 = arith.addf %34, %37 : vector<8x32xf32>
    %39 = math.tanh %38 : vector<8x32xf32>
    %cst_17 = arith.constant 1.000000e+00 : f32
    %40 = vector.broadcast %cst_17 : f32 to vector<8x32xf32>
    %41 = arith.subf %40, %33 : vector<8x32xf32>
    %42 = arith.mulf %41, %39 : vector<8x32xf32>
    %43 = arith.mulf %33, %20 : vector<8x32xf32>
    %44 = arith.addf %42, %43 : vector<8x32xf32>
    %c0_18 = arith.constant 0 : index
    %c0_19 = arith.constant 0 : index
    %c0_20 = arith.constant 0 : index
    %45 = vector.load %arg20[%c0_18, %c0_19, %c0_20] : memref<8x8x32xf32, #tpu.memory_space<vmem>>, vector<1x8x32xf32>
    %46 = vector.shape_cast %45 : vector<1x8x32xf32> to vector<8x32xf32>
    %47 = vector.shape_cast %44 : vector<8x32xf32> to vector<1x8x32xf32>
    tpu.vector_store %arg20[%c0_18, %c0_19, %c0_20], %47 {strides = array<i32>} : memref<8x8x32xf32, #tpu.memory_space<vmem>>, vector<1x8x32xf32>,
    %cst_21 = arith.constant dense<0.000000e+00> : vector<8x96xf32>
    %48 = tpu.matmul %44, %10, %cst_21 {dimension_numbers = #tpu.dot_dimension_numbers<[1], [0], [0], [1], [0, 0, 1, 1], [], []>} : vector<8x32xf32>, vector<32x96xf32>, vector<8x96xf32> -> vector<8x96xf32>
    %49 = vector.extract_strided_slice %19 {offsets = [1, 0, 0], sizes = [1, 8, 96], strides = [1, 1, 1]} : vector<8x8x96xf32> to vector<1x8x96xf32>
    %50 = vector.shape_cast %49 : vector<1x8x96xf32> to vector<8x96xf32>
    %51 = vector.extract_strided_slice %50 {offsets = [0, 0], sizes = [8, 64], strides = [1, 1]} : vector<8x96xf32> to vector<8x64xf32>
    %52 = vector.extract_strided_slice %48 {offsets = [0, 0], sizes = [8, 64], strides = [1, 1]} : vector<8x96xf32> to vector<8x64xf32>
    %53 = arith.addf %51, %52 : vector<8x64xf32>
    %54 = arith.negf %53 : vector<8x64xf32>
    %55 = math.exp %54 : vector<8x64xf32>
    %cst_22 = arith.constant 1.000000e+00 : f32
    %56 = vector.broadcast %cst_22 : f32 to vector<8x64xf32>
    %57 = arith.addf %56, %55 : vector<8x64xf32>
    %58 = arith.divf %56, %57 : vector<8x64xf32>
    %59 = vector.extract_strided_slice %58 {offsets = [0, 0], sizes = [8, 32], strides = [1, 1]} : vector<8x64xf32> to vector<8x32xf32>
    %60 = vector.extract_strided_slice %58 {offsets = [0, 32], sizes = [8, 32], strides = [1, 1]} : vector<8x64xf32> to vector<8x32xf32>
    %61 = vector.extract_strided_slice %50 {offsets = [0, 64], sizes = [8, 32], strides = [1, 1]} : vector<8x96xf32> to vector<8x32xf32>
    %62 = vector.extract_strided_slice %48 {offsets = [0, 64], sizes = [8, 32], strides = [1, 1]} : vector<8x96xf32> to vector<8x32xf32>
    %63 = arith.addf %62, %15 : vector<8x32xf32>
    %64 = arith.mulf %59, %63 : vector<8x32xf32>
    %65 = arith.addf %61, %64 : vector<8x32xf32>
    %66 = math.tanh %65 : vector<8x32xf32>
    %cst_23 = arith.constant 1.000000e+00 : f32
    %67 = vector.broadcast %cst_23 : f32 to vector<8x32xf32>
    %68 = arith.subf %67, %60 : vector<8x32xf32>
    %69 = arith.mulf %68, %66 : vector<8x32xf32>
    %70 = arith.mulf %60, %44 : vector<8x32xf32>
    %71 = arith.addf %69, %70 : vector<8x32xf32>
    %c1 = arith.constant 1 : index
    %c0_24 = arith.constant 0 : index
    %c0_25 = arith.constant 0 : index
    %72 = vector.load %arg20[%c1, %c0_24, %c0_25] : memref<8x8x32xf32, #tpu.memory_space<vmem>>, vector<1x8x32xf32>
    %73 = vector.shape_cast %72 : vector<1x8x32xf32> to vector<8x32xf32>
    %74 = vector.shape_cast %71 : vector<8x32xf32> to vector<1x8x32xf32>
    tpu.vector_store %arg20[%c1, %c0_24, %c0_25], %74 {strides = array<i32>} : memref<8x8x32xf32, #tpu.memory_space<vmem>>, vector<1x8x32xf32>,
    %cst_26 = arith.constant dense<0.000000e+00> : vector<8x96xf32>
    %75 = tpu.matmul %71, %10, %cst_26 {dimension_numbers = #tpu.dot_dimension_numbers<[1], [0], [0], [1], [0, 0, 1, 1], [], []>} : vector<8x32xf32>, vector<32x96xf32>, vector<8x96xf32> -> vector<8x96xf32>
    %76 = vector.extract_strided_slice %19 {offsets = [2, 0, 0], sizes = [1, 8, 96], strides = [1, 1, 1]} : vector<8x8x96xf32> to vector<1x8x96xf32>
    %77 = vector.shape_cast %76 : vector<1x8x96xf32> to vector<8x96xf32>
    %78 = vector.extract_strided_slice %77 {offsets = [0, 0], sizes = [8, 64], strides = [1, 1]} : vector<8x96xf32> to vector<8x64xf32>
    %79 = vector.extract_strided_slice %75 {offsets = [0, 0], sizes = [8, 64], strides = [1, 1]} : vector<8x96xf32> to vector<8x64xf32>
    %80 = arith.addf %78, %79 : vector<8x64xf32>
    %81 = arith.negf %80 : vector<8x64xf32>
    %82 = math.exp %81 : vector<8x64xf32>
    %cst_27 = arith.constant 1.000000e+00 : f32
    %83 = vector.broadcast %cst_27 : f32 to vector<8x64xf32>
    %84 = arith.addf %83, %82 : vector<8x64xf32>
    %85 = arith.divf %83, %84 : vector<8x64xf32>
    %86 = vector.extract_strided_slice %85 {offsets = [0, 0], sizes = [8, 32], strides = [1, 1]} : vector<8x64xf32> to vector<8x32xf32>
    %87 = vector.extract_strided_slice %85 {offsets = [0, 32], sizes = [8, 32], strides = [1, 1]} : vector<8x64xf32> to vector<8x32xf32>
    %88 = vector.extract_strided_slice %77 {offsets = [0, 64], sizes = [8, 32], strides = [1, 1]} : vector<8x96xf32> to vector<8x32xf32>
    %89 = vector.extract_strided_slice %75 {offsets = [0, 64], sizes = [8, 32], strides = [1, 1]} : vector<8x96xf32> to vector<8x32xf32>
    %90 = arith.addf %89, %15 : vector<8x32xf32>
    %91 = arith.mulf %86, %90 : vector<8x32xf32>
    %92 = arith.addf %88, %91 : vector<8x32xf32>
    %93 = math.tanh %92 : vector<8x32xf32>
    %cst_28 = arith.constant 1.000000e+00 : f32
    %94 = vector.broadcast %cst_28 : f32 to vector<8x32xf32>
    %95 = arith.subf %94, %87 : vector<8x32xf32>
    %96 = arith.mulf %95, %93 : vector<8x32xf32>
    %97 = arith.mulf %87, %71 : vector<8x32xf32>
    %98 = arith.addf %96, %97 : vector<8x32xf32>
    %c2 = arith.constant 2 : index
    %c0_29 = arith.constant 0 : index
    %c0_30 = arith.constant 0 : index
    %99 = vector.load %arg20[%c2, %c0_29, %c0_30] : memref<8x8x32xf32, #tpu.memory_space<vmem>>, vector<1x8x32xf32>
    %100 = vector.shape_cast %99 : vector<1x8x32xf32> to vector<8x32xf32>
    %101 = vector.shape_cast %98 : vector<8x32xf32> to vector<1x8x32xf32>
    tpu.vector_store %arg20[%c2, %c0_29, %c0_30], %101 {strides = array<i32>} : memref<8x8x32xf32, #tpu.memory_space<vmem>>, vector<1x8x32xf32>,
    %cst_31 = arith.constant dense<0.000000e+00> : vector<8x96xf32>
    %102 = tpu.matmul %98, %10, %cst_31 {dimension_numbers = #tpu.dot_dimension_numbers<[1], [0], [0], [1], [0, 0, 1, 1], [], []>} : vector<8x32xf32>, vector<32x96xf32>, vector<8x96xf32> -> vector<8x96xf32>
    %103 = vector.extract_strided_slice %19 {offsets = [3, 0, 0], sizes = [1, 8, 96], strides = [1, 1, 1]} : vector<8x8x96xf32> to vector<1x8x96xf32>
    %104 = vector.shape_cast %103 : vector<1x8x96xf32> to vector<8x96xf32>
    %105 = vector.extract_strided_slice %104 {offsets = [0, 0], sizes = [8, 64], strides = [1, 1]} : vector<8x96xf32> to vector<8x64xf32>
    %106 = vector.extract_strided_slice %102 {offsets = [0, 0], sizes = [8, 64], strides = [1, 1]} : vector<8x96xf32> to vector<8x64xf32>
    %107 = arith.addf %105, %106 : vector<8x64xf32>
    %108 = arith.negf %107 : vector<8x64xf32>
    %109 = math.exp %108 : vector<8x64xf32>
    %cst_32 = arith.constant 1.000000e+00 : f32
    %110 = vector.broadcast %cst_32 : f32 to vector<8x64xf32>
    %111 = arith.addf %110, %109 : vector<8x64xf32>
    %112 = arith.divf %110, %111 : vector<8x64xf32>
    %113 = vector.extract_strided_slice %112 {offsets = [0, 0], sizes = [8, 32], strides = [1, 1]} : vector<8x64xf32> to vector<8x32xf32>
    %114 = vector.extract_strided_slice %112 {offsets = [0, 32], sizes = [8, 32], strides = [1, 1]} : vector<8x64xf32> to vector<8x32xf32>
    %115 = vector.extract_strided_slice %104 {offsets = [0, 64], sizes = [8, 32], strides = [1, 1]} : vector<8x96xf32> to vector<8x32xf32>
    %116 = vector.extract_strided_slice %102 {offsets = [0, 64], sizes = [8, 32], strides = [1, 1]} : vector<8x96xf32> to vector<8x32xf32>
    %117 = arith.addf %116, %15 : vector<8x32xf32>
    %118 = arith.mulf %113, %117 : vector<8x32xf32>
    %119 = arith.addf %115, %118 : vector<8x32xf32>
    %120 = math.tanh %119 : vector<8x32xf32>
    %cst_33 = arith.constant 1.000000e+00 : f32
    %121 = vector.broadcast %cst_33 : f32 to vector<8x32xf32>
    %122 = arith.subf %121, %114 : vector<8x32xf32>
    %123 = arith.mulf %122, %120 : vector<8x32xf32>
    %124 = arith.mulf %114, %98 : vector<8x32xf32>
    %125 = arith.addf %123, %124 : vector<8x32xf32>
    %c3 = arith.constant 3 : index
    %c0_34 = arith.constant 0 : index
    %c0_35 = arith.constant 0 : index
    %126 = vector.load %arg20[%c3, %c0_34, %c0_35] : memref<8x8x32xf32, #tpu.memory_space<vmem>>, vector<1x8x32xf32>
    %127 = vector.shape_cast %126 : vector<1x8x32xf32> to vector<8x32xf32>
    %128 = vector.shape_cast %125 : vector<8x32xf32> to vector<1x8x32xf32>
    tpu.vector_store %arg20[%c3, %c0_34, %c0_35], %128 {strides = array<i32>} : memref<8x8x32xf32, #tpu.memory_space<vmem>>, vector<1x8x32xf32>,
    %cst_36 = arith.constant dense<0.000000e+00> : vector<8x96xf32>
    %129 = tpu.matmul %125, %10, %cst_36 {dimension_numbers = #tpu.dot_dimension_numbers<[1], [0], [0], [1], [0, 0, 1, 1], [], []>} : vector<8x32xf32>, vector<32x96xf32>, vector<8x96xf32> -> vector<8x96xf32>
    %130 = vector.extract_strided_slice %19 {offsets = [4, 0, 0], sizes = [1, 8, 96], strides = [1, 1, 1]} : vector<8x8x96xf32> to vector<1x8x96xf32>
    %131 = vector.shape_cast %130 : vector<1x8x96xf32> to vector<8x96xf32>
    %132 = vector.extract_strided_slice %131 {offsets = [0, 0], sizes = [8, 64], strides = [1, 1]} : vector<8x96xf32> to vector<8x64xf32>
    %133 = vector.extract_strided_slice %129 {offsets = [0, 0], sizes = [8, 64], strides = [1, 1]} : vector<8x96xf32> to vector<8x64xf32>
    %134 = arith.addf %132, %133 : vector<8x64xf32>
    %135 = arith.negf %134 : vector<8x64xf32>
    %136 = math.exp %135 : vector<8x64xf32>
    %cst_37 = arith.constant 1.000000e+00 : f32
    %137 = vector.broadcast %cst_37 : f32 to vector<8x64xf32>
    %138 = arith.addf %137, %136 : vector<8x64xf32>
    %139 = arith.divf %137, %138 : vector<8x64xf32>
    %140 = vector.extract_strided_slice %139 {offsets = [0, 0], sizes = [8, 32], strides = [1, 1]} : vector<8x64xf32> to vector<8x32xf32>
    %141 = vector.extract_strided_slice %139 {offsets = [0, 32], sizes = [8, 32], strides = [1, 1]} : vector<8x64xf32> to vector<8x32xf32>
    %142 = vector.extract_strided_slice %131 {offsets = [0, 64], sizes = [8, 32], strides = [1, 1]} : vector<8x96xf32> to vector<8x32xf32>
    %143 = vector.extract_strided_slice %129 {offsets = [0, 64], sizes = [8, 32], strides = [1, 1]} : vector<8x96xf32> to vector<8x32xf32>
    %144 = arith.addf %143, %15 : vector<8x32xf32>
    %145 = arith.mulf %140, %144 : vector<8x32xf32>
    %146 = arith.addf %142, %145 : vector<8x32xf32>
    %147 = math.tanh %146 : vector<8x32xf32>
    %cst_38 = arith.constant 1.000000e+00 : f32
    %148 = vector.broadcast %cst_38 : f32 to vector<8x32xf32>
    %149 = arith.subf %148, %141 : vector<8x32xf32>
    %150 = arith.mulf %149, %147 : vector<8x32xf32>
    %151 = arith.mulf %141, %125 : vector<8x32xf32>
    %152 = arith.addf %150, %151 : vector<8x32xf32>
    %c4 = arith.constant 4 : index
    %c0_39 = arith.constant 0 : index
    %c0_40 = arith.constant 0 : index
    %153 = vector.load %arg20[%c4, %c0_39, %c0_40] : memref<8x8x32xf32, #tpu.memory_space<vmem>>, vector<1x8x32xf32>
    %154 = vector.shape_cast %153 : vector<1x8x32xf32> to vector<8x32xf32>
    %155 = vector.shape_cast %152 : vector<8x32xf32> to vector<1x8x32xf32>
    tpu.vector_store %arg20[%c4, %c0_39, %c0_40], %155 {strides = array<i32>} : memref<8x8x32xf32, #tpu.memory_space<vmem>>, vector<1x8x32xf32>,
    %cst_41 = arith.constant dense<0.000000e+00> : vector<8x96xf32>
    %156 = tpu.matmul %152, %10, %cst_41 {dimension_numbers = #tpu.dot_dimension_numbers<[1], [0], [0], [1], [0, 0, 1, 1], [], []>} : vector<8x32xf32>, vector<32x96xf32>, vector<8x96xf32> -> vector<8x96xf32>
    %157 = vector.extract_strided_slice %19 {offsets = [5, 0, 0], sizes = [1, 8, 96], strides = [1, 1, 1]} : vector<8x8x96xf32> to vector<1x8x96xf32>
    %158 = vector.shape_cast %157 : vector<1x8x96xf32> to vector<8x96xf32>
    %159 = vector.extract_strided_slice %158 {offsets = [0, 0], sizes = [8, 64], strides = [1, 1]} : vector<8x96xf32> to vector<8x64xf32>
    %160 = vector.extract_strided_slice %156 {offsets = [0, 0], sizes = [8, 64], strides = [1, 1]} : vector<8x96xf32> to vector<8x64xf32>
    %161 = arith.addf %159, %160 : vector<8x64xf32>
    %162 = arith.negf %161 : vector<8x64xf32>
    %163 = math.exp %162 : vector<8x64xf32>
    %cst_42 = arith.constant 1.000000e+00 : f32
    %164 = vector.broadcast %cst_42 : f32 to vector<8x64xf32>
    %165 = arith.addf %164, %163 : vector<8x64xf32>
    %166 = arith.divf %164, %165 : vector<8x64xf32>
    %167 = vector.extract_strided_slice %166 {offsets = [0, 0], sizes = [8, 32], strides = [1, 1]} : vector<8x64xf32> to vector<8x32xf32>
    %168 = vector.extract_strided_slice %166 {offsets = [0, 32], sizes = [8, 32], strides = [1, 1]} : vector<8x64xf32> to vector<8x32xf32>
    %169 = vector.extract_strided_slice %158 {offsets = [0, 64], sizes = [8, 32], strides = [1, 1]} : vector<8x96xf32> to vector<8x32xf32>
    %170 = vector.extract_strided_slice %156 {offsets = [0, 64], sizes = [8, 32], strides = [1, 1]} : vector<8x96xf32> to vector<8x32xf32>
    %171 = arith.addf %170, %15 : vector<8x32xf32>
    %172 = arith.mulf %167, %171 : vector<8x32xf32>
    %173 = arith.addf %169, %172 : vector<8x32xf32>
    %174 = math.tanh %173 : vector<8x32xf32>
    %cst_43 = arith.constant 1.000000e+00 : f32
    %175 = vector.broadcast %cst_43 : f32 to vector<8x32xf32>
    %176 = arith.subf %175, %168 : vector<8x32xf32>
    %177 = arith.mulf %176, %174 : vector<8x32xf32>
    %178 = arith.mulf %168, %152 : vector<8x32xf32>
    %179 = arith.addf %177, %178 : vector<8x32xf32>
    %c5 = arith.constant 5 : index
    %c0_44 = arith.constant 0 : index
    %c0_45 = arith.constant 0 : index
    %180 = vector.load %arg20[%c5, %c0_44, %c0_45] : memref<8x8x32xf32, #tpu.memory_space<vmem>>, vector<1x8x32xf32>
    %181 = vector.shape_cast %180 : vector<1x8x32xf32> to vector<8x32xf32>
    %182 = vector.shape_cast %179 : vector<8x32xf32> to vector<1x8x32xf32>
    tpu.vector_store %arg20[%c5, %c0_44, %c0_45], %182 {strides = array<i32>} : memref<8x8x32xf32, #tpu.memory_space<vmem>>, vector<1x8x32xf32>,
    %cst_46 = arith.constant dense<0.000000e+00> : vector<8x96xf32>
    %183 = tpu.matmul %179, %10, %cst_46 {dimension_numbers = #tpu.dot_dimension_numbers<[1], [0], [0], [1], [0, 0, 1, 1], [], []>} : vector<8x32xf32>, vector<32x96xf32>, vector<8x96xf32> -> vector<8x96xf32>
    %184 = vector.extract_strided_slice %19 {offsets = [6, 0, 0], sizes = [1, 8, 96], strides = [1, 1, 1]} : vector<8x8x96xf32> to vector<1x8x96xf32>
    %185 = vector.shape_cast %184 : vector<1x8x96xf32> to vector<8x96xf32>
    %186 = vector.extract_strided_slice %185 {offsets = [0, 0], sizes = [8, 64], strides = [1, 1]} : vector<8x96xf32> to vector<8x64xf32>
    %187 = vector.extract_strided_slice %183 {offsets = [0, 0], sizes = [8, 64], strides = [1, 1]} : vector<8x96xf32> to vector<8x64xf32>
    %188 = arith.addf %186, %187 : vector<8x64xf32>
    %189 = arith.negf %188 : vector<8x64xf32>
    %190 = math.exp %189 : vector<8x64xf32>
    %cst_47 = arith.constant 1.000000e+00 : f32
    %191 = vector.broadcast %cst_47 : f32 to vector<8x64xf32>
    %192 = arith.addf %191, %190 : vector<8x64xf32>
    %193 = arith.divf %191, %192 : vector<8x64xf32>
    %194 = vector.extract_strided_slice %193 {offsets = [0, 0], sizes = [8, 32], strides = [1, 1]} : vector<8x64xf32> to vector<8x32xf32>
    %195 = vector.extract_strided_slice %193 {offsets = [0, 32], sizes = [8, 32], strides = [1, 1]} : vector<8x64xf32> to vector<8x32xf32>
    %196 = vector.extract_strided_slice %185 {offsets = [0, 64], sizes = [8, 32], strides = [1, 1]} : vector<8x96xf32> to vector<8x32xf32>
    %197 = vector.extract_strided_slice %183 {offsets = [0, 64], sizes = [8, 32], strides = [1, 1]} : vector<8x96xf32> to vector<8x32xf32>
    %198 = arith.addf %197, %15 : vector<8x32xf32>
    %199 = arith.mulf %194, %198 : vector<8x32xf32>
    %200 = arith.addf %196, %199 : vector<8x32xf32>
    %201 = math.tanh %200 : vector<8x32xf32>
    %cst_48 = arith.constant 1.000000e+00 : f32
    %202 = vector.broadcast %cst_48 : f32 to vector<8x32xf32>
    %203 = arith.subf %202, %195 : vector<8x32xf32>
    %204 = arith.mulf %203, %201 : vector<8x32xf32>
    %205 = arith.mulf %195, %179 : vector<8x32xf32>
    %206 = arith.addf %204, %205 : vector<8x32xf32>
    %c6 = arith.constant 6 : index
    %c0_49 = arith.constant 0 : index
    %c0_50 = arith.constant 0 : index
    %207 = vector.load %arg20[%c6, %c0_49, %c0_50] : memref<8x8x32xf32, #tpu.memory_space<vmem>>, vector<1x8x32xf32>
    %208 = vector.shape_cast %207 : vector<1x8x32xf32> to vector<8x32xf32>
    %209 = vector.shape_cast %206 : vector<8x32xf32> to vector<1x8x32xf32>
    tpu.vector_store %arg20[%c6, %c0_49, %c0_50], %209 {strides = array<i32>} : memref<8x8x32xf32, #tpu.memory_space<vmem>>, vector<1x8x32xf32>,
    %cst_51 = arith.constant dense<0.000000e+00> : vector<8x96xf32>
    %210 = tpu.matmul %206, %10, %cst_51 {dimension_numbers = #tpu.dot_dimension_numbers<[1], [0], [0], [1], [0, 0, 1, 1], [], []>} : vector<8x32xf32>, vector<32x96xf32>, vector<8x96xf32> -> vector<8x96xf32>
    %211 = vector.extract_strided_slice %19 {offsets = [7, 0, 0], sizes = [1, 8, 96], strides = [1, 1, 1]} : vector<8x8x96xf32> to vector<1x8x96xf32>
    %212 = vector.shape_cast %211 : vector<1x8x96xf32> to vector<8x96xf32>
    %213 = vector.extract_strided_slice %212 {offsets = [0, 0], sizes = [8, 64], strides = [1, 1]} : vector<8x96xf32> to vector<8x64xf32>
    %214 = vector.extract_strided_slice %210 {offsets = [0, 0], sizes = [8, 64], strides = [1, 1]} : vector<8x96xf32> to vector<8x64xf32>
    %215 = arith.addf %213, %214 : vector<8x64xf32>
    %216 = arith.negf %215 : vector<8x64xf32>
    %217 = math.exp %216 : vector<8x64xf32>
    %cst_52 = arith.constant 1.000000e+00 : f32
    %218 = vector.broadcast %cst_52 : f32 to vector<8x64xf32>
    %219 = arith.addf %218, %217 : vector<8x64xf32>
    %220 = arith.divf %218, %219 : vector<8x64xf32>
    %221 = vector.extract_strided_slice %220 {offsets = [0, 0], sizes = [8, 32], strides = [1, 1]} : vector<8x64xf32> to vector<8x32xf32>
    %222 = vector.extract_strided_slice %220 {offsets = [0, 32], sizes = [8, 32], strides = [1, 1]} : vector<8x64xf32> to vector<8x32xf32>
    %223 = vector.extract_strided_slice %212 {offsets = [0, 64], sizes = [8, 32], strides = [1, 1]} : vector<8x96xf32> to vector<8x32xf32>
    %224 = vector.extract_strided_slice %210 {offsets = [0, 64], sizes = [8, 32], strides = [1, 1]} : vector<8x96xf32> to vector<8x32xf32>
    %225 = arith.addf %224, %15 : vector<8x32xf32>
    %226 = arith.mulf %221, %225 : vector<8x32xf32>
    %227 = arith.addf %223, %226 : vector<8x32xf32>
    %228 = math.tanh %227 : vector<8x32xf32>
    %cst_53 = arith.constant 1.000000e+00 : f32
    %229 = vector.broadcast %cst_53 : f32 to vector<8x32xf32>
    %230 = arith.subf %229, %222 : vector<8x32xf32>
    %231 = arith.mulf %230, %228 : vector<8x32xf32>
    %232 = arith.mulf %222, %206 : vector<8x32xf32>
    %233 = arith.addf %231, %232 : vector<8x32xf32>
    %c7 = arith.constant 7 : index
    %c0_54 = arith.constant 0 : index
    %c0_55 = arith.constant 0 : index
    %234 = vector.load %arg20[%c7, %c0_54, %c0_55] : memref<8x8x32xf32, #tpu.memory_space<vmem>>, vector<1x8x32xf32>
    %235 = vector.shape_cast %234 : vector<1x8x32xf32> to vector<8x32xf32>
    %236 = vector.shape_cast %233 : vector<8x32xf32> to vector<1x8x32xf32>
    tpu.vector_store %arg20[%c7, %c0_54, %c0_55], %236 {strides = array<i32>} : memref<8x8x32xf32, #tpu.memory_space<vmem>>, vector<1x8x32xf32>,
    %c0_56 = arith.constant 0 : index
    %c0_57 = arith.constant 0 : index
    %c0_58 = arith.constant 0 : index
    %237 = vector.load %arg20[%c0_56, %c0_57, %c0_58] : memref<8x8x32xf32, #tpu.memory_space<vmem>>, vector<8x8x32xf32>
    %238 = vector.shape_cast %237 : vector<8x8x32xf32> to vector<64x32xf32>
    %c0_59 = arith.constant 0 : index
    %c0_60 = arith.constant 0 : index
    %239 = vector.load %arg7[%c0_59, %c0_60] : memref<32x96xf32, #tpu.memory_space<vmem>>, vector<32x96xf32>
    %c0_61 = arith.constant 0 : index
    %c0_62 = arith.constant 0 : index
    %240 = vector.load %arg8[%c0_61, %c0_62] : memref<32x96xf32, #tpu.memory_space<vmem>>, vector<32x96xf32>
    %c0_63 = arith.constant 0 : index
    %c0_64 = arith.constant 0 : index
    %241 = vector.load %arg9[%c0_63, %c0_64] : memref<1x128xf32, #tpu.memory_space<vmem>>, vector<1x128xf32>
    %242 = vector.extract_strided_slice %241 {offsets = [0, 0], sizes = [1, 96], strides = [1, 1]} : vector<1x128xf32> to vector<1x96xf32>
    %243 = vector.extract_strided_slice %241 {offsets = [0, 96], sizes = [1, 32], strides = [1, 1]} : vector<1x128xf32> to vector<1x32xf32>
    %244 = vector.shape_cast %243 : vector<1x32xf32> to vector<1x32xf32>
    %245 = vector.broadcast %244 : vector<1x32xf32> to vector<8x32xf32>
    %cst_65 = arith.constant dense<0.000000e+00> : vector<64x96xf32>
    %246 = tpu.matmul %238, %239, %cst_65 {dimension_numbers = #tpu.dot_dimension_numbers<[1], [0], [0], [1], [0, 0, 1, 1], [], []>} : vector<64x32xf32>, vector<32x96xf32>, vector<64x96xf32> -> vector<64x96xf32>
    %247 = vector.broadcast %242 : vector<1x96xf32> to vector<64x96xf32>
    %248 = arith.addf %246, %247 : vector<64x96xf32>
    %249 = vector.shape_cast %248 : vector<64x96xf32> to vector<8x8x96xf32>
    %cst_66 = arith.constant 0.000000e+00 : f32
    %250 = vector.broadcast %cst_66 : f32 to vector<8x32xf32>
    %cst_67 = arith.constant dense<0.000000e+00> : vector<8x96xf32>
    %251 = tpu.matmul %250, %240, %cst_67 {dimension_numbers = #tpu.dot_dimension_numbers<[1], [0], [0], [1], [0, 0, 1, 1], [], []>} : vector<8x32xf32>, vector<32x96xf32>, vector<8x96xf32> -> vector<8x96xf32>
    %252 = vector.extract_strided_slice %249 {offsets = [0, 0, 0], sizes = [1, 8, 96], strides = [1, 1, 1]} : vector<8x8x96xf32> to vector<1x8x96xf32>
    %253 = vector.shape_cast %252 : vector<1x8x96xf32> to vector<8x96xf32>
    %254 = vector.extract_strided_slice %253 {offsets = [0, 0], sizes = [8, 64], strides = [1, 1]} : vector<8x96xf32> to vector<8x64xf32>
    %255 = vector.extract_strided_slice %251 {offsets = [0, 0], sizes = [8, 64], strides = [1, 1]} : vector<8x96xf32> to vector<8x64xf32>
    %256 = arith.addf %254, %255 : vector<8x64xf32>
    %257 = arith.negf %256 : vector<8x64xf32>
    %258 = math.exp %257 : vector<8x64xf32>
    %cst_68 = arith.constant 1.000000e+00 : f32
    %259 = vector.broadcast %cst_68 : f32 to vector<8x64xf32>
    %260 = arith.addf %259, %258 : vector<8x64xf32>
    %261 = arith.divf %259, %260 : vector<8x64xf32>
    %262 = vector.extract_strided_slice %261 {offsets = [0, 0], sizes = [8, 32], strides = [1, 1]} : vector<8x64xf32> to vector<8x32xf32>
    %263 = vector.extract_strided_slice %261 {offsets = [0, 32], sizes = [8, 32], strides = [1, 1]} : vector<8x64xf32> to vector<8x32xf32>
    %264 = vector.extract_strided_slice %253 {offsets = [0, 64], sizes = [8, 32], strides = [1, 1]} : vector<8x96xf32> to vector<8x32xf32>
    %265 = vector.extract_strided_slice %251 {offsets = [0, 64], sizes = [8, 32], strides = [1, 1]} : vector<8x96xf32> to vector<8x32xf32>
    %266 = arith.addf %265, %245 : vector<8x32xf32>
    %267 = arith.mulf %262, %266 : vector<8x32xf32>
    %268 = arith.addf %264, %267 : vector<8x32xf32>
    %269 = math.tanh %268 : vector<8x32xf32>
    %cst_69 = arith.constant 1.000000e+00 : f32
    %270 = vector.broadcast %cst_69 : f32 to vector<8x32xf32>
    %271 = arith.subf %270, %263 : vector<8x32xf32>
    %272 = arith.mulf %271, %269 : vector<8x32xf32>
    %273 = arith.mulf %263, %250 : vector<8x32xf32>
    %274 = arith.addf %272, %273 : vector<8x32xf32>
    %c0_70 = arith.constant 0 : index
    %c0_71 = arith.constant 0 : index
    %c0_72 = arith.constant 0 : index
    %275 = vector.load %arg20[%c0_70, %c0_71, %c0_72] : memref<8x8x32xf32, #tpu.memory_space<vmem>>, vector<1x8x32xf32>
    %276 = vector.shape_cast %275 : vector<1x8x32xf32> to vector<8x32xf32>
    %277 = vector.shape_cast %274 : vector<8x32xf32> to vector<1x8x32xf32>
    tpu.vector_store %arg20[%c0_70, %c0_71, %c0_72], %277 {strides = array<i32>} : memref<8x8x32xf32, #tpu.memory_space<vmem>>, vector<1x8x32xf32>,
    %cst_73 = arith.constant dense<0.000000e+00> : vector<8x96xf32>
    %278 = tpu.matmul %274, %240, %cst_73 {dimension_numbers = #tpu.dot_dimension_numbers<[1], [0], [0], [1], [0, 0, 1, 1], [], []>} : vector<8x32xf32>, vector<32x96xf32>, vector<8x96xf32> -> vector<8x96xf32>
    %279 = vector.extract_strided_slice %249 {offsets = [1, 0, 0], sizes = [1, 8, 96], strides = [1, 1, 1]} : vector<8x8x96xf32> to vector<1x8x96xf32>
    %280 = vector.shape_cast %279 : vector<1x8x96xf32> to vector<8x96xf32>
    %281 = vector.extract_strided_slice %280 {offsets = [0, 0], sizes = [8, 64], strides = [1, 1]} : vector<8x96xf32> to vector<8x64xf32>
    %282 = vector.extract_strided_slice %278 {offsets = [0, 0], sizes = [8, 64], strides = [1, 1]} : vector<8x96xf32> to vector<8x64xf32>
    %283 = arith.addf %281, %282 : vector<8x64xf32>
    %284 = arith.negf %283 : vector<8x64xf32>
    %285 = math.exp %284 : vector<8x64xf32>
    %cst_74 = arith.constant 1.000000e+00 : f32
    %286 = vector.broadcast %cst_74 : f32 to vector<8x64xf32>
    %287 = arith.addf %286, %285 : vector<8x64xf32>
    %288 = arith.divf %286, %287 : vector<8x64xf32>
    %289 = vector.extract_strided_slice %288 {offsets = [0, 0], sizes = [8, 32], strides = [1, 1]} : vector<8x64xf32> to vector<8x32xf32>
    %290 = vector.extract_strided_slice %288 {offsets = [0, 32], sizes = [8, 32], strides = [1, 1]} : vector<8x64xf32> to vector<8x32xf32>
    %291 = vector.extract_strided_slice %280 {offsets = [0, 64], sizes = [8, 32], strides = [1, 1]} : vector<8x96xf32> to vector<8x32xf32>
    %292 = vector.extract_strided_slice %278 {offsets = [0, 64], sizes = [8, 32], strides = [1, 1]} : vector<8x96xf32> to vector<8x32xf32>
    %293 = arith.addf %292, %245 : vector<8x32xf32>
    %294 = arith.mulf %289, %293 : vector<8x32xf32>
    %295 = arith.addf %291, %294 : vector<8x32xf32>
    %296 = math.tanh %295 : vector<8x32xf32>
    %cst_75 = arith.constant 1.000000e+00 : f32
    %297 = vector.broadcast %cst_75 : f32 to vector<8x32xf32>
    %298 = arith.subf %297, %290 : vector<8x32xf32>
    %299 = arith.mulf %298, %296 : vector<8x32xf32>
    %300 = arith.mulf %290, %274 : vector<8x32xf32>
    %301 = arith.addf %299, %300 : vector<8x32xf32>
    %c1_76 = arith.constant 1 : index
    %c0_77 = arith.constant 0 : index
    %c0_78 = arith.constant 0 : index
    %302 = vector.load %arg20[%c1_76, %c0_77, %c0_78] : memref<8x8x32xf32, #tpu.memory_space<vmem>>, vector<1x8x32xf32>
    %303 = vector.shape_cast %302 : vector<1x8x32xf32> to vector<8x32xf32>
    %304 = vector.shape_cast %301 : vector<8x32xf32> to vector<1x8x32xf32>
    tpu.vector_store %arg20[%c1_76, %c0_77, %c0_78], %304 {strides = array<i32>} : memref<8x8x32xf32, #tpu.memory_space<vmem>>, vector<1x8x32xf32>,
    %cst_79 = arith.constant dense<0.000000e+00> : vector<8x96xf32>
    %305 = tpu.matmul %301, %240, %cst_79 {dimension_numbers = #tpu.dot_dimension_numbers<[1], [0], [0], [1], [0, 0, 1, 1], [], []>} : vector<8x32xf32>, vector<32x96xf32>, vector<8x96xf32> -> vector<8x96xf32>
    %306 = vector.extract_strided_slice %249 {offsets = [2, 0, 0], sizes = [1, 8, 96], strides = [1, 1, 1]} : vector<8x8x96xf32> to vector<1x8x96xf32>
    %307 = vector.shape_cast %306 : vector<1x8x96xf32> to vector<8x96xf32>
    %308 = vector.extract_strided_slice %307 {offsets = [0, 0], sizes = [8, 64], strides = [1, 1]} : vector<8x96xf32> to vector<8x64xf32>
    %309 = vector.extract_strided_slice %305 {offsets = [0, 0], sizes = [8, 64], strides = [1, 1]} : vector<8x96xf32> to vector<8x64xf32>
    %310 = arith.addf %308, %309 : vector<8x64xf32>
    %311 = arith.negf %310 : vector<8x64xf32>
    %312 = math.exp %311 : vector<8x64xf32>
    %cst_80 = arith.constant 1.000000e+00 : f32
    %313 = vector.broadcast %cst_80 : f32 to vector<8x64xf32>
    %314 = arith.addf %313, %312 : vector<8x64xf32>
    %315 = arith.divf %313, %314 : vector<8x64xf32>
    %316 = vector.extract_strided_slice %315 {offsets = [0, 0], sizes = [8, 32], strides = [1, 1]} : vector<8x64xf32> to vector<8x32xf32>
    %317 = vector.extract_strided_slice %315 {offsets = [0, 32], sizes = [8, 32], strides = [1, 1]} : vector<8x64xf32> to vector<8x32xf32>
    %318 = vector.extract_strided_slice %307 {offsets = [0, 64], sizes = [8, 32], strides = [1, 1]} : vector<8x96xf32> to vector<8x32xf32>
    %319 = vector.extract_strided_slice %305 {offsets = [0, 64], sizes = [8, 32], strides = [1, 1]} : vector<8x96xf32> to vector<8x32xf32>
    %320 = arith.addf %319, %245 : vector<8x32xf32>
    %321 = arith.mulf %316, %320 : vector<8x32xf32>
    %322 = arith.addf %318, %321 : vector<8x32xf32>
    %323 = math.tanh %322 : vector<8x32xf32>
    %cst_81 = arith.constant 1.000000e+00 : f32
    %324 = vector.broadcast %cst_81 : f32 to vector<8x32xf32>
    %325 = arith.subf %324, %317 : vector<8x32xf32>
    %326 = arith.mulf %325, %323 : vector<8x32xf32>
    %327 = arith.mulf %317, %301 : vector<8x32xf32>
    %328 = arith.addf %326, %327 : vector<8x32xf32>
    %c2_82 = arith.constant 2 : index
    %c0_83 = arith.constant 0 : index
    %c0_84 = arith.constant 0 : index
    %329 = vector.load %arg20[%c2_82, %c0_83, %c0_84] : memref<8x8x32xf32, #tpu.memory_space<vmem>>, vector<1x8x32xf32>
    %330 = vector.shape_cast %329 : vector<1x8x32xf32> to vector<8x32xf32>
    %331 = vector.shape_cast %328 : vector<8x32xf32> to vector<1x8x32xf32>
    tpu.vector_store %arg20[%c2_82, %c0_83, %c0_84], %331 {strides = array<i32>} : memref<8x8x32xf32, #tpu.memory_space<vmem>>, vector<1x8x32xf32>,
    %cst_85 = arith.constant dense<0.000000e+00> : vector<8x96xf32>
    %332 = tpu.matmul %328, %240, %cst_85 {dimension_numbers = #tpu.dot_dimension_numbers<[1], [0], [0], [1], [0, 0, 1, 1], [], []>} : vector<8x32xf32>, vector<32x96xf32>, vector<8x96xf32> -> vector<8x96xf32>
    %333 = vector.extract_strided_slice %249 {offsets = [3, 0, 0], sizes = [1, 8, 96], strides = [1, 1, 1]} : vector<8x8x96xf32> to vector<1x8x96xf32>
    %334 = vector.shape_cast %333 : vector<1x8x96xf32> to vector<8x96xf32>
    %335 = vector.extract_strided_slice %334 {offsets = [0, 0], sizes = [8, 64], strides = [1, 1]} : vector<8x96xf32> to vector<8x64xf32>
    %336 = vector.extract_strided_slice %332 {offsets = [0, 0], sizes = [8, 64], strides = [1, 1]} : vector<8x96xf32> to vector<8x64xf32>
    %337 = arith.addf %335, %336 : vector<8x64xf32>
    %338 = arith.negf %337 : vector<8x64xf32>
    %339 = math.exp %338 : vector<8x64xf32>
    %cst_86 = arith.constant 1.000000e+00 : f32
    %340 = vector.broadcast %cst_86 : f32 to vector<8x64xf32>
    %341 = arith.addf %340, %339 : vector<8x64xf32>
    %342 = arith.divf %340, %341 : vector<8x64xf32>
    %343 = vector.extract_strided_slice %342 {offsets = [0, 0], sizes = [8, 32], strides = [1, 1]} : vector<8x64xf32> to vector<8x32xf32>
    %344 = vector.extract_strided_slice %342 {offsets = [0, 32], sizes = [8, 32], strides = [1, 1]} : vector<8x64xf32> to vector<8x32xf32>
    %345 = vector.extract_strided_slice %334 {offsets = [0, 64], sizes = [8, 32], strides = [1, 1]} : vector<8x96xf32> to vector<8x32xf32>
    %346 = vector.extract_strided_slice %332 {offsets = [0, 64], sizes = [8, 32], strides = [1, 1]} : vector<8x96xf32> to vector<8x32xf32>
    %347 = arith.addf %346, %245 : vector<8x32xf32>
    %348 = arith.mulf %343, %347 : vector<8x32xf32>
    %349 = arith.addf %345, %348 : vector<8x32xf32>
    %350 = math.tanh %349 : vector<8x32xf32>
    %cst_87 = arith.constant 1.000000e+00 : f32
    %351 = vector.broadcast %cst_87 : f32 to vector<8x32xf32>
    %352 = arith.subf %351, %344 : vector<8x32xf32>
    %353 = arith.mulf %352, %350 : vector<8x32xf32>
    %354 = arith.mulf %344, %328 : vector<8x32xf32>
    %355 = arith.addf %353, %354 : vector<8x32xf32>
    %c3_88 = arith.constant 3 : index
    %c0_89 = arith.constant 0 : index
    %c0_90 = arith.constant 0 : index
    %356 = vector.load %arg20[%c3_88, %c0_89, %c0_90] : memref<8x8x32xf32, #tpu.memory_space<vmem>>, vector<1x8x32xf32>
    %357 = vector.shape_cast %356 : vector<1x8x32xf32> to vector<8x32xf32>
    %358 = vector.shape_cast %355 : vector<8x32xf32> to vector<1x8x32xf32>
    tpu.vector_store %arg20[%c3_88, %c0_89, %c0_90], %358 {strides = array<i32>} : memref<8x8x32xf32, #tpu.memory_space<vmem>>, vector<1x8x32xf32>,
    %cst_91 = arith.constant dense<0.000000e+00> : vector<8x96xf32>
    %359 = tpu.matmul %355, %240, %cst_91 {dimension_numbers = #tpu.dot_dimension_numbers<[1], [0], [0], [1], [0, 0, 1, 1], [], []>} : vector<8x32xf32>, vector<32x96xf32>, vector<8x96xf32> -> vector<8x96xf32>
    %360 = vector.extract_strided_slice %249 {offsets = [4, 0, 0], sizes = [1, 8, 96], strides = [1, 1, 1]} : vector<8x8x96xf32> to vector<1x8x96xf32>
    %361 = vector.shape_cast %360 : vector<1x8x96xf32> to vector<8x96xf32>
    %362 = vector.extract_strided_slice %361 {offsets = [0, 0], sizes = [8, 64], strides = [1, 1]} : vector<8x96xf32> to vector<8x64xf32>
    %363 = vector.extract_strided_slice %359 {offsets = [0, 0], sizes = [8, 64], strides = [1, 1]} : vector<8x96xf32> to vector<8x64xf32>
    %364 = arith.addf %362, %363 : vector<8x64xf32>
    %365 = arith.negf %364 : vector<8x64xf32>
    %366 = math.exp %365 : vector<8x64xf32>
    %cst_92 = arith.constant 1.000000e+00 : f32
    %367 = vector.broadcast %cst_92 : f32 to vector<8x64xf32>
    %368 = arith.addf %367, %366 : vector<8x64xf32>
    %369 = arith.divf %367, %368 : vector<8x64xf32>
    %370 = vector.extract_strided_slice %369 {offsets = [0, 0], sizes = [8, 32], strides = [1, 1]} : vector<8x64xf32> to vector<8x32xf32>
    %371 = vector.extract_strided_slice %369 {offsets = [0, 32], sizes = [8, 32], strides = [1, 1]} : vector<8x64xf32> to vector<8x32xf32>
    %372 = vector.extract_strided_slice %361 {offsets = [0, 64], sizes = [8, 32], strides = [1, 1]} : vector<8x96xf32> to vector<8x32xf32>
    %373 = vector.extract_strided_slice %359 {offsets = [0, 64], sizes = [8, 32], strides = [1, 1]} : vector<8x96xf32> to vector<8x32xf32>
    %374 = arith.addf %373, %245 : vector<8x32xf32>
    %375 = arith.mulf %370, %374 : vector<8x32xf32>
    %376 = arith.addf %372, %375 : vector<8x32xf32>
    %377 = math.tanh %376 : vector<8x32xf32>
    %cst_93 = arith.constant 1.000000e+00 : f32
    %378 = vector.broadcast %cst_93 : f32 to vector<8x32xf32>
    %379 = arith.subf %378, %371 : vector<8x32xf32>
    %380 = arith.mulf %379, %377 : vector<8x32xf32>
    %381 = arith.mulf %371, %355 : vector<8x32xf32>
    %382 = arith.addf %380, %381 : vector<8x32xf32>
    %c4_94 = arith.constant 4 : index
    %c0_95 = arith.constant 0 : index
    %c0_96 = arith.constant 0 : index
    %383 = vector.load %arg20[%c4_94, %c0_95, %c0_96] : memref<8x8x32xf32, #tpu.memory_space<vmem>>, vector<1x8x32xf32>
    %384 = vector.shape_cast %383 : vector<1x8x32xf32> to vector<8x32xf32>
    %385 = vector.shape_cast %382 : vector<8x32xf32> to vector<1x8x32xf32>
    tpu.vector_store %arg20[%c4_94, %c0_95, %c0_96], %385 {strides = array<i32>} : memref<8x8x32xf32, #tpu.memory_space<vmem>>, vector<1x8x32xf32>,
    %cst_97 = arith.constant dense<0.000000e+00> : vector<8x96xf32>
    %386 = tpu.matmul %382, %240, %cst_97 {dimension_numbers = #tpu.dot_dimension_numbers<[1], [0], [0], [1], [0, 0, 1, 1], [], []>} : vector<8x32xf32>, vector<32x96xf32>, vector<8x96xf32> -> vector<8x96xf32>
    %387 = vector.extract_strided_slice %249 {offsets = [5, 0, 0], sizes = [1, 8, 96], strides = [1, 1, 1]} : vector<8x8x96xf32> to vector<1x8x96xf32>
    %388 = vector.shape_cast %387 : vector<1x8x96xf32> to vector<8x96xf32>
    %389 = vector.extract_strided_slice %388 {offsets = [0, 0], sizes = [8, 64], strides = [1, 1]} : vector<8x96xf32> to vector<8x64xf32>
    %390 = vector.extract_strided_slice %386 {offsets = [0, 0], sizes = [8, 64], strides = [1, 1]} : vector<8x96xf32> to vector<8x64xf32>
    %391 = arith.addf %389, %390 : vector<8x64xf32>
    %392 = arith.negf %391 : vector<8x64xf32>
    %393 = math.exp %392 : vector<8x64xf32>
    %cst_98 = arith.constant 1.000000e+00 : f32
    %394 = vector.broadcast %cst_98 : f32 to vector<8x64xf32>
    %395 = arith.addf %394, %393 : vector<8x64xf32>
    %396 = arith.divf %394, %395 : vector<8x64xf32>
    %397 = vector.extract_strided_slice %396 {offsets = [0, 0], sizes = [8, 32], strides = [1, 1]} : vector<8x64xf32> to vector<8x32xf32>
    %398 = vector.extract_strided_slice %396 {offsets = [0, 32], sizes = [8, 32], strides = [1, 1]} : vector<8x64xf32> to vector<8x32xf32>
    %399 = vector.extract_strided_slice %388 {offsets = [0, 64], sizes = [8, 32], strides = [1, 1]} : vector<8x96xf32> to vector<8x32xf32>
    %400 = vector.extract_strided_slice %386 {offsets = [0, 64], sizes = [8, 32], strides = [1, 1]} : vector<8x96xf32> to vector<8x32xf32>
    %401 = arith.addf %400, %245 : vector<8x32xf32>
    %402 = arith.mulf %397, %401 : vector<8x32xf32>
    %403 = arith.addf %399, %402 : vector<8x32xf32>
    %404 = math.tanh %403 : vector<8x32xf32>
    %cst_99 = arith.constant 1.000000e+00 : f32
    %405 = vector.broadcast %cst_99 : f32 to vector<8x32xf32>
    %406 = arith.subf %405, %398 : vector<8x32xf32>
    %407 = arith.mulf %406, %404 : vector<8x32xf32>
    %408 = arith.mulf %398, %382 : vector<8x32xf32>
    %409 = arith.addf %407, %408 : vector<8x32xf32>
    %c5_100 = arith.constant 5 : index
    %c0_101 = arith.constant 0 : index
    %c0_102 = arith.constant 0 : index
    %410 = vector.load %arg20[%c5_100, %c0_101, %c0_102] : memref<8x8x32xf32, #tpu.memory_space<vmem>>, vector<1x8x32xf32>
    %411 = vector.shape_cast %410 : vector<1x8x32xf32> to vector<8x32xf32>
    %412 = vector.shape_cast %409 : vector<8x32xf32> to vector<1x8x32xf32>
    tpu.vector_store %arg20[%c5_100, %c0_101, %c0_102], %412 {strides = array<i32>} : memref<8x8x32xf32, #tpu.memory_space<vmem>>, vector<1x8x32xf32>,
    %cst_103 = arith.constant dense<0.000000e+00> : vector<8x96xf32>
    %413 = tpu.matmul %409, %240, %cst_103 {dimension_numbers = #tpu.dot_dimension_numbers<[1], [0], [0], [1], [0, 0, 1, 1], [], []>} : vector<8x32xf32>, vector<32x96xf32>, vector<8x96xf32> -> vector<8x96xf32>
    %414 = vector.extract_strided_slice %249 {offsets = [6, 0, 0], sizes = [1, 8, 96], strides = [1, 1, 1]} : vector<8x8x96xf32> to vector<1x8x96xf32>
    %415 = vector.shape_cast %414 : vector<1x8x96xf32> to vector<8x96xf32>
    %416 = vector.extract_strided_slice %415 {offsets = [0, 0], sizes = [8, 64], strides = [1, 1]} : vector<8x96xf32> to vector<8x64xf32>
    %417 = vector.extract_strided_slice %413 {offsets = [0, 0], sizes = [8, 64], strides = [1, 1]} : vector<8x96xf32> to vector<8x64xf32>
    %418 = arith.addf %416, %417 : vector<8x64xf32>
    %419 = arith.negf %418 : vector<8x64xf32>
    %420 = math.exp %419 : vector<8x64xf32>
    %cst_104 = arith.constant 1.000000e+00 : f32
    %421 = vector.broadcast %cst_104 : f32 to vector<8x64xf32>
    %422 = arith.addf %421, %420 : vector<8x64xf32>
    %423 = arith.divf %421, %422 : vector<8x64xf32>
    %424 = vector.extract_strided_slice %423 {offsets = [0, 0], sizes = [8, 32], strides = [1, 1]} : vector<8x64xf32> to vector<8x32xf32>
    %425 = vector.extract_strided_slice %423 {offsets = [0, 32], sizes = [8, 32], strides = [1, 1]} : vector<8x64xf32> to vector<8x32xf32>
    %426 = vector.extract_strided_slice %415 {offsets = [0, 64], sizes = [8, 32], strides = [1, 1]} : vector<8x96xf32> to vector<8x32xf32>
    %427 = vector.extract_strided_slice %413 {offsets = [0, 64], sizes = [8, 32], strides = [1, 1]} : vector<8x96xf32> to vector<8x32xf32>
    %428 = arith.addf %427, %245 : vector<8x32xf32>
    %429 = arith.mulf %424, %428 : vector<8x32xf32>
    %430 = arith.addf %426, %429 : vector<8x32xf32>
    %431 = math.tanh %430 : vector<8x32xf32>
    %cst_105 = arith.constant 1.000000e+00 : f32
    %432 = vector.broadcast %cst_105 : f32 to vector<8x32xf32>
    %433 = arith.subf %432, %425 : vector<8x32xf32>
    %434 = arith.mulf %433, %431 : vector<8x32xf32>
    %435 = arith.mulf %425, %409 : vector<8x32xf32>
    %436 = arith.addf %434, %435 : vector<8x32xf32>
    %c6_106 = arith.constant 6 : index
    %c0_107 = arith.constant 0 : index
    %c0_108 = arith.constant 0 : index
    %437 = vector.load %arg20[%c6_106, %c0_107, %c0_108] : memref<8x8x32xf32, #tpu.memory_space<vmem>>, vector<1x8x32xf32>
    %438 = vector.shape_cast %437 : vector<1x8x32xf32> to vector<8x32xf32>
    %439 = vector.shape_cast %436 : vector<8x32xf32> to vector<1x8x32xf32>
    tpu.vector_store %arg20[%c6_106, %c0_107, %c0_108], %439 {strides = array<i32>} : memref<8x8x32xf32, #tpu.memory_space<vmem>>, vector<1x8x32xf32>,
    %cst_109 = arith.constant dense<0.000000e+00> : vector<8x96xf32>
    %440 = tpu.matmul %436, %240, %cst_109 {dimension_numbers = #tpu.dot_dimension_numbers<[1], [0], [0], [1], [0, 0, 1, 1], [], []>} : vector<8x32xf32>, vector<32x96xf32>, vector<8x96xf32> -> vector<8x96xf32>
    %441 = vector.extract_strided_slice %249 {offsets = [7, 0, 0], sizes = [1, 8, 96], strides = [1, 1, 1]} : vector<8x8x96xf32> to vector<1x8x96xf32>
    %442 = vector.shape_cast %441 : vector<1x8x96xf32> to vector<8x96xf32>
    %443 = vector.extract_strided_slice %442 {offsets = [0, 0], sizes = [8, 64], strides = [1, 1]} : vector<8x96xf32> to vector<8x64xf32>
    %444 = vector.extract_strided_slice %440 {offsets = [0, 0], sizes = [8, 64], strides = [1, 1]} : vector<8x96xf32> to vector<8x64xf32>
    %445 = arith.addf %443, %444 : vector<8x64xf32>
    %446 = arith.negf %445 : vector<8x64xf32>
    %447 = math.exp %446 : vector<8x64xf32>
    %cst_110 = arith.constant 1.000000e+00 : f32
    %448 = vector.broadcast %cst_110 : f32 to vector<8x64xf32>
    %449 = arith.addf %448, %447 : vector<8x64xf32>
    %450 = arith.divf %448, %449 : vector<8x64xf32>
    %451 = vector.extract_strided_slice %450 {offsets = [0, 0], sizes = [8, 32], strides = [1, 1]} : vector<8x64xf32> to vector<8x32xf32>
    %452 = vector.extract_strided_slice %450 {offsets = [0, 32], sizes = [8, 32], strides = [1, 1]} : vector<8x64xf32> to vector<8x32xf32>
    %453 = vector.extract_strided_slice %442 {offsets = [0, 64], sizes = [8, 32], strides = [1, 1]} : vector<8x96xf32> to vector<8x32xf32>
    %454 = vector.extract_strided_slice %440 {offsets = [0, 64], sizes = [8, 32], strides = [1, 1]} : vector<8x96xf32> to vector<8x32xf32>
    %455 = arith.addf %454, %245 : vector<8x32xf32>
    %456 = arith.mulf %451, %455 : vector<8x32xf32>
    %457 = arith.addf %453, %456 : vector<8x32xf32>
    %458 = math.tanh %457 : vector<8x32xf32>
    %cst_111 = arith.constant 1.000000e+00 : f32
    %459 = vector.broadcast %cst_111 : f32 to vector<8x32xf32>
    %460 = arith.subf %459, %452 : vector<8x32xf32>
    %461 = arith.mulf %460, %458 : vector<8x32xf32>
    %462 = arith.mulf %452, %436 : vector<8x32xf32>
    %463 = arith.addf %461, %462 : vector<8x32xf32>
    %c7_112 = arith.constant 7 : index
    %c0_113 = arith.constant 0 : index
    %c0_114 = arith.constant 0 : index
    %464 = vector.load %arg20[%c7_112, %c0_113, %c0_114] : memref<8x8x32xf32, #tpu.memory_space<vmem>>, vector<1x8x32xf32>
    %465 = vector.shape_cast %464 : vector<1x8x32xf32> to vector<8x32xf32>
    %466 = vector.shape_cast %463 : vector<8x32xf32> to vector<1x8x32xf32>
    tpu.vector_store %arg20[%c7_112, %c0_113, %c0_114], %466 {strides = array<i32>} : memref<8x8x32xf32, #tpu.memory_space<vmem>>, vector<1x8x32xf32>,
    %c0_115 = arith.constant 0 : index
    %c0_116 = arith.constant 0 : index
    %c0_117 = arith.constant 0 : index
    %467 = vector.load %arg20[%c0_115, %c0_116, %c0_117] : memref<8x8x32xf32, #tpu.memory_space<vmem>>, vector<8x8x32xf32>
    %468 = vector.shape_cast %467 : vector<8x8x32xf32> to vector<64x32xf32>
    %c0_118 = arith.constant 0 : index
    %c0_119 = arith.constant 0 : index
    %c0_120 = arith.constant 0 : index
    %469 = vector.load %arg20[%c0_118, %c0_119, %c0_120] : memref<8x8x32xf32, #tpu.memory_space<vmem>>, vector<8x8x32xf32>
    %c0_121 = arith.constant 0 : index
    %c0_122 = arith.constant 0 : index
    %c0_123 = arith.constant 0 : index
    %470 = vector.load %arg18[%c0_121, %c0_122, %c0_123] : memref<8x8x32xf32, #tpu.memory_space<vmem>>, vector<8x8x32xf32>
    tpu.vector_store %arg18[%c0_121, %c0_122, %c0_123], %469 {strides = array<i32>} : memref<8x8x32xf32, #tpu.memory_space<vmem>>, vector<8x8x32xf32>,
    %c0_124 = arith.constant 0 : index
    %c0_125 = arith.constant 0 : index
    %471 = vector.load %arg10[%c0_124, %c0_125] : memref<32x48xf32, #tpu.memory_space<vmem>>, vector<32x48xf32>
    %c0_126 = arith.constant 0 : index
    %c0_127 = arith.constant 0 : index
    %472 = vector.load %arg11[%c0_126, %c0_127] : memref<16x48xf32, #tpu.memory_space<vmem>>, vector<16x48xf32>
    %c0_128 = arith.constant 0 : index
    %c0_129 = arith.constant 0 : index
    %473 = vector.load %arg12[%c0_128, %c0_129] : memref<1x64xf32, #tpu.memory_space<vmem>>, vector<1x64xf32>
    %474 = vector.extract_strided_slice %473 {offsets = [0, 0], sizes = [1, 48], strides = [1, 1]} : vector<1x64xf32> to vector<1x48xf32>
    %475 = vector.extract_strided_slice %473 {offsets = [0, 48], sizes = [1, 16], strides = [1, 1]} : vector<1x64xf32> to vector<1x16xf32>
    %476 = vector.shape_cast %475 : vector<1x16xf32> to vector<1x16xf32>
    %477 = vector.broadcast %476 : vector<1x16xf32> to vector<8x16xf32>
    %cst_130 = arith.constant dense<0.000000e+00> : vector<64x48xf32>
    %478 = tpu.matmul %468, %471, %cst_130 {dimension_numbers = #tpu.dot_dimension_numbers<[1], [0], [0], [1], [0, 0, 1, 1], [], []>} : vector<64x32xf32>, vector<32x48xf32>, vector<64x48xf32> -> vector<64x48xf32>
    %479 = vector.broadcast %474 : vector<1x48xf32> to vector<64x48xf32>
    %480 = arith.addf %478, %479 : vector<64x48xf32>
    %481 = vector.shape_cast %480 : vector<64x48xf32> to vector<8x8x48xf32>
    %cst_131 = arith.constant 0.000000e+00 : f32
    %482 = vector.broadcast %cst_131 : f32 to vector<8x16xf32>
    %cst_132 = arith.constant dense<0.000000e+00> : vector<8x48xf32>
    %483 = tpu.matmul %482, %472, %cst_132 {dimension_numbers = #tpu.dot_dimension_numbers<[1], [0], [0], [1], [0, 0, 1, 1], [], []>} : vector<8x16xf32>, vector<16x48xf32>, vector<8x48xf32> -> vector<8x48xf32>
    %484 = vector.extract_strided_slice %481 {offsets = [0, 0, 0], sizes = [1, 8, 48], strides = [1, 1, 1]} : vector<8x8x48xf32> to vector<1x8x48xf32>
    %485 = vector.shape_cast %484 : vector<1x8x48xf32> to vector<8x48xf32>
    %486 = vector.extract_strided_slice %485 {offsets = [0, 0], sizes = [8, 32], strides = [1, 1]} : vector<8x48xf32> to vector<8x32xf32>
    %487 = vector.extract_strided_slice %483 {offsets = [0, 0], sizes = [8, 32], strides = [1, 1]} : vector<8x48xf32> to vector<8x32xf32>
    %488 = arith.addf %486, %487 : vector<8x32xf32>
    %489 = arith.negf %488 : vector<8x32xf32>
    %490 = math.exp %489 : vector<8x32xf32>
    %cst_133 = arith.constant 1.000000e+00 : f32
    %491 = vector.broadcast %cst_133 : f32 to vector<8x32xf32>
    %492 = arith.addf %491, %490 : vector<8x32xf32>
    %493 = arith.divf %491, %492 : vector<8x32xf32>
    %494 = vector.extract_strided_slice %493 {offsets = [0, 0], sizes = [8, 16], strides = [1, 1]} : vector<8x32xf32> to vector<8x16xf32>
    %495 = vector.extract_strided_slice %493 {offsets = [0, 16], sizes = [8, 16], strides = [1, 1]} : vector<8x32xf32> to vector<8x16xf32>
    %496 = vector.extract_strided_slice %485 {offsets = [0, 32], sizes = [8, 16], strides = [1, 1]} : vector<8x48xf32> to vector<8x16xf32>
    %497 = vector.extract_strided_slice %483 {offsets = [0, 32], sizes = [8, 16], strides = [1, 1]} : vector<8x48xf32> to vector<8x16xf32>
    %498 = arith.addf %497, %477 : vector<8x16xf32>
    %499 = arith.mulf %494, %498 : vector<8x16xf32>
    %500 = arith.addf %496, %499 : vector<8x16xf32>
    %501 = math.tanh %500 : vector<8x16xf32>
    %cst_134 = arith.constant 1.000000e+00 : f32
    %502 = vector.broadcast %cst_134 : f32 to vector<8x16xf32>
    %503 = arith.subf %502, %495 : vector<8x16xf32>
    %504 = arith.mulf %503, %501 : vector<8x16xf32>
    %505 = arith.mulf %495, %482 : vector<8x16xf32>
    %506 = arith.addf %504, %505 : vector<8x16xf32>
    %c0_135 = arith.constant 0 : index
    %c0_136 = arith.constant 0 : index
    %c0_137 = arith.constant 0 : index
    %507 = vector.load %arg21[%c0_135, %c0_136, %c0_137] : memref<8x8x16xf32, #tpu.memory_space<vmem>>, vector<1x8x16xf32>
    %508 = vector.shape_cast %507 : vector<1x8x16xf32> to vector<8x16xf32>
    %509 = vector.shape_cast %506 : vector<8x16xf32> to vector<1x8x16xf32>
    tpu.vector_store %arg21[%c0_135, %c0_136, %c0_137], %509 {strides = array<i32>} : memref<8x8x16xf32, #tpu.memory_space<vmem>>, vector<1x8x16xf32>,
    %cst_138 = arith.constant dense<0.000000e+00> : vector<8x48xf32>
    %510 = tpu.matmul %506, %472, %cst_138 {dimension_numbers = #tpu.dot_dimension_numbers<[1], [0], [0], [1], [0, 0, 1, 1], [], []>} : vector<8x16xf32>, vector<16x48xf32>, vector<8x48xf32> -> vector<8x48xf32>
    %511 = vector.extract_strided_slice %481 {offsets = [1, 0, 0], sizes = [1, 8, 48], strides = [1, 1, 1]} : vector<8x8x48xf32> to vector<1x8x48xf32>
    %512 = vector.shape_cast %511 : vector<1x8x48xf32> to vector<8x48xf32>
    %513 = vector.extract_strided_slice %512 {offsets = [0, 0], sizes = [8, 32], strides = [1, 1]} : vector<8x48xf32> to vector<8x32xf32>
    %514 = vector.extract_strided_slice %510 {offsets = [0, 0], sizes = [8, 32], strides = [1, 1]} : vector<8x48xf32> to vector<8x32xf32>
    %515 = arith.addf %513, %514 : vector<8x32xf32>
    %516 = arith.negf %515 : vector<8x32xf32>
    %517 = math.exp %516 : vector<8x32xf32>
    %cst_139 = arith.constant 1.000000e+00 : f32
    %518 = vector.broadcast %cst_139 : f32 to vector<8x32xf32>
    %519 = arith.addf %518, %517 : vector<8x32xf32>
    %520 = arith.divf %518, %519 : vector<8x32xf32>
    %521 = vector.extract_strided_slice %520 {offsets = [0, 0], sizes = [8, 16], strides = [1, 1]} : vector<8x32xf32> to vector<8x16xf32>
    %522 = vector.extract_strided_slice %520 {offsets = [0, 16], sizes = [8, 16], strides = [1, 1]} : vector<8x32xf32> to vector<8x16xf32>
    %523 = vector.extract_strided_slice %512 {offsets = [0, 32], sizes = [8, 16], strides = [1, 1]} : vector<8x48xf32> to vector<8x16xf32>
    %524 = vector.extract_strided_slice %510 {offsets = [0, 32], sizes = [8, 16], strides = [1, 1]} : vector<8x48xf32> to vector<8x16xf32>
    %525 = arith.addf %524, %477 : vector<8x16xf32>
    %526 = arith.mulf %521, %525 : vector<8x16xf32>
    %527 = arith.addf %523, %526 : vector<8x16xf32>
    %528 = math.tanh %527 : vector<8x16xf32>
    %cst_140 = arith.constant 1.000000e+00 : f32
    %529 = vector.broadcast %cst_140 : f32 to vector<8x16xf32>
    %530 = arith.subf %529, %522 : vector<8x16xf32>
    %531 = arith.mulf %530, %528 : vector<8x16xf32>
    %532 = arith.mulf %522, %506 : vector<8x16xf32>
    %533 = arith.addf %531, %532 : vector<8x16xf32>
    %c1_141 = arith.constant 1 : index
    %c0_142 = arith.constant 0 : index
    %c0_143 = arith.constant 0 : index
    %534 = vector.load %arg21[%c1_141, %c0_142, %c0_143] : memref<8x8x16xf32, #tpu.memory_space<vmem>>, vector<1x8x16xf32>
    %535 = vector.shape_cast %534 : vector<1x8x16xf32> to vector<8x16xf32>
    %536 = vector.shape_cast %533 : vector<8x16xf32> to vector<1x8x16xf32>
    tpu.vector_store %arg21[%c1_141, %c0_142, %c0_143], %536 {strides = array<i32>} : memref<8x8x16xf32, #tpu.memory_space<vmem>>, vector<1x8x16xf32>,
    %cst_144 = arith.constant dense<0.000000e+00> : vector<8x48xf32>
    %537 = tpu.matmul %533, %472, %cst_144 {dimension_numbers = #tpu.dot_dimension_numbers<[1], [0], [0], [1], [0, 0, 1, 1], [], []>} : vector<8x16xf32>, vector<16x48xf32>, vector<8x48xf32> -> vector<8x48xf32>
    %538 = vector.extract_strided_slice %481 {offsets = [2, 0, 0], sizes = [1, 8, 48], strides = [1, 1, 1]} : vector<8x8x48xf32> to vector<1x8x48xf32>
    %539 = vector.shape_cast %538 : vector<1x8x48xf32> to vector<8x48xf32>
    %540 = vector.extract_strided_slice %539 {offsets = [0, 0], sizes = [8, 32], strides = [1, 1]} : vector<8x48xf32> to vector<8x32xf32>
    %541 = vector.extract_strided_slice %537 {offsets = [0, 0], sizes = [8, 32], strides = [1, 1]} : vector<8x48xf32> to vector<8x32xf32>
    %542 = arith.addf %540, %541 : vector<8x32xf32>
    %543 = arith.negf %542 : vector<8x32xf32>
    %544 = math.exp %543 : vector<8x32xf32>
    %cst_145 = arith.constant 1.000000e+00 : f32
    %545 = vector.broadcast %cst_145 : f32 to vector<8x32xf32>
    %546 = arith.addf %545, %544 : vector<8x32xf32>
    %547 = arith.divf %545, %546 : vector<8x32xf32>
    %548 = vector.extract_strided_slice %547 {offsets = [0, 0], sizes = [8, 16], strides = [1, 1]} : vector<8x32xf32> to vector<8x16xf32>
    %549 = vector.extract_strided_slice %547 {offsets = [0, 16], sizes = [8, 16], strides = [1, 1]} : vector<8x32xf32> to vector<8x16xf32>
    %550 = vector.extract_strided_slice %539 {offsets = [0, 32], sizes = [8, 16], strides = [1, 1]} : vector<8x48xf32> to vector<8x16xf32>
    %551 = vector.extract_strided_slice %537 {offsets = [0, 32], sizes = [8, 16], strides = [1, 1]} : vector<8x48xf32> to vector<8x16xf32>
    %552 = arith.addf %551, %477 : vector<8x16xf32>
    %553 = arith.mulf %548, %552 : vector<8x16xf32>
    %554 = arith.addf %550, %553 : vector<8x16xf32>
    %555 = math.tanh %554 : vector<8x16xf32>
    %cst_146 = arith.constant 1.000000e+00 : f32
    %556 = vector.broadcast %cst_146 : f32 to vector<8x16xf32>
    %557 = arith.subf %556, %549 : vector<8x16xf32>
    %558 = arith.mulf %557, %555 : vector<8x16xf32>
    %559 = arith.mulf %549, %533 : vector<8x16xf32>
    %560 = arith.addf %558, %559 : vector<8x16xf32>
    %c2_147 = arith.constant 2 : index
    %c0_148 = arith.constant 0 : index
    %c0_149 = arith.constant 0 : index
    %561 = vector.load %arg21[%c2_147, %c0_148, %c0_149] : memref<8x8x16xf32, #tpu.memory_space<vmem>>, vector<1x8x16xf32>
    %562 = vector.shape_cast %561 : vector<1x8x16xf32> to vector<8x16xf32>
    %563 = vector.shape_cast %560 : vector<8x16xf32> to vector<1x8x16xf32>
    tpu.vector_store %arg21[%c2_147, %c0_148, %c0_149], %563 {strides = array<i32>} : memref<8x8x16xf32, #tpu.memory_space<vmem>>, vector<1x8x16xf32>,
    %cst_150 = arith.constant dense<0.000000e+00> : vector<8x48xf32>
    %564 = tpu.matmul %560, %472, %cst_150 {dimension_numbers = #tpu.dot_dimension_numbers<[1], [0], [0], [1], [0, 0, 1, 1], [], []>} : vector<8x16xf32>, vector<16x48xf32>, vector<8x48xf32> -> vector<8x48xf32>
    %565 = vector.extract_strided_slice %481 {offsets = [3, 0, 0], sizes = [1, 8, 48], strides = [1, 1, 1]} : vector<8x8x48xf32> to vector<1x8x48xf32>
    %566 = vector.shape_cast %565 : vector<1x8x48xf32> to vector<8x48xf32>
    %567 = vector.extract_strided_slice %566 {offsets = [0, 0], sizes = [8, 32], strides = [1, 1]} : vector<8x48xf32> to vector<8x32xf32>
    %568 = vector.extract_strided_slice %564 {offsets = [0, 0], sizes = [8, 32], strides = [1, 1]} : vector<8x48xf32> to vector<8x32xf32>
    %569 = arith.addf %567, %568 : vector<8x32xf32>
    %570 = arith.negf %569 : vector<8x32xf32>
    %571 = math.exp %570 : vector<8x32xf32>
    %cst_151 = arith.constant 1.000000e+00 : f32
    %572 = vector.broadcast %cst_151 : f32 to vector<8x32xf32>
    %573 = arith.addf %572, %571 : vector<8x32xf32>
    %574 = arith.divf %572, %573 : vector<8x32xf32>
    %575 = vector.extract_strided_slice %574 {offsets = [0, 0], sizes = [8, 16], strides = [1, 1]} : vector<8x32xf32> to vector<8x16xf32>
    %576 = vector.extract_strided_slice %574 {offsets = [0, 16], sizes = [8, 16], strides = [1, 1]} : vector<8x32xf32> to vector<8x16xf32>
    %577 = vector.extract_strided_slice %566 {offsets = [0, 32], sizes = [8, 16], strides = [1, 1]} : vector<8x48xf32> to vector<8x16xf32>
    %578 = vector.extract_strided_slice %564 {offsets = [0, 32], sizes = [8, 16], strides = [1, 1]} : vector<8x48xf32> to vector<8x16xf32>
    %579 = arith.addf %578, %477 : vector<8x16xf32>
    %580 = arith.mulf %575, %579 : vector<8x16xf32>
    %581 = arith.addf %577, %580 : vector<8x16xf32>
    %582 = math.tanh %581 : vector<8x16xf32>
    %cst_152 = arith.constant 1.000000e+00 : f32
    %583 = vector.broadcast %cst_152 : f32 to vector<8x16xf32>
    %584 = arith.subf %583, %576 : vector<8x16xf32>
    %585 = arith.mulf %584, %582 : vector<8x16xf32>
    %586 = arith.mulf %576, %560 : vector<8x16xf32>
    %587 = arith.addf %585, %586 : vector<8x16xf32>
    %c3_153 = arith.constant 3 : index
    %c0_154 = arith.constant 0 : index
    %c0_155 = arith.constant 0 : index
    %588 = vector.load %arg21[%c3_153, %c0_154, %c0_155] : memref<8x8x16xf32, #tpu.memory_space<vmem>>, vector<1x8x16xf32>
    %589 = vector.shape_cast %588 : vector<1x8x16xf32> to vector<8x16xf32>
    %590 = vector.shape_cast %587 : vector<8x16xf32> to vector<1x8x16xf32>
    tpu.vector_store %arg21[%c3_153, %c0_154, %c0_155], %590 {strides = array<i32>} : memref<8x8x16xf32, #tpu.memory_space<vmem>>, vector<1x8x16xf32>,
    %cst_156 = arith.constant dense<0.000000e+00> : vector<8x48xf32>
    %591 = tpu.matmul %587, %472, %cst_156 {dimension_numbers = #tpu.dot_dimension_numbers<[1], [0], [0], [1], [0, 0, 1, 1], [], []>} : vector<8x16xf32>, vector<16x48xf32>, vector<8x48xf32> -> vector<8x48xf32>
    %592 = vector.extract_strided_slice %481 {offsets = [4, 0, 0], sizes = [1, 8, 48], strides = [1, 1, 1]} : vector<8x8x48xf32> to vector<1x8x48xf32>
    %593 = vector.shape_cast %592 : vector<1x8x48xf32> to vector<8x48xf32>
    %594 = vector.extract_strided_slice %593 {offsets = [0, 0], sizes = [8, 32], strides = [1, 1]} : vector<8x48xf32> to vector<8x32xf32>
    %595 = vector.extract_strided_slice %591 {offsets = [0, 0], sizes = [8, 32], strides = [1, 1]} : vector<8x48xf32> to vector<8x32xf32>
    %596 = arith.addf %594, %595 : vector<8x32xf32>
    %597 = arith.negf %596 : vector<8x32xf32>
    %598 = math.exp %597 : vector<8x32xf32>
    %cst_157 = arith.constant 1.000000e+00 : f32
    %599 = vector.broadcast %cst_157 : f32 to vector<8x32xf32>
    %600 = arith.addf %599, %598 : vector<8x32xf32>
    %601 = arith.divf %599, %600 : vector<8x32xf32>
    %602 = vector.extract_strided_slice %601 {offsets = [0, 0], sizes = [8, 16], strides = [1, 1]} : vector<8x32xf32> to vector<8x16xf32>
    %603 = vector.extract_strided_slice %601 {offsets = [0, 16], sizes = [8, 16], strides = [1, 1]} : vector<8x32xf32> to vector<8x16xf32>
    %604 = vector.extract_strided_slice %593 {offsets = [0, 32], sizes = [8, 16], strides = [1, 1]} : vector<8x48xf32> to vector<8x16xf32>
    %605 = vector.extract_strided_slice %591 {offsets = [0, 32], sizes = [8, 16], strides = [1, 1]} : vector<8x48xf32> to vector<8x16xf32>
    %606 = arith.addf %605, %477 : vector<8x16xf32>
    %607 = arith.mulf %602, %606 : vector<8x16xf32>
    %608 = arith.addf %604, %607 : vector<8x16xf32>
    %609 = math.tanh %608 : vector<8x16xf32>
    %cst_158 = arith.constant 1.000000e+00 : f32
    %610 = vector.broadcast %cst_158 : f32 to vector<8x16xf32>
    %611 = arith.subf %610, %603 : vector<8x16xf32>
    %612 = arith.mulf %611, %609 : vector<8x16xf32>
    %613 = arith.mulf %603, %587 : vector<8x16xf32>
    %614 = arith.addf %612, %613 : vector<8x16xf32>
    %c4_159 = arith.constant 4 : index
    %c0_160 = arith.constant 0 : index
    %c0_161 = arith.constant 0 : index
    %615 = vector.load %arg21[%c4_159, %c0_160, %c0_161] : memref<8x8x16xf32, #tpu.memory_space<vmem>>, vector<1x8x16xf32>
    %616 = vector.shape_cast %615 : vector<1x8x16xf32> to vector<8x16xf32>
    %617 = vector.shape_cast %614 : vector<8x16xf32> to vector<1x8x16xf32>
    tpu.vector_store %arg21[%c4_159, %c0_160, %c0_161], %617 {strides = array<i32>} : memref<8x8x16xf32, #tpu.memory_space<vmem>>, vector<1x8x16xf32>,
    %cst_162 = arith.constant dense<0.000000e+00> : vector<8x48xf32>
    %618 = tpu.matmul %614, %472, %cst_162 {dimension_numbers = #tpu.dot_dimension_numbers<[1], [0], [0], [1], [0, 0, 1, 1], [], []>} : vector<8x16xf32>, vector<16x48xf32>, vector<8x48xf32> -> vector<8x48xf32>
    %619 = vector.extract_strided_slice %481 {offsets = [5, 0, 0], sizes = [1, 8, 48], strides = [1, 1, 1]} : vector<8x8x48xf32> to vector<1x8x48xf32>
    %620 = vector.shape_cast %619 : vector<1x8x48xf32> to vector<8x48xf32>
    %621 = vector.extract_strided_slice %620 {offsets = [0, 0], sizes = [8, 32], strides = [1, 1]} : vector<8x48xf32> to vector<8x32xf32>
    %622 = vector.extract_strided_slice %618 {offsets = [0, 0], sizes = [8, 32], strides = [1, 1]} : vector<8x48xf32> to vector<8x32xf32>
    %623 = arith.addf %621, %622 : vector<8x32xf32>
    %624 = arith.negf %623 : vector<8x32xf32>
    %625 = math.exp %624 : vector<8x32xf32>
    %cst_163 = arith.constant 1.000000e+00 : f32
    %626 = vector.broadcast %cst_163 : f32 to vector<8x32xf32>
    %627 = arith.addf %626, %625 : vector<8x32xf32>
    %628 = arith.divf %626, %627 : vector<8x32xf32>
    %629 = vector.extract_strided_slice %628 {offsets = [0, 0], sizes = [8, 16], strides = [1, 1]} : vector<8x32xf32> to vector<8x16xf32>
    %630 = vector.extract_strided_slice %628 {offsets = [0, 16], sizes = [8, 16], strides = [1, 1]} : vector<8x32xf32> to vector<8x16xf32>
    %631 = vector.extract_strided_slice %620 {offsets = [0, 32], sizes = [8, 16], strides = [1, 1]} : vector<8x48xf32> to vector<8x16xf32>
    %632 = vector.extract_strided_slice %618 {offsets = [0, 32], sizes = [8, 16], strides = [1, 1]} : vector<8x48xf32> to vector<8x16xf32>
    %633 = arith.addf %632, %477 : vector<8x16xf32>
    %634 = arith.mulf %629, %633 : vector<8x16xf32>
    %635 = arith.addf %631, %634 : vector<8x16xf32>
    %636 = math.tanh %635 : vector<8x16xf32>
    %cst_164 = arith.constant 1.000000e+00 : f32
    %637 = vector.broadcast %cst_164 : f32 to vector<8x16xf32>
    %638 = arith.subf %637, %630 : vector<8x16xf32>
    %639 = arith.mulf %638, %636 : vector<8x16xf32>
    %640 = arith.mulf %630, %614 : vector<8x16xf32>
    %641 = arith.addf %639, %640 : vector<8x16xf32>
    %c5_165 = arith.constant 5 : index
    %c0_166 = arith.constant 0 : index
    %c0_167 = arith.constant 0 : index
    %642 = vector.load %arg21[%c5_165, %c0_166, %c0_167] : memref<8x8x16xf32, #tpu.memory_space<vmem>>, vector<1x8x16xf32>
    %643 = vector.shape_cast %642 : vector<1x8x16xf32> to vector<8x16xf32>
    %644 = vector.shape_cast %641 : vector<8x16xf32> to vector<1x8x16xf32>
    tpu.vector_store %arg21[%c5_165, %c0_166, %c0_167], %644 {strides = array<i32>} : memref<8x8x16xf32, #tpu.memory_space<vmem>>, vector<1x8x16xf32>,
    %cst_168 = arith.constant dense<0.000000e+00> : vector<8x48xf32>
    %645 = tpu.matmul %641, %472, %cst_168 {dimension_numbers = #tpu.dot_dimension_numbers<[1], [0], [0], [1], [0, 0, 1, 1], [], []>} : vector<8x16xf32>, vector<16x48xf32>, vector<8x48xf32> -> vector<8x48xf32>
    %646 = vector.extract_strided_slice %481 {offsets = [6, 0, 0], sizes = [1, 8, 48], strides = [1, 1, 1]} : vector<8x8x48xf32> to vector<1x8x48xf32>
    %647 = vector.shape_cast %646 : vector<1x8x48xf32> to vector<8x48xf32>
    %648 = vector.extract_strided_slice %647 {offsets = [0, 0], sizes = [8, 32], strides = [1, 1]} : vector<8x48xf32> to vector<8x32xf32>
    %649 = vector.extract_strided_slice %645 {offsets = [0, 0], sizes = [8, 32], strides = [1, 1]} : vector<8x48xf32> to vector<8x32xf32>
    %650 = arith.addf %648, %649 : vector<8x32xf32>
    %651 = arith.negf %650 : vector<8x32xf32>
    %652 = math.exp %651 : vector<8x32xf32>
    %cst_169 = arith.constant 1.000000e+00 : f32
    %653 = vector.broadcast %cst_169 : f32 to vector<8x32xf32>
    %654 = arith.addf %653, %652 : vector<8x32xf32>
    %655 = arith.divf %653, %654 : vector<8x32xf32>
    %656 = vector.extract_strided_slice %655 {offsets = [0, 0], sizes = [8, 16], strides = [1, 1]} : vector<8x32xf32> to vector<8x16xf32>
    %657 = vector.extract_strided_slice %655 {offsets = [0, 16], sizes = [8, 16], strides = [1, 1]} : vector<8x32xf32> to vector<8x16xf32>
    %658 = vector.extract_strided_slice %647 {offsets = [0, 32], sizes = [8, 16], strides = [1, 1]} : vector<8x48xf32> to vector<8x16xf32>
    %659 = vector.extract_strided_slice %645 {offsets = [0, 32], sizes = [8, 16], strides = [1, 1]} : vector<8x48xf32> to vector<8x16xf32>
    %660 = arith.addf %659, %477 : vector<8x16xf32>
    %661 = arith.mulf %656, %660 : vector<8x16xf32>
    %662 = arith.addf %658, %661 : vector<8x16xf32>
    %663 = math.tanh %662 : vector<8x16xf32>
    %cst_170 = arith.constant 1.000000e+00 : f32
    %664 = vector.broadcast %cst_170 : f32 to vector<8x16xf32>
    %665 = arith.subf %664, %657 : vector<8x16xf32>
    %666 = arith.mulf %665, %663 : vector<8x16xf32>
    %667 = arith.mulf %657, %641 : vector<8x16xf32>
    %668 = arith.addf %666, %667 : vector<8x16xf32>
    %c6_171 = arith.constant 6 : index
    %c0_172 = arith.constant 0 : index
    %c0_173 = arith.constant 0 : index
    %669 = vector.load %arg21[%c6_171, %c0_172, %c0_173] : memref<8x8x16xf32, #tpu.memory_space<vmem>>, vector<1x8x16xf32>
    %670 = vector.shape_cast %669 : vector<1x8x16xf32> to vector<8x16xf32>
    %671 = vector.shape_cast %668 : vector<8x16xf32> to vector<1x8x16xf32>
    tpu.vector_store %arg21[%c6_171, %c0_172, %c0_173], %671 {strides = array<i32>} : memref<8x8x16xf32, #tpu.memory_space<vmem>>, vector<1x8x16xf32>,
    %cst_174 = arith.constant dense<0.000000e+00> : vector<8x48xf32>
    %672 = tpu.matmul %668, %472, %cst_174 {dimension_numbers = #tpu.dot_dimension_numbers<[1], [0], [0], [1], [0, 0, 1, 1], [], []>} : vector<8x16xf32>, vector<16x48xf32>, vector<8x48xf32> -> vector<8x48xf32>
    %673 = vector.extract_strided_slice %481 {offsets = [7, 0, 0], sizes = [1, 8, 48], strides = [1, 1, 1]} : vector<8x8x48xf32> to vector<1x8x48xf32>
    %674 = vector.shape_cast %673 : vector<1x8x48xf32> to vector<8x48xf32>
    %675 = vector.extract_strided_slice %674 {offsets = [0, 0], sizes = [8, 32], strides = [1, 1]} : vector<8x48xf32> to vector<8x32xf32>
    %676 = vector.extract_strided_slice %672 {offsets = [0, 0], sizes = [8, 32], strides = [1, 1]} : vector<8x48xf32> to vector<8x32xf32>
    %677 = arith.addf %675, %676 : vector<8x32xf32>
    %678 = arith.negf %677 : vector<8x32xf32>
    %679 = math.exp %678 : vector<8x32xf32>
    %cst_175 = arith.constant 1.000000e+00 : f32
    %680 = vector.broadcast %cst_175 : f32 to vector<8x32xf32>
    %681 = arith.addf %680, %679 : vector<8x32xf32>
    %682 = arith.divf %680, %681 : vector<8x32xf32>
    %683 = vector.extract_strided_slice %682 {offsets = [0, 0], sizes = [8, 16], strides = [1, 1]} : vector<8x32xf32> to vector<8x16xf32>
    %684 = vector.extract_strided_slice %682 {offsets = [0, 16], sizes = [8, 16], strides = [1, 1]} : vector<8x32xf32> to vector<8x16xf32>
    %685 = vector.extract_strided_slice %674 {offsets = [0, 32], sizes = [8, 16], strides = [1, 1]} : vector<8x48xf32> to vector<8x16xf32>
    %686 = vector.extract_strided_slice %672 {offsets = [0, 32], sizes = [8, 16], strides = [1, 1]} : vector<8x48xf32> to vector<8x16xf32>
    %687 = arith.addf %686, %477 : vector<8x16xf32>
    %688 = arith.mulf %683, %687 : vector<8x16xf32>
    %689 = arith.addf %685, %688 : vector<8x16xf32>
    %690 = math.tanh %689 : vector<8x16xf32>
    %cst_176 = arith.constant 1.000000e+00 : f32
    %691 = vector.broadcast %cst_176 : f32 to vector<8x16xf32>
    %692 = arith.subf %691, %684 : vector<8x16xf32>
    %693 = arith.mulf %692, %690 : vector<8x16xf32>
    %694 = arith.mulf %684, %668 : vector<8x16xf32>
    %695 = arith.addf %693, %694 : vector<8x16xf32>
    %c7_177 = arith.constant 7 : index
    %c0_178 = arith.constant 0 : index
    %c0_179 = arith.constant 0 : index
    %696 = vector.load %arg21[%c7_177, %c0_178, %c0_179] : memref<8x8x16xf32, #tpu.memory_space<vmem>>, vector<1x8x16xf32>
    %697 = vector.shape_cast %696 : vector<1x8x16xf32> to vector<8x16xf32>
    %698 = vector.shape_cast %695 : vector<8x16xf32> to vector<1x8x16xf32>
    tpu.vector_store %arg21[%c7_177, %c0_178, %c0_179], %698 {strides = array<i32>} : memref<8x8x16xf32, #tpu.memory_space<vmem>>, vector<1x8x16xf32>,
    %c0_180 = arith.constant 0 : index
    %c0_181 = arith.constant 0 : index
    %c0_182 = arith.constant 0 : index
    %699 = vector.load %arg21[%c0_180, %c0_181, %c0_182] : memref<8x8x16xf32, #tpu.memory_space<vmem>>, vector<8x8x16xf32>
    %700 = vector.shape_cast %699 : vector<8x8x16xf32> to vector<64x16xf32>
    %c0_183 = arith.constant 0 : index
    %c0_184 = arith.constant 0 : index
    %701 = vector.load %arg13[%c0_183, %c0_184] : memref<16x48xf32, #tpu.memory_space<vmem>>, vector<16x48xf32>
    %c0_185 = arith.constant 0 : index
    %c0_186 = arith.constant 0 : index
    %702 = vector.load %arg14[%c0_185, %c0_186] : memref<16x48xf32, #tpu.memory_space<vmem>>, vector<16x48xf32>
    %c0_187 = arith.constant 0 : index
    %c0_188 = arith.constant 0 : index
    %703 = vector.load %arg15[%c0_187, %c0_188] : memref<1x64xf32, #tpu.memory_space<vmem>>, vector<1x64xf32>
    %704 = vector.extract_strided_slice %703 {offsets = [0, 0], sizes = [1, 48], strides = [1, 1]} : vector<1x64xf32> to vector<1x48xf32>
    %705 = vector.extract_strided_slice %703 {offsets = [0, 48], sizes = [1, 16], strides = [1, 1]} : vector<1x64xf32> to vector<1x16xf32>
    %706 = vector.shape_cast %705 : vector<1x16xf32> to vector<1x16xf32>
    %707 = vector.broadcast %706 : vector<1x16xf32> to vector<8x16xf32>
    %cst_189 = arith.constant dense<0.000000e+00> : vector<64x48xf32>
    %708 = tpu.matmul %700, %701, %cst_189 {dimension_numbers = #tpu.dot_dimension_numbers<[1], [0], [0], [1], [0, 0, 1, 1], [], []>} : vector<64x16xf32>, vector<16x48xf32>, vector<64x48xf32> -> vector<64x48xf32>
    %709 = vector.broadcast %704 : vector<1x48xf32> to vector<64x48xf32>
    %710 = arith.addf %708, %709 : vector<64x48xf32>
    %711 = vector.shape_cast %710 : vector<64x48xf32> to vector<8x8x48xf32>
    %cst_190 = arith.constant 0.000000e+00 : f32
    %712 = vector.broadcast %cst_190 : f32 to vector<8x16xf32>
    %cst_191 = arith.constant dense<0.000000e+00> : vector<8x48xf32>
    %713 = tpu.matmul %712, %702, %cst_191 {dimension_numbers = #tpu.dot_dimension_numbers<[1], [0], [0], [1], [0, 0, 1, 1], [], []>} : vector<8x16xf32>, vector<16x48xf32>, vector<8x48xf32> -> vector<8x48xf32>
    %714 = vector.extract_strided_slice %711 {offsets = [0, 0, 0], sizes = [1, 8, 48], strides = [1, 1, 1]} : vector<8x8x48xf32> to vector<1x8x48xf32>
    %715 = vector.shape_cast %714 : vector<1x8x48xf32> to vector<8x48xf32>
    %716 = vector.extract_strided_slice %715 {offsets = [0, 0], sizes = [8, 32], strides = [1, 1]} : vector<8x48xf32> to vector<8x32xf32>
    %717 = vector.extract_strided_slice %713 {offsets = [0, 0], sizes = [8, 32], strides = [1, 1]} : vector<8x48xf32> to vector<8x32xf32>
    %718 = arith.addf %716, %717 : vector<8x32xf32>
    %719 = arith.negf %718 : vector<8x32xf32>
    %720 = math.exp %719 : vector<8x32xf32>
    %cst_192 = arith.constant 1.000000e+00 : f32
    %721 = vector.broadcast %cst_192 : f32 to vector<8x32xf32>
    %722 = arith.addf %721, %720 : vector<8x32xf32>
    %723 = arith.divf %721, %722 : vector<8x32xf32>
    %724 = vector.extract_strided_slice %723 {offsets = [0, 0], sizes = [8, 16], strides = [1, 1]} : vector<8x32xf32> to vector<8x16xf32>
    %725 = vector.extract_strided_slice %723 {offsets = [0, 16], sizes = [8, 16], strides = [1, 1]} : vector<8x32xf32> to vector<8x16xf32>
    %726 = vector.extract_strided_slice %715 {offsets = [0, 32], sizes = [8, 16], strides = [1, 1]} : vector<8x48xf32> to vector<8x16xf32>
    %727 = vector.extract_strided_slice %713 {offsets = [0, 32], sizes = [8, 16], strides = [1, 1]} : vector<8x48xf32> to vector<8x16xf32>
    %728 = arith.addf %727, %707 : vector<8x16xf32>
    %729 = arith.mulf %724, %728 : vector<8x16xf32>
    %730 = arith.addf %726, %729 : vector<8x16xf32>
    %731 = math.tanh %730 : vector<8x16xf32>
    %cst_193 = arith.constant 1.000000e+00 : f32
    %732 = vector.broadcast %cst_193 : f32 to vector<8x16xf32>
    %733 = arith.subf %732, %725 : vector<8x16xf32>
    %734 = arith.mulf %733, %731 : vector<8x16xf32>
    %735 = arith.mulf %725, %712 : vector<8x16xf32>
    %736 = arith.addf %734, %735 : vector<8x16xf32>
    %c0_194 = arith.constant 0 : index
    %c0_195 = arith.constant 0 : index
    %c0_196 = arith.constant 0 : index
    %737 = vector.load %arg21[%c0_194, %c0_195, %c0_196] : memref<8x8x16xf32, #tpu.memory_space<vmem>>, vector<1x8x16xf32>
    %738 = vector.shape_cast %737 : vector<1x8x16xf32> to vector<8x16xf32>
    %739 = vector.shape_cast %736 : vector<8x16xf32> to vector<1x8x16xf32>
    tpu.vector_store %arg21[%c0_194, %c0_195, %c0_196], %739 {strides = array<i32>} : memref<8x8x16xf32, #tpu.memory_space<vmem>>, vector<1x8x16xf32>,
    %cst_197 = arith.constant dense<0.000000e+00> : vector<8x48xf32>
    %740 = tpu.matmul %736, %702, %cst_197 {dimension_numbers = #tpu.dot_dimension_numbers<[1], [0], [0], [1], [0, 0, 1, 1], [], []>} : vector<8x16xf32>, vector<16x48xf32>, vector<8x48xf32> -> vector<8x48xf32>
    %741 = vector.extract_strided_slice %711 {offsets = [1, 0, 0], sizes = [1, 8, 48], strides = [1, 1, 1]} : vector<8x8x48xf32> to vector<1x8x48xf32>
    %742 = vector.shape_cast %741 : vector<1x8x48xf32> to vector<8x48xf32>
    %743 = vector.extract_strided_slice %742 {offsets = [0, 0], sizes = [8, 32], strides = [1, 1]} : vector<8x48xf32> to vector<8x32xf32>
    %744 = vector.extract_strided_slice %740 {offsets = [0, 0], sizes = [8, 32], strides = [1, 1]} : vector<8x48xf32> to vector<8x32xf32>
    %745 = arith.addf %743, %744 : vector<8x32xf32>
    %746 = arith.negf %745 : vector<8x32xf32>
    %747 = math.exp %746 : vector<8x32xf32>
    %cst_198 = arith.constant 1.000000e+00 : f32
    %748 = vector.broadcast %cst_198 : f32 to vector<8x32xf32>
    %749 = arith.addf %748, %747 : vector<8x32xf32>
    %750 = arith.divf %748, %749 : vector<8x32xf32>
    %751 = vector.extract_strided_slice %750 {offsets = [0, 0], sizes = [8, 16], strides = [1, 1]} : vector<8x32xf32> to vector<8x16xf32>
    %752 = vector.extract_strided_slice %750 {offsets = [0, 16], sizes = [8, 16], strides = [1, 1]} : vector<8x32xf32> to vector<8x16xf32>
    %753 = vector.extract_strided_slice %742 {offsets = [0, 32], sizes = [8, 16], strides = [1, 1]} : vector<8x48xf32> to vector<8x16xf32>
    %754 = vector.extract_strided_slice %740 {offsets = [0, 32], sizes = [8, 16], strides = [1, 1]} : vector<8x48xf32> to vector<8x16xf32>
    %755 = arith.addf %754, %707 : vector<8x16xf32>
    %756 = arith.mulf %751, %755 : vector<8x16xf32>
    %757 = arith.addf %753, %756 : vector<8x16xf32>
    %758 = math.tanh %757 : vector<8x16xf32>
    %cst_199 = arith.constant 1.000000e+00 : f32
    %759 = vector.broadcast %cst_199 : f32 to vector<8x16xf32>
    %760 = arith.subf %759, %752 : vector<8x16xf32>
    %761 = arith.mulf %760, %758 : vector<8x16xf32>
    %762 = arith.mulf %752, %736 : vector<8x16xf32>
    %763 = arith.addf %761, %762 : vector<8x16xf32>
    %c1_200 = arith.constant 1 : index
    %c0_201 = arith.constant 0 : index
    %c0_202 = arith.constant 0 : index
    %764 = vector.load %arg21[%c1_200, %c0_201, %c0_202] : memref<8x8x16xf32, #tpu.memory_space<vmem>>, vector<1x8x16xf32>
    %765 = vector.shape_cast %764 : vector<1x8x16xf32> to vector<8x16xf32>
    %766 = vector.shape_cast %763 : vector<8x16xf32> to vector<1x8x16xf32>
    tpu.vector_store %arg21[%c1_200, %c0_201, %c0_202], %766 {strides = array<i32>} : memref<8x8x16xf32, #tpu.memory_space<vmem>>, vector<1x8x16xf32>,
    %cst_203 = arith.constant dense<0.000000e+00> : vector<8x48xf32>
    %767 = tpu.matmul %763, %702, %cst_203 {dimension_numbers = #tpu.dot_dimension_numbers<[1], [0], [0], [1], [0, 0, 1, 1], [], []>} : vector<8x16xf32>, vector<16x48xf32>, vector<8x48xf32> -> vector<8x48xf32>
    %768 = vector.extract_strided_slice %711 {offsets = [2, 0, 0], sizes = [1, 8, 48], strides = [1, 1, 1]} : vector<8x8x48xf32> to vector<1x8x48xf32>
    %769 = vector.shape_cast %768 : vector<1x8x48xf32> to vector<8x48xf32>
    %770 = vector.extract_strided_slice %769 {offsets = [0, 0], sizes = [8, 32], strides = [1, 1]} : vector<8x48xf32> to vector<8x32xf32>
    %771 = vector.extract_strided_slice %767 {offsets = [0, 0], sizes = [8, 32], strides = [1, 1]} : vector<8x48xf32> to vector<8x32xf32>
    %772 = arith.addf %770, %771 : vector<8x32xf32>
    %773 = arith.negf %772 : vector<8x32xf32>
    %774 = math.exp %773 : vector<8x32xf32>
    %cst_204 = arith.constant 1.000000e+00 : f32
    %775 = vector.broadcast %cst_204 : f32 to vector<8x32xf32>
    %776 = arith.addf %775, %774 : vector<8x32xf32>
    %777 = arith.divf %775, %776 : vector<8x32xf32>
    %778 = vector.extract_strided_slice %777 {offsets = [0, 0], sizes = [8, 16], strides = [1, 1]} : vector<8x32xf32> to vector<8x16xf32>
    %779 = vector.extract_strided_slice %777 {offsets = [0, 16], sizes = [8, 16], strides = [1, 1]} : vector<8x32xf32> to vector<8x16xf32>
    %780 = vector.extract_strided_slice %769 {offsets = [0, 32], sizes = [8, 16], strides = [1, 1]} : vector<8x48xf32> to vector<8x16xf32>
    %781 = vector.extract_strided_slice %767 {offsets = [0, 32], sizes = [8, 16], strides = [1, 1]} : vector<8x48xf32> to vector<8x16xf32>
    %782 = arith.addf %781, %707 : vector<8x16xf32>
    %783 = arith.mulf %778, %782 : vector<8x16xf32>
    %784 = arith.addf %780, %783 : vector<8x16xf32>
    %785 = math.tanh %784 : vector<8x16xf32>
    %cst_205 = arith.constant 1.000000e+00 : f32
    %786 = vector.broadcast %cst_205 : f32 to vector<8x16xf32>
    %787 = arith.subf %786, %779 : vector<8x16xf32>
    %788 = arith.mulf %787, %785 : vector<8x16xf32>
    %789 = arith.mulf %779, %763 : vector<8x16xf32>
    %790 = arith.addf %788, %789 : vector<8x16xf32>
    %c2_206 = arith.constant 2 : index
    %c0_207 = arith.constant 0 : index
    %c0_208 = arith.constant 0 : index
    %791 = vector.load %arg21[%c2_206, %c0_207, %c0_208] : memref<8x8x16xf32, #tpu.memory_space<vmem>>, vector<1x8x16xf32>
    %792 = vector.shape_cast %791 : vector<1x8x16xf32> to vector<8x16xf32>
    %793 = vector.shape_cast %790 : vector<8x16xf32> to vector<1x8x16xf32>
    tpu.vector_store %arg21[%c2_206, %c0_207, %c0_208], %793 {strides = array<i32>} : memref<8x8x16xf32, #tpu.memory_space<vmem>>, vector<1x8x16xf32>,
    %cst_209 = arith.constant dense<0.000000e+00> : vector<8x48xf32>
    %794 = tpu.matmul %790, %702, %cst_209 {dimension_numbers = #tpu.dot_dimension_numbers<[1], [0], [0], [1], [0, 0, 1, 1], [], []>} : vector<8x16xf32>, vector<16x48xf32>, vector<8x48xf32> -> vector<8x48xf32>
    %795 = vector.extract_strided_slice %711 {offsets = [3, 0, 0], sizes = [1, 8, 48], strides = [1, 1, 1]} : vector<8x8x48xf32> to vector<1x8x48xf32>
    %796 = vector.shape_cast %795 : vector<1x8x48xf32> to vector<8x48xf32>
    %797 = vector.extract_strided_slice %796 {offsets = [0, 0], sizes = [8, 32], strides = [1, 1]} : vector<8x48xf32> to vector<8x32xf32>
    %798 = vector.extract_strided_slice %794 {offsets = [0, 0], sizes = [8, 32], strides = [1, 1]} : vector<8x48xf32> to vector<8x32xf32>
    %799 = arith.addf %797, %798 : vector<8x32xf32>
    %800 = arith.negf %799 : vector<8x32xf32>
    %801 = math.exp %800 : vector<8x32xf32>
    %cst_210 = arith.constant 1.000000e+00 : f32
    %802 = vector.broadcast %cst_210 : f32 to vector<8x32xf32>
    %803 = arith.addf %802, %801 : vector<8x32xf32>
    %804 = arith.divf %802, %803 : vector<8x32xf32>
    %805 = vector.extract_strided_slice %804 {offsets = [0, 0], sizes = [8, 16], strides = [1, 1]} : vector<8x32xf32> to vector<8x16xf32>
    %806 = vector.extract_strided_slice %804 {offsets = [0, 16], sizes = [8, 16], strides = [1, 1]} : vector<8x32xf32> to vector<8x16xf32>
    %807 = vector.extract_strided_slice %796 {offsets = [0, 32], sizes = [8, 16], strides = [1, 1]} : vector<8x48xf32> to vector<8x16xf32>
    %808 = vector.extract_strided_slice %794 {offsets = [0, 32], sizes = [8, 16], strides = [1, 1]} : vector<8x48xf32> to vector<8x16xf32>
    %809 = arith.addf %808, %707 : vector<8x16xf32>
    %810 = arith.mulf %805, %809 : vector<8x16xf32>
    %811 = arith.addf %807, %810 : vector<8x16xf32>
    %812 = math.tanh %811 : vector<8x16xf32>
    %cst_211 = arith.constant 1.000000e+00 : f32
    %813 = vector.broadcast %cst_211 : f32 to vector<8x16xf32>
    %814 = arith.subf %813, %806 : vector<8x16xf32>
    %815 = arith.mulf %814, %812 : vector<8x16xf32>
    %816 = arith.mulf %806, %790 : vector<8x16xf32>
    %817 = arith.addf %815, %816 : vector<8x16xf32>
    %c3_212 = arith.constant 3 : index
    %c0_213 = arith.constant 0 : index
    %c0_214 = arith.constant 0 : index
    %818 = vector.load %arg21[%c3_212, %c0_213, %c0_214] : memref<8x8x16xf32, #tpu.memory_space<vmem>>, vector<1x8x16xf32>
    %819 = vector.shape_cast %818 : vector<1x8x16xf32> to vector<8x16xf32>
    %820 = vector.shape_cast %817 : vector<8x16xf32> to vector<1x8x16xf32>
    tpu.vector_store %arg21[%c3_212, %c0_213, %c0_214], %820 {strides = array<i32>} : memref<8x8x16xf32, #tpu.memory_space<vmem>>, vector<1x8x16xf32>,
    %cst_215 = arith.constant dense<0.000000e+00> : vector<8x48xf32>
    %821 = tpu.matmul %817, %702, %cst_215 {dimension_numbers = #tpu.dot_dimension_numbers<[1], [0], [0], [1], [0, 0, 1, 1], [], []>} : vector<8x16xf32>, vector<16x48xf32>, vector<8x48xf32> -> vector<8x48xf32>
    %822 = vector.extract_strided_slice %711 {offsets = [4, 0, 0], sizes = [1, 8, 48], strides = [1, 1, 1]} : vector<8x8x48xf32> to vector<1x8x48xf32>
    %823 = vector.shape_cast %822 : vector<1x8x48xf32> to vector<8x48xf32>
    %824 = vector.extract_strided_slice %823 {offsets = [0, 0], sizes = [8, 32], strides = [1, 1]} : vector<8x48xf32> to vector<8x32xf32>
    %825 = vector.extract_strided_slice %821 {offsets = [0, 0], sizes = [8, 32], strides = [1, 1]} : vector<8x48xf32> to vector<8x32xf32>
    %826 = arith.addf %824, %825 : vector<8x32xf32>
    %827 = arith.negf %826 : vector<8x32xf32>
    %828 = math.exp %827 : vector<8x32xf32>
    %cst_216 = arith.constant 1.000000e+00 : f32
    %829 = vector.broadcast %cst_216 : f32 to vector<8x32xf32>
    %830 = arith.addf %829, %828 : vector<8x32xf32>
    %831 = arith.divf %829, %830 : vector<8x32xf32>
    %832 = vector.extract_strided_slice %831 {offsets = [0, 0], sizes = [8, 16], strides = [1, 1]} : vector<8x32xf32> to vector<8x16xf32>
    %833 = vector.extract_strided_slice %831 {offsets = [0, 16], sizes = [8, 16], strides = [1, 1]} : vector<8x32xf32> to vector<8x16xf32>
    %834 = vector.extract_strided_slice %823 {offsets = [0, 32], sizes = [8, 16], strides = [1, 1]} : vector<8x48xf32> to vector<8x16xf32>
    %835 = vector.extract_strided_slice %821 {offsets = [0, 32], sizes = [8, 16], strides = [1, 1]} : vector<8x48xf32> to vector<8x16xf32>
    %836 = arith.addf %835, %707 : vector<8x16xf32>
    %837 = arith.mulf %832, %836 : vector<8x16xf32>
    %838 = arith.addf %834, %837 : vector<8x16xf32>
    %839 = math.tanh %838 : vector<8x16xf32>
    %cst_217 = arith.constant 1.000000e+00 : f32
    %840 = vector.broadcast %cst_217 : f32 to vector<8x16xf32>
    %841 = arith.subf %840, %833 : vector<8x16xf32>
    %842 = arith.mulf %841, %839 : vector<8x16xf32>
    %843 = arith.mulf %833, %817 : vector<8x16xf32>
    %844 = arith.addf %842, %843 : vector<8x16xf32>
    %c4_218 = arith.constant 4 : index
    %c0_219 = arith.constant 0 : index
    %c0_220 = arith.constant 0 : index
    %845 = vector.load %arg21[%c4_218, %c0_219, %c0_220] : memref<8x8x16xf32, #tpu.memory_space<vmem>>, vector<1x8x16xf32>
    %846 = vector.shape_cast %845 : vector<1x8x16xf32> to vector<8x16xf32>
    %847 = vector.shape_cast %844 : vector<8x16xf32> to vector<1x8x16xf32>
    tpu.vector_store %arg21[%c4_218, %c0_219, %c0_220], %847 {strides = array<i32>} : memref<8x8x16xf32, #tpu.memory_space<vmem>>, vector<1x8x16xf32>,
    %cst_221 = arith.constant dense<0.000000e+00> : vector<8x48xf32>
    %848 = tpu.matmul %844, %702, %cst_221 {dimension_numbers = #tpu.dot_dimension_numbers<[1], [0], [0], [1], [0, 0, 1, 1], [], []>} : vector<8x16xf32>, vector<16x48xf32>, vector<8x48xf32> -> vector<8x48xf32>
    %849 = vector.extract_strided_slice %711 {offsets = [5, 0, 0], sizes = [1, 8, 48], strides = [1, 1, 1]} : vector<8x8x48xf32> to vector<1x8x48xf32>
    %850 = vector.shape_cast %849 : vector<1x8x48xf32> to vector<8x48xf32>
    %851 = vector.extract_strided_slice %850 {offsets = [0, 0], sizes = [8, 32], strides = [1, 1]} : vector<8x48xf32> to vector<8x32xf32>
    %852 = vector.extract_strided_slice %848 {offsets = [0, 0], sizes = [8, 32], strides = [1, 1]} : vector<8x48xf32> to vector<8x32xf32>
    %853 = arith.addf %851, %852 : vector<8x32xf32>
    %854 = arith.negf %853 : vector<8x32xf32>
    %855 = math.exp %854 : vector<8x32xf32>
    %cst_222 = arith.constant 1.000000e+00 : f32
    %856 = vector.broadcast %cst_222 : f32 to vector<8x32xf32>
    %857 = arith.addf %856, %855 : vector<8x32xf32>
    %858 = arith.divf %856, %857 : vector<8x32xf32>
    %859 = vector.extract_strided_slice %858 {offsets = [0, 0], sizes = [8, 16], strides = [1, 1]} : vector<8x32xf32> to vector<8x16xf32>
    %860 = vector.extract_strided_slice %858 {offsets = [0, 16], sizes = [8, 16], strides = [1, 1]} : vector<8x32xf32> to vector<8x16xf32>
    %861 = vector.extract_strided_slice %850 {offsets = [0, 32], sizes = [8, 16], strides = [1, 1]} : vector<8x48xf32> to vector<8x16xf32>
    %862 = vector.extract_strided_slice %848 {offsets = [0, 32], sizes = [8, 16], strides = [1, 1]} : vector<8x48xf32> to vector<8x16xf32>
    %863 = arith.addf %862, %707 : vector<8x16xf32>
    %864 = arith.mulf %859, %863 : vector<8x16xf32>
    %865 = arith.addf %861, %864 : vector<8x16xf32>
    %866 = math.tanh %865 : vector<8x16xf32>
    %cst_223 = arith.constant 1.000000e+00 : f32
    %867 = vector.broadcast %cst_223 : f32 to vector<8x16xf32>
    %868 = arith.subf %867, %860 : vector<8x16xf32>
    %869 = arith.mulf %868, %866 : vector<8x16xf32>
    %870 = arith.mulf %860, %844 : vector<8x16xf32>
    %871 = arith.addf %869, %870 : vector<8x16xf32>
    %c5_224 = arith.constant 5 : index
    %c0_225 = arith.constant 0 : index
    %c0_226 = arith.constant 0 : index
    %872 = vector.load %arg21[%c5_224, %c0_225, %c0_226] : memref<8x8x16xf32, #tpu.memory_space<vmem>>, vector<1x8x16xf32>
    %873 = vector.shape_cast %872 : vector<1x8x16xf32> to vector<8x16xf32>
    %874 = vector.shape_cast %871 : vector<8x16xf32> to vector<1x8x16xf32>
    tpu.vector_store %arg21[%c5_224, %c0_225, %c0_226], %874 {strides = array<i32>} : memref<8x8x16xf32, #tpu.memory_space<vmem>>, vector<1x8x16xf32>,
    %cst_227 = arith.constant dense<0.000000e+00> : vector<8x48xf32>
    %875 = tpu.matmul %871, %702, %cst_227 {dimension_numbers = #tpu.dot_dimension_numbers<[1], [0], [0], [1], [0, 0, 1, 1], [], []>} : vector<8x16xf32>, vector<16x48xf32>, vector<8x48xf32> -> vector<8x48xf32>
    %876 = vector.extract_strided_slice %711 {offsets = [6, 0, 0], sizes = [1, 8, 48], strides = [1, 1, 1]} : vector<8x8x48xf32> to vector<1x8x48xf32>
    %877 = vector.shape_cast %876 : vector<1x8x48xf32> to vector<8x48xf32>
    %878 = vector.extract_strided_slice %877 {offsets = [0, 0], sizes = [8, 32], strides = [1, 1]} : vector<8x48xf32> to vector<8x32xf32>
    %879 = vector.extract_strided_slice %875 {offsets = [0, 0], sizes = [8, 32], strides = [1, 1]} : vector<8x48xf32> to vector<8x32xf32>
    %880 = arith.addf %878, %879 : vector<8x32xf32>
    %881 = arith.negf %880 : vector<8x32xf32>
    %882 = math.exp %881 : vector<8x32xf32>
    %cst_228 = arith.constant 1.000000e+00 : f32
    %883 = vector.broadcast %cst_228 : f32 to vector<8x32xf32>
    %884 = arith.addf %883, %882 : vector<8x32xf32>
    %885 = arith.divf %883, %884 : vector<8x32xf32>
    %886 = vector.extract_strided_slice %885 {offsets = [0, 0], sizes = [8, 16], strides = [1, 1]} : vector<8x32xf32> to vector<8x16xf32>
    %887 = vector.extract_strided_slice %885 {offsets = [0, 16], sizes = [8, 16], strides = [1, 1]} : vector<8x32xf32> to vector<8x16xf32>
    %888 = vector.extract_strided_slice %877 {offsets = [0, 32], sizes = [8, 16], strides = [1, 1]} : vector<8x48xf32> to vector<8x16xf32>
    %889 = vector.extract_strided_slice %875 {offsets = [0, 32], sizes = [8, 16], strides = [1, 1]} : vector<8x48xf32> to vector<8x16xf32>
    %890 = arith.addf %889, %707 : vector<8x16xf32>
    %891 = arith.mulf %886, %890 : vector<8x16xf32>
    %892 = arith.addf %888, %891 : vector<8x16xf32>
    %893 = math.tanh %892 : vector<8x16xf32>
    %cst_229 = arith.constant 1.000000e+00 : f32
    %894 = vector.broadcast %cst_229 : f32 to vector<8x16xf32>
    %895 = arith.subf %894, %887 : vector<8x16xf32>
    %896 = arith.mulf %895, %893 : vector<8x16xf32>
    %897 = arith.mulf %887, %871 : vector<8x16xf32>
    %898 = arith.addf %896, %897 : vector<8x16xf32>
    %c6_230 = arith.constant 6 : index
    %c0_231 = arith.constant 0 : index
    %c0_232 = arith.constant 0 : index
    %899 = vector.load %arg21[%c6_230, %c0_231, %c0_232] : memref<8x8x16xf32, #tpu.memory_space<vmem>>, vector<1x8x16xf32>
    %900 = vector.shape_cast %899 : vector<1x8x16xf32> to vector<8x16xf32>
    %901 = vector.shape_cast %898 : vector<8x16xf32> to vector<1x8x16xf32>
    tpu.vector_store %arg21[%c6_230, %c0_231, %c0_232], %901 {strides = array<i32>} : memref<8x8x16xf32, #tpu.memory_space<vmem>>, vector<1x8x16xf32>,
    %cst_233 = arith.constant dense<0.000000e+00> : vector<8x48xf32>
    %902 = tpu.matmul %898, %702, %cst_233 {dimension_numbers = #tpu.dot_dimension_numbers<[1], [0], [0], [1], [0, 0, 1, 1], [], []>} : vector<8x16xf32>, vector<16x48xf32>, vector<8x48xf32> -> vector<8x48xf32>
    %903 = vector.extract_strided_slice %711 {offsets = [7, 0, 0], sizes = [1, 8, 48], strides = [1, 1, 1]} : vector<8x8x48xf32> to vector<1x8x48xf32>
    %904 = vector.shape_cast %903 : vector<1x8x48xf32> to vector<8x48xf32>
    %905 = vector.extract_strided_slice %904 {offsets = [0, 0], sizes = [8, 32], strides = [1, 1]} : vector<8x48xf32> to vector<8x32xf32>
    %906 = vector.extract_strided_slice %902 {offsets = [0, 0], sizes = [8, 32], strides = [1, 1]} : vector<8x48xf32> to vector<8x32xf32>
    %907 = arith.addf %905, %906 : vector<8x32xf32>
    %908 = arith.negf %907 : vector<8x32xf32>
    %909 = math.exp %908 : vector<8x32xf32>
    %cst_234 = arith.constant 1.000000e+00 : f32
    %910 = vector.broadcast %cst_234 : f32 to vector<8x32xf32>
    %911 = arith.addf %910, %909 : vector<8x32xf32>
    %912 = arith.divf %910, %911 : vector<8x32xf32>
    %913 = vector.extract_strided_slice %912 {offsets = [0, 0], sizes = [8, 16], strides = [1, 1]} : vector<8x32xf32> to vector<8x16xf32>
    %914 = vector.extract_strided_slice %912 {offsets = [0, 16], sizes = [8, 16], strides = [1, 1]} : vector<8x32xf32> to vector<8x16xf32>
    %915 = vector.extract_strided_slice %904 {offsets = [0, 32], sizes = [8, 16], strides = [1, 1]} : vector<8x48xf32> to vector<8x16xf32>
    %916 = vector.extract_strided_slice %902 {offsets = [0, 32], sizes = [8, 16], strides = [1, 1]} : vector<8x48xf32> to vector<8x16xf32>
    %917 = arith.addf %916, %707 : vector<8x16xf32>
    %918 = arith.mulf %913, %917 : vector<8x16xf32>
    %919 = arith.addf %915, %918 : vector<8x16xf32>
    %920 = math.tanh %919 : vector<8x16xf32>
    %cst_235 = arith.constant 1.000000e+00 : f32
    %921 = vector.broadcast %cst_235 : f32 to vector<8x16xf32>
    %922 = arith.subf %921, %914 : vector<8x16xf32>
    %923 = arith.mulf %922, %920 : vector<8x16xf32>
    %924 = arith.mulf %914, %898 : vector<8x16xf32>
    %925 = arith.addf %923, %924 : vector<8x16xf32>
    %c7_236 = arith.constant 7 : index
    %c0_237 = arith.constant 0 : index
    %c0_238 = arith.constant 0 : index
    %926 = vector.load %arg21[%c7_236, %c0_237, %c0_238] : memref<8x8x16xf32, #tpu.memory_space<vmem>>, vector<1x8x16xf32>
    %927 = vector.shape_cast %926 : vector<1x8x16xf32> to vector<8x16xf32>
    %928 = vector.shape_cast %925 : vector<8x16xf32> to vector<1x8x16xf32>
    tpu.vector_store %arg21[%c7_236, %c0_237, %c0_238], %928 {strides = array<i32>} : memref<8x8x16xf32, #tpu.memory_space<vmem>>, vector<1x8x16xf32>,
    %c0_239 = arith.constant 0 : index
    %c0_240 = arith.constant 0 : index
    %c0_241 = arith.constant 0 : index
    %929 = vector.load %arg21[%c0_239, %c0_240, %c0_241] : memref<8x8x16xf32, #tpu.memory_space<vmem>>, vector<8x8x16xf32>
    %930 = vector.shape_cast %929 : vector<8x8x16xf32> to vector<64x16xf32>
    %c0_242 = arith.constant 0 : index
    %c0_243 = arith.constant 0 : index
    %931 = vector.load %arg16[%c0_242, %c0_243] : memref<16x16xf32, #tpu.memory_space<vmem>>, vector<16x16xf32>
    %cst_244 = arith.constant dense<0.000000e+00> : vector<64x16xf32>
    %932 = tpu.matmul %930, %931, %cst_244 {dimension_numbers = #tpu.dot_dimension_numbers<[1], [0], [0], [1], [0, 0, 1, 1], [], []>} : vector<64x16xf32>, vector<16x16xf32>, vector<64x16xf32> -> vector<64x16xf32>
    %c0_245 = arith.constant 0 : index
    %c0_246 = arith.constant 0 : index
    %933 = vector.load %arg17[%c0_245, %c0_246] : memref<1x16xf32, #tpu.memory_space<vmem>>, vector<1x16xf32>
    %934 = vector.broadcast %933 : vector<1x16xf32> to vector<64x16xf32>
    %935 = arith.addf %932, %934 : vector<64x16xf32>
    %cst_247 = arith.constant 0.000000e+00 : f32
    %936 = vector.broadcast %cst_247 : f32 to vector<64x16xf32>
    %937 = arith.maximumf %935, %936 : vector<64x16xf32>
    %938 = vector.shape_cast %937 : vector<64x16xf32> to vector<8x8x16xf32>
    %c0_248 = arith.constant 0 : index
    %c0_249 = arith.constant 0 : index
    %c0_250 = arith.constant 0 : index
    %939 = vector.load %arg19[%c0_248, %c0_249, %c0_250] : memref<8x8x16xf32, #tpu.memory_space<vmem>>, vector<8x8x16xf32>
    tpu.vector_store %arg19[%c0_248, %c0_249, %c0_250], %938 {strides = array<i32>} : memref<8x8x16xf32, #tpu.memory_space<vmem>>, vector<8x8x16xf32>,
    return
  }
  func.func @transform_0(%arg0: i32) -> (i32, i32, i32) {
    %c0_i32 = arith.constant 0 : i32
    %c0_i32_0 = arith.constant 0 : i32
    %c0_i32_1 = arith.constant 0 : i32
    return %c0_i32, %arg0, %c0_i32_0 : i32, i32, i32
  }
  func.func @transform_1(%arg0: i32) -> (i32, i32) {
    %c0_i32 = arith.constant 0 : i32
    %c0_i32_0 = arith.constant 0 : i32
    %c0_i32_1 = arith.constant 0 : i32
    return %c0_i32, %c0_i32_0 : i32, i32
  }
  func.func @transform_2(%arg0: i32) -> (i32, i32) {
    %c0_i32 = arith.constant 0 : i32
    %c0_i32_0 = arith.constant 0 : i32
    %c0_i32_1 = arith.constant 0 : i32
    return %c0_i32, %c0_i32_0 : i32, i32
  }
  func.func @transform_3(%arg0: i32) -> (i32, i32) {
    %c0_i32 = arith.constant 0 : i32
    %c0_i32_0 = arith.constant 0 : i32
    %c0_i32_1 = arith.constant 0 : i32
    return %c0_i32, %c0_i32_0 : i32, i32
  }
  func.func @transform_4(%arg0: i32) -> (i32, i32) {
    %c0_i32 = arith.constant 0 : i32
    %c0_i32_0 = arith.constant 0 : i32
    %c0_i32_1 = arith.constant 0 : i32
    return %c0_i32, %c0_i32_0 : i32, i32
  }
  func.func @transform_5(%arg0: i32) -> (i32, i32) {
    %c0_i32 = arith.constant 0 : i32
    %c0_i32_0 = arith.constant 0 : i32
    %c0_i32_1 = arith.constant 0 : i32
    return %c0_i32, %c0_i32_0 : i32, i32
  }
  func.func @transform_6(%arg0: i32) -> (i32, i32) {
    %c0_i32 = arith.constant 0 : i32
    %c0_i32_0 = arith.constant 0 : i32
    %c0_i32_1 = arith.constant 0 : i32
    return %c0_i32, %c0_i32_0 : i32, i32
  }
  func.func @transform_7(%arg0: i32) -> (i32, i32) {
    %c0_i32 = arith.constant 0 : i32
    %c0_i32_0 = arith.constant 0 : i32
    %c0_i32_1 = arith.constant 0 : i32
    return %c0_i32, %c0_i32_0 : i32, i32
  }
  func.func @transform_8(%arg0: i32) -> (i32, i32) {
    %c0_i32 = arith.constant 0 : i32
    %c0_i32_0 = arith.constant 0 : i32
    %c0_i32_1 = arith.constant 0 : i32
    return %c0_i32, %c0_i32_0 : i32, i32
  }
  func.func @transform_9(%arg0: i32) -> (i32, i32) {
    %c0_i32 = arith.constant 0 : i32
    %c0_i32_0 = arith.constant 0 : i32
    %c0_i32_1 = arith.constant 0 : i32
    return %c0_i32, %c0_i32_0 : i32, i32
  }
  func.func @transform_10(%arg0: i32) -> (i32, i32) {
    %c0_i32 = arith.constant 0 : i32
    %c0_i32_0 = arith.constant 0 : i32
    %c0_i32_1 = arith.constant 0 : i32
    return %c0_i32, %c0_i32_0 : i32, i32
  }
  func.func @transform_11(%arg0: i32) -> (i32, i32) {
    %c0_i32 = arith.constant 0 : i32
    %c0_i32_0 = arith.constant 0 : i32
    %c0_i32_1 = arith.constant 0 : i32
    return %c0_i32, %c0_i32_0 : i32, i32
  }
  func.func @transform_12(%arg0: i32) -> (i32, i32) {
    %c0_i32 = arith.constant 0 : i32
    %c0_i32_0 = arith.constant 0 : i32
    %c0_i32_1 = arith.constant 0 : i32
    return %c0_i32, %c0_i32_0 : i32, i32
  }
  func.func @transform_13(%arg0: i32) -> (i32, i32) {
    %c0_i32 = arith.constant 0 : i32
    %c0_i32_0 = arith.constant 0 : i32
    %c0_i32_1 = arith.constant 0 : i32
    return %c0_i32, %c0_i32_0 : i32, i32
  }
  func.func @transform_14(%arg0: i32) -> (i32, i32) {
    %c0_i32 = arith.constant 0 : i32
    %c0_i32_0 = arith.constant 0 : i32
    %c0_i32_1 = arith.constant 0 : i32
    return %c0_i32, %c0_i32_0 : i32, i32
  }
  func.func @transform_15(%arg0: i32) -> (i32, i32) {
    %c0_i32 = arith.constant 0 : i32
    %c0_i32_0 = arith.constant 0 : i32
    %c0_i32_1 = arith.constant 0 : i32
    return %c0_i32, %c0_i32_0 : i32, i32
  }
  func.func @transform_16(%arg0: i32) -> (i32, i32) {
    %c0_i32 = arith.constant 0 : i32
    %c0_i32_0 = arith.constant 0 : i32
    %c0_i32_1 = arith.constant 0 : i32
    return %c0_i32, %c0_i32_0 : i32, i32
  }
  func.func @transform_17(%arg0: i32) -> (i32, i32, i32) {
    %c0_i32 = arith.constant 0 : i32
    %c0_i32_0 = arith.constant 0 : i32
    %c0_i32_1 = arith.constant 0 : i32
    return %c0_i32, %arg0, %c0_i32_0 : i32, i32, i32
  }
  func.func @transform_18(%arg0: i32) -> (i32, i32, i32) {
    %c0_i32 = arith.constant 0 : i32
    %c0_i32_0 = arith.constant 0 : i32
    %c0_i32_1 = arith.constant 0 : i32
    return %c0_i32, %arg0, %c0_i32_0 : i32, i32, i32
  }
}

</mosaic_0001>

<bundles_post_ra>
// kernel: netd_masked_forward.1
= control target key start
LH: loop header
LB: loop body
LE: loop exit
PB: predicated region body
PF: predicated region fallthrough
CT: control target
= control target key end

     0   :  { %s7231_s0 = inlined_call_operand.vmem [shape: f32[8,16,16], index: 0, kind: input, shape index: {}]   ;;  %s7232_s1 = inlined_call_operand.vmem [shape: f32[16,16], index: 1, kind: input, shape index: {}]   ;;  %s7233_s2 = inlined_call_operand.vmem [shape: f32[1,16], index: 2, kind: input, shape index: {}]   ;;  %s7234_s3 = inlined_call_operand.vmem [shape: f32[16,96], index: 3, kind: input, shape index: {}]   ;;  %s7235_s4 = inlined_call_operand.vmem [shape: f32[32,96], index: 4, kind: input, shape index: {}]   ;;  %s7236_s5 = inlined_call_operand.vmem [shape: f32[1,128], index: 5, kind: input, shape index: {}]   ;;  %s7237_s6 = inlined_call_operand.vmem [shape: f32[32,96], index: 6, kind: input, shape index: {}]   ;;  %s7238_s7 = inlined_call_operand.vmem [shape: f32[32,96], index: 7, kind: input, shape index: {}]   ;;  %s7239_s8 = inlined_call_operand.vmem [shape: f32[1,128], index: 8, kind: input, shape index: {}]   ;;  %s7240_s9 = inlined_call_operand.vmem [shape: f32[32,48], index: 9, kind: input, shape index: {}]   ;;  %s7241_s10 = inlined_call_operand.vmem [shape: f32[16,48], index: 10, kind: input, shape index: {}]   ;;  %s7242_s11 = inlined_call_operand.vmem [shape: f32[1,64], index: 11, kind: input, shape index: {}]   ;;  %s7243_s12 = inlined_call_operand.vmem [shape: f32[16,48], index: 12, kind: input, shape index: {}]   ;;  %s7244_s13 = inlined_call_operand.vmem [shape: f32[16,48], index: 13, kind: input, shape index: {}]   ;;  %s7245_s14 = inlined_call_operand.vmem [shape: f32[1,64], index: 14, kind: input, shape index: {}]   ;;  %s7246_s15 = inlined_call_operand.vmem [shape: f32[16,16], index: 15, kind: input, shape index: {}]   ;;  %s7247_s16 = inlined_call_operand.vmem [shape: f32[1,16], index: 16, kind: input, shape index: {}]   ;;  %s7248_s17 = inlined_call_operand.vmem [shape: f32[8,16,32], index: 17, kind: output, shape index: {0}]   ;;  %s7249_s18 = inlined_call_operand.vmem [shape: f32[8,16,16], index: 18, kind: output, shape index: {1}]  }
   0x1   :  { %7252 = sst [smem:[#allocation9_spill]] %s7231_s0 }
   0x2   :  { %7253 = sst [smem:[#allocation10_spill]] %s7232_s1 }
   0x3   :  { %7254 = sst [smem:[#allocation11_spill]] %s7233_s2 }
   0x4   :  { %s6371_s27 = smov 0   ;;  %s6373_s28 = smov 0  }
   0x5   :  { %s6375_s29 = smov 0  }
   0x6 LB: > { %7255 = sst [smem:[#allocation7_spill]] %s6263_s28  ;;  %s6387_s30 = sadd.s32 4294967295, %s6267_s29   ;;  %s6267_s29 = sphi %s6375_s29, %s7263_s29   ;;  %s6263_s28 = sphi %s6373_s28, %s7262_s28   ;;  %s6259_s27 = sphi %s6371_s27, %s7261_s27  }
   0x7   : > { %s6390_s0 = sadd.s32 1, %s6267_s29   ;;  %s36_s1 = sadd.s32 1, %s6263_s28 }
   0x8   : > { %s33_s19 = ssub.s32 %s6267_s29, %s6390_s0  ;;  %p43_p1 = scmp.ne.s32.totalorder %s6263_s28, %s6259_s27 }
   0x9   : > { %p34_p0 = scmp.eq.s32.totalorder %s33_s19, 0  ;;  %p44_p2 = scmp.eq.s32.totalorder %s6267_s29, 0 }
   0xa   : > { %p409_p3 = scmp.eq.s32.totalorder %s6387_s30, 1  ;;  %p5133_p6 = scmp.ge.s32.totalorder %s6267_s29, 2 }
   0xb   : > { %s6400_s20 = scalar_select %p34_p0, %s6263_s28, %s36_s1  }
   0xc   : > { %p45_p4 = por %p44_p2, %p43_p1  ;;  %p6402_p5 = por %p409_p3, %p43_p1 }
   0xd   : > { %7256 = sst [smem:[#allocation8_spill]] %s6400_s20  ;;  %505 = sbr.rel (%p5133_p6) target bundleno = 34 (0x22), region = 80 }
  0x14   : > { %508 = sbr.rel (!%p45_p4) target bundleno = 34 (0x22), region = 84  ;;  %s510_s22 = sand.u32 (%p45_p4), 1, %s6263_s28  }
  0x15   : > { %s5135_s2 = sshll.u32 (%p45_p4), %s6267_s29, 3  ;;  %s5134_s23 = sshll.u32 (%p45_p4), %s510_s22, 6 }
  0x16   : > { %s7258_s26 = sld [smem:[#allocation9_spill]] (%p45_p4)  ;;  %s512_s1 = scalar_lea.vmem (%p45_p4), [#allocation4], %s5134_s23 }
  0x1c   : > { %s514_s19 = scalar_lea.vmem %s7258_s26, %s5135_s2 }
  0x1d   : > { %v556_v0 = vld [vmem:[%s514_s19] sm:$0xff]  ;;  %v558_v1 = vld [vmem:[%s514_s19 + $0x10] sm:$0xff] }
  0x1e   : > { %v560_v2 = vld [vmem:[%s514_s19 + $0x20] sm:$0xff]  ;;  %557 = vst [vmem:[%s512_s1] sm:$0xff] %v556_v0  ;;  %559 = vst [vmem:[%s512_s1 + $0x8] sm:$0xff] %v558_v1  ;;  %v562_v3 = vld [vmem:[%s514_s19 + $0x30] sm:$0xff] }
  0x1f   : > { %561 = vst [vmem:[%s512_s1 + $0x10] sm:$0xff] %v560_v2  ;;  %v564_v4 = vld [vmem:[%s514_s19 + $0x40] sm:$0xff]  ;;  %v566_v5 = vld [vmem:[%s514_s19 + $0x50] sm:$0xff]  ;;  %563 = vst [vmem:[%s512_s1 + $0x18] sm:$0xff] %v562_v3 }
  0x20   : > { %565 = vst [vmem:[%s512_s1 + $0x20] sm:$0xff] %v564_v4  ;;  %567 = vst [vmem:[%s512_s1 + $0x28] sm:$0xff] %v566_v5  ;;  %v568_v6 = vld [vmem:[%s514_s19 + $0x60] sm:$0xff]  ;;  %v570_v7 = vld [vmem:[%s514_s19 + $0x70] sm:$0xff] }
  0x21   : > { %569 = vst [vmem:[%s512_s1 + $0x30] sm:$0xff] %v568_v6  ;;  %571 = vst [vmem:[%s512_s1 + $0x38] sm:$0xff] %v570_v7 }
  0x22 PF: > { %p5136_p7 = scmp.ge.s32.totalorder %s6267_s29, 1  ;;  %p576_p8 = scmp.lt.s32.totalorder %s6267_s29, 3 }
  0x24   : > { %p577_p9 = pnand %p5136_p7, %p576_p8 }
  0x25   : > { %s7259_s23 = sld [smem:[#allocation10_spill]] (!%p577_p9)  ;;  %s583_s26 = sand.u32 (!%p577_p9), 1, %s6259_s27   ;;  %v794_v10 = vld [vmem:[%s7234_s3] sm:$0xff] (!%p577_p9)  ;;  %vm656_vm0 = vcmask (!%p577_p9), 130048   ;;  %v795_v12 = vld [vmem:[%s7234_s3 + $0x8] sm:$0xff] (!%p577_p9)  ;;  %v6269_v22 = vmov (!%p577_p9), 0.0|0.0  }
  0x26   : > { %580 = sbr.rel (%p577_p9) target bundleno = 20623 (0x508f), region = 122  ;;  %s6424_s20 = sshll.u32 (!%p577_p9), %s583_s26, 6  ;;  %v5848_v13 = vpack.c.bf16 (!%p577_p9), %v795_v12, %v794_v10  ;;  %v6443_v23 = vld [vmem:[%s7236_s5] ss:$0 sm:$0xff] (!%p577_p9)  ;;  %v797_v29 = vld [vmem:[%s7235_s4 + $0x8] sm:$0xff] (!%p577_p9)  ;;  %v798_v37 = vld [vmem:[%s7235_s4 + $0x10] sm:$0xff] (!%p577_p9) }
  0x27   : > { %s585_s22 = scalar_lea.vmem (!%p577_p9), [#allocation4], %s6424_s20  ;;  %s6270_s2 = smov (!%p577_p9), 96   ;;  %v796_v28 = vld [vmem:[%s7235_s4] sm:$0xff] (!%p577_p9)  ;;  %v799_v38 = vld [vmem:[%s7235_s4 + $0x18] sm:$0xff] (!%p577_p9)  ;;  %vm6271_vm1 = vmmov (!%p577_p9), 0   ;;  %v6272_v48 = vmov (!%p577_p9), 0.0  }
  0x28   : > { %v639_v14 = vld [vmem:[%s585_s22] sm:$0xff] (!%p577_p9)  ;;  %v640_v15 = vld [vmem:[%s585_s22 + $0x8] sm:$0xff] (!%p577_p9)  ;;  %v641_v16 = vld [vmem:[%s585_s22 + $0x10] sm:$0xff] (!%p577_p9)  ;;  %6020 = vmatprep.subr.bf16.mxu1 (!%p577_p9), %v5848_v13  ;;  %1017 = vrot.lane.b32.xlu0 (!%p577_p9), %v6443_v23, %s6270_s2  ;;  %s7260_s26 = sld [smem:[#allocation11_spill]] (!%p577_p9)  ;;  %v6456_v33 = vpack.c.bf16 (!%p577_p9), %v797_v29, %v796_v28  ;;  %v6467_v41 = vpack.c.bf16 (!%p577_p9), %v799_v38, %v798_v37  ;;  %vm936_vm2 = vcmask (!%p577_p9), 261120   ;;  %s6698_s29 = scalar_lea.vmem (!%p577_p9), [#allocation5], %s6424_s20 }
  0x29   : > { %5456 = vmatprep.mubr.msk.f32.mxu0 (!%p577_p9), %vm656_vm0, %v639_v14  ;;  %6021 = vmatpush3.bf16.msra.mxu1 (!%p577_p9), %v5848_v13  ;;  %v642_v17 = vld [vmem:[%s585_s22 + $0x18] sm:$0xff] (!%p577_p9)  ;;  %v643_v18 = vld [vmem:[%s585_s22 + $0x20] sm:$0xff] (!%p577_p9)  ;;  %v644_v19 = vld [vmem:[%s585_s22 + $0x28] sm:$0xff] (!%p577_p9)  ;;  %s6275_s27 = smov (!%p577_p9), 32   ;;  %s7151_s19 = scalar_lea.vmem (!%p577_p9), [#allocation6], %s6424_s20 }
  0x2a   : > { %v645_v20 = vld [vmem:[%s585_s22 + $0x30] sm:$0xff] (!%p577_p9)  ;;  %v646_v21 = vld [vmem:[%s585_s22 + $0x38] sm:$0xff] (!%p577_p9)  ;;  %5858 = vmatprep.subr.bf16.mxu1 (!%p577_p9), %v6269_v22  ;;  %s6274_s22 = smov (!%p577_p9), 112  }
  0x2b   : > { %v647_v8 = vld [vmem:[%s7259_s23] sm:$0xff] (!%p577_p9)  ;;  %v648_v9 = vld [vmem:[%s7259_s23 + $0x8] sm:$0xff] (!%p577_p9) }
  0x2c   : > { %v5844_v11 = vpack.c.bf16 (!%p577_p9), %v648_v9, %v647_v8 }
  0x2d   : > { %s5256_s20 = sshll.u32 (%p6402_p5), %s6387_s30, 3 }
  0x2e   : > { %5845 = vmatprep.subr.bf16.mxu0 %v5844_v11  ;;  %v5140_v24 = vld [vmem:[%s7260_s26] ss:$0 sm:$0xff]  ;;  %s6273_s26 = smov 64  }
  0x2f   : > { %5847 = vmatpush3.bf16.msra.mxu0 %v5844_v11 }
  0x30   : > { %5849 = vmatprep.subr.bf16.mxu0 %v5848_v13 }
  0x32   : > { %5457 = vmatmul.mubr.msk.f32.vlgmr.msra.gmra.mrb[0].mxu0 %vm656_vm0, %v640_v15 }
  0x33   : > { %5459 = vmatprep.mubr.msk.f32.mxu0 %vm656_vm0, %v641_v16  ;;  %5851 = vmatpush3.bf16.msra.mxu0 %v5848_v13 }
  0x34   : > { %5852 = vmatprep.subr.bf16.mxu0 %v6269_v22 }
  0x36   : > { %5460 = vmatmul.mubr.msk.f32.gmra.mrb[2].mxu0 %vm656_vm0, %v642_v17 }
  0x37   : > { %5462 = vmatprep.mubr.msk.f32.mxu0 %vm656_vm0, %v643_v18 }
  0x3a   : > { %5463 = vmatmul.mubr.msk.f32.gmra.mrb[4].mxu0 %vm656_vm0, %v644_v19 }
  0x3b   : > { %5465 = vmatprep.mubr.msk.f32.mxu0 %vm656_vm0, %v645_v20 }
  0x3e   : > { %5466 = vmatmul.mubr.msk.f32.gmra.mrb[6].mxu0 %vm656_vm0, %v646_v21 }
  0x9a   : > { %v6497_v60 = vpop.permute.xlu0 %1017 }
 0x105   : > { %v5458_v25 = vpop.f32.mrb[0].mxu0 }
 0x106   : > { %v753_v26 = vadd.f32 %v5458_v25, %v5140_v24  ;;  %v747_v27 = vpop.f32.mrb[1].mxu0 }
 0x107   : > { %v748_v30 = vadd.f32 %v5140_v24, %v747_v27 }
 0x108   : > { %v787_v34 = vmax.f32 %v753_v26, 0.0 }
 0x109   : > { %v786_v31 = vmax.f32 %v748_v30, 0.0  ;;  %v5461_v32 = vpop.f32.mrb[2].mxu0 }
 0x10a   : > { %v763_v35 = vadd.f32 %v5461_v32, %v5140_v24  ;;  %v757_v36 = vpop.f32.mrb[3].mxu0 }
 0x10b   : > { %v758_v39 = vadd.f32 %v5140_v24, %v757_v36  ;;  %5472 = vmatprep.mubr.msk.f32.mxu0 %vm656_vm0, %v786_v31 }
 0x10c   : > { %5473 = vmatmul.mubr.msk.f32.vlgmr.msra.gmra.mrb[8].mxu0 %vm656_vm0, %v787_v34  ;;  %v789_v43 = vmax.f32 %v763_v35, 0.0 }
 0x10d   : > { %v788_v40 = vmax.f32 %v758_v39, 0.0  ;;  %5854 = vmatpush3.bf16.msra.mxu0 %v6456_v33  ;;  %v5464_v42 = vpop.f32.mrb[4].mxu0 }
 0x10e   : > { %5855 = vmatprep.subr.bf16.mxu0 %v6269_v22  ;;  %v773_v44 = vadd.f32 %v5464_v42, %v5140_v24  ;;  %v767_v45 = vpop.f32.mrb[5].mxu0 }
 0x10f   : > { %5475 = vmatprep.mubr.msk.f32.mxu0 %vm656_vm0, %v788_v40  ;;  %v768_v46 = vadd.f32 %v5140_v24, %v767_v45 }
 0x110   : > { %5476 = vmatmul.mubr.msk.f32.gmra.mrb[10].mxu0 %vm656_vm0, %v789_v43  ;;  %v791_v47 = vmax.f32 %v773_v44, 0.0 }
 0x111   : > { %5857 = vmatpush3.bf16.msra.mxu0 %v6467_v41  ;;  %5492 = vmatprep.mubr.msk.f32.mxu0 %vm6271_vm1, %v6272_v48  ;;  %v790_v49 = vmax.f32 %v768_v46, 0.0  ;;  %v5467_v50 = vpop.f32.mrb[6].mxu0 }
 0x112   : > { %5864 = vmatprep.subr.bf16.mxu0 %v6269_v22  ;;  %v783_v51 = vadd.f32 %v5467_v50, %v5140_v24  ;;  %v777_v52 = vpop.f32.mrb[7].mxu0 }
 0x113   : > { %5478 = vmatprep.mubr.msk.f32.mxu1 %vm656_vm0, %v790_v49  ;;  %v778_v53 = vadd.f32 %v5140_v24, %v777_v52 }
 0x114   : > { %5493 = vmatmul.mubr.f32.vlgmr.msra.gmra.mrb[12].mxu0 %v6272_v48  ;;  %5479 = vmatmul.mubr.msk.f32.vlgmr.msra.gmra.mrb[0].mxu1 %vm656_vm0, %v791_v47  ;;  %v793_v54 = vmax.f32 %v783_v51, 0.0 }
 0x115   : > { %5860 = vmatpush3.bf16.msra.mxu1 %v6456_v33  ;;  %5866 = vmatpush3.bf16.msra.mxu0 %v6456_v33  ;;  %v792_v55 = vmax.f32 %v778_v53, 0.0 }
 0x116   : > { %5861 = vmatprep.subr.bf16.mxu1 %v6269_v22  ;;  %5867 = vmatprep.subr.bf16.mxu0 %v6269_v22 }
 0x117   : > { %5514 = vmatprep.mubr.msk.f32.mxu0 %vm6271_vm1, %v6272_v48  ;;  %5481 = vmatprep.mubr.msk.f32.mxu1 %vm656_vm0, %v792_v55 }
 0x118   : > { %5482 = vmatmul.mubr.msk.f32.gmra.mrb[2].mxu1 %vm656_vm0, %v793_v54 }
 0x119   : > { %5863 = vmatpush3.bf16.msra.mxu1 %v6467_v41  ;;  %5869 = vmatpush3.bf16.msra.mxu0 %v6467_v41 }
 0x11a   : > { %5870 = vmatprep.subr.bf16.mxu1 %v6269_v22  ;;  %5876 = vmatprep.subr.bf16.mxu0 %v6269_v22 }
 0x11b   : > { %5503 = vmatprep.mubr.msk.f32.mxu1 %vm6271_vm1, %v6272_v48 }
 0x1df   : > { %v5474_v56 = vpop.f32.mrb[8].mxu0 }
 0x1e0   : > { %v897_v57 = vpop.f32.mrb[9].mxu0  ;;  %v903_v26 = vadd.f32 %v5474_v56, %v6443_v23 }
 0x1e1   : > { %v898_v4 = vadd.f32 %v6443_v23, %v897_v57 }
 0x1e3   : > { %v6493_v58 = vpop.f32.mrb[10].mxu0 }
 0x1e4   : > { %v6495_v59 = vpop.f32.mrb[11].mxu0 }
 0x1e5   : > { %v908_v49 = vadd.f32 %v6443_v23, %v6495_v59 }
 0x1e7   : > { %v1006_v61 = vpop.f32.mrb[12].mxu0  ;;  %v6499_v62 = vpop.f32.mrb[0].mxu1 }
 0x1e8   : > { %v1020_v63 = vadd.f32 %v6497_v60, %v1006_v61  ;;  %v5494_v0 = vpop.f32.mrb[13].mxu0  ;;  %v6502_v1 = vpop.f32.mrb[1].mxu1  ;;  %v1010_v5 = vadd.f32 %v1006_v61, %v898_v4 }
 0x1ea   : > { %1022 = vrot.lane.b32.xlu0 %v1020_v63, %s6273_s26  ;;  %v5158_v6 = vmul.f32 -1.442695, %v1010_v5 }
 0x1eb   : > { %v6505_v2 = vpop.f32.mrb[2].mxu1 }
 0x1ec   : > { %v6507_v3 = vpop.f32.mrb[3].mxu1  ;;  %6053 = vpow2.f32 %v5158_v6 }
 0x1f6   : > { %v6054_v7 = vpop.eup %6053 }
 0x1f7   : > { %v1014_v8 = vadd.f32 1.0, %v6054_v7 }
 0x1f9   : > { %6055 = vrcp.f32 %v1014_v8 }
 0x203   : > { %v6056_v9 = vpop.eup %6055 }
 0x204   : > { %v1032_v15 = vsub.f32 1.0, %v6056_v9  ;;  %v1038_v17 = vmul.f32 0.0, %v6056_v9 }
 0x25c   : > { %v1023_v10 = vpop.permute.xlu0 %1022 }
 0x25d   : > { %v1025_v11 = vmul.f32 %v6056_v9, %v1023_v10 }
 0x25f   : > { %1027 = vrot.lane.b32.xlu1 %v1025_v11, %s6273_s26  ;;  %v913_v11 = vadd.f32 %v6493_v58, %v6443_v23 }
 0x2d1   : > { %v1028_v12 = vpop.permute.xlu1 %1027 }
 0x2d2   : > { %v1030_v13 = vadd.f32 %v1028_v12, %v898_v4 }
 0x2d4   : > { %6057 = vtanh.f32 %v1030_v13 }
 0x2de   : > { %v6058_v14 = vpop.eup %6057 }
 0x2df   : > { %1034 = vrot.lane.b32.xlu1 %v6058_v14, %s6270_s2 }
 0x351   : > { %v1035_v16 = vpop.permute.xlu1 %1034 }
 0x352   : > { %v1037_v18 = vmul.f32 %v1035_v16, %v1032_v15 }
 0x354   : > { %v1039_v19 = vadd.f32 %v1038_v17, %v1037_v18 }
 0x356   : > { %1041 = vrot.lane.b32.xlu0 %v1039_v19, %s6270_s2 }
 0x3c8   : > { %v1042_v20 = vpop.permute.xlu0 %1041 }
 0x3c9   : > { %1044 = vst.msk [vmem:[#allocation2] sm:$0xff] %vm936_vm2, %v1042_v20  ;;  %5504 = vmatmul.mubr.msk.f32.vlgmr.msra.gmra.mrb[4].mxu1 %vm936_vm2, %v1042_v20 }
 0x3ca   : > { %5872 = vmatpush3.bf16.msra.mxu1 %v6456_v33  ;;  %5525 = vmatprep.mubr.msk.f32.mxu1 %vm6271_vm1, %v6272_v48 }
 0x3cb   : > { %5873 = vmatprep.subr.bf16.mxu1 %v6269_v22 }
 0x3ce   : > { %5875 = vmatpush3.bf16.msra.mxu1 %v6467_v41 }
 0x3cf   : > { %5882 = vmatprep.subr.bf16.mxu1 %v6269_v22 }
 0x49c   : > { %v1113_v21 = vpop.f32.mrb[4].mxu1 }
 0x49d   : > { %v1124_v24 = vadd.f32 %v1113_v21, %v6497_v60  ;;  %v5505_v25 = vpop.f32.mrb[5].mxu1  ;;  %v1117_v27 = vadd.f32 %v1113_v21, %v903_v26 }
 0x49f   : > { %1126 = vrot.lane.b32.xlu1 %v1124_v24, %s6273_s26  ;;  %v5160_v28 = vmul.f32 -1.442695, %v1117_v27 }
 0x4a1   : > { %6059 = vpow2.f32 %v5160_v28 }
 0x4ab   : > { %v6060_v29 = vpop.eup %6059 }
 0x4ac   : > { %v1121_v30 = vadd.f32 1.0, %v6060_v29 }
 0x4ae   : > { %6061 = vrcp.f32 %v1121_v30 }
 0x4b8   : > { %v6062_v31 = vpop.eup %6061 }
 0x4b9   : > { %v1136_v38 = vsub.f32 1.0, %v6062_v31  ;;  %v1142_v40 = vmul.f32 %v6062_v31, %v1039_v19 }
 0x511   : > { %v1127_v32 = vpop.permute.xlu1 %1126 }
 0x512   : > { %v1129_v34 = vmul.f32 %v6062_v31, %v1127_v32  ;;  %v918_v32 = vadd.f32 %v6443_v23, %v6502_v1 }
 0x514   : > { %1131 = vrot.lane.b32.xlu0 %v1129_v34, %s6273_s26 }
 0x586   : > { %v1132_v35 = vpop.permute.xlu0 %1131 }
 0x587   : > { %v1134_v36 = vadd.f32 %v1132_v35, %v903_v26 }
 0x589   : > { %6063 = vtanh.f32 %v1134_v36 }
 0x593   : > { %v6064_v37 = vpop.eup %6063 }
 0x594   : > { %1138 = vrot.lane.b32.xlu1 %v6064_v37, %s6270_s2 }
 0x606   : > { %v1139_v39 = vpop.permute.xlu1 %1138 }
 0x607   : > { %v1141_v42 = vmul.f32 %v1139_v39, %v1136_v38 }
 0x609   : > { %v1143_v43 = vadd.f32 %v1142_v40, %v1141_v42 }
 0x60b   : > { %1145 = vrot.lane.b32.xlu0 %v1143_v43, %s6270_s2 }
 0x67d   : > { %v1146_v44 = vpop.permute.xlu0 %1145 }
 0x67e   : > { %1149 = vst.msk [vmem:[#allocation2 + $0x8] sm:$0xff] %vm936_vm2, %v1146_v44  ;;  %5515 = vmatmul.mubr.msk.f32.vlgmr.msra.gmra.mrb[14].mxu0 %vm936_vm2, %v1146_v44 }
 0x67f   : > { %5878 = vmatpush3.bf16.msra.mxu0 %v6456_v33  ;;  %5536 = vmatprep.mubr.msk.f32.mxu0 %vm6271_vm1, %v6272_v48 }
 0x680   : > { %5879 = vmatprep.subr.bf16.mxu0 %v6269_v22 }
 0x683   : > { %5881 = vmatpush3.bf16.msra.mxu0 %v6467_v41 }
 0x684   : > { %5888 = vmatprep.subr.bf16.mxu0 %v6269_v22 }
 0x751   : > { %v1218_v45 = vpop.f32.mrb[14].mxu0 }
 0x752   : > { %v1229_v46 = vadd.f32 %v1218_v45, %v6497_v60  ;;  %v5516_v47 = vpop.f32.mrb[15].mxu0  ;;  %v1222_v50 = vadd.f32 %v1218_v45, %v908_v49 }
 0x754   : > { %1231 = vrot.lane.b32.xlu1 %v1229_v46, %s6273_s26  ;;  %v5162_v51 = vmul.f32 -1.442695, %v1222_v50 }
 0x756   : > { %6065 = vpow2.f32 %v5162_v51 }
 0x760   : > { %v6066_v52 = vpop.eup %6065 }
 0x761   : > { %v1226_v53 = vadd.f32 1.0, %v6066_v52 }
 0x763   : > { %6067 = vrcp.f32 %v1226_v53 }
 0x76d   : > { %v6068_v54 = vpop.eup %6067 }
 0x76e   : > { %v1241_v0 = vsub.f32 1.0, %v6068_v54  ;;  %v1247_v59 = vmul.f32 %v6068_v54, %v1143_v43 }
 0x7c6   : > { %v1232_v55 = vpop.permute.xlu1 %1231 }
 0x7c7   : > { %v1234_v56 = vmul.f32 %v6068_v54, %v1232_v55  ;;  %v923_v54 = vadd.f32 %v6499_v62, %v6443_v23  ;;  %v1789_v62 = vld [vmem:[%s7237_s6 + $0x8] sm:$0xff] }
 0x7c9   : > { %1236 = vrot.lane.b32.xlu0 %v1234_v56, %s6273_s26 }
 0x83b   : > { %v1237_v57 = vpop.permute.xlu0 %1236 }
 0x83c   : > { %v1239_v61 = vadd.f32 %v1237_v57, %v908_v49 }
 0x83e   : > { %6069 = vtanh.f32 %v1239_v61 }
 0x848   : > { %v6070_v63 = vpop.eup %6069 }
 0x849   : > { %1243 = vrot.lane.b32.xlu1 %v6070_v63, %s6270_s2 }
 0x8bb   : > { %v1244_v4 = vpop.permute.xlu1 %1243 }
 0x8bc   : > { %v1246_v5 = vmul.f32 %v1244_v4, %v1241_v0 }
 0x8be   : > { %v1248_v6 = vadd.f32 %v1247_v59, %v1246_v5  ;;  %v1788_v59 = vld [vmem:[%s7237_s6] sm:$0xff] }
 0x8bf   : > { %v5900_v5 = vpack.c.bf16 %v1789_v62, %v1788_v59 }
 0x8c0   : > { %1250 = vrot.lane.b32.xlu0 %v1248_v6, %s6270_s2 }
 0x932   : > { %v1251_v7 = vpop.permute.xlu0 %1250 }
 0x933   : > { %1254 = vst.msk [vmem:[#allocation2 + $0x10] sm:$0xff] %vm936_vm2, %v1251_v7  ;;  %5526 = vmatmul.mubr.msk.f32.vlgmr.msra.gmra.mrb[6].mxu1 %vm936_vm2, %v1251_v7 }
 0x934   : > { %5884 = vmatpush3.bf16.msra.mxu1 %v6456_v33  ;;  %5547 = vmatprep.mubr.msk.f32.mxu1 %vm6271_vm1, %v6272_v48 }
 0x935   : > { %5885 = vmatprep.subr.bf16.mxu1 %v6269_v22 }
 0x938   : > { %5887 = vmatpush3.bf16.msra.mxu1 %v6467_v41 }
 0x939   : > { %5894 = vmatprep.subr.bf16.mxu1 %v6269_v22 }
 0xa06   : > { %v1323_v8 = vpop.f32.mrb[6].mxu1 }
 0xa07   : > { %v1334_v9 = vadd.f32 %v1323_v8, %v6497_v60  ;;  %v5527_v10 = vpop.f32.mrb[7].mxu1  ;;  %v1327_v12 = vadd.f32 %v1323_v8, %v913_v11 }
 0xa09   : > { %1336 = vrot.lane.b32.xlu1 %v1334_v9, %s6273_s26  ;;  %v5164_v13 = vmul.f32 -1.442695, %v1327_v12  ;;  %v1790_v12 = vld [vmem:[%s7237_s6 + $0x10] sm:$0xff] }
 0xa0b   : > { %6071 = vpow2.f32 %v5164_v13  ;;  %v1791_v13 = vld [vmem:[%s7237_s6 + $0x18] sm:$0xff] }
 0xa15   : > { %v6072_v14 = vpop.eup %6071 }
 0xa16   : > { %v1331_v15 = vadd.f32 1.0, %v6072_v14  ;;  %v5904_v14 = vpack.c.bf16 %v1791_v13, %v1790_v12 }
 0xa18   : > { %6073 = vrcp.f32 %v1331_v15 }
 0xa22   : > { %v6074_v16 = vpop.eup %6073 }
 0xa23   : > { %v1346_v24 = vsub.f32 1.0, %v6074_v16  ;;  %v1352_v58 = vmul.f32 %v6074_v16, %v1248_v6 }
 0xa7b   : > { %v1337_v17 = vpop.permute.xlu1 %1336 }
 0xa7c   : > { %v1339_v18 = vmul.f32 %v6074_v16, %v1337_v17  ;;  %v1780_v16 = vld [vmem:[#allocation2] sm:$0xff]  ;;  %v1781_v17 = vld [vmem:[#allocation2 + $0x8] sm:$0xff] }
 0xa7e   : > { %1341 = vrot.lane.b32.xlu0 %v1339_v18, %s6273_s26  ;;  %v1782_v18 = vld [vmem:[#allocation2 + $0x10] sm:$0xff] }
 0xaf0   : > { %v1342_v19 = vpop.permute.xlu0 %1341 }
 0xaf1   : > { %v1344_v20 = vadd.f32 %v1342_v19, %v913_v11 }
 0xaf3   : > { %6075 = vtanh.f32 %v1344_v20 }
 0xafd   : > { %v6076_v21 = vpop.eup %6075 }
 0xafe   : > { %1348 = vrot.lane.b32.xlu1 %v6076_v21, %s6270_s2 }
 0xb70   : > { %v1349_v25 = vpop.permute.xlu1 %1348 }
 0xb71   : > { %v1351_v26 = vmul.f32 %v1349_v25, %v1346_v24 }
 0xb73   : > { %v1353_v27 = vadd.f32 %v1352_v58, %v1351_v26 }
 0xb75   : > { %1355 = vrot.lane.b32.xlu0 %v1353_v27, %s6270_s2 }
 0xbe7   : > { %v1356_v28 = vpop.permute.xlu0 %1355 }
 0xbe8   : > { %1359 = vst.msk [vmem:[#allocation2 + $0x18] sm:$0xff] %vm936_vm2, %v1356_v28  ;;  %5537 = vmatmul.mubr.msk.f32.vlgmr.msra.gmra.mrb[16].mxu0 %vm936_vm2, %v1356_v28 }
 0xbe9   : > { %5890 = vmatpush3.bf16.msra.mxu0 %v6456_v33  ;;  %5558 = vmatprep.mubr.msk.f32.mxu0 %vm6271_vm1, %v6272_v48 }
 0xbea   : > { %5891 = vmatprep.subr.bf16.mxu0 %v6269_v22 }
 0xbed   : > { %5893 = vmatpush3.bf16.msra.mxu0 %v6467_v41 }
 0xbee   : > { %5901 = vmatprep.subr.bf16.mxu0 %v5900_v5 }
 0xbef   : > { %v1783_v19 = vld [vmem:[#allocation2 + $0x18] sm:$0xff] }
 0xcbb   : > { %v1428_v29 = vpop.f32.mrb[16].mxu0 }
 0xcbc   : > { %v1439_v30 = vadd.f32 %v1428_v29, %v6497_v60  ;;  %v5538_v31 = vpop.f32.mrb[17].mxu0  ;;  %v1432_v34 = vadd.f32 %v1428_v29, %v918_v32 }
 0xcbe   : > { %1441 = vrot.lane.b32.xlu1 %v1439_v30, %s6273_s26  ;;  %v5166_v35 = vmul.f32 -1.442695, %v1432_v34 }
 0xcc0   : > { %6077 = vpow2.f32 %v5166_v35 }
 0xcca   : > { %v6078_v36 = vpop.eup %6077 }
 0xccb   : > { %v1436_v37 = vadd.f32 1.0, %v6078_v36 }
 0xccd   : > { %6079 = vrcp.f32 %v1436_v37 }
 0xcd7   : > { %v6080_v38 = vpop.eup %6079 }
 0xcd8   : > { %v1451_v45 = vsub.f32 1.0, %v6080_v38  ;;  %v1457_v1 = vmul.f32 %v6080_v38, %v1353_v27 }
 0xd30   : > { %v1442_v39 = vpop.permute.xlu1 %1441 }
 0xd31   : > { %v1444_v40 = vmul.f32 %v6080_v38, %v1442_v39 }
 0xd33   : > { %1446 = vrot.lane.b32.xlu0 %v1444_v40, %s6273_s26 }
 0xda5   : > { %v1447_v42 = vpop.permute.xlu0 %1446 }
 0xda6   : > { %v1449_v43 = vadd.f32 %v1447_v42, %v918_v32  ;;  %v928_v32 = vadd.f32 %v6443_v23, %v6507_v3  ;;  %v6629_v3 = vld [vmem:[%s7239_s8] ss:$0 sm:$0xff] }
 0xda8   : > { %6081 = vtanh.f32 %v1449_v43 }
 0xdb2   : > { %v6082_v44 = vpop.eup %6081 }
 0xdb3   : > { %1453 = vrot.lane.b32.xlu1 %v6082_v44, %s6270_s2 }
 0xe25   : > { %v1454_v46 = vpop.permute.xlu1 %1453 }
 0xe26   : > { %v1456_v47 = vmul.f32 %v1454_v46, %v1451_v45  ;;  %v1792_v45 = vld [vmem:[%s7238_s7] sm:$0xff]  ;;  %v1793_v46 = vld [vmem:[%s7238_s7 + $0x8] sm:$0xff] }
 0xe28   : > { %v1458_v49 = vadd.f32 %v1457_v1, %v1456_v47  ;;  %v6639_v1 = vpack.c.bf16 %v1793_v46, %v1792_v45  ;;  %v1794_v47 = vld [vmem:[%s7238_s7 + $0x10] sm:$0xff] }
 0xe2a   : > { %1460 = vrot.lane.b32.xlu0 %v1458_v49, %s6270_s2 }
 0xe9c   : > { %v1461_v50 = vpop.permute.xlu0 %1460 }
 0xe9d   : > { %1464 = vst.msk [vmem:[#allocation2 + $0x20] sm:$0xff] %vm936_vm2, %v1461_v50  ;;  %5548 = vmatmul.mubr.msk.f32.vlgmr.msra.gmra.mrb[8].mxu1 %vm936_vm2, %v1461_v50 }
 0xe9e   : > { %5896 = vmatpush3.bf16.msra.mxu1 %v6456_v33  ;;  %5569 = vmatprep.mubr.msk.f32.mxu1 %vm6271_vm1, %v6272_v48 }
 0xe9f   : > { %5897 = vmatprep.subr.bf16.mxu1 %v6269_v22 }
 0xea2   : > { %5899 = vmatpush3.bf16.msra.mxu1 %v6467_v41 }
 0xea3   : > { %5908 = vmatprep.subr.bf16.mxu1 %v6269_v22 }
 0xea4   : > { %v1784_v20 = vld [vmem:[#allocation2 + $0x20] sm:$0xff] }
 0xf70   : > { %v1533_v51 = vpop.f32.mrb[8].mxu1 }
 0xf71   : > { %v1544_v52 = vadd.f32 %v1533_v51, %v6497_v60  ;;  %v5549_v53 = vpop.f32.mrb[9].mxu1  ;;  %v1537_v55 = vadd.f32 %v1533_v51, %v923_v54 }
 0xf73   : > { %1546 = vrot.lane.b32.xlu1 %v1544_v52, %s6273_s26  ;;  %v5168_v33 = vmul.f32 -1.442695, %v1537_v55 }
 0xf75   : > { %6083 = vpow2.f32 %v5168_v33 }
 0xf7f   : > { %v6084_v56 = vpop.eup %6083 }
 0xf80   : > { %v1541_v57 = vadd.f32 1.0, %v6084_v56 }
 0xf82   : > { %6085 = vrcp.f32 %v1541_v57 }
 0xf8c   : > { %v6086_v61 = vpop.eup %6085 }
 0xf8d   : > { %v1556_v7 = vsub.f32 1.0, %v6086_v61  ;;  %v1562_v9 = vmul.f32 %v6086_v61, %v1458_v49  ;;  %v1795_v49 = vld [vmem:[%s7238_s7 + $0x18] sm:$0xff] }
 0xf8e   : > { %v6649_v50 = vpack.c.bf16 %v1795_v49, %v1794_v47 }
 0xfe5   : > { %v1547_v63 = vpop.permute.xlu1 %1546 }
 0xfe6   : > { %v1549_v41 = vmul.f32 %v6086_v61, %v1547_v63 }
 0xfe8   : > { %1551 = vrot.lane.b32.xlu0 %v1549_v41, %s6273_s26 }
0x105a   : > { %v1552_v0 = vpop.permute.xlu0 %1551 }
0x105b   : > { %v1554_v4 = vadd.f32 %v1552_v0, %v923_v54 }
0x105d   : > { %6087 = vtanh.f32 %v1554_v4 }
0x1067   : > { %v6088_v6 = vpop.eup %6087 }
0x1068   : > { %1558 = vrot.lane.b32.xlu1 %v6088_v6, %s6270_s2 }
0x10da   : > { %v1559_v8 = vpop.permute.xlu1 %1558 }
0x10db   : > { %v1561_v10 = vmul.f32 %v1559_v8, %v1556_v7 }
0x10dd   : > { %v6591_v11 = vadd.f32 %v1562_v9, %v1561_v10 }
0x10df   : > { %1565 = vrot.lane.b32.xlu0 %v6591_v11, %s6270_s2 }
0x1151   : > { %v1566_v15 = vpop.permute.xlu0 %1565 }
0x1152   : > { %1569 = vst.msk [vmem:[#allocation2 + $0x28] sm:$0xff] %vm936_vm2, %v1566_v15  ;;  %5559 = vmatmul.mubr.msk.f32.vlgmr.msra.gmra.mrb[18].mxu0 %vm936_vm2, %v1566_v15  ;;  %v933_v15 = vadd.f32 %v6505_v2, %v6443_v23 }
0x1153   : > { %5903 = vmatpush3.bf16.msra.mxu0 %v5900_v5  ;;  %5580 = vmatprep.mubr.msk.f32.mxu0 %vm936_vm2, %v1780_v16 }
0x1154   : > { %5905 = vmatprep.subr.bf16.mxu0 %v5904_v14 }
0x1157   : > { %5907 = vmatpush3.bf16.msra.mxu0 %v5904_v14 }
0x1158   : > { %5920 = vmatprep.subr.bf16.mxu0 %v6269_v22 }
0x1159   : > { %v1785_v21 = vld [vmem:[#allocation2 + $0x28] sm:$0xff] }
0x115a   : > { %5581 = vmatmul.mubr.msk.f32.vlgmr.msra.gmra.mrb[20].mxu0 %vm936_vm2, %v1781_v17 }
0x115b   : > { %5583 = vmatprep.mubr.msk.f32.mxu0 %vm936_vm2, %v1782_v18  ;;  %5922 = vmatpush3.bf16.msra.mxu0 %v6639_v1 }
0x115c   : > { %5923 = vmatprep.subr.bf16.mxu0 %v6269_v22 }
0x115e   : > { %5584 = vmatmul.mubr.msk.f32.gmra.mrb[22].mxu0 %vm936_vm2, %v1783_v19 }
0x115f   : > { %5586 = vmatprep.mubr.msk.f32.mxu0 %vm936_vm2, %v1784_v20  ;;  %5925 = vmatpush3.bf16.msra.mxu0 %v6649_v50 }
0x1160   : > { %5932 = vmatprep.subr.bf16.mxu0 %v6269_v22 }
0x1162   : > { %5587 = vmatmul.mubr.msk.f32.gmra.mrb[24].mxu0 %vm936_vm2, %v1785_v21 }
0x1225   : > { %v1638_v24 = vpop.f32.mrb[18].mxu0 }
0x1226   : > { %v1649_v25 = vadd.f32 %v1638_v24, %v6497_v60  ;;  %v5560_v58 = vpop.f32.mrb[19].mxu0  ;;  %v1642_v34 = vadd.f32 %v1638_v24, %v928_v32 }
0x1228   : > { %1651 = vrot.lane.b32.xlu1 %v1649_v25, %s6273_s26  ;;  %v5170_v35 = vmul.f32 -1.442695, %v1642_v34 }
0x122a   : > { %6089 = vpow2.f32 %v5170_v35 }
0x122d   : > { %v6612_v26 = vpop.f32.mrb[20].mxu0 }
0x122e   : > { %v1893_v27 = vpop.f32.mrb[21].mxu0  ;;  %v1899_v49 = vadd.f32 %v6612_v26, %v6629_v3 }
0x122f   : > { %v1894_v59 = vadd.f32 %v6629_v3, %v1893_v27 }
0x1231   : > { %v6614_v28 = vpop.f32.mrb[22].mxu0 }
0x1232   : > { %v6616_v29 = vpop.f32.mrb[23].mxu0 }
0x1234   : > { %v6090_v36 = vpop.eup %6089 }
0x1235   : > { %v6618_v30 = vpop.f32.mrb[24].mxu0  ;;  %v1646_v37 = vadd.f32 1.0, %v6090_v36 }
0x1236   : > { %v6620_v31 = vpop.f32.mrb[25].mxu0 }
0x1237   : > { %6091 = vrcp.f32 %v1646_v37 }
0x1241   : > { %v6092_v38 = vpop.eup %6091 }
0x1242   : > { %v1661_v51 = vsub.f32 1.0, %v6092_v38  ;;  %v1667_v53 = vmul.f32 %v6092_v38, %v6591_v11 }
0x129a   : > { %v1652_v39 = vpop.permute.xlu1 %1651 }
0x129b   : > { %v1654_v40 = vmul.f32 %v6092_v38, %v1652_v39 }
0x129d   : > { %1656 = vrot.lane.b32.xlu0 %v1654_v40, %s6273_s26 }
0x130f   : > { %v1657_v42 = vpop.permute.xlu0 %1656 }
0x1310   : > { %v1659_v43 = vadd.f32 %v1657_v42, %v928_v32 }
0x1312   : > { %6093 = vtanh.f32 %v1659_v43 }
0x131c   : > { %v6094_v44 = vpop.eup %6093 }
0x131d   : > { %1663 = vrot.lane.b32.xlu1 %v6094_v44, %s6270_s2 }
0x1321   : > { %2009 = vrot.lane.b32.xlu1 %v6629_v3, %s6270_s2 }
0x138f   : > { %v1664_v52 = vpop.permute.xlu1 %1663 }
0x1390   : > { %v1666_v54 = vmul.f32 %v1664_v52, %v1661_v51 }
0x1392   : > { %v6654_v55 = vadd.f32 %v1667_v53, %v1666_v54 }
0x1393   : > { %v6674_v63 = vpop.permute.xlu1 %2009 }
0x1394   : > { %1670 = vrot.lane.b32.xlu0 %v6654_v55, %s6270_s2 }
0x1406   : > { %v1671_v33 = vpop.permute.xlu0 %1670 }
0x1407   : > { %1674 = vst.msk [vmem:[#allocation2 + $0x30] sm:$0xff] %vm936_vm2, %v1671_v33  ;;  %5570 = vmatmul.mubr.msk.f32.vlgmr.msra.gmra.mrb[10].mxu1 %vm936_vm2, %v1671_v33 }
0x1408   : > { %5910 = vmatpush3.bf16.msra.mxu1 %v6639_v1  ;;  %5600 = vmatprep.mubr.msk.f32.mxu1 %vm6271_vm1, %v6272_v48 }
0x1409   : > { %5911 = vmatprep.subr.bf16.mxu1 %v6269_v22 }
0x140c   : > { %5913 = vmatpush3.bf16.msra.mxu1 %v6649_v50 }
0x140d   : > { %5914 = vmatprep.subr.bf16.mxu1 %v6269_v22 }
0x140e   : > { %v1786_v56 = vld [vmem:[#allocation2 + $0x30] sm:$0xff] }
0x140f   : > { %5601 = vmatmul.mubr.f32.vlgmr.msra.gmra.mrb[12].mxu1 %v6272_v48  ;;  %5589 = vmatprep.mubr.msk.f32.mxu0 %vm936_vm2, %v1786_v56 }
0x1410   : > { %5916 = vmatpush3.bf16.msra.mxu1 %v6639_v1  ;;  %5611 = vmatprep.mubr.msk.f32.mxu1 %vm6271_vm1, %v6272_v48 }
0x1411   : > { %5917 = vmatprep.subr.bf16.mxu1 %v6269_v22 }
0x1414   : > { %5919 = vmatpush3.bf16.msra.mxu1 %v6649_v50 }
0x1415   : > { %5926 = vmatprep.subr.bf16.mxu1 %v6269_v22 }
0x14da   : > { %v1743_v57 = vpop.f32.mrb[10].mxu1 }
0x14db   : > { %v5571_v61 = vpop.f32.mrb[11].mxu1  ;;  %v1754_v14 = vadd.f32 %v1743_v57, %v6497_v60  ;;  %v1747_v16 = vadd.f32 %v1743_v57, %v933_v15 }
0x14dd   : > { %v5172_v17 = vmul.f32 -1.442695, %v1747_v16 }
0x14e2   : > { %v1998_v41 = vpop.f32.mrb[12].mxu1 }
0x14e3   : > { %v2012_v0 = vadd.f32 %v6674_v63, %v1998_v41  ;;  %v5602_v4 = vpop.f32.mrb[13].mxu1  ;;  %v2002_v62 = vadd.f32 %v1998_v41, %v1894_v59 }
0x14e5   : > { %2014 = vrot.lane.b32.xlu0 %v2012_v0, %s6273_s26  ;;  %v5182_v5 = vmul.f32 -1.442695, %v2002_v62 }
0x14e7   : > { %6095 = vpow2.f32 %v5182_v5 }
0x14f1   : > { %v6096_v6 = vpop.eup %6095 }
0x14f2   : > { %v2006_v7 = vadd.f32 1.0, %v6096_v6 }
0x14f4   : > { %6097 = vrcp.f32 %v2006_v7 }
0x14fe   : > { %v6098_v8 = vpop.eup %6097 }
0x14ff   : > { %v2024_v20 = vsub.f32 1.0, %v6098_v8  ;;  %v2030_v24 = vmul.f32 0.0, %v6098_v8 }
0x1557   : > { %v2015_v9 = vpop.permute.xlu0 %2014 }
0x1558   : > { %v2017_v10 = vmul.f32 %v6098_v8, %v2015_v9 }
0x155a   : > { %2019 = vrot.lane.b32.xlu1 %v2017_v10, %s6273_s26 }
0x15cc   : > { %v2020_v11 = vpop.permute.xlu1 %2019 }
0x15cd   : > { %v2022_v12 = vadd.f32 %v2020_v11, %v1894_v59 }
0x15cf   : > { %6099 = vtanh.f32 %v2022_v12  ;;  %v1904_v12 = vadd.f32 %v6629_v3, %v6616_v29 }
0x15d0   : > { %6101 = vpow2.f32 %v5172_v17 }
0x15d9   : > { %v6100_v13 = vpop.eup %6099 }
0x15da   : > { %2026 = vrot.lane.b32.xlu0 %v6100_v13, %s6270_s2  ;;  %v6102_v18 = vpop.eup %6101 }
0x15db   : > { %v1751_v19 = vadd.f32 1.0, %v6102_v18 }
0x15dd   : > { %6103 = vrcp.f32 %v1751_v19 }
0x15de   : > { %1756 = vrot.lane.b32.xlu0 %v1754_v14, %s6273_s26 }
0x15e7   : > { %v6104_v27 = vpop.eup %6103 }
0x15e8   : > { %v1766_v37 = vsub.f32 1.0, %v6104_v27  ;;  %v1772_v39 = vmul.f32 %v6104_v27, %v6654_v55 }
0x164c   : > { %v2027_v21 = vpop.permute.xlu0 %2026 }
0x164d   : > { %v2029_v25 = vmul.f32 %v2027_v21, %v2024_v20 }
0x164f   : > { %v2031_v58 = vadd.f32 %v2030_v24, %v2029_v25 }
0x1650   : > { %v1757_v32 = vpop.permute.xlu0 %1756 }
0x1651   : > { %v1759_v60 = vmul.f32 %v6104_v27, %v1757_v32  ;;  %2033 = vrot.lane.b32.xlu1 %v2031_v58, %s6270_s2 }
0x1653   : > { %1761 = vrot.lane.b32.xlu0 %v1759_v60, %s6273_s26 }
0x16c3   : > { %v2034_v23 = vpop.permute.xlu1 %2033 }
0x16c4   : > { %2036 = vst.msk [vmem:[#allocation2] sm:$0xff] %vm936_vm2, %v2034_v23  ;;  %5612 = vmatmul.mubr.msk.f32.vlgmr.msra.gmra.mrb[14].mxu1 %vm936_vm2, %v2034_v23 }
0x16c5   : > { %v1762_v2 = vpop.permute.xlu0 %1761  ;;  %5928 = vmatpush3.bf16.msra.mxu1 %v6639_v1  ;;  %5633 = vmatprep.mubr.msk.f32.mxu1 %vm6271_vm1, %v6272_v48 }
0x16c6   : > { %v1764_v34 = vadd.f32 %v1762_v2, %v933_v15  ;;  %5929 = vmatprep.subr.bf16.mxu1 %v6269_v22 }
0x16c8   : > { %6105 = vtanh.f32 %v1764_v34 }
0x16c9   : > { %5931 = vmatpush3.bf16.msra.mxu1 %v6649_v50 }
0x16ca   : > { %5938 = vmatprep.subr.bf16.mxu1 %v6269_v22 }
0x16cb   : > { %v6695_v35 = vld [vmem:[#allocation2] sm:$0xff] }
0x16cc   : > { %2773 = vst.msk [vmem:[%s6698_s29] sm:$0xff] %vm936_vm2, %v6695_v35 }
0x16d2   : > { %v6106_v36 = vpop.eup %6105 }
0x16d3   : > { %1768 = vrot.lane.b32.xlu0 %v6106_v36, %s6270_s2 }
0x1745   : > { %v1769_v38 = vpop.permute.xlu0 %1768 }
0x1746   : > { %v1771_v40 = vmul.f32 %v1769_v38, %v1766_v37  ;;  %v1909_v37 = vadd.f32 %v6614_v28, %v6629_v3 }
0x1748   : > { %v1773_v42 = vadd.f32 %v1772_v39, %v1771_v40 }
0x174a   : > { %1775 = vrot.lane.b32.xlu0 %v1773_v42, %s6270_s2 }
0x1797   : > { %v2105_v43 = vpop.f32.mrb[14].mxu1 }
0x1798   : > { %v2116_v44 = vadd.f32 %v2105_v43, %v6674_v63  ;;  %v5613_v45 = vpop.f32.mrb[15].mxu1  ;;  %v2109_v51 = vadd.f32 %v2105_v43, %v1899_v49 }
0x179a   : > { %2118 = vrot.lane.b32.xlu1 %v2116_v44, %s6273_s26  ;;  %v5184_v52 = vmul.f32 -1.442695, %v2109_v51 }
0x179c   : > { %6107 = vpow2.f32 %v5184_v52 }
0x17a6   : > { %v6108_v53 = vpop.eup %6107 }
0x17a7   : > { %v2113_v54 = vadd.f32 1.0, %v6108_v53 }
0x17a9   : > { %6109 = vrcp.f32 %v2113_v54 }
0x17b3   : > { %v6110_v55 = vpop.eup %6109 }
0x17b4   : > { %v2128_v4 = vsub.f32 1.0, %v6110_v55  ;;  %v2134_v62 = vmul.f32 %v6110_v55, %v2031_v58 }
0x17bc   : > { %v1776_v46 = vpop.permute.xlu0 %1775 }
0x17bd   : > { %1779 = vst.msk [vmem:[#allocation2 + $0x38] sm:$0xff] %vm936_vm2, %v1776_v46 }
0x17c4   : > { %v1787_v47 = vld [vmem:[#allocation2 + $0x38] sm:$0xff] }
0x17c5   : > { %5590 = vmatmul.mubr.msk.f32.gmra.mrb[26].mxu0 %vm936_vm2, %v1787_v47 }
0x17c6   : > { %5622 = vmatprep.mubr.msk.f32.mxu0 %vm6271_vm1, %v6272_v48 }
0x180c   : > { %v2119_v33 = vpop.permute.xlu1 %2118 }
0x180d   : > { %v2121_v56 = vmul.f32 %v6110_v55, %v2119_v33 }
0x180f   : > { %2123 = vrot.lane.b32.xlu1 %v2121_v56, %s6273_s26 }
0x1881   : > { %v2124_v57 = vpop.permute.xlu1 %2123 }
0x1882   : > { %v2126_v61 = vadd.f32 %v2124_v57, %v1899_v49 }
0x1884   : > { %6111 = vtanh.f32 %v2126_v61 }
0x188e   : > { %v6112_v41 = vpop.eup %6111 }
0x188f   : > { %2130 = vrot.lane.b32.xlu1 %v6112_v41, %s6270_s2  ;;  %v1914_v41 = vadd.f32 %v6629_v3, %v6620_v31 }
0x1898   : > { %v6716_v0 = vpop.f32.mrb[26].mxu0 }
0x1899   : > { %v6718_v26 = vpop.f32.mrb[27].mxu0 }
0x1901   : > { %v2131_v59 = vpop.permute.xlu1 %2130 }
0x1902   : > { %v2133_v5 = vmul.f32 %v2131_v59, %v2128_v4 }
0x1904   : > { %v2135_v6 = vadd.f32 %v2134_v62, %v2133_v5 }
0x1906   : > { %2137 = vrot.lane.b32.xlu1 %v2135_v6, %s6270_s2 }
0x1978   : > { %v2138_v7 = vpop.permute.xlu1 %2137 }
0x1979   : > { %2140 = vst.msk [vmem:[#allocation2 + $0x8] sm:$0xff] %vm936_vm2, %v2138_v7  ;;  %5623 = vmatmul.mubr.msk.f32.vlgmr.msra.gmra.mrb[28].mxu0 %vm936_vm2, %v2138_v7 }
0x197a   : > { %5934 = vmatpush3.bf16.msra.mxu0 %v6639_v1  ;;  %5644 = vmatprep.mubr.msk.f32.mxu0 %vm6271_vm1, %v6272_v48 }
0x197b   : > { %5935 = vmatprep.subr.bf16.mxu0 %v6269_v22 }
0x197e   : > { %5937 = vmatpush3.bf16.msra.mxu0 %v6649_v50 }
0x197f   : > { %5944 = vmatprep.subr.bf16.mxu0 %v6269_v22 }
0x1980   : > { %v6729_v8 = vld [vmem:[#allocation2 + $0x8] sm:$0xff] }
0x1981   : > { %2774 = vst.msk [vmem:[%s6698_s29 + $0x8] sm:$0xff] %vm936_vm2, %v6729_v8 }
0x1a4c   : > { %v2209_v9 = vpop.f32.mrb[28].mxu0 }
0x1a4d   : > { %v2220_v10 = vadd.f32 %v2209_v9, %v6674_v63  ;;  %v5624_v11 = vpop.f32.mrb[29].mxu0  ;;  %v2213_v13 = vadd.f32 %v2209_v9, %v1904_v12 }
0x1a4f   : > { %2222 = vrot.lane.b32.xlu0 %v2220_v10, %s6273_s26  ;;  %v5186_v14 = vmul.f32 -1.442695, %v2213_v13 }
0x1a51   : > { %6113 = vpow2.f32 %v5186_v14 }
0x1a5b   : > { %v6114_v15 = vpop.eup %6113 }
0x1a5c   : > { %v2217_v16 = vadd.f32 1.0, %v6114_v15 }
0x1a5e   : > { %6115 = vrcp.f32 %v2217_v16 }
0x1a68   : > { %v6116_v17 = vpop.eup %6115 }
0x1a69   : > { %v2232_v25 = vsub.f32 1.0, %v6116_v17  ;;  %v2238_v58 = vmul.f32 %v6116_v17, %v2135_v6 }
0x1ac1   : > { %v2223_v18 = vpop.permute.xlu0 %2222 }
0x1ac2   : > { %v2225_v19 = vmul.f32 %v6116_v17, %v2223_v18 }
0x1ac4   : > { %2227 = vrot.lane.b32.xlu1 %v2225_v19, %s6273_s26 }
0x1b36   : > { %v2228_v20 = vpop.permute.xlu1 %2227 }
0x1b37   : > { %v2230_v21 = vadd.f32 %v2228_v20, %v1904_v12 }
0x1b39   : > { %6117 = vtanh.f32 %v2230_v21 }
0x1b43   : > { %v6118_v24 = vpop.eup %6117 }
0x1b44   : > { %2234 = vrot.lane.b32.xlu0 %v6118_v24, %s6270_s2 }
0x1bb6   : > { %v2235_v29 = vpop.permute.xlu0 %2234 }
0x1bb7   : > { %v2237_v27 = vmul.f32 %v2235_v29, %v2232_v25 }
0x1bb9   : > { %v2239_v32 = vadd.f32 %v2238_v58, %v2237_v27 }
0x1bbb   : > { %2241 = vrot.lane.b32.xlu1 %v2239_v32, %s6270_s2 }
0x1c2d   : > { %v2242_v60 = vpop.permute.xlu1 %2241 }
0x1c2e   : > { %2244 = vst.msk [vmem:[#allocation2 + $0x10] sm:$0xff] %vm936_vm2, %v2242_v60  ;;  %5634 = vmatmul.mubr.msk.f32.vlgmr.msra.gmra.mrb[16].mxu1 %vm936_vm2, %v2242_v60 }
0x1c2f   : > { %5940 = vmatpush3.bf16.msra.mxu1 %v6639_v1  ;;  %5655 = vmatprep.mubr.msk.f32.mxu1 %vm6271_vm1, %v6272_v48 }
0x1c30   : > { %5941 = vmatprep.subr.bf16.mxu1 %v6269_v22 }
0x1c33   : > { %5943 = vmatpush3.bf16.msra.mxu1 %v6649_v50 }
0x1c34   : > { %5950 = vmatprep.subr.bf16.mxu1 %v6269_v22 }
0x1c35   : > { %v6749_v23 = vld [vmem:[#allocation2 + $0x10] sm:$0xff] }
0x1c36   : > { %2775 = vst.msk [vmem:[%s6698_s29 + $0x10] sm:$0xff] %vm936_vm2, %v6749_v23 }
0x1d01   : > { %v2313_v2 = vpop.f32.mrb[16].mxu1 }
0x1d02   : > { %v2324_v34 = vadd.f32 %v2313_v2, %v6674_v63  ;;  %v5635_v36 = vpop.f32.mrb[17].mxu1  ;;  %v2317_v38 = vadd.f32 %v2313_v2, %v1909_v37 }
0x1d04   : > { %2326 = vrot.lane.b32.xlu0 %v2324_v34, %s6273_s26  ;;  %v5188_v39 = vmul.f32 -1.442695, %v2317_v38  ;;  %v2781_v34 = vld [vmem:[%s7240_s9] sm:$0xff] }
0x1d06   : > { %6119 = vpow2.f32 %v5188_v39 }
0x1d10   : > { %v6120_v40 = vpop.eup %6119 }
0x1d11   : > { %v2321_v42 = vadd.f32 1.0, %v6120_v40 }
0x1d13   : > { %6121 = vrcp.f32 %v2321_v42 }
0x1d1d   : > { %v6122_v43 = vpop.eup %6121 }
0x1d1e   : > { %v2336_v51 = vsub.f32 1.0, %v6122_v43  ;;  %v2342_v52 = vmul.f32 %v6122_v43, %v2239_v32 }
0x1d76   : > { %v2327_v44 = vpop.permute.xlu0 %2326 }
0x1d77   : > { %v2329_v45 = vmul.f32 %v6122_v43, %v2327_v44  ;;  %v2783_v44 = vld [vmem:[%s7240_s9 + $0x10] sm:$0xff] }
0x1d79   : > { %2331 = vrot.lane.b32.xlu1 %v2329_v45, %s6273_s26  ;;  %v2784_v45 = vld [vmem:[%s7240_s9 + $0x18] sm:$0xff] }
0x1deb   : > { %v2332_v46 = vpop.permute.xlu1 %2331 }
0x1dec   : > { %v2334_v47 = vadd.f32 %v2332_v46, %v1909_v37  ;;  %v5960_v46 = vpack.c.bf16 %v2784_v45, %v2783_v44 }
0x1dee   : > { %6123 = vtanh.f32 %v2334_v47 }
0x1df8   : > { %v6124_v49 = vpop.eup %6123 }
0x1df9   : > { %2338 = vrot.lane.b32.xlu0 %v6124_v49, %s6270_s2 }
0x1e6b   : > { %v2339_v28 = vpop.permute.xlu0 %2338 }
0x1e6c   : > { %v2341_v53 = vmul.f32 %v2339_v28, %v2336_v51 }
0x1e6e   : > { %v2343_v54 = vadd.f32 %v2342_v52, %v2341_v53 }
0x1e70   : > { %2345 = vrot.lane.b32.xlu1 %v2343_v54, %s6270_s2 }
0x1ee2   : > { %v2346_v55 = vpop.permute.xlu1 %2345 }
0x1ee3   : > { %2348 = vst.msk [vmem:[#allocation2 + $0x18] sm:$0xff] %vm936_vm2, %v2346_v55  ;;  %5645 = vmatmul.mubr.msk.f32.vlgmr.msra.gmra.mrb[30].mxu0 %vm936_vm2, %v2346_v55 }
0x1ee4   : > { %5946 = vmatpush3.bf16.msra.mxu0 %v6639_v1  ;;  %5666 = vmatprep.mubr.msk.f32.mxu0 %vm6271_vm1, %v6272_v48 }
0x1ee5   : > { %5947 = vmatprep.subr.bf16.mxu0 %v6269_v22 }
0x1ee8   : > { %5949 = vmatpush3.bf16.msra.mxu0 %v6649_v50 }
0x1eea   : > { %v6768_v33 = vld [vmem:[#allocation2 + $0x18] sm:$0xff] }
0x1eeb   : > { %2776 = vst.msk [vmem:[%s6698_s29 + $0x18] sm:$0xff] %vm936_vm2, %v6768_v33 }
0x1fb6   : > { %v2417_v56 = vpop.f32.mrb[30].mxu0 }
0x1fb7   : > { %v2428_v57 = vadd.f32 %v2417_v56, %v6674_v63  ;;  %v5646_v61 = vpop.f32.mrb[31].mxu0  ;;  %v2421_v4 = vadd.f32 %v2417_v56, %v1914_v41 }
0x1fb9   : > { %2430 = vrot.lane.b32.xlu0 %v2428_v57, %s6273_s26  ;;  %v5190_v59 = vmul.f32 -1.442695, %v2421_v4 }
0x1fbb   : > { %6125 = vpow2.f32 %v5190_v59 }
0x1fc5   : > { %v6126_v62 = vpop.eup %6125 }
0x1fc6   : > { %v2425_v5 = vadd.f32 1.0, %v6126_v62 }
0x1fc8   : > { %6127 = vrcp.f32 %v2425_v5 }
0x1fd2   : > { %v6128_v6 = vpop.eup %6127 }
0x1fd3   : > { %v2440_v13 = vsub.f32 1.0, %v6128_v6  ;;  %v2446_v14 = vmul.f32 %v6128_v6, %v2343_v54 }
0x202b   : > { %v2431_v7 = vpop.permute.xlu0 %2430 }
0x202c   : > { %v2433_v9 = vmul.f32 %v6128_v6, %v2431_v7 }
0x202e   : > { %2435 = vrot.lane.b32.xlu1 %v2433_v9, %s6273_s26  ;;  %v2786_v9 = vld [vmem:[%s7241_s10 + $0x8] sm:$0xff] }
0x20a0   : > { %v2436_v10 = vpop.permute.xlu1 %2435 }
0x20a1   : > { %v2438_v11 = vadd.f32 %v2436_v10, %v1914_v41 }
0x20a3   : > { %6129 = vtanh.f32 %v2438_v11 }
0x20ad   : > { %v6130_v12 = vpop.eup %6129 }
0x20ae   : > { %2442 = vrot.lane.b32.xlu0 %v6130_v12, %s6270_s2  ;;  %v6853_v12 = vld [vmem:[%s7242_s11] ss:$0 sm:$0xff] }
0x2120   : > { %v2443_v31 = vpop.permute.xlu0 %2442 }
0x2121   : > { %v2445_v15 = vmul.f32 %v2443_v31, %v2440_v13 }
0x2123   : > { %v2447_v16 = vadd.f32 %v2446_v14, %v2445_v15 }
0x2125   : > { %2449 = vrot.lane.b32.xlu1 %v2447_v16, %s6270_s2 }
0x2197   : > { %v2450_v17 = vpop.permute.xlu1 %2449 }
0x2198   : > { %2452 = vst.msk [vmem:[#allocation2 + $0x20] sm:$0xff] %vm936_vm2, %v2450_v17  ;;  %5656 = vmatmul.mubr.msk.f32.vlgmr.msra.gmra.mrb[18].mxu1 %vm936_vm2, %v2450_v17 }
0x2199   : > { %5952 = vmatpush3.bf16.msra.mxu1 %v6639_v1  ;;  %5677 = vmatprep.mubr.msk.f32.mxu1 %vm6271_vm1, %v6272_v48  ;;  %v1919_v1 = vadd.f32 %v6618_v30, %v6629_v3  ;;  %v2782_v30 = vld [vmem:[%s7240_s9 + $0x8] sm:$0xff] }
0x219a   : > { %5953 = vmatprep.subr.bf16.mxu1 %v6269_v22  ;;  %v5956_v36 = vpack.c.bf16 %v2782_v30, %v2781_v34 }
0x219c   : > { %5957 = vmatprep.subr.bf16.mxu0 %v5956_v36 }
0x219d   : > { %5955 = vmatpush3.bf16.msra.mxu1 %v6649_v50 }
0x219e   : > { %5964 = vmatprep.subr.bf16.mxu1 %v6269_v22 }
0x219f   : > { %v2769_v18 = vld [vmem:[#allocation2 + $0x20] sm:$0xff] }
0x21a0   : > { %2777 = vst.msk [vmem:[%s6698_s29 + $0x20] sm:$0xff] %vm936_vm2, %v2769_v18 }
0x226b   : > { %v2521_v19 = vpop.f32.mrb[18].mxu1 }
0x226c   : > { %v2532_v20 = vadd.f32 %v2521_v19, %v6674_v63  ;;  %v5657_v21 = vpop.f32.mrb[19].mxu1  ;;  %v2525_v24 = vadd.f32 %v2521_v19, %v1919_v1 }
0x226e   : > { %2534 = vrot.lane.b32.xlu0 %v2532_v20, %s6273_s26  ;;  %v5192_v25 = vmul.f32 -1.442695, %v2525_v24 }
0x2270   : > { %6131 = vpow2.f32 %v5192_v25 }
0x227a   : > { %v6132_v29 = vpop.eup %6131 }
0x227b   : > { %v2529_v58 = vadd.f32 1.0, %v6132_v29 }
0x227d   : > { %6133 = vrcp.f32 %v2529_v58 }
0x2287   : > { %v6134_v50 = vpop.eup %6133 }
0x2288   : > { %v2544_v38 = vsub.f32 1.0, %v6134_v50  ;;  %v2550_v40 = vmul.f32 %v6134_v50, %v2447_v16 }
0x22e0   : > { %v2535_v27 = vpop.permute.xlu0 %2534 }
0x22e1   : > { %v2537_v32 = vmul.f32 %v6134_v50, %v2535_v27 }
0x22e3   : > { %2539 = vrot.lane.b32.xlu1 %v2537_v32, %s6273_s26 }
0x2355   : > { %v2540_v60 = vpop.permute.xlu1 %2539 }
0x2356   : > { %v2542_v2 = vadd.f32 %v2540_v60, %v1919_v1 }
0x2358   : > { %6135 = vtanh.f32 %v2542_v2 }
0x2362   : > { %v6136_v37 = vpop.eup %6135 }
0x2363   : > { %2546 = vrot.lane.b32.xlu0 %v6136_v37, %s6270_s2 }
0x23d5   : > { %v2547_v39 = vpop.permute.xlu0 %2546 }
0x23d6   : > { %v2549_v42 = vmul.f32 %v2547_v39, %v2544_v38 }
0x23d8   : > { %v2551_v43 = vadd.f32 %v2550_v40, %v2549_v42 }
0x23da   : > { %2553 = vrot.lane.b32.xlu1 %v2551_v43, %s6270_s2 }
0x244c   : > { %v2554_v47 = vpop.permute.xlu1 %2553 }
0x244d   : > { %2556 = vst.msk [vmem:[#allocation2 + $0x28] sm:$0xff] %vm936_vm2, %v2554_v47  ;;  %5667 = vmatmul.mubr.msk.f32.vlgmr.msra.gmra.mrb[32].mxu0 %vm936_vm2, %v2554_v47 }
0x244e   : > { %5959 = vmatpush3.bf16.msra.mxu0 %v5956_v36  ;;  %5688 = vmatprep.mubr.msk.f32.mxu0 %vm936_vm2, %v6695_v35 }
0x244f   : > { %5961 = vmatprep.subr.bf16.mxu0 %v5960_v46 }
0x2452   : > { %5963 = vmatpush3.bf16.msra.mxu0 %v5960_v46 }
0x2453   : > { %5979 = vmatprep.subr.bf16.mxu0 %v6269_v22 }
0x2454   : > { %v2770_v49 = vld [vmem:[#allocation2 + $0x28] sm:$0xff] }
0x2455   : > { %5689 = vmatmul.mubr.msk.f32.vlgmr.msra.gmra.mrb[34].mxu0 %vm936_vm2, %v6729_v8  ;;  %2778 = vst.msk [vmem:[%s6698_s29 + $0x28] sm:$0xff] %vm936_vm2, %v2770_v49 }
0x2456   : > { %5691 = vmatprep.mubr.msk.f32.mxu0 %vm936_vm2, %v6749_v23 }
0x2459   : > { %5692 = vmatmul.mubr.msk.f32.gmra.mrb[36].mxu0 %vm936_vm2, %v6768_v33  ;;  %v1924_v33 = vadd.f32 %v6629_v3, %v6718_v26  ;;  %v2785_v26 = vld [vmem:[%s7241_s10] sm:$0xff] }
0x245a   : > { %5694 = vmatprep.mubr.msk.f32.mxu0 %vm936_vm2, %v2769_v18  ;;  %v6846_v10 = vpack.c.bf16 %v2786_v9, %v2785_v26 }
0x245c   : > { %5981 = vmatpush3.bf16.msra.mxu0 %v6846_v10 }
0x245d   : > { %5695 = vmatmul.mubr.msk.f32.gmra.mrb[38].mxu0 %vm936_vm2, %v2770_v49  ;;  %5985 = vmatprep.subr.bf16.mxu0 %v6269_v22 }
0x2520   : > { %v2625_v35 = vpop.f32.mrb[32].mxu0 }
0x2521   : > { %v2636_v51 = vadd.f32 %v2625_v35, %v6674_v63  ;;  %v5668_v28 = vpop.f32.mrb[33].mxu0  ;;  %v2629_v56 = vadd.f32 %v2625_v35, %v1924_v33 }
0x2523   : > { %2638 = vrot.lane.b32.xlu0 %v2636_v51, %s6273_s26  ;;  %v5194_v57 = vmul.f32 -1.442695, %v2629_v56 }
0x2525   : > { %6137 = vpow2.f32 %v5194_v57 }
0x2528   : > { %v6826_v52 = vpop.f32.mrb[34].mxu0 }
0x2529   : > { %v2884_v8 = vpop.f32.mrb[35].mxu0  ;;  %v2890_v47 = vadd.f32 %v6826_v52, %v6853_v12 }
0x252a   : > { %v2885_v25 = vadd.f32 %v6853_v12, %v2884_v8 }
0x252c   : > { %v6828_v53 = vpop.f32.mrb[36].mxu0 }
0x252d   : > { %v6830_v54 = vpop.f32.mrb[37].mxu0 }
0x252f   : > { %v6138_v61 = vpop.eup %6137 }
0x2530   : > { %v6832_v23 = vpop.f32.mrb[38].mxu0  ;;  %v2633_v41 = vadd.f32 1.0, %v6138_v61 }
0x2531   : > { %v6834_v55 = vpop.f32.mrb[39].mxu0 }
0x2532   : > { %6139 = vrcp.f32 %v2633_v41 }
0x253c   : > { %v6140_v4 = vpop.eup %6139 }
0x253d   : > { %v2648_v11 = vsub.f32 1.0, %v6140_v4  ;;  %v2654_v31 = vmul.f32 %v6140_v4, %v2551_v43 }
0x2595   : > { %v2639_v59 = vpop.permute.xlu0 %2638 }
0x2596   : > { %v2641_v62 = vmul.f32 %v6140_v4, %v2639_v59 }
0x2598   : > { %2643 = vrot.lane.b32.xlu1 %v2641_v62, %s6273_s26 }
0x260a   : > { %v2644_v5 = vpop.permute.xlu1 %2643 }
0x260b   : > { %v2646_v6 = vadd.f32 %v2644_v5, %v1924_v33 }
0x260d   : > { %6141 = vtanh.f32 %v2646_v6 }
0x2617   : > { %v6142_v7 = vpop.eup %6141 }
0x2618   : > { %2650 = vrot.lane.b32.xlu0 %v6142_v7, %s6270_s2 }
0x261c   : > { %3002 = vrot.lane.b32.xlu0 %v6853_v12, %s6274_s22 }
0x268a   : > { %v2651_v13 = vpop.permute.xlu0 %2650 }
0x268b   : > { %v2653_v14 = vmul.f32 %v2651_v13, %v2648_v11  ;;  %v2895_v11 = vadd.f32 %v6853_v12, %v6830_v54 }
0x268d   : > { %v6857_v15 = vadd.f32 %v2654_v31, %v2653_v14 }
0x268e   : > { %v6877_v20 = vpop.permute.xlu0 %3002 }
0x268f   : > { %2657 = vrot.lane.b32.xlu1 %v6857_v15, %s6270_s2 }
0x2701   : > { %v2658_v16 = vpop.permute.xlu1 %2657 }
0x2702   : > { %2660 = vst.msk [vmem:[#allocation2 + $0x30] sm:$0xff] %vm936_vm2, %v2658_v16  ;;  %5678 = vmatmul.mubr.msk.f32.vlgmr.msra.gmra.mrb[20].mxu1 %vm936_vm2, %v2658_v16 }
0x2703   : > { %5966 = vmatpush3.bf16.msra.mxu1 %v6846_v10  ;;  %5704 = vmatprep.mubr.msk.f32.mxu1 %vm6271_vm1, %v6272_v48 }
0x2704   : > { %5967 = vmatprep.subr.bf16.mxu1 %v6269_v22 }
0x2706   : > { %5705 = vmatmul.mubr.f32.vlgmr.msra.gmra.mrb[22].mxu1 %v6272_v48 }
0x2707   : > { %5969 = vmatpush3.bf16.msra.mxu1 %v6846_v10  ;;  %5711 = vmatprep.mubr.msk.f32.mxu1 %vm6271_vm1, %v6272_v48 }
0x2708   : > { %5970 = vmatprep.subr.bf16.mxu1 %v6269_v22 }
0x2709   : > { %v2771_v17 = vld [vmem:[#allocation2 + $0x30] sm:$0xff] }
0x270a   : > { %2779 = vst.msk [vmem:[%s6698_s29 + $0x30] sm:$0xff] %vm936_vm2, %v2771_v17  ;;  %5697 = vmatprep.mubr.msk.f32.mxu0 %vm936_vm2, %v2771_v17 }
0x27d5   : > { %v6875_v18 = vpop.f32.mrb[20].mxu1 }
0x27d6   : > { %v5679_v19 = vpop.f32.mrb[21].mxu1 }
0x27d9   : > { %v2991_v21 = vpop.f32.mrb[22].mxu1 }
0x27da   : > { %v5706_v1 = vpop.f32.mrb[23].mxu1  ;;  %v3005_v24 = vadd.f32 %v6877_v20, %v2991_v21  ;;  %v2995_v29 = vadd.f32 %v2991_v21, %v2885_v25 }
0x27dc   : > { %3007 = vrot.lane.b32.xlu1 %v3005_v24, %s6270_s2  ;;  %v5206_v58 = vmul.f32 -1.442695, %v2995_v29 }
0x27de   : > { %6143 = vpow2.f32 %v5206_v58 }
0x27e8   : > { %v6144_v50 = vpop.eup %6143 }
0x27e9   : > { %v2999_v27 = vadd.f32 1.0, %v6144_v50 }
0x27eb   : > { %6145 = vrcp.f32 %v2999_v27 }
0x27f5   : > { %v6146_v32 = vpop.eup %6145 }
0x27f6   : > { %v3017_v37 = vsub.f32 1.0, %v6146_v32  ;;  %v3023_v39 = vmul.f32 0.0, %v6146_v32 }
0x284e   : > { %v3008_v60 = vpop.permute.xlu1 %3007 }
0x284f   : > { %v3010_v2 = vmul.f32 %v6146_v32, %v3008_v60 }
0x2851   : > { %3012 = vrot.lane.b32.xlu0 %v3010_v2, %s6275_s27 }
0x28c3   : > { %v3013_v34 = vpop.permute.xlu0 %3012 }
0x28c4   : > { %v3015_v30 = vadd.f32 %v3013_v34, %v2885_v25 }
0x28c6   : > { %6147 = vtanh.f32 %v3015_v30  ;;  %v2900_v30 = vadd.f32 %v6828_v53, %v6853_v12  ;;  %v2740_v53 = vadd.f32 %v6875_v18, %v6674_v63 }
0x28d0   : > { %v6148_v36 = vpop.eup %6147 }
0x28d1   : > { %3019 = vrot.lane.b32.xlu1 %v6148_v36, %s6274_s22 }
0x2943   : > { %v3020_v38 = vpop.permute.xlu1 %3019 }
0x2944   : > { %v3022_v40 = vmul.f32 %v3020_v38, %v3017_v37 }
0x2946   : > { %v3024_v42 = vadd.f32 %v3023_v39, %v3022_v40 }
0x2948   : > { %3026 = vrot.lane.b32.xlu0 %v3024_v42, %s6274_s22 }
0x29ba   : > { %v3027_v43 = vpop.permute.xlu0 %3026 }
0x29bb   : > { %3029 = vst.msk [vmem:[#allocation3] sm:$0xff] %vm656_vm0, %v3027_v43  ;;  %5712 = vmatmul.mubr.msk.f32.vlgmr.msra.gmra.mrb[24].mxu1 %vm656_vm0, %v3027_v43 }
0x29bc   : > { %5972 = vmatpush3.bf16.msra.mxu1 %v6846_v10  ;;  %5718 = vmatprep.mubr.msk.f32.mxu1 %vm6271_vm1, %v6272_v48 }
0x29bd   : > { %5973 = vmatprep.subr.bf16.mxu1 %v6269_v22 }
0x2a8e   : > { %v3098_v44 = vpop.f32.mrb[24].mxu1 }
0x2a8f   : > { %v3109_v45 = vadd.f32 %v3098_v44, %v6877_v20  ;;  %v5713_v46 = vpop.f32.mrb[25].mxu1  ;;  %v3102_v49 = vadd.f32 %v3098_v44, %v2890_v47 }
0x2a91   : > { %3111 = vrot.lane.b32.xlu1 %v3109_v45, %s6270_s2  ;;  %v5208_v35 = vmul.f32 -1.442695, %v3102_v49 }
0x2a93   : > { %6149 = vpow2.f32 %v5208_v35 }
0x2a9d   : > { %v6150_v51 = vpop.eup %6149 }
0x2a9e   : > { %v3106_v28 = vadd.f32 1.0, %v6150_v51 }
0x2aa0   : > { %6151 = vrcp.f32 %v3106_v28 }
0x2aaa   : > { %v6152_v8 = vpop.eup %6151 }
0x2aab   : > { %v3121_v4 = vsub.f32 1.0, %v6152_v8  ;;  %v3127_v52 = vmul.f32 %v6152_v8, %v3024_v42 }
0x2b03   : > { %v3112_v33 = vpop.permute.xlu1 %3111 }
0x2b04   : > { %v3114_v56 = vmul.f32 %v6152_v8, %v3112_v33 }
0x2b06   : > { %3116 = vrot.lane.b32.xlu0 %v3114_v56, %s6275_s27 }
0x2b78   : > { %v3117_v57 = vpop.permute.xlu0 %3116 }
0x2b79   : > { %v3119_v61 = vadd.f32 %v3117_v57, %v2890_v47  ;;  %v1929_v47 = vadd.f32 %v6716_v0, %v6629_v3 }
0x2b7b   : > { %6153 = vtanh.f32 %v3119_v61  ;;  %v2733_v49 = vadd.f32 %v6875_v18, %v1929_v47 }
0x2b7d   : > { %v5196_v35 = vmul.f32 -1.442695, %v2733_v49  ;;  %v3774_v49 = vld [vmem:[%s7243_s12 + $0x8] sm:$0xff] }
0x2b85   : > { %v6154_v41 = vpop.eup %6153 }
0x2b86   : > { %3123 = vrot.lane.b32.xlu1 %v6154_v41, %s6274_s22 }
0x2bf8   : > { %v3124_v59 = vpop.permute.xlu1 %3123 }
0x2bf9   : > { %v3126_v62 = vmul.f32 %v3124_v59, %v3121_v4 }
0x2bfb   : > { %v3128_v5 = vadd.f32 %v3127_v52, %v3126_v62 }
0x2bfd   : > { %3130 = vrot.lane.b32.xlu0 %v3128_v5, %s6274_s22 }
0x2c6f   : > { %v3131_v6 = vpop.permute.xlu0 %3130 }
0x2c70   : > { %3134 = vst.msk [vmem:[#allocation3 + $0x8] sm:$0xff] %vm656_vm0, %v3131_v6  ;;  %5719 = vmatmul.mubr.msk.f32.vlgmr.msra.gmra.mrb[26].mxu1 %vm656_vm0, %v3131_v6 }
0x2c71   : > { %5975 = vmatpush3.bf16.msra.mxu1 %v6846_v10  ;;  %5725 = vmatprep.mubr.msk.f32.mxu1 %vm6271_vm1, %v6272_v48 }
0x2c72   : > { %5976 = vmatprep.subr.bf16.mxu1 %v6269_v22 }
0x2d43   : > { %v3203_v7 = vpop.f32.mrb[26].mxu1 }
0x2d44   : > { %v3214_v26 = vadd.f32 %v3203_v7, %v6877_v20  ;;  %v5720_v9 = vpop.f32.mrb[27].mxu1  ;;  %v3207_v13 = vadd.f32 %v3203_v7, %v2895_v11 }
0x2d46   : > { %3216 = vrot.lane.b32.xlu1 %v3214_v26, %s6270_s2  ;;  %v5210_v31 = vmul.f32 -1.442695, %v3207_v13 }
0x2d48   : > { %6155 = vpow2.f32 %v5210_v31 }
0x2d52   : > { %v6156_v14 = vpop.eup %6155 }
0x2d53   : > { %v3211_v16 = vadd.f32 1.0, %v6156_v14 }
0x2d55   : > { %6157 = vrcp.f32 %v3211_v16 }
0x2d5f   : > { %v6158_v17 = vpop.eup %6157 }
0x2d60   : > { %v3226_v29 = vsub.f32 1.0, %v6158_v17  ;;  %v3232_v54 = vmul.f32 %v6158_v17, %v3128_v5 }
0x2db8   : > { %v3217_v19 = vpop.permute.xlu1 %3216 }
0x2db9   : > { %v3219_v21 = vmul.f32 %v6158_v17, %v3217_v19 }
0x2dbb   : > { %3221 = vrot.lane.b32.xlu0 %v3219_v21, %s6275_s27 }
0x2e2d   : > { %v3222_v1 = vpop.permute.xlu0 %3221 }
0x2e2e   : > { %v3224_v24 = vadd.f32 %v3222_v1, %v2895_v11 }
0x2e30   : > { %6159 = vtanh.f32 %v3224_v24 }
0x2e3a   : > { %v6160_v25 = vpop.eup %6159 }
0x2e3b   : > { %3228 = vrot.lane.b32.xlu1 %v6160_v25, %s6274_s22 }
0x2ead   : > { %v3229_v58 = vpop.permute.xlu1 %3228 }
0x2eae   : > { %v3231_v50 = vmul.f32 %v3229_v58, %v3226_v29 }
0x2eb0   : > { %v3233_v27 = vadd.f32 %v3232_v54, %v3231_v50 }
0x2eb2   : > { %3235 = vrot.lane.b32.xlu0 %v3233_v27, %s6274_s22 }
0x2f24   : > { %v3236_v32 = vpop.permute.xlu0 %3235 }
0x2f25   : > { %3239 = vst.msk [vmem:[#allocation3 + $0x10] sm:$0xff] %vm656_vm0, %v3236_v32  ;;  %5726 = vmatmul.mubr.msk.f32.vlgmr.msra.gmra.mrb[28].mxu1 %vm656_vm0, %v3236_v32 }
0x2f26   : > { %5978 = vmatpush3.bf16.msra.mxu1 %v6846_v10  ;;  %5732 = vmatprep.mubr.msk.f32.mxu1 %vm6271_vm1, %v6272_v48 }
0x2f27   : > { %5982 = vmatprep.subr.bf16.mxu1 %v6269_v22 }
0x2ff8   : > { %v3308_v60 = vpop.f32.mrb[28].mxu1 }
0x2ff9   : > { %v3319_v2 = vadd.f32 %v3308_v60, %v6877_v20  ;;  %v5727_v34 = vpop.f32.mrb[29].mxu1  ;;  %v3312_v36 = vadd.f32 %v3308_v60, %v2900_v30 }
0x2ffb   : > { %3321 = vrot.lane.b32.xlu1 %v3319_v2, %s6270_s2  ;;  %v5212_v37 = vmul.f32 -1.442695, %v3312_v36 }
0x2ffd   : > { %6161 = vpow2.f32 %v5212_v37 }
0x3007   : > { %v6162_v38 = vpop.eup %6161 }
0x3008   : > { %v3316_v39 = vadd.f32 1.0, %v6162_v38  ;;  %v2910_v38 = vadd.f32 %v6832_v23, %v6853_v12  ;;  %v3773_v23 = vld [vmem:[%s7243_s12] sm:$0xff] }
0x300a   : > { %6163 = vrcp.f32 %v3316_v39 }
0x3014   : > { %v6164_v40 = vpop.eup %6163 }
0x3015   : > { %v3331_v8 = vsub.f32 1.0, %v6164_v40  ;;  %v3337_v56 = vmul.f32 %v6164_v40, %v3233_v27 }
0x306d   : > { %v3322_v42 = vpop.permute.xlu1 %3321 }
0x306e   : > { %v3324_v43 = vmul.f32 %v6164_v40, %v3322_v42 }
0x3070   : > { %3326 = vrot.lane.b32.xlu0 %v3324_v43, %s6275_s27 }
0x30e2   : > { %v3327_v44 = vpop.permute.xlu0 %3326 }
0x30e3   : > { %v3329_v45 = vadd.f32 %v3327_v44, %v2900_v30 }
0x30e5   : > { %6165 = vtanh.f32 %v3329_v45 }
0x30e6   : > { %6167 = vpow2.f32 %v5196_v35  ;;  %v5988_v35 = vpack.c.bf16 %v3774_v49, %v3773_v23 }
0x30ef   : > { %v6166_v46 = vpop.eup %6165 }
0x30f0   : > { %3333 = vrot.lane.b32.xlu1 %v6166_v46, %s6274_s22  ;;  %v6168_v51 = vpop.eup %6167 }
0x30f1   : > { %v2737_v28 = vadd.f32 1.0, %v6168_v51 }
0x30f3   : > { %6169 = vrcp.f32 %v2737_v28 }
0x30f4   : > { %2742 = vrot.lane.b32.xlu1 %v2740_v53, %s6273_s26 }
0x30fd   : > { %v6170_v41 = vpop.eup %6169 }
0x30fe   : > { %v2752_v52 = vsub.f32 1.0, %v6170_v41  ;;  %v2758_v5 = vmul.f32 %v6170_v41, %v6857_v15  ;;  %v2905_v15 = vadd.f32 %v6853_v12, %v6834_v55 }
0x3162   : > { %v3334_v33 = vpop.permute.xlu1 %3333 }
0x3163   : > { %v3336_v57 = vmul.f32 %v3334_v33, %v3331_v8 }
0x3165   : > { %v3338_v61 = vadd.f32 %v3337_v56, %v3336_v57 }
0x3166   : > { %v2743_v4 = vpop.permute.xlu1 %2742 }
0x3167   : > { %v2745_v63 = vmul.f32 %v6170_v41, %v2743_v4  ;;  %3340 = vrot.lane.b32.xlu0 %v3338_v61, %s6274_s22  ;;  %v3766_v41 = vld [vmem:[#allocation3 + $0x8] sm:$0xff]  ;;  %v3767_v4 = vld [vmem:[#allocation3 + $0x10] sm:$0xff] }
0x3169   : > { %2747 = vrot.lane.b32.xlu1 %v2745_v63, %s6273_s26 }
0x31d9   : > { %v3341_v3 = vpop.permute.xlu0 %3340 }
0x31da   : > { %3344 = vst.msk [vmem:[#allocation3 + $0x18] sm:$0xff] %vm656_vm0, %v3341_v3  ;;  %5733 = vmatmul.mubr.msk.f32.vlgmr.msra.gmra.mrb[30].mxu1 %vm656_vm0, %v3341_v3 }
0x31db   : > { %v2748_v0 = vpop.permute.xlu1 %2747  ;;  %5984 = vmatpush3.bf16.msra.mxu1 %v6846_v10  ;;  %5746 = vmatprep.mubr.msk.f32.mxu1 %vm6271_vm1, %v6272_v48 }
0x31dc   : > { %v2750_v18 = vadd.f32 %v2748_v0, %v1929_v47  ;;  %5989 = vmatprep.subr.bf16.mxu1 %v5988_v35 }
0x31de   : > { %6171 = vtanh.f32 %v2750_v18 }
0x31e1   : > { %v3768_v63 = vld [vmem:[#allocation3 + $0x18] sm:$0xff] }
0x31e8   : > { %v6172_v59 = vpop.eup %6171 }
0x31e9   : > { %2754 = vrot.lane.b32.xlu1 %v6172_v59, %s6270_s2 }
0x325b   : > { %v2755_v62 = vpop.permute.xlu1 %2754 }
0x325c   : > { %v2757_v6 = vmul.f32 %v2755_v62, %v2752_v52 }
0x325e   : > { %v2759_v7 = vadd.f32 %v2758_v5, %v2757_v6 }
0x3260   : > { %2761 = vrot.lane.b32.xlu1 %v2759_v7, %s6270_s2 }
0x32ad   : > { %v3413_v26 = vpop.f32.mrb[30].mxu1 }
0x32ae   : > { %v3424_v9 = vadd.f32 %v3413_v26, %v6877_v20  ;;  %v5734_v11 = vpop.f32.mrb[31].mxu1  ;;  %v3417_v14 = vadd.f32 %v3413_v26, %v2905_v15 }
0x32b0   : > { %3426 = vrot.lane.b32.xlu0 %v3424_v9, %s6270_s2  ;;  %v5214_v16 = vmul.f32 -1.442695, %v3417_v14 }
0x32b2   : > { %6173 = vpow2.f32 %v5214_v16 }
0x32bc   : > { %v6174_v17 = vpop.eup %6173 }
0x32bd   : > { %v3421_v19 = vadd.f32 1.0, %v6174_v17 }
0x32bf   : > { %6175 = vrcp.f32 %v3421_v19 }
0x32c9   : > { %v6176_v21 = vpop.eup %6175 }
0x32ca   : > { %v3436_v50 = vsub.f32 1.0, %v6176_v21  ;;  %v3442_v32 = vmul.f32 %v6176_v21, %v3338_v61  ;;  %v3765_v61 = vld [vmem:[#allocation3] sm:$0xff] }
0x32d2   : > { %v2762_v13 = vpop.permute.xlu1 %2761 }
0x32d3   : > { %2764 = vst.msk [vmem:[#allocation2 + $0x38] sm:$0xff] %vm936_vm2, %v2762_v13 }
0x32da   : > { %v2772_v31 = vld [vmem:[#allocation2 + $0x38] sm:$0xff] }
0x32db   : > { %2780 = vst.msk [vmem:[%s6698_s29 + $0x38] sm:$0xff] %vm936_vm2, %v2772_v31  ;;  %5698 = vmatmul.mubr.msk.f32.gmra.mrb[40].mxu0 %vm936_vm2, %v2772_v31 }
0x32dc   : > { %5739 = vmatprep.mubr.msk.f32.mxu0 %vm6271_vm1, %v6272_v48 }
0x3322   : > { %v3427_v1 = vpop.permute.xlu0 %3426 }
0x3323   : > { %v3429_v24 = vmul.f32 %v6176_v21, %v3427_v1 }
0x3325   : > { %3431 = vrot.lane.b32.xlu0 %v3429_v24, %s6275_s27 }
0x3397   : > { %v3432_v25 = vpop.permute.xlu0 %3431 }
0x3398   : > { %v3434_v29 = vadd.f32 %v3432_v25, %v2905_v15  ;;  %v7003_v25 = vld [vmem:[%s7245_s14] ss:$0 sm:$0xff] }
0x339a   : > { %6177 = vtanh.f32 %v3434_v29  ;;  %v3775_v29 = vld [vmem:[%s7244_s13] sm:$0xff] }
0x33a4   : > { %v6178_v58 = vpop.eup %6177 }
0x33a5   : > { %3438 = vrot.lane.b32.xlu0 %v6178_v58, %s6274_s22  ;;  %v3776_v58 = vld [vmem:[%s7244_s13 + $0x8] sm:$0xff] }
0x33ae   : > { %v6951_v54 = vpop.f32.mrb[40].mxu0 }
0x33af   : > { %v6953_v55 = vpop.f32.mrb[41].mxu0 }
0x33b0   : > { %v2915_v11 = vadd.f32 %v6853_v12, %v6953_v55  ;;  %v7013_v55 = vpack.c.bf16 %v3776_v58, %v3775_v29 }
0x3417   : > { %v3439_v27 = vpop.permute.xlu0 %3438 }
0x3418   : > { %v3441_v60 = vmul.f32 %v3439_v27, %v3436_v50 }
0x341a   : > { %v3443_v2 = vadd.f32 %v3442_v32, %v3441_v60 }
0x341c   : > { %3445 = vrot.lane.b32.xlu0 %v3443_v2, %s6274_s22 }
0x348e   : > { %v3446_v34 = vpop.permute.xlu0 %3445 }
0x348f   : > { %3449 = vst.msk [vmem:[#allocation3 + $0x20] sm:$0xff] %vm656_vm0, %v3446_v34  ;;  %5740 = vmatmul.mubr.msk.f32.vlgmr.msra.gmra.mrb[42].mxu0 %vm656_vm0, %v3446_v34 }
0x3490   : > { %5987 = vmatpush3.bf16.msra.mxu0 %v6846_v10  ;;  %5753 = vmatprep.mubr.msk.f32.mxu0 %vm6271_vm1, %v6272_v48 }
0x3491   : > { %5992 = vmatprep.subr.bf16.mxu0 %v6269_v22 }
0x3496   : > { %v3769_v3 = vld [vmem:[#allocation3 + $0x20] sm:$0xff] }
0x3562   : > { %v3518_v30 = vpop.f32.mrb[42].mxu0 }
0x3563   : > { %v3529_v36 = vadd.f32 %v3518_v30, %v6877_v20  ;;  %v5741_v37 = vpop.f32.mrb[43].mxu0  ;;  %v3522_v39 = vadd.f32 %v3518_v30, %v2910_v38 }
0x3565   : > { %3531 = vrot.lane.b32.xlu1 %v3529_v36, %s6270_s2  ;;  %v5216_v40 = vmul.f32 -1.442695, %v3522_v39 }
0x3567   : > { %6179 = vpow2.f32 %v5216_v40 }
0x3571   : > { %v6180_v42 = vpop.eup %6179 }
0x3572   : > { %v3526_v43 = vadd.f32 1.0, %v6180_v42 }
0x3574   : > { %6181 = vrcp.f32 %v3526_v43 }
0x357e   : > { %v6182_v10 = vpop.eup %6181 }
0x357f   : > { %v3541_v51 = vsub.f32 1.0, %v6182_v10  ;;  %v3547_v8 = vmul.f32 %v6182_v10, %v3443_v2 }
0x35d7   : > { %v3532_v44 = vpop.permute.xlu1 %3531 }
0x35d8   : > { %v3534_v45 = vmul.f32 %v6182_v10, %v3532_v44 }
0x35da   : > { %3536 = vrot.lane.b32.xlu0 %v3534_v45, %s6275_s27 }
0x364c   : > { %v3537_v46 = vpop.permute.xlu0 %3536 }
0x364d   : > { %v3539_v53 = vadd.f32 %v3537_v46, %v2910_v38 }
0x364f   : > { %6183 = vtanh.f32 %v3539_v53 }
0x3659   : > { %v6184_v47 = vpop.eup %6183 }
0x365a   : > { %3543 = vrot.lane.b32.xlu1 %v6184_v47, %s6274_s22 }
0x36cc   : > { %v3544_v28 = vpop.permute.xlu1 %3543 }
0x36cd   : > { %v3546_v33 = vmul.f32 %v3544_v28, %v3541_v51 }
0x36cf   : > { %v3548_v56 = vadd.f32 %v3547_v8, %v3546_v33 }
0x36d1   : > { %3550 = vrot.lane.b32.xlu0 %v3548_v56, %s6274_s22 }
0x3743   : > { %v3551_v57 = vpop.permute.xlu0 %3550 }
0x3744   : > { %3554 = vst.msk [vmem:[#allocation3 + $0x28] sm:$0xff] %vm656_vm0, %v3551_v57  ;;  %5747 = vmatmul.mubr.msk.f32.vlgmr.msra.gmra.mrb[32].mxu1 %vm656_vm0, %v3551_v57 }
0x3745   : > { %5991 = vmatpush3.bf16.msra.mxu1 %v5988_v35  ;;  %5760 = vmatprep.mubr.msk.f32.mxu1 %vm656_vm0, %v3765_v61 }
0x3746   : > { %6004 = vmatprep.subr.bf16.mxu1 %v6269_v22 }
0x3748   : > { %5761 = vmatmul.mubr.msk.f32.vlgmr.msra.gmra.mrb[34].mxu1 %vm656_vm0, %v3766_v41 }
0x3749   : > { %5763 = vmatprep.mubr.msk.f32.mxu1 %vm656_vm0, %v3767_v4  ;;  %6006 = vmatpush3.bf16.msra.mxu1 %v7013_v55 }
0x374a   : > { %6010 = vmatprep.subr.bf16.mxu1 %v6269_v22 }
0x374b   : > { %v3770_v0 = vld [vmem:[#allocation3 + $0x28] sm:$0xff] }
0x374c   : > { %5764 = vmatmul.mubr.msk.f32.gmra.mrb[36].mxu1 %vm656_vm0, %v3768_v63 }
0x374d   : > { %5766 = vmatprep.mubr.msk.f32.mxu1 %vm656_vm0, %v3769_v3 }
0x3750   : > { %5767 = vmatmul.mubr.msk.f32.gmra.mrb[38].mxu1 %vm656_vm0, %v3770_v0 }
0x3817   : > { %v3623_v18 = vpop.f32.mrb[32].mxu1 }
0x3818   : > { %v3634_v59 = vadd.f32 %v3623_v18, %v6877_v20  ;;  %v5748_v52 = vpop.f32.mrb[33].mxu1  ;;  %v3627_v13 = vadd.f32 %v3623_v18, %v2915_v11 }
0x381a   : > { %3636 = vrot.lane.b32.xlu1 %v3634_v59, %s6270_s2  ;;  %v5218_v31 = vmul.f32 -1.442695, %v3627_v13 }
0x381b   : > { %v6986_v62 = vpop.f32.mrb[34].mxu1 }
0x381c   : > { %v3874_v5 = vpop.f32.mrb[35].mxu1  ;;  %6185 = vpow2.f32 %v5218_v31  ;;  %v3880_v3 = vadd.f32 %v6986_v62, %v7003_v25 }
0x381d   : > { %v3875_v43 = vadd.f32 %v7003_v25, %v3874_v5 }
0x381f   : > { %v6988_v6 = vpop.f32.mrb[36].mxu1 }
0x3820   : > { %v6990_v7 = vpop.f32.mrb[37].mxu1 }
0x3823   : > { %v6992_v26 = vpop.f32.mrb[38].mxu1 }
0x3824   : > { %v6994_v9 = vpop.f32.mrb[39].mxu1 }
0x3826   : > { %v6186_v15 = vpop.eup %6185 }
0x3827   : > { %v3631_v14 = vadd.f32 1.0, %v6186_v15 }
0x3829   : > { %6187 = vrcp.f32 %v3631_v14 }
0x3833   : > { %v6188_v16 = vpop.eup %6187 }
0x3834   : > { %v3646_v50 = vsub.f32 1.0, %v6188_v16  ;;  %v3652_v32 = vmul.f32 %v6188_v16, %v3548_v56 }
0x388c   : > { %v3637_v17 = vpop.permute.xlu1 %3636 }
0x388d   : > { %v3639_v19 = vmul.f32 %v6188_v16, %v3637_v17 }
0x388f   : > { %3641 = vrot.lane.b32.xlu0 %v3639_v19, %s6275_s27 }
0x3901   : > { %v3642_v21 = vpop.permute.xlu0 %3641 }
0x3902   : > { %v3644_v1 = vadd.f32 %v3642_v21, %v2915_v11 }
0x3904   : > { %6189 = vtanh.f32 %v3644_v1 }
0x390e   : > { %v6190_v24 = vpop.eup %6189 }
0x390f   : > { %3648 = vrot.lane.b32.xlu1 %v6190_v24, %s6274_s22 }
0x3913   : > { %3990 = vrot.lane.b32.xlu1 %v7003_v25, %s6274_s22 }
0x3981   : > { %v3649_v27 = vpop.permute.xlu1 %3648 }
0x3982   : > { %v3651_v60 = vmul.f32 %v3649_v27, %v3646_v50  ;;  %v3885_v50 = vadd.f32 %v7003_v25, %v6990_v7 }
0x3984   : > { %v7017_v2 = vadd.f32 %v3652_v32, %v3651_v60 }
0x3985   : > { %v7035_v38 = vpop.permute.xlu1 %3990 }
0x3986   : > { %3655 = vrot.lane.b32.xlu0 %v7017_v2, %s6274_s22 }
0x39f8   : > { %v3656_v34 = vpop.permute.xlu0 %3655 }
0x39f9   : > { %3659 = vst.msk [vmem:[#allocation3 + $0x30] sm:$0xff] %vm656_vm0, %v3656_v34  ;;  %5754 = vmatmul.mubr.msk.f32.vlgmr.msra.gmra.mrb[44].mxu0 %vm656_vm0, %v3656_v34 }
0x39fa   : > { %5994 = vmatpush3.bf16.msra.mxu0 %v7013_v55  ;;  %5776 = vmatprep.mubr.msk.f32.mxu0 %vm6271_vm1, %v6272_v48 }
0x39fb   : > { %5995 = vmatprep.subr.bf16.mxu0 %v6269_v22 }
0x39fd   : > { %5777 = vmatmul.mubr.f32.vlgmr.msra.gmra.mrb[46].mxu0 %v6272_v48 }
0x39fe   : > { %5997 = vmatpush3.bf16.msra.mxu0 %v7013_v55  ;;  %5783 = vmatprep.mubr.msk.f32.mxu0 %vm6271_vm1, %v6272_v48 }
0x39ff   : > { %5998 = vmatprep.subr.bf16.mxu0 %v6269_v22 }
0x3a00   : > { %v3771_v30 = vld [vmem:[#allocation3 + $0x30] sm:$0xff] }
0x3a01   : > { %5769 = vmatprep.mubr.msk.f32.mxu1 %vm656_vm0, %v3771_v30 }
0x3acc   : > { %v7033_v36 = vpop.f32.mrb[44].mxu0 }
0x3acd   : > { %v5755_v37 = vpop.f32.mrb[45].mxu0  ;;  %v3739_v7 = vadd.f32 %v7033_v36, %v6877_v20 }
0x3ad0   : > { %v3979_v39 = vpop.f32.mrb[46].mxu0 }
0x3ad1   : > { %v5778_v40 = vpop.f32.mrb[47].mxu0  ;;  %v3993_v42 = vadd.f32 %v7035_v38, %v3979_v39  ;;  %v3983_v10 = vadd.f32 %v3979_v39, %v3875_v43 }
0x3ad3   : > { %3995 = vrot.lane.b32.xlu0 %v3993_v42, %s6270_s2  ;;  %v5230_v44 = vmul.f32 -1.442695, %v3983_v10  ;;  %v2920_v10 = vadd.f32 %v6951_v54, %v6853_v12 }
0x3ad5   : > { %6191 = vpow2.f32 %v5230_v44  ;;  %v3732_v44 = vadd.f32 %v7033_v36, %v2920_v10 }
0x3adf   : > { %v6192_v45 = vpop.eup %6191 }
0x3ae0   : > { %v3987_v46 = vadd.f32 1.0, %v6192_v45  ;;  %v5220_v45 = vmul.f32 -1.442695, %v3732_v44 }
0x3ae2   : > { %6193 = vrcp.f32 %v3987_v46 }
0x3aec   : > { %v6194_v53 = vpop.eup %6193 }
0x3aed   : > { %v4005_v28 = vsub.f32 1.0, %v6194_v53  ;;  %v4011_v33 = vmul.f32 0.0, %v6194_v53 }
0x3b45   : > { %v3996_v47 = vpop.permute.xlu0 %3995 }
0x3b46   : > { %v3998_v23 = vmul.f32 %v6194_v53, %v3996_v47 }
0x3b48   : > { %4000 = vrot.lane.b32.xlu1 %v3998_v23, %s6275_s27 }
0x3bba   : > { %v4001_v49 = vpop.permute.xlu1 %4000 }
0x3bbb   : > { %v4003_v35 = vadd.f32 %v4001_v49, %v3875_v43 }
0x3bbd   : > { %6195 = vtanh.f32 %v4003_v35 }
0x3bc7   : > { %v6196_v51 = vpop.eup %6195 }
0x3bc8   : > { %4007 = vrot.lane.b32.xlu0 %v6196_v51, %s6274_s22 }
0x3c3a   : > { %v4008_v8 = vpop.permute.xlu0 %4007 }
0x3c3b   : > { %v4010_v56 = vmul.f32 %v4008_v8, %v4005_v28 }
0x3c3d   : > { %v4012_v57 = vadd.f32 %v4011_v33, %v4010_v56 }
0x3c3f   : > { %4014 = vrot.lane.b32.xlu1 %v4012_v57, %s6274_s22 }
0x3cb1   : > { %v4015_v61 = vpop.permute.xlu1 %4014 }
0x3cb2   : > { %4017 = vst.msk [vmem:[#allocation3] sm:$0xff] %vm656_vm0, %v4015_v61  ;;  %5784 = vmatmul.mubr.msk.f32.vlgmr.msra.gmra.mrb[48].mxu0 %vm656_vm0, %v4015_v61 }
0x3cb3   : > { %6000 = vmatpush3.bf16.msra.mxu0 %v7013_v55  ;;  %5790 = vmatprep.mubr.msk.f32.mxu0 %vm6271_vm1, %v6272_v48 }
0x3cb4   : > { %6001 = vmatprep.subr.bf16.mxu0 %v6269_v22 }
0x3d85   : > { %v4086_v41 = vpop.f32.mrb[48].mxu0 }
0x3d86   : > { %v4097_v4 = vadd.f32 %v4086_v41, %v7035_v38  ;;  %v5785_v63 = vpop.f32.mrb[49].mxu0  ;;  %v4090_v0 = vadd.f32 %v4086_v41, %v3880_v3 }
0x3d88   : > { %4099 = vrot.lane.b32.xlu0 %v4097_v4, %s6270_s2  ;;  %v5232_v18 = vmul.f32 -1.442695, %v4090_v0 }
0x3d8a   : > { %6197 = vpow2.f32 %v5232_v18 }
0x3d94   : > { %v6198_v59 = vpop.eup %6197 }
0x3d95   : > { %v4094_v52 = vadd.f32 1.0, %v6198_v59 }
0x3d97   : > { %6199 = vrcp.f32 %v4094_v52 }
0x3da1   : > { %v6200_v5 = vpop.eup %6199 }
0x3da2   : > { %v4109_v16 = vsub.f32 1.0, %v6200_v5  ;;  %v4115_v62 = vmul.f32 %v6200_v5, %v4012_v57 }
0x3dfa   : > { %v4100_v11 = vpop.permute.xlu0 %4099 }
0x3dfb   : > { %v4102_v13 = vmul.f32 %v6200_v5, %v4100_v11 }
0x3dfd   : > { %4104 = vrot.lane.b32.xlu1 %v4102_v13, %s6275_s27 }
0x3e6f   : > { %v4105_v31 = vpop.permute.xlu1 %4104 }
0x3e70   : > { %v4107_v15 = vadd.f32 %v4105_v31, %v3880_v3 }
0x3e72   : > { %6201 = vtanh.f32 %v4107_v15 }
0x3e7c   : > { %v6202_v14 = vpop.eup %6201 }
0x3e7d   : > { %4111 = vrot.lane.b32.xlu0 %v6202_v14, %s6274_s22 }
0x3eef   : > { %v4112_v17 = vpop.permute.xlu0 %4111 }
0x3ef0   : > { %v4114_v19 = vmul.f32 %v4112_v17, %v4109_v16 }
0x3ef2   : > { %v4116_v21 = vadd.f32 %v4115_v62, %v4114_v19 }
0x3ef4   : > { %4118 = vrot.lane.b32.xlu1 %v4116_v21, %s6274_s22 }
0x3f66   : > { %v4119_v1 = vpop.permute.xlu1 %4118 }
0x3f67   : > { %4121 = vst.msk [vmem:[#allocation3 + $0x8] sm:$0xff] %vm656_vm0, %v4119_v1  ;;  %5791 = vmatmul.mubr.msk.f32.vlgmr.msra.gmra.mrb[50].mxu0 %vm656_vm0, %v4119_v1 }
0x3f68   : > { %6003 = vmatpush3.bf16.msra.mxu0 %v7013_v55  ;;  %5797 = vmatprep.mubr.msk.f32.mxu0 %vm6271_vm1, %v6272_v48 }
0x3f69   : > { %6007 = vmatprep.subr.bf16.mxu0 %v6269_v22 }
0x403a   : > { %v4190_v24 = vpop.f32.mrb[50].mxu0 }
0x403b   : > { %v4201_v29 = vadd.f32 %v4190_v24, %v7035_v38  ;;  %v5792_v58 = vpop.f32.mrb[51].mxu0  ;;  %v4194_v27 = vadd.f32 %v4190_v24, %v3885_v50 }
0x403d   : > { %4203 = vrot.lane.b32.xlu0 %v4201_v29, %s6270_s2  ;;  %v5234_v32 = vmul.f32 -1.442695, %v4194_v27 }
0x403f   : > { %6203 = vpow2.f32 %v5234_v32 }
0x4049   : > { %v6204_v60 = vpop.eup %6203 }
0x404a   : > { %v4198_v34 = vadd.f32 1.0, %v6204_v60  ;;  %v3895_v60 = vadd.f32 %v7003_v25, %v6994_v9 }
0x404c   : > { %6205 = vrcp.f32 %v4198_v34 }
0x4056   : > { %v6206_v30 = vpop.eup %6205 }
0x4057   : > { %v4213_v47 = vsub.f32 1.0, %v6206_v30  ;;  %v4219_v49 = vmul.f32 %v6206_v30, %v4116_v21 }
0x40af   : > { %v4204_v37 = vpop.permute.xlu0 %4203 }
0x40b0   : > { %v4206_v39 = vmul.f32 %v6206_v30, %v4204_v37 }
0x40b2   : > { %4208 = vrot.lane.b32.xlu1 %v4206_v39, %s6275_s27 }
0x4124   : > { %v4209_v40 = vpop.permute.xlu1 %4208 }
0x4125   : > { %v4211_v42 = vadd.f32 %v4209_v40, %v3885_v50 }
0x4127   : > { %6207 = vtanh.f32 %v4211_v42 }
0x4128   : > { %6209 = vpow2.f32 %v5220_v45 }
0x4131   : > { %v6208_v43 = vpop.eup %6207 }
0x4132   : > { %4215 = vrot.lane.b32.xlu0 %v6208_v43, %s6274_s22  ;;  %v6210_v46 = vpop.eup %6209 }
0x4133   : > { %v3736_v53 = vadd.f32 1.0, %v6210_v46 }
0x4135   : > { %6211 = vrcp.f32 %v3736_v53 }
0x4136   : > { %3741 = vrot.lane.b32.xlu0 %v3739_v7, %s6270_s2 }
0x413f   : > { %v6212_v28 = vpop.eup %6211 }
0x4140   : > { %v3751_v56 = vsub.f32 1.0, %v6212_v28  ;;  %v3757_v61 = vmul.f32 %v6212_v28, %v7017_v2  ;;  %v3890_v2 = vadd.f32 %v6988_v6, %v7003_v25 }
0x41a4   : > { %v4216_v23 = vpop.permute.xlu0 %4215 }
0x41a5   : > { %v4218_v35 = vmul.f32 %v4216_v23, %v4213_v47 }
0x41a7   : > { %v4220_v51 = vadd.f32 %v4219_v49, %v4218_v35 }
0x41a8   : > { %v3742_v8 = vpop.permute.xlu0 %3741 }
0x41a9   : > { %v3744_v20 = vmul.f32 %v6212_v28, %v3742_v8  ;;  %4222 = vrot.lane.b32.xlu1 %v4220_v51, %s6274_s22  ;;  %v3900_v28 = vadd.f32 %v6992_v26, %v7003_v25  ;;  %v4754_v26 = vld [vmem:[%s7246_s15] sm:$0xff] }
0x41ab   : > { %3746 = vrot.lane.b32.xlu0 %v3744_v20, %s6275_s27 }
0x421b   : > { %v4223_v12 = vpop.permute.xlu1 %4222 }
0x421c   : > { %4225 = vst.msk [vmem:[#allocation3 + $0x10] sm:$0xff] %vm656_vm0, %v4223_v12  ;;  %5798 = vmatmul.mubr.msk.f32.vlgmr.msra.gmra.mrb[52].mxu0 %vm656_vm0, %v4223_v12 }
0x421d   : > { %v3747_v54 = vpop.permute.xlu0 %3746  ;;  %6009 = vmatpush3.bf16.msra.mxu0 %v7013_v55  ;;  %5811 = vmatprep.mubr.msk.f32.mxu0 %vm6271_vm1, %v6272_v48 }
0x421e   : > { %v3749_v36 = vadd.f32 %v3747_v54, %v2920_v10  ;;  %6013 = vmatprep.subr.bf16.mxu0 %v6269_v22 }
0x4220   : > { %6213 = vtanh.f32 %v3749_v36 }
0x422a   : > { %v6214_v33 = vpop.eup %6213 }
0x422b   : > { %3753 = vrot.lane.b32.xlu0 %v6214_v33, %s6274_s22 }
0x429d   : > { %v3754_v57 = vpop.permute.xlu0 %3753 }
0x429e   : > { %v3756_v41 = vmul.f32 %v3754_v57, %v3751_v56 }
0x42a0   : > { %v3758_v4 = vadd.f32 %v3757_v61, %v3756_v41  ;;  %v4755_v61 = vld [vmem:[%s7246_s15 + $0x8] sm:$0xff] }
0x42a1   : > { %v6016_v41 = vpack.c.bf16 %v4755_v61, %v4754_v26 }
0x42a2   : > { %3760 = vrot.lane.b32.xlu0 %v3758_v4, %s6274_s22 }
0x42ef   : > { %v4294_v63 = vpop.f32.mrb[52].mxu0 }
0x42f0   : > { %v4305_v3 = vadd.f32 %v4294_v63, %v7035_v38  ;;  %v5799_v0 = vpop.f32.mrb[53].mxu0  ;;  %v4298_v59 = vadd.f32 %v4294_v63, %v3890_v2 }
0x42f2   : > { %4307 = vrot.lane.b32.xlu1 %v4305_v3, %s6270_s2  ;;  %v5236_v52 = vmul.f32 -1.442695, %v4298_v59  ;;  %v4747_v59 = vld [vmem:[#allocation3 + $0x8] sm:$0xff] }
0x42f4   : > { %6215 = vpow2.f32 %v5236_v52  ;;  %v4748_v52 = vld [vmem:[#allocation3 + $0x10] sm:$0xff] }
0x42fe   : > { %v6216_v5 = vpop.eup %6215 }
0x42ff   : > { %v4302_v11 = vadd.f32 1.0, %v6216_v5 }
0x4301   : > { %6217 = vrcp.f32 %v4302_v11 }
0x430b   : > { %v6218_v13 = vpop.eup %6217 }
0x430c   : > { %v4317_v19 = vsub.f32 1.0, %v6218_v13  ;;  %v4323_v1 = vmul.f32 %v6218_v13, %v4220_v51 }
0x4314   : > { %v3761_v18 = vpop.permute.xlu0 %3760 }
0x4315   : > { %3764 = vst.msk [vmem:[#allocation3 + $0x38] sm:$0xff] %vm656_vm0, %v3761_v18 }
0x431c   : > { %v3772_v22 = vld [vmem:[#allocation3 + $0x38] sm:$0xff] }
0x431d   : > { %5770 = vmatmul.mubr.msk.f32.gmra.mrb[40].mxu1 %vm656_vm0, %v3772_v22 }
0x431e   : > { %5804 = vmatprep.mubr.msk.f32.mxu1 %vm6271_vm1, %v6272_v48 }
0x4364   : > { %v4308_v31 = vpop.permute.xlu1 %4307 }
0x4365   : > { %v4310_v15 = vmul.f32 %v6218_v13, %v4308_v31 }
0x4367   : > { %4312 = vrot.lane.b32.xlu1 %v4310_v15, %s6275_s27 }
0x43d9   : > { %v4313_v14 = vpop.permute.xlu1 %4312 }
0x43da   : > { %v4315_v16 = vadd.f32 %v4313_v14, %v3890_v2  ;;  %v4746_v2 = vld [vmem:[#allocation3] sm:$0xff] }
0x43dc   : > { %6219 = vtanh.f32 %v4315_v16  ;;  %v7145_v16 = vld [vmem:[%s7247_s16] ss:$0 sm:$0xff] }
0x43e6   : > { %v6220_v17 = vpop.eup %6219 }
0x43e7   : > { %4319 = vrot.lane.b32.xlu1 %v6220_v17, %s6274_s22 }
0x43f0   : > { %v7095_v62 = vpop.f32.mrb[40].mxu1 }
0x43f1   : > { %v7097_v6 = vpop.f32.mrb[41].mxu1 }
0x4459   : > { %v4320_v21 = vpop.permute.xlu1 %4319 }
0x445a   : > { %v4322_v24 = vmul.f32 %v4320_v21, %v4317_v19 }
0x445c   : > { %v4324_v29 = vadd.f32 %v4323_v1, %v4322_v24 }
0x445e   : > { %4326 = vrot.lane.b32.xlu1 %v4324_v29, %s6274_s22 }
0x44d0   : > { %v4327_v58 = vpop.permute.xlu1 %4326 }
0x44d1   : > { %4329 = vst.msk [vmem:[#allocation3 + $0x18] sm:$0xff] %vm656_vm0, %v4327_v58  ;;  %5805 = vmatmul.mubr.msk.f32.vlgmr.msra.gmra.mrb[42].mxu1 %vm656_vm0, %v4327_v58 }
0x44d2   : > { %6012 = vmatpush3.bf16.msra.mxu1 %v7013_v55  ;;  %5818 = vmatprep.mubr.msk.f32.mxu1 %vm6271_vm1, %v6272_v48 }
0x44d3   : > { %6017 = vmatprep.subr.bf16.mxu1 %v6016_v41 }
0x44d8   : > { %v4749_v5 = vld [vmem:[#allocation3 + $0x18] sm:$0xff] }
0x45a4   : > { %v4398_v50 = vpop.f32.mrb[42].mxu1 }
0x45a5   : > { %v4409_v27 = vadd.f32 %v4398_v50, %v7035_v38  ;;  %v5806_v32 = vpop.f32.mrb[43].mxu1  ;;  %v4402_v34 = vadd.f32 %v4398_v50, %v3895_v60 }
0x45a7   : > { %4411 = vrot.lane.b32.xlu0 %v4409_v27, %s6270_s2  ;;  %v5238_v30 = vmul.f32 -1.442695, %v4402_v34 }
0x45a9   : > { %6221 = vpow2.f32 %v5238_v30 }
0x45b3   : > { %v6222_v37 = vpop.eup %6221 }
0x45b4   : > { %v4406_v39 = vadd.f32 1.0, %v6222_v37 }
0x45b6   : > { %6223 = vrcp.f32 %v4406_v39 }
0x45c0   : > { %v6224_v40 = vpop.eup %6223 }
0x45c1   : > { %v4421_v45 = vsub.f32 1.0, %v6224_v40  ;;  %v4427_v9 = vmul.f32 %v6224_v40, %v4324_v29 }
0x4619   : > { %v4412_v42 = vpop.permute.xlu0 %4411 }
0x461a   : > { %v4414_v43 = vmul.f32 %v6224_v40, %v4412_v42 }
0x461c   : > { %4416 = vrot.lane.b32.xlu1 %v4414_v43, %s6275_s27 }
0x468e   : > { %v4417_v7 = vpop.permute.xlu1 %4416 }
0x468f   : > { %v4419_v10 = vadd.f32 %v4417_v7, %v3895_v60  ;;  %v3905_v7 = vadd.f32 %v7003_v25, %v7097_v6 }
0x4691   : > { %6225 = vtanh.f32 %v4419_v10 }
0x469b   : > { %v6226_v44 = vpop.eup %6225 }
0x469c   : > { %4423 = vrot.lane.b32.xlu0 %v6226_v44, %s6274_s22 }
0x470e   : > { %v4424_v46 = vpop.permute.xlu0 %4423 }
0x470f   : > { %v4426_v53 = vmul.f32 %v4424_v46, %v4421_v45 }
0x4711   : > { %v4428_v47 = vadd.f32 %v4427_v9, %v4426_v53 }
0x4713   : > { %4430 = vrot.lane.b32.xlu1 %v4428_v47, %s6274_s22 }
0x4785   : > { %v4431_v23 = vpop.permute.xlu1 %4430 }
0x4786   : > { %4433 = vst.msk [vmem:[#allocation3 + $0x20] sm:$0xff] %vm656_vm0, %v4431_v23  ;;  %5812 = vmatmul.mubr.msk.f32.vlgmr.msra.gmra.mrb[54].mxu0 %vm656_vm0, %v4431_v23 }
0x4787   : > { %6015 = vmatpush3.bf16.msra.mxu0 %v7013_v55  ;;  %5825 = vmatprep.mubr.msk.f32.mxu0 %vm6271_vm1, %v6272_v48 }
0x478d   : > { %v4750_v11 = vld [vmem:[#allocation3 + $0x20] sm:$0xff] }
0x4859   : > { %v4502_v49 = vpop.f32.mrb[54].mxu0 }
0x485a   : > { %v4513_v35 = vadd.f32 %v4502_v49, %v7035_v38  ;;  %v5813_v51 = vpop.f32.mrb[55].mxu0  ;;  %v4506_v8 = vadd.f32 %v4502_v49, %v3900_v28 }
0x485c   : > { %4515 = vrot.lane.b32.xlu0 %v4513_v35, %s6270_s2  ;;  %v5240_v20 = vmul.f32 -1.442695, %v4506_v8 }
0x485e   : > { %6227 = vpow2.f32 %v5240_v20 }
0x4868   : > { %v6228_v12 = vpop.eup %6227 }
0x4869   : > { %v4510_v54 = vadd.f32 1.0, %v6228_v12 }
0x486b   : > { %6229 = vrcp.f32 %v4510_v54 }
0x4875   : > { %v6230_v36 = vpop.eup %6229 }
0x4876   : > { %v4525_v4 = vsub.f32 1.0, %v6230_v36  ;;  %v4531_v3 = vmul.f32 %v6230_v36, %v4428_v47 }
0x48ce   : > { %v4516_v55 = vpop.permute.xlu0 %4515 }
0x48cf   : > { %v4518_v33 = vmul.f32 %v6230_v36, %v4516_v55 }
0x48d1   : > { %4520 = vrot.lane.b32.xlu1 %v4518_v33, %s6275_s27 }
0x4943   : > { %v4521_v48 = vpop.permute.xlu1 %4520 }
0x4944   : > { %v4523_v56 = vadd.f32 %v4521_v48, %v3900_v28  ;;  %v3910_v48 = vadd.f32 %v7095_v62, %v7003_v25 }
0x4946   : > { %6231 = vtanh.f32 %v4523_v56 }
0x4950   : > { %v6232_v57 = vpop.eup %6231 }
0x4951   : > { %4527 = vrot.lane.b32.xlu0 %v6232_v57, %s6274_s22 }
0x49c3   : > { %v4528_v63 = vpop.permute.xlu0 %4527 }
0x49c4   : > { %v4530_v0 = vmul.f32 %v4528_v63, %v4525_v4 }
0x49c6   : > { %v7129_v18 = vadd.f32 %v4531_v3, %v4530_v0 }
0x49c8   : > { %4534 = vrot.lane.b32.xlu1 %v7129_v18, %s6274_s22 }
0x4a3a   : > { %v4535_v22 = vpop.permute.xlu1 %4534 }
0x4a3b   : > { %4537 = vst.msk [vmem:[#allocation3 + $0x28] sm:$0xff] %vm656_vm0, %v4535_v22  ;;  %5819 = vmatmul.mubr.msk.f32.vlgmr.msra.gmra.mrb[44].mxu1 %vm656_vm0, %v4535_v22 }
0x4a3c   : > { %6019 = vmatpush3.bf16.msra.mxu1 %v6016_v41  ;;  %5832 = vmatprep.mubr.msk.f32.mxu1 %vm656_vm0, %v4746_v2 }
0x4a3f   : > { %5833 = vmatmul.mubr.msk.f32.vlgmr.msra.gmra.mrb[46].mxu1 %vm656_vm0, %v4747_v59 }
0x4a40   : > { %5835 = vmatprep.mubr.msk.f32.mxu1 %vm656_vm0, %v4748_v52 }
0x4a42   : > { %v4751_v13 = vld [vmem:[#allocation3 + $0x28] sm:$0xff] }
0x4a43   : > { %5836 = vmatmul.mubr.msk.f32.gmra.mrb[48].mxu1 %vm656_vm0, %v4749_v5 }
0x4a44   : > { %5838 = vmatprep.mubr.msk.f32.mxu1 %vm656_vm0, %v4750_v11 }
0x4a47   : > { %5839 = vmatmul.mubr.msk.f32.gmra.mrb[50].mxu1 %vm656_vm0, %v4751_v13 }
0x4b0e   : > { %v4606_v31 = vpop.f32.mrb[44].mxu1 }
0x4b0f   : > { %v4617_v15 = vadd.f32 %v4606_v31, %v7035_v38  ;;  %v5820_v14 = vpop.f32.mrb[45].mxu1  ;;  %v4610_v10 = vadd.f32 %v4606_v31, %v3905_v7 }
0x4b11   : > { %4619 = vrot.lane.b32.xlu0 %v4617_v15, %s6270_s2  ;;  %v5242_v44 = vmul.f32 -1.442695, %v4610_v10 }
0x4b12   : > { %v5834_v17 = vpop.f32.mrb[46].mxu1 }
0x4b13   : > { %v4859_v19 = vadd.f32 %v5834_v17, %v7145_v16  ;;  %v4853_v21 = vpop.f32.mrb[47].mxu1  ;;  %6233 = vpow2.f32 %v5242_v44  ;;  %v4964_v17 = vld [vmem:[%s6698_s29 + $0x8] sm:$0xff] (%p6402_p5) }
0x4b14   : > { %v4854_v1 = vadd.f32 %v7145_v16, %v4853_v21  ;;  %v4968_v21 = vld [vmem:[%s6698_s29 + $0x18] sm:$0xff] (%p6402_p5) }
0x4b15   : > { %v4893_v24 = vmax.f32 %v4859_v19, 0.0  ;;  %v4966_v19 = vld [vmem:[%s6698_s29 + $0x10] sm:$0xff] (%p6402_p5) }
0x4b16   : > { %v4892_v29 = vmax.f32 %v4854_v1, 0.0  ;;  %v5837_v58 = vpop.f32.mrb[48].mxu1  ;;  %v4970_v1 = vld [vmem:[%s6698_s29 + $0x20] sm:$0xff] (%p6402_p5) }
0x4b17   : > { %4901 = vst.msk [vmem:[%s7151_s19 + $0x8] sm:$0xff] %vm656_vm0, %v4893_v24  ;;  %v4869_v50 = vadd.f32 %v5837_v58, %v7145_v16  ;;  %v4863_v27 = vpop.f32.mrb[49].mxu1  ;;  %v4972_v24 = vld [vmem:[%s6698_s29 + $0x28] sm:$0xff] (%p6402_p5)  ;;  %v4976_v58 = vld [vmem:[%s6698_s29 + $0x38] sm:$0xff] (%p6402_p5) }
0x4b18   : > { %4900 = vst.msk [vmem:[%s7151_s19] sm:$0xff] %vm656_vm0, %v4892_v29  ;;  %v4864_v32 = vadd.f32 %v7145_v16, %v4863_v27  ;;  %v4974_v29 = vld [vmem:[%s6698_s29 + $0x30] sm:$0xff] (%p6402_p5) }
0x4b19   : > { %v4895_v60 = vmax.f32 %v4869_v50, 0.0 }
0x4b1a   : > { %v4894_v34 = vmax.f32 %v4864_v32, 0.0  ;;  %v5840_v30 = vpop.f32.mrb[50].mxu1 }
0x4b1b   : > { %4903 = vst.msk [vmem:[%s7151_s19 + $0x18] sm:$0xff] %vm656_vm0, %v4895_v60  ;;  %v4879_v37 = vadd.f32 %v5840_v30, %v7145_v16  ;;  %v4873_v39 = vpop.f32.mrb[51].mxu1 }
0x4b1c   : > { %4902 = vst.msk [vmem:[%s7151_s19 + $0x10] sm:$0xff] %vm656_vm0, %v4894_v34  ;;  %v4874_v40 = vadd.f32 %v7145_v16, %v4873_v39 }
0x4b1d   : > { %v4897_v42 = vmax.f32 %v4879_v37, 0.0  ;;  %v6234_v45 = vpop.eup %6233 }
0x4b1e   : > { %v4896_v43 = vmax.f32 %v4874_v40, 0.0  ;;  %v4614_v46 = vadd.f32 1.0, %v6234_v45 }
0x4b1f   : > { %4905 = vst.msk [vmem:[%s7151_s19 + $0x28] sm:$0xff] %vm656_vm0, %v4897_v42 }
0x4b20   : > { %4904 = vst.msk [vmem:[%s7151_s19 + $0x20] sm:$0xff] %vm656_vm0, %v4896_v43  ;;  %6235 = vrcp.f32 %v4614_v46 }
0x4b2a   : > { %v6236_v9 = vpop.eup %6235 }
0x4b2b   : > { %v4629_v51 = vsub.f32 1.0, %v6236_v9  ;;  %v4635_v6 = vmul.f32 %v6236_v9, %v7129_v18 }
0x4b83   : > { %v4620_v53 = vpop.permute.xlu0 %4619 }
0x4b84   : > { %v4622_v47 = vmul.f32 %v6236_v9, %v4620_v53 }
0x4b86   : > { %4624 = vrot.lane.b32.xlu1 %v4622_v47, %s6275_s27 }
0x4bf8   : > { %v4625_v23 = vpop.permute.xlu1 %4624 }
0x4bf9   : > { %v4627_v49 = vadd.f32 %v4625_v23, %v3905_v7 }
0x4bfb   : > { %6237 = vtanh.f32 %v4627_v49 }
0x4c05   : > { %v6238_v35 = vpop.eup %6237 }
0x4c06   : > { %4631 = vrot.lane.b32.xlu0 %v6238_v35, %s6274_s22 }
0x4c78   : > { %v4632_v28 = vpop.permute.xlu0 %4631 }
0x4c79   : > { %v4634_v8 = vmul.f32 %v4632_v28, %v4629_v51 }
0x4c7b   : > { %v4636_v20 = vadd.f32 %v4635_v6, %v4634_v8 }
0x4c7d   : > { %4638 = vrot.lane.b32.xlu1 %v4636_v20, %s6274_s22 }
0x4cef   : > { %v4639_v12 = vpop.permute.xlu1 %4638 }
0x4cf0   : > { %4641 = vst.msk [vmem:[#allocation3 + $0x30] sm:$0xff] %vm656_vm0, %v4639_v12  ;;  %5826 = vmatmul.mubr.msk.f32.vlgmr.msra.gmra.mrb[56].mxu0 %vm656_vm0, %v4639_v12 }
0x4cf7   : > { %v4752_v54 = vld [vmem:[#allocation3 + $0x30] sm:$0xff] }
0x4cf8   : > { %5841 = vmatprep.mubr.msk.f32.mxu1 %vm656_vm0, %v4752_v54 }
0x4dc3   : > { %v4710_v36 = vpop.f32.mrb[56].mxu0 }
0x4dc4   : > { %v4721_v55 = vadd.f32 %v4710_v36, %v7035_v38  ;;  %v5827_v33 = vpop.f32.mrb[57].mxu0  ;;  %v4714_v56 = vadd.f32 %v4710_v36, %v3910_v48 }
0x4dc6   : > { %4723 = vrot.lane.b32.xlu0 %v4721_v55, %s6270_s2  ;;  %v5244_v57 = vmul.f32 -1.442695, %v4714_v56 }
0x4dc8   : > { %6239 = vpow2.f32 %v5244_v57 }
0x4dd2   : > { %v6240_v26 = vpop.eup %6239 }
0x4dd3   : > { %v4718_v61 = vadd.f32 1.0, %v6240_v26 }
0x4dd5   : > { %6241 = vrcp.f32 %v4718_v61 }
0x4ddf   : > { %v6242_v41 = vpop.eup %6241 }
0x4de0   : > { %v4733_v18 = vsub.f32 1.0, %v6242_v41  ;;  %v4739_v62 = vmul.f32 %v6242_v41, %v4636_v20 }
0x4e38   : > { %v4724_v4 = vpop.permute.xlu0 %4723 }
0x4e39   : > { %v4726_v63 = vmul.f32 %v6242_v41, %v4724_v4 }
0x4e3b   : > { %4728 = vrot.lane.b32.xlu1 %v4726_v63, %s6275_s27  ;;  %s4920_s27 = scalar_lea.vmem (%p6402_p5), %s7248_s17, %s5256_s20 }
0x4e3c   : > { %4965 = vst [vmem:[%s4920_s27 + $0x10] sm:$0xff] (%p6402_p5), %v4964_v17  ;;  %4967 = vst [vmem:[%s4920_s27 + $0x20] sm:$0xff] (%p6402_p5), %v4966_v19 }
0x4e3d   : > { %4969 = vst [vmem:[%s4920_s27 + $0x30] sm:$0xff] (%p6402_p5), %v4968_v21  ;;  %4971 = vst [vmem:[%s4920_s27 + $0x40] sm:$0xff] (%p6402_p5), %v4970_v1 }
0x4e3e   : > { %4973 = vst [vmem:[%s4920_s27 + $0x50] sm:$0xff] (%p6402_p5), %v4972_v24  ;;  %4975 = vst [vmem:[%s4920_s27 + $0x60] sm:$0xff] (%p6402_p5), %v4974_v29 }
0x4e3f   : > { %4977 = vst [vmem:[%s4920_s27 + $0x70] sm:$0xff] (%p6402_p5), %v4976_v58 }
0x4ead   : > { %v4729_v3 = vpop.permute.xlu1 %4728 }
0x4eae   : > { %v4731_v0 = vadd.f32 %v4729_v3, %v3910_v48 }
0x4eb0   : > { %6243 = vtanh.f32 %v4731_v0 }
0x4eba   : > { %v6244_v38 = vpop.eup %6243 }
0x4ebb   : > { %4735 = vrot.lane.b32.xlu0 %v6244_v38, %s6274_s22 }
0x4f2d   : > { %v4736_v25 = vpop.permute.xlu0 %4735 }
0x4f2e   : > { %v4738_v22 = vmul.f32 %v4736_v25, %v4733_v18 }
0x4f30   : > { %v4740_v2 = vadd.f32 %v4739_v62, %v4738_v22 }
0x4f32   : > { %4742 = vrot.lane.b32.xlu1 %v4740_v2, %s6274_s22 }
0x4fa4   : > { %v4743_v59 = vpop.permute.xlu1 %4742 }
0x4fa5   : > { %4745 = vst.msk [vmem:[#allocation3 + $0x38] sm:$0xff] %vm656_vm0, %v4743_v59 }
0x4fac   : > { %v4753_v52 = vld [vmem:[#allocation3 + $0x38] sm:$0xff] }
0x4fad   : > { %5842 = vmatmul.mubr.msk.f32.gmra.mrb[52].mxu1 %vm656_vm0, %v4753_v52 }
0x5080   : > { %v5843_v5 = vpop.f32.mrb[52].mxu1  ;;  %4918 = sbr.rel (!%p6402_p5) target bundleno = 20615 (0x5087), region = 130 }
0x5081   : > { %v4889_v11 = vadd.f32 %v5843_v5, %v7145_v16  ;;  %v4883_v13 = vpop.f32.mrb[53].mxu1 }
0x5082   : > { %v4884_v31 = vadd.f32 %v7145_v16, %v4883_v13  ;;  %v4962_v16 = vld [vmem:[%s6698_s29] sm:$0xff] (%p6402_p5) }
0x5083   : > { %v4899_v15 = vmax.f32 %v4889_v11, 0.0  ;;  %4963 = vst [vmem:[%s4920_s27] sm:$0xff] (%p6402_p5), %v4962_v16 }
0x5084   : > { %v4898_v14 = vmax.f32 %v4884_v31, 0.0 }
0x5085   : > { %4907 = vst.msk [vmem:[%s7151_s19 + $0x38] sm:$0xff] %vm656_vm0, %v4899_v15 }
0x5086   : > { %4906 = vst.msk [vmem:[%s7151_s19 + $0x30] sm:$0xff] %vm656_vm0, %v4898_v14 }
0x5087 PF: > { %4983 = sbr.rel (!%p6402_p5) target bundleno = 20623 (0x508f), region = 168  ;;  %s5257_s1 = sshll.u32 (%p6402_p5), %s6387_s30, 3  ;;  %v5027_v50 = vld [vmem:[%s7151_s19] sm:$0xff] (%p6402_p5)  ;;  %v5029_v27 = vld [vmem:[%s7151_s19 + $0x8] sm:$0xff] (%p6402_p5)  ;;  %v5031_v32 = vld [vmem:[%s7151_s19 + $0x10] sm:$0xff] (%p6402_p5) }
0x5088   : > { %s4985_s28 = scalar_lea.vmem (%p6402_p5), %s7249_s18, %s5257_s1  ;;  %v5033_v60 = vld [vmem:[%s7151_s19 + $0x18] sm:$0xff] (%p6402_p5)  ;;  %v5035_v34 = vld [vmem:[%s7151_s19 + $0x20] sm:$0xff] (%p6402_p5)  ;;  %v5037_v30 = vld [vmem:[%s7151_s19 + $0x28] sm:$0xff] (%p6402_p5) }
0x5089   : > { %5028 = vst [vmem:[%s4985_s28] sm:$0xff] (%p6402_p5), %v5027_v50  ;;  %5030 = vst [vmem:[%s4985_s28 + $0x10] sm:$0xff] (%p6402_p5), %v5029_v27 }
0x508a   : > { %5032 = vst [vmem:[%s4985_s28 + $0x20] sm:$0xff] (%p6402_p5), %v5031_v32  ;;  %5034 = vst [vmem:[%s4985_s28 + $0x30] sm:$0xff] (%p6402_p5), %v5033_v60 }
0x508b   : > { %5036 = vst [vmem:[%s4985_s28 + $0x40] sm:$0xff] (%p6402_p5), %v5035_v34  ;;  %5038 = vst [vmem:[%s4985_s28 + $0x50] sm:$0xff] (%p6402_p5), %v5037_v30 }
0x508c   : > { %v5041_v39 = vld [vmem:[%s7151_s19 + $0x38] sm:$0xff] (%p6402_p5) }
0x508d   : > { %v5039_v37 = vld [vmem:[%s7151_s19 + $0x30] sm:$0xff] (%p6402_p5)  ;;  %5042 = vst [vmem:[%s4985_s28 + $0x70] sm:$0xff] (%p6402_p5), %v5041_v39 }
0x508e   : > { %5040 = vst [vmem:[%s4985_s28 + $0x60] sm:$0xff] %v5039_v37 }
0x508f PF: > { %s7261_s27 = sld [smem:[#allocation7_spill]]  ;;  %s7262_s28 = sld [smem:[#allocation8_spill]] }
0x5090   : > { %p26_p10 = scmp.ge.s32.totalorder %s6390_s0, 4   ;;  %s7263_s29 = smov %s6390_s0 }
0x5092   :  { %28 = sbr.rel (!%p26_p10) target bundleno = 6 (0x6), region = 263 }

// kernel: netd_masked_forward.1
= control target key start
LH: loop header
LB: loop body
LE: loop exit
PB: predicated region body
PF: predicated region fallthrough
CT: control target
= control target key end

     0   :  { %s7231_s0 = inlined_call_operand.vmem [shape: f32[8,16,16], index: 0, kind: input, shape index: {}]   ;;  %s7232_s1 = inlined_call_operand.vmem [shape: f32[16,16], index: 1, kind: input, shape index: {}]   ;;  %s7233_s2 = inlined_call_operand.vmem [shape: f32[1,16], index: 2, kind: input, shape index: {}]   ;;  %s7234_s3 = inlined_call_operand.vmem [shape: f32[16,96], index: 3, kind: input, shape index: {}]   ;;  %s7235_s4 = inlined_call_operand.vmem [shape: f32[32,96], index: 4, kind: input, shape index: {}]   ;;  %s7236_s5 = inlined_call_operand.vmem [shape: f32[1,128], index: 5, kind: input, shape index: {}]   ;;  %s7237_s6 = inlined_call_operand.vmem [shape: f32[32,96], index: 6, kind: input, shape index: {}]   ;;  %s7238_s7 = inlined_call_operand.vmem [shape: f32[32,96], index: 7, kind: input, shape index: {}]   ;;  %s7239_s8 = inlined_call_operand.vmem [shape: f32[1,128], index: 8, kind: input, shape index: {}]   ;;  %s7240_s9 = inlined_call_operand.vmem [shape: f32[32,48], index: 9, kind: input, shape index: {}]   ;;  %s7241_s10 = inlined_call_operand.vmem [shape: f32[16,48], index: 10, kind: input, shape index: {}]   ;;  %s7242_s11 = inlined_call_operand.vmem [shape: f32[1,64], index: 11, kind: input, shape index: {}]   ;;  %s7243_s12 = inlined_call_operand.vmem [shape: f32[16,48], index: 12, kind: input, shape index: {}]   ;;  %s7244_s13 = inlined_call_operand.vmem [shape: f32[16,48], index: 13, kind: input, shape index: {}]   ;;  %s7245_s14 = inlined_call_operand.vmem [shape: f32[1,64], index: 14, kind: input, shape index: {}]   ;;  %s7246_s15 = inlined_call_operand.vmem [shape: f32[16,16], index: 15, kind: input, shape index: {}]   ;;  %s7247_s16 = inlined_call_operand.vmem [shape: f32[1,16], index: 16, kind: input, shape index: {}]   ;;  %s7248_s17 = inlined_call_operand.vmem [shape: f32[8,16,32], index: 17, kind: output, shape index: {0}]   ;;  %s7249_s18 = inlined_call_operand.vmem [shape: f32[8,16,16], index: 18, kind: output, shape index: {1}]  }
   0x1   :  { %7252 = sst [smem:[#allocation9_spill]] %s7231_s0 }
   0x2   :  { %7253 = sst [smem:[#allocation10_spill]] %s7232_s1 }
   0x3   :  { %7254 = sst [smem:[#allocation11_spill]] %s7233_s2 }
   0x4   :  { %s6371_s27 = smov 0   ;;  %s6373_s28 = smov 0  }
   0x5   :  { %s6375_s29 = smov 0  }
   0x6 LB: > { %7255 = sst [smem:[#allocation7_spill]] %s6263_s28  ;;  %s6387_s30 = sadd.s32 4294967295, %s6267_s29   ;;  %s6267_s29 = sphi %s6375_s29, %s7263_s29   ;;  %s6263_s28 = sphi %s6373_s28, %s7262_s28   ;;  %s6259_s27 = sphi %s6371_s27, %s7261_s27  }
   0x7   : > { %s6390_s0 = sadd.s32 1, %s6267_s29   ;;  %s36_s1 = sadd.s32 1, %s6263_s28 }
   0x8   : > { %s33_s19 = ssub.s32 %s6267_s29, %s6390_s0  ;;  %p43_p1 = scmp.ne.s32.totalorder %s6263_s28, %s6259_s27 }
   0x9   : > { %p34_p0 = scmp.eq.s32.totalorder %s33_s19, 0  ;;  %p44_p2 = scmp.eq.s32.totalorder %s6267_s29, 0 }
   0xa   : > { %p409_p3 = scmp.eq.s32.totalorder %s6387_s30, 1  ;;  %p5133_p6 = scmp.ge.s32.totalorder %s6267_s29, 2 }
   0xb   : > { %s6400_s20 = scalar_select %p34_p0, %s6263_s28, %s36_s1  }
   0xc   : > { %p45_p4 = por %p44_p2, %p43_p1  ;;  %p6402_p5 = por %p409_p3, %p43_p1 }
   0xd   : > { %7256 = sst [smem:[#allocation8_spill]] %s6400_s20  ;;  %505 = sbr.rel (%p5133_p6) target bundleno = 34 (0x22), region = 80 }
  0x14   : > { %508 = sbr.rel (!%p45_p4) target bundleno = 34 (0x22), region = 84  ;;  %s510_s22 = sand.u32 (%p45_p4), 1, %s6263_s28  }
  0x15   : > { %s5135_s2 = sshll.u32 (%p45_p4), %s6267_s29, 3  ;;  %s5134_s23 = sshll.u32 (%p45_p4), %s510_s22, 6 }
  0x16   : > { %s7258_s26 = sld [smem:[#allocation9_spill]] (%p45_p4)  ;;  %s512_s1 = scalar_lea.vmem (%p45_p4), [#allocation4], %s5134_s23 }
  0x1c   : > { %s514_s19 = scalar_lea.vmem %s7258_s26, %s5135_s2 }
  0x1d   : > { %v556_v0 = vld [vmem:[%s514_s19] sm:$0xff]  ;;  %v558_v1 = vld [vmem:[%s514_s19 + $0x10] sm:$0xff] }
  0x1e   : > { %v560_v2 = vld [vmem:[%s514_s19 + $0x20] sm:$0xff]  ;;  %557 = vst [vmem:[%s512_s1] sm:$0xff] %v556_v0  ;;  %559 = vst [vmem:[%s512_s1 + $0x8] sm:$0xff] %v558_v1  ;;  %v562_v3 = vld [vmem:[%s514_s19 + $0x30] sm:$0xff] }
  0x1f   : > { %561 = vst [vmem:[%s512_s1 + $0x10] sm:$0xff] %v560_v2  ;;  %v564_v4 = vld [vmem:[%s514_s19 + $0x40] sm:$0xff]  ;;  %v566_v5 = vld [vmem:[%s514_s19 + $0x50] sm:$0xff]  ;;  %563 = vst [vmem:[%s512_s1 + $0x18] sm:$0xff] %v562_v3 }
  0x20   : > { %565 = vst [vmem:[%s512_s1 + $0x20] sm:$0xff] %v564_v4  ;;  %567 = vst [vmem:[%s512_s1 + $0x28] sm:$0xff] %v566_v5  ;;  %v568_v6 = vld [vmem:[%s514_s19 + $0x60] sm:$0xff]  ;;  %v570_v7 = vld [vmem:[%s514_s19 + $0x70] sm:$0xff] }
  0x21   : > { %569 = vst [vmem:[%s512_s1 + $0x30] sm:$0xff] %v568_v6  ;;  %571 = vst [vmem:[%s512_s1 + $0x38] sm:$0xff] %v570_v7 }
  0x22 PF: > { %p5136_p7 = scmp.ge.s32.totalorder %s6267_s29, 1  ;;  %p576_p8 = scmp.lt.s32.totalorder %s6267_s29, 3 }
  0x24   : > { %p577_p9 = pnand %p5136_p7, %p576_p8 }
  0x25   : > { %s7259_s23 = sld [smem:[#allocation10_spill]] (!%p577_p9)  ;;  %s583_s26 = sand.u32 (!%p577_p9), 1, %s6259_s27   ;;  %v794_v10 = vld [vmem:[%s7234_s3] sm:$0xff] (!%p577_p9)  ;;  %vm656_vm0 = vcmask (!%p577_p9), 130048   ;;  %v795_v12 = vld [vmem:[%s7234_s3 + $0x8] sm:$0xff] (!%p577_p9)  ;;  %v6269_v22 = vmov (!%p577_p9), 0.0|0.0  }
  0x26   : > { %580 = sbr.rel (%p577_p9) target bundleno = 20623 (0x508f), region = 122  ;;  %s6424_s20 = sshll.u32 (!%p577_p9), %s583_s26, 6  ;;  %v5848_v13 = vpack.c.bf16 (!%p577_p9), %v795_v12, %v794_v10  ;;  %v6443_v23 = vld [vmem:[%s7236_s5] ss:$0 sm:$0xff] (!%p577_p9)  ;;  %v797_v29 = vld [vmem:[%s7235_s4 + $0x8] sm:$0xff] (!%p577_p9)  ;;  %v798_v37 = vld [vmem:[%s7235_s4 + $0x10] sm:$0xff] (!%p577_p9) }
  0x27   : > { %s585_s22 = scalar_lea.vmem (!%p577_p9), [#allocation4], %s6424_s20  ;;  %s6270_s2 = smov (!%p577_p9), 96   ;;  %v796_v28 = vld [vmem:[%s7235_s4] sm:$0xff] (!%p577_p9)  ;;  %v799_v38 = vld [vmem:[%s7235_s4 + $0x18] sm:$0xff] (!%p577_p9)  ;;  %vm6271_vm1 = vmmov (!%p577_p9), 0   ;;  %v6272_v48 = vmov (!%p577_p9), 0.0  }
  0x28   : > { %v639_v14 = vld [vmem:[%s585_s22] sm:$0xff] (!%p577_p9)  ;;  %v640_v15 = vld [vmem:[%s585_s22 + $0x8] sm:$0xff] (!%p577_p9)  ;;  %v641_v16 = vld [vmem:[%s585_s22 + $0x10] sm:$0xff] (!%p577_p9)  ;;  %6020 = vmatprep.subr.bf16.mxu1 (!%p577_p9), %v5848_v13  ;;  %1017 = vrot.lane.b32.xlu0 (!%p577_p9), %v6443_v23, %s6270_s2  ;;  %s7260_s26 = sld [smem:[#allocation11_spill]] (!%p577_p9)  ;;  %v6456_v33 = vpack.c.bf16 (!%p577_p9), %v797_v29, %v796_v28  ;;  %v6467_v41 = vpack.c.bf16 (!%p577_p9), %v799_v38, %v798_v37  ;;  %vm936_vm2 = vcmask (!%p577_p9), 261120   ;;  %s6698_s29 = scalar_lea.vmem (!%p577_p9), [#allocation5], %s6424_s20 }
  0x29   : > { %5456 = vmatprep.mubr.msk.f32.mxu0 (!%p577_p9), %vm656_vm0, %v639_v14  ;;  %6021 = vmatpush3.bf16.msra.mxu1 (!%p577_p9), %v5848_v13  ;;  %v642_v17 = vld [vmem:[%s585_s22 + $0x18] sm:$0xff] (!%p577_p9)  ;;  %v643_v18 = vld [vmem:[%s585_s22 + $0x20] sm:$0xff] (!%p577_p9)  ;;  %v644_v19 = vld [vmem:[%s585_s22 + $0x28] sm:$0xff] (!%p577_p9)  ;;  %s6275_s27 = smov (!%p577_p9), 32   ;;  %s7151_s19 = scalar_lea.vmem (!%p577_p9), [#allocation6], %s6424_s20 }
  0x2a   : > { %v645_v20 = vld [vmem:[%s585_s22 + $0x30] sm:$0xff] (!%p577_p9)  ;;  %v646_v21 = vld [vmem:[%s585_s22 + $0x38] sm:$0xff] (!%p577_p9)  ;;  %5858 = vmatprep.subr.bf16.mxu1 (!%p577_p9), %v6269_v22  ;;  %s6274_s22 = smov (!%p577_p9), 112  }
  0x2b   : > { %v647_v8 = vld [vmem:[%s7259_s23] sm:$0xff] (!%p577_p9)  ;;  %v648_v9 = vld [vmem:[%s7259_s23 + $0x8] sm:$0xff] (!%p577_p9) }
  0x2c   : > { %v5844_v11 = vpack.c.bf16 (!%p577_p9), %v648_v9, %v647_v8 }
  0x2d   : > { %s5256_s20 = sshll.u32 (%p6402_p5), %s6387_s30, 3 }
  0x2e   : > { %5845 = vmatprep.subr.bf16.mxu0 %v5844_v11  ;;  %v5140_v24 = vld [vmem:[%s7260_s26] ss:$0 sm:$0xff]  ;;  %s6273_s26 = smov 64  }
  0x2f   : > { %5847 = vmatpush3.bf16.msra.mxu0 %v5844_v11 }
  0x30   : > { %5849 = vmatprep.subr.bf16.mxu0 %v5848_v13 }
  0x32   : > { %5457 = vmatmul.mubr.msk.f32.vlgmr.msra.gmra.mrb[0].mxu0 %vm656_vm0, %v640_v15 }
  0x33   : > { %5459 = vmatprep.mubr.msk.f32.mxu0 %vm656_vm0, %v641_v16  ;;  %5851 = vmatpush3.bf16.msra.mxu0 %v5848_v13 }
  0x34   : > { %5852 = vmatprep.subr.bf16.mxu0 %v6269_v22 }
  0x36   : > { %5460 = vmatmul.mubr.msk.f32.gmra.mrb[2].mxu0 %vm656_vm0, %v642_v17 }
  0x37   : > { %5462 = vmatprep.mubr.msk.f32.mxu0 %vm656_vm0, %v643_v18 }
  0x3a   : > { %5463 = vmatmul.mubr.msk.f32.gmra.mrb[4].mxu0 %vm656_vm0, %v644_v19 }
  0x3b   : > { %5465 = vmatprep.mubr.msk.f32.mxu0 %vm656_vm0, %v645_v20 }
  0x3e   : > { %5466 = vmatmul.mubr.msk.f32.gmra.mrb[6].mxu0 %vm656_vm0, %v646_v21 }
  0x9a   : > { %v6497_v60 = vpop.permute.xlu0 %1017 }
 0x105   : > { %v5458_v25 = vpop.f32.mrb[0].mxu0 }
 0x106   : > { %v753_v26 = vadd.f32 %v5458_v25, %v5140_v24  ;;  %v747_v27 = vpop.f32.mrb[1].mxu0 }
 0x107   : > { %v748_v30 = vadd.f32 %v5140_v24, %v747_v27 }
 0x108   : > { %v787_v34 = vmax.f32 %v753_v26, 0.0 }
 0x109   : > { %v786_v31 = vmax.f32 %v748_v30, 0.0  ;;  %v5461_v32 = vpop.f32.mrb[2].mxu0 }
 0x10a   : > { %v763_v35 = vadd.f32 %v5461_v32, %v5140_v24  ;;  %v757_v36 = vpop.f32.mrb[3].mxu0 }
 0x10b   : > { %v758_v39 = vadd.f32 %v5140_v24, %v757_v36  ;;  %5472 = vmatprep.mubr.msk.f32.mxu0 %vm656_vm0, %v786_v31 }
 0x10c   : > { %5473 = vmatmul.mubr.msk.f32.vlgmr.msra.gmra.mrb[8].mxu0 %vm656_vm0, %v787_v34  ;;  %v789_v43 = vmax.f32 %v763_v35, 0.0 }
 0x10d   : > { %v788_v40 = vmax.f32 %v758_v39, 0.0  ;;  %5854 = vmatpush3.bf16.msra.mxu0 %v6456_v33  ;;  %v5464_v42 = vpop.f32.mrb[4].mxu0 }
 0x10e   : > { %5855 = vmatprep.subr.bf16.mxu0 %v6269_v22  ;;  %v773_v44 = vadd.f32 %v5464_v42, %v5140_v24  ;;  %v767_v45 = vpop.f32.mrb[5].mxu0 }
 0x10f   : > { %5475 = vmatprep.mubr.msk.f32.mxu0 %vm656_vm0, %v788_v40  ;;  %v768_v46 = vadd.f32 %v5140_v24, %v767_v45 }
 0x110   : > { %5476 = vmatmul.mubr.msk.f32.gmra.mrb[10].mxu0 %vm656_vm0, %v789_v43  ;;  %v791_v47 = vmax.f32 %v773_v44, 0.0 }
 0x111   : > { %5857 = vmatpush3.bf16.msra.mxu0 %v6467_v41  ;;  %5492 = vmatprep.mubr.msk.f32.mxu0 %vm6271_vm1, %v6272_v48  ;;  %v790_v49 = vmax.f32 %v768_v46, 0.0  ;;  %v5467_v50 = vpop.f32.mrb[6].mxu0 }
 0x112   : > { %5864 = vmatprep.subr.bf16.mxu0 %v6269_v22  ;;  %v783_v51 = vadd.f32 %v5467_v50, %v5140_v24  ;;  %v777_v52 = vpop.f32.mrb[7].mxu0 }
 0x113   : > { %5478 = vmatprep.mubr.msk.f32.mxu1 %vm656_vm0, %v790_v49  ;;  %v778_v53 = vadd.f32 %v5140_v24, %v777_v52 }
 0x114   : > { %5493 = vmatmul.mubr.f32.vlgmr.msra.gmra.mrb[12].mxu0 %v6272_v48  ;;  %5479 = vmatmul.mubr.msk.f32.vlgmr.msra.gmra.mrb[0].mxu1 %vm656_vm0, %v791_v47  ;;  %v793_v54 = vmax.f32 %v783_v51, 0.0 }
 0x115   : > { %5860 = vmatpush3.bf16.msra.mxu1 %v6456_v33  ;;  %5866 = vmatpush3.bf16.msra.mxu0 %v6456_v33  ;;  %v792_v55 = vmax.f32 %v778_v53, 0.0 }
 0x116   : > { %5861 = vmatprep.subr.bf16.mxu1 %v6269_v22  ;;  %5867 = vmatprep.subr.bf16.mxu0 %v6269_v22 }
 0x117   : > { %5514 = vmatprep.mubr.msk.f32.mxu0 %vm6271_vm1, %v6272_v48  ;;  %5481 = vmatprep.mubr.msk.f32.mxu1 %vm656_vm0, %v792_v55 }
 0x118   : > { %5482 = vmatmul.mubr.msk.f32.gmra.mrb[2].mxu1 %vm656_vm0, %v793_v54 }
 0x119   : > { %5863 = vmatpush3.bf16.msra.mxu1 %v6467_v41  ;;  %5869 = vmatpush3.bf16.msra.mxu0 %v6467_v41 }
 0x11a   : > { %5870 = vmatprep.subr.bf16.mxu1 %v6269_v22  ;;  %5876 = vmatprep.subr.bf16.mxu0 %v6269_v22 }
 0x11b   : > { %5503 = vmatprep.mubr.msk.f32.mxu1 %vm6271_vm1, %v6272_v48 }
 0x1df   : > { %v5474_v56 = vpop.f32.mrb[8].mxu0 }
 0x1e0   : > { %v897_v57 = vpop.f32.mrb[9].mxu0  ;;  %v903_v26 = vadd.f32 %v5474_v56, %v6443_v23 }
 0x1e1   : > { %v898_v4 = vadd.f32 %v6443_v23, %v897_v57 }
 0x1e3   : > { %v6493_v58 = vpop.f32.mrb[10].mxu0 }
 0x1e4   : > { %v6495_v59 = vpop.f32.mrb[11].mxu0 }
 0x1e5   : > { %v908_v49 = vadd.f32 %v6443_v23, %v6495_v59 }
 0x1e7   : > { %v1006_v61 = vpop.f32.mrb[12].mxu0  ;;  %v6499_v62 = vpop.f32.mrb[0].mxu1 }
 0x1e8   : > { %v1020_v63 = vadd.f32 %v6497_v60, %v1006_v61  ;;  %v5494_v0 = vpop.f32.mrb[13].mxu0  ;;  %v6502_v1 = vpop.f32.mrb[1].mxu1  ;;  %v1010_v5 = vadd.f32 %v1006_v61, %v898_v4 }
 0x1ea   : > { %1022 = vrot.lane.b32.xlu0 %v1020_v63, %s6273_s26  ;;  %v5158_v6 = vmul.f32 -1.442695, %v1010_v5 }
 0x1eb   : > { %v6505_v2 = vpop.f32.mrb[2].mxu1 }
 0x1ec   : > { %v6507_v3 = vpop.f32.mrb[3].mxu1  ;;  %6053 = vpow2.f32 %v5158_v6 }
 0x1f6   : > { %v6054_v7 = vpop.eup %6053 }
 0x1f7   : > { %v1014_v8 = vadd.f32 1.0, %v6054_v7 }
 0x1f9   : > { %6055 = vrcp.f32 %v1014_v8 }
 0x203   : > { %v6056_v9 = vpop.eup %6055 }
 0x204   : > { %v1032_v15 = vsub.f32 1.0, %v6056_v9  ;;  %v1038_v17 = vmul.f32 0.0, %v6056_v9 }
 0x25c   : > { %v1023_v10 = vpop.permute.xlu0 %1022 }
 0x25d   : > { %v1025_v11 = vmul.f32 %v6056_v9, %v1023_v10 }
 0x25f   : > { %1027 = vrot.lane.b32.xlu1 %v1025_v11, %s6273_s26  ;;  %v913_v11 = vadd.f32 %v6493_v58, %v6443_v23 }
 0x2d1   : > { %v1028_v12 = vpop.permute.xlu1 %1027 }
 0x2d2   : > { %v1030_v13 = vadd.f32 %v1028_v12, %v898_v4 }
 0x2d4   : > { %6057 = vtanh.f32 %v1030_v13 }
 0x2de   : > { %v6058_v14 = vpop.eup %6057 }
 0x2df   : > { %1034 = vrot.lane.b32.xlu1 %v6058_v14, %s6270_s2 }
 0x351   : > { %v1035_v16 = vpop.permute.xlu1 %1034 }
 0x352   : > { %v1037_v18 = vmul.f32 %v1035_v16, %v1032_v15 }
 0x354   : > { %v1039_v19 = vadd.f32 %v1038_v17, %v1037_v18 }
 0x356   : > { %1041 = vrot.lane.b32.xlu0 %v1039_v19, %s6270_s2 }
 0x3c8   : > { %v1042_v20 = vpop.permute.xlu0 %1041 }
 0x3c9   : > { %1044 = vst.msk [vmem:[#allocation2] sm:$0xff] %vm936_vm2, %v1042_v20  ;;  %5504 = vmatmul.mubr.msk.f32.vlgmr.msra.gmra.mrb[4].mxu1 %vm936_vm2, %v1042_v20 }
 0x3ca   : > { %5872 = vmatpush3.bf16.msra.mxu1 %v6456_v33  ;;  %5525 = vmatprep.mubr.msk.f32.mxu1 %vm6271_vm1, %v6272_v48 }
 0x3cb   : > { %5873 = vmatprep.subr.bf16.mxu1 %v6269_v22 }
 0x3ce   : > { %5875 = vmatpush3.bf16.msra.mxu1 %v6467_v41 }
 0x3cf   : > { %5882 = vmatprep.subr.bf16.mxu1 %v6269_v22 }
 0x49c   : > { %v1113_v21 = vpop.f32.mrb[4].mxu1 }
 0x49d   : > { %v1124_v24 = vadd.f32 %v1113_v21, %v6497_v60  ;;  %v5505_v25 = vpop.f32.mrb[5].mxu1  ;;  %v1117_v27 = vadd.f32 %v1113_v21, %v903_v26 }
 0x49f   : > { %1126 = vrot.lane.b32.xlu1 %v1124_v24, %s6273_s26  ;;  %v5160_v28 = vmul.f32 -1.442695, %v1117_v27 }
 0x4a1   : > { %6059 = vpow2.f32 %v5160_v28 }
 0x4ab   : > { %v6060_v29 = vpop.eup %6059 }
 0x4ac   : > { %v1121_v30 = vadd.f32 1.0, %v6060_v29 }
 0x4ae   : > { %6061 = vrcp.f32 %v1121_v30 }
 0x4b8   : > { %v6062_v31 = vpop.eup %6061 }
 0x4b9   : > { %v1136_v38 = vsub.f32 1.0, %v6062_v31  ;;  %v1142_v40 = vmul.f32 %v6062_v31, %v1039_v19 }
 0x511   : > { %v1127_v32 = vpop.permute.xlu1 %1126 }
 0x512   : > { %v1129_v34 = vmul.f32 %v6062_v31, %v1127_v32  ;;  %v918_v32 = vadd.f32 %v6443_v23, %v6502_v1 }
 0x514   : > { %1131 = vrot.lane.b32.xlu0 %v1129_v34, %s6273_s26 }
 0x586   : > { %v1132_v35 = vpop.permute.xlu0 %1131 }
 0x587   : > { %v1134_v36 = vadd.f32 %v1132_v35, %v903_v26 }
 0x589   : > { %6063 = vtanh.f32 %v1134_v36 }
 0x593   : > { %v6064_v37 = vpop.eup %6063 }
 0x594   : > { %1138 = vrot.lane.b32.xlu1 %v6064_v37, %s6270_s2 }
 0x606   : > { %v1139_v39 = vpop.permute.xlu1 %1138 }
 0x607   : > { %v1141_v42 = vmul.f32 %v1139_v39, %v1136_v38 }
 0x609   : > { %v1143_v43 = vadd.f32 %v1142_v40, %v1141_v42 }
 0x60b   : > { %1145 = vrot.lane.b32.xlu0 %v1143_v43, %s6270_s2 }
 0x67d   : > { %v1146_v44 = vpop.permute.xlu0 %1145 }
 0x67e   : > { %1149 = vst.msk [vmem:[#allocation2 + $0x8] sm:$0xff] %vm936_vm2, %v1146_v44  ;;  %5515 = vmatmul.mubr.msk.f32.vlgmr.msra.gmra.mrb[14].mxu0 %vm936_vm2, %v1146_v44 }
 0x67f   : > { %5878 = vmatpush3.bf16.msra.mxu0 %v6456_v33  ;;  %5536 = vmatprep.mubr.msk.f32.mxu0 %vm6271_vm1, %v6272_v48 }
 0x680   : > { %5879 = vmatprep.subr.bf16.mxu0 %v6269_v22 }
 0x683   : > { %5881 = vmatpush3.bf16.msra.mxu0 %v6467_v41 }
 0x684   : > { %5888 = vmatprep.subr.bf16.mxu0 %v6269_v22 }
 0x751   : > { %v1218_v45 = vpop.f32.mrb[14].mxu0 }
 0x752   : > { %v1229_v46 = vadd.f32 %v1218_v45, %v6497_v60  ;;  %v5516_v47 = vpop.f32.mrb[15].mxu0  ;;  %v1222_v50 = vadd.f32 %v1218_v45, %v908_v49 }
 0x754   : > { %1231 = vrot.lane.b32.xlu1 %v1229_v46, %s6273_s26  ;;  %v5162_v51 = vmul.f32 -1.442695, %v1222_v50 }
 0x756   : > { %6065 = vpow2.f32 %v5162_v51 }
 0x760   : > { %v6066_v52 = vpop.eup %6065 }
 0x761   : > { %v1226_v53 = vadd.f32 1.0, %v6066_v52 }
 0x763   : > { %6067 = vrcp.f32 %v1226_v53 }
 0x76d   : > { %v6068_v54 = vpop.eup %6067 }
 0x76e   : > { %v1241_v0 = vsub.f32 1.0, %v6068_v54  ;;  %v1247_v59 = vmul.f32 %v6068_v54, %v1143_v43 }
 0x7c6   : > { %v1232_v55 = vpop.permute.xlu1 %1231 }
 0x7c7   : > { %v1234_v56 = vmul.f32 %v6068_v54, %v1232_v55  ;;  %v923_v54 = vadd.f32 %v6499_v62, %v6443_v23  ;;  %v1789_v62 = vld [vmem:[%s7237_s6 + $0x8] sm:$0xff] }
 0x7c9   : > { %1236 = vrot.lane.b32.xlu0 %v1234_v56, %s6273_s26 }
 0x83b   : > { %v1237_v57 = vpop.permute.xlu0 %1236 }
 0x83c   : > { %v1239_v61 = vadd.f32 %v1237_v57, %v908_v49 }
 0x83e   : > { %6069 = vtanh.f32 %v1239_v61 }
 0x848   : > { %v6070_v63 = vpop.eup %6069 }
 0x849   : > { %1243 = vrot.lane.b32.xlu1 %v6070_v63, %s6270_s2 }
 0x8bb   : > { %v1244_v4 = vpop.permute.xlu1 %1243 }
 0x8bc   : > { %v1246_v5 = vmul.f32 %v1244_v4, %v1241_v0 }
 0x8be   : > { %v1248_v6 = vadd.f32 %v1247_v59, %v1246_v5  ;;  %v1788_v59 = vld [vmem:[%s7237_s6] sm:$0xff] }
 0x8bf   : > { %v5900_v5 = vpack.c.bf16 %v1789_v62, %v1788_v59 }
 0x8c0   : > { %1250 = vrot.lane.b32.xlu0 %v1248_v6, %s6270_s2 }
 0x932   : > { %v1251_v7 = vpop.permute.xlu0 %1250 }
 0x933   : > { %1254 = vst.msk [vmem:[#allocation2 + $0x10] sm:$0xff] %vm936_vm2, %v1251_v7  ;;  %5526 = vmatmul.mubr.msk.f32.vlgmr.msra.gmra.mrb[6].mxu1 %vm936_vm2, %v1251_v7 }
 0x934   : > { %5884 = vmatpush3.bf16.msra.mxu1 %v6456_v33  ;;  %5547 = vmatprep.mubr.msk.f32.mxu1 %vm6271_vm1, %v6272_v48 }
 0x935   : > { %5885 = vmatprep.subr.bf16.mxu1 %v6269_v22 }
 0x938   : > { %5887 = vmatpush3.bf16.msra.mxu1 %v6467_v41 }
 0x939   : > { %5894 = vmatprep.subr.bf16.mxu1 %v6269_v22 }
 0xa06   : > { %v1323_v8 = vpop.f32.mrb[6].mxu1 }
 0xa07   : > { %v1334_v9 = vadd.f32 %v1323_v8, %v6497_v60  ;;  %v5527_v10 = vpop.f32.mrb[7].mxu1  ;;  %v1327_v12 = vadd.f32 %v1323_v8, %v913_v11 }
 0xa09   : > { %1336 = vrot.lane.b32.xlu1 %v1334_v9, %s6273_s26  ;;  %v5164_v13 = vmul.f32 -1.442695, %v1327_v12  ;;  %v1790_v12 = vld [vmem:[%s7237_s6 + $0x10] sm:$0xff] }
 0xa0b   : > { %6071 = vpow2.f32 %v5164_v13  ;;  %v1791_v13 = vld [vmem:[%s7237_s6 + $0x18] sm:$0xff] }
 0xa15   : > { %v6072_v14 = vpop.eup %6071 }
 0xa16   : > { %v1331_v15 = vadd.f32 1.0, %v6072_v14  ;;  %v5904_v14 = vpack.c.bf16 %v1791_v13, %v1790_v12 }
 0xa18   : > { %6073 = vrcp.f32 %v1331_v15 }
 0xa22   : > { %v6074_v16 = vpop.eup %6073 }
 0xa23   : > { %v1346_v24 = vsub.f32 1.0, %v6074_v16  ;;  %v1352_v58 = vmul.f32 %v6074_v16, %v1248_v6 }
 0xa7b   : > { %v1337_v17 = vpop.permute.xlu1 %1336 }
 0xa7c   : > { %v1339_v18 = vmul.f32 %v6074_v16, %v1337_v17  ;;  %v1780_v16 = vld [vmem:[#allocation2] sm:$0xff]  ;;  %v1781_v17 = vld [vmem:[#allocation2 + $0x8] sm:$0xff] }
 0xa7e   : > { %1341 = vrot.lane.b32.xlu0 %v1339_v18, %s6273_s26  ;;  %v1782_v18 = vld [vmem:[#allocation2 + $0x10] sm:$0xff] }
 0xaf0   : > { %v1342_v19 = vpop.permute.xlu0 %1341 }
 0xaf1   : > { %v1344_v20 = vadd.f32 %v1342_v19, %v913_v11 }
 0xaf3   : > { %6075 = vtanh.f32 %v1344_v20 }
 0xafd   : > { %v6076_v21 = vpop.eup %6075 }
 0xafe   : > { %1348 = vrot.lane.b32.xlu1 %v6076_v21, %s6270_s2 }
 0xb70   : > { %v1349_v25 = vpop.permute.xlu1 %1348 }
 0xb71   : > { %v1351_v26 = vmul.f32 %v1349_v25, %v1346_v24 }
 0xb73   : > { %v1353_v27 = vadd.f32 %v1352_v58, %v1351_v26 }
 0xb75   : > { %1355 = vrot.lane.b32.xlu0 %v1353_v27, %s6270_s2 }
 0xbe7   : > { %v1356_v28 = vpop.permute.xlu0 %1355 }
 0xbe8   : > { %1359 = vst.msk [vmem:[#allocation2 + $0x18] sm:$0xff] %vm936_vm2, %v1356_v28  ;;  %5537 = vmatmul.mubr.msk.f32.vlgmr.msra.gmra.mrb[16].mxu0 %vm936_vm2, %v1356_v28 }
 0xbe9   : > { %5890 = vmatpush3.bf16.msra.mxu0 %v6456_v33  ;;  %5558 = vmatprep.mubr.msk.f32.mxu0 %vm6271_vm1, %v6272_v48 }
 0xbea   : > { %5891 = vmatprep.subr.bf16.mxu0 %v6269_v22 }
 0xbed   : > { %5893 = vmatpush3.bf16.msra.mxu0 %v6467_v41 }
 0xbee   : > { %5901 = vmatprep.subr.bf16.mxu0 %v5900_v5 }
 0xbef   : > { %v1783_v19 = vld [vmem:[#allocation2 + $0x18] sm:$0xff] }
 0xcbb   : > { %v1428_v29 = vpop.f32.mrb[16].mxu0 }
 0xcbc   : > { %v1439_v30 = vadd.f32 %v1428_v29, %v6497_v60  ;;  %v5538_v31 = vpop.f32.mrb[17].mxu0  ;;  %v1432_v34 = vadd.f32 %v1428_v29, %v918_v32 }
 0xcbe   : > { %1441 = vrot.lane.b32.xlu1 %v1439_v30, %s6273_s26  ;;  %v5166_v35 = vmul.f32 -1.442695, %v1432_v34 }
 0xcc0   : > { %6077 = vpow2.f32 %v5166_v35 }
 0xcca   : > { %v6078_v36 = vpop.eup %6077 }
 0xccb   : > { %v1436_v37 = vadd.f32 1.0, %v6078_v36 }
 0xccd   : > { %6079 = vrcp.f32 %v1436_v37 }
 0xcd7   : > { %v6080_v38 = vpop.eup %6079 }
 0xcd8   : > { %v1451_v45 = vsub.f32 1.0, %v6080_v38  ;;  %v1457_v1 = vmul.f32 %v6080_v38, %v1353_v27 }
 0xd30   : > { %v1442_v39 = vpop.permute.xlu1 %1441 }
 0xd31   : > { %v1444_v40 = vmul.f32 %v6080_v38, %v1442_v39 }
 0xd33   : > { %1446 = vrot.lane.b32.xlu0 %v1444_v40, %s6273_s26 }
 0xda5   : > { %v1447_v42 = vpop.permute.xlu0 %1446 }
 0xda6   : > { %v1449_v43 = vadd.f32 %v1447_v42, %v918_v32  ;;  %v928_v32 = vadd.f32 %v6443_v23, %v6507_v3  ;;  %v6629_v3 = vld [vmem:[%s7239_s8] ss:$0 sm:$0xff] }
 0xda8   : > { %6081 = vtanh.f32 %v1449_v43 }
 0xdb2   : > { %v6082_v44 = vpop.eup %6081 }
 0xdb3   : > { %1453 = vrot.lane.b32.xlu1 %v6082_v44, %s6270_s2 }
 0xe25   : > { %v1454_v46 = vpop.permute.xlu1 %1453 }
 0xe26   : > { %v1456_v47 = vmul.f32 %v1454_v46, %v1451_v45  ;;  %v1792_v45 = vld [vmem:[%s7238_s7] sm:$0xff]  ;;  %v1793_v46 = vld [vmem:[%s7238_s7 + $0x8] sm:$0xff] }
 0xe28   : > { %v1458_v49 = vadd.f32 %v1457_v1, %v1456_v47  ;;  %v6639_v1 = vpack.c.bf16 %v1793_v46, %v1792_v45  ;;  %v1794_v47 = vld [vmem:[%s7238_s7 + $0x10] sm:$0xff] }
 0xe2a   : > { %1460 = vrot.lane.b32.xlu0 %v1458_v49, %s6270_s2 }
 0xe9c   : > { %v1461_v50 = vpop.permute.xlu0 %1460 }
 0xe9d   : > { %1464 = vst.msk [vmem:[#allocation2 + $0x20] sm:$0xff] %vm936_vm2, %v1461_v50  ;;  %5548 = vmatmul.mubr.msk.f32.vlgmr.msra.gmra.mrb[8].mxu1 %vm936_vm2, %v1461_v50 }
 0xe9e   : > { %5896 = vmatpush3.bf16.msra.mxu1 %v6456_v33  ;;  %5569 = vmatprep.mubr.msk.f32.mxu1 %vm6271_vm1, %v6272_v48 }
 0xe9f   : > { %5897 = vmatprep.subr.bf16.mxu1 %v6269_v22 }
 0xea2   : > { %5899 = vmatpush3.bf16.msra.mxu1 %v6467_v41 }
 0xea3   : > { %5908 = vmatprep.subr.bf16.mxu1 %v6269_v22 }
 0xea4   : > { %v1784_v20 = vld [vmem:[#allocation2 + $0x20] sm:$0xff] }
 0xf70   : > { %v1533_v51 = vpop.f32.mrb[8].mxu1 }
 0xf71   : > { %v1544_v52 = vadd.f32 %v1533_v51, %v6497_v60  ;;  %v5549_v53 = vpop.f32.mrb[9].mxu1  ;;  %v1537_v55 = vadd.f32 %v1533_v51, %v923_v54 }
 0xf73   : > { %1546 = vrot.lane.b32.xlu1 %v1544_v52, %s6273_s26  ;;  %v5168_v33 = vmul.f32 -1.442695, %v1537_v55 }
 0xf75   : > { %6083 = vpow2.f32 %v5168_v33 }
 0xf7f   : > { %v6084_v56 = vpop.eup %6083 }
 0xf80   : > { %v1541_v57 = vadd.f32 1.0, %v6084_v56 }
 0xf82   : > { %6085 = vrcp.f32 %v1541_v57 }
 0xf8c   : > { %v6086_v61 = vpop.eup %6085 }
 0xf8d   : > { %v1556_v7 = vsub.f32 1.0, %v6086_v61  ;;  %v1562_v9 = vmul.f32 %v6086_v61, %v1458_v49  ;;  %v1795_v49 = vld [vmem:[%s7238_s7 + $0x18] sm:$0xff] }
 0xf8e   : > { %v6649_v50 = vpack.c.bf16 %v1795_v49, %v1794_v47 }
 0xfe5   : > { %v1547_v63 = vpop.permute.xlu1 %1546 }
 0xfe6   : > { %v1549_v41 = vmul.f32 %v6086_v61, %v1547_v63 }
 0xfe8   : > { %1551 = vrot.lane.b32.xlu0 %v1549_v41, %s6273_s26 }
0x105a   : > { %v1552_v0 = vpop.permute.xlu0 %1551 }
0x105b   : > { %v1554_v4 = vadd.f32 %v1552_v0, %v923_v54 }
0x105d   : > { %6087 = vtanh.f32 %v1554_v4 }
0x1067   : > { %v6088_v6 = vpop.eup %6087 }
0x1068   : > { %1558 = vrot.lane.b32.xlu1 %v6088_v6, %s6270_s2 }
0x10da   : > { %v1559_v8 = vpop.permute.xlu1 %1558 }
0x10db   : > { %v1561_v10 = vmul.f32 %v1559_v8, %v1556_v7 }
0x10dd   : > { %v6591_v11 = vadd.f32 %v1562_v9, %v1561_v10 }
0x10df   : > { %1565 = vrot.lane.b32.xlu0 %v6591_v11, %s6270_s2 }
0x1151   : > { %v1566_v15 = vpop.permute.xlu0 %1565 }
0x1152   : > { %1569 = vst.msk [vmem:[#allocation2 + $0x28] sm:$0xff] %vm936_vm2, %v1566_v15  ;;  %5559 = vmatmul.mubr.msk.f32.vlgmr.msra.gmra.mrb[18].mxu0 %vm936_vm2, %v1566_v15  ;;  %v933_v15 = vadd.f32 %v6505_v2, %v6443_v23 }
0x1153   : > { %5903 = vmatpush3.bf16.msra.mxu0 %v5900_v5  ;;  %5580 = vmatprep.mubr.msk.f32.mxu0 %vm936_vm2, %v1780_v16 }
0x1154   : > { %5905 = vmatprep.subr.bf16.mxu0 %v5904_v14 }
0x1157   : > { %5907 = vmatpush3.bf16.msra.mxu0 %v5904_v14 }
0x1158   : > { %5920 = vmatprep.subr.bf16.mxu0 %v6269_v22 }
0x1159   : > { %v1785_v21 = vld [vmem:[#allocation2 + $0x28] sm:$0xff] }
0x115a   : > { %5581 = vmatmul.mubr.msk.f32.vlgmr.msra.gmra.mrb[20].mxu0 %vm936_vm2, %v1781_v17 }
0x115b   : > { %5583 = vmatprep.mubr.msk.f32.mxu0 %vm936_vm2, %v1782_v18  ;;  %5922 = vmatpush3.bf16.msra.mxu0 %v6639_v1 }
0x115c   : > { %5923 = vmatprep.subr.bf16.mxu0 %v6269_v22 }
0x115e   : > { %5584 = vmatmul.mubr.msk.f32.gmra.mrb[22].mxu0 %vm936_vm2, %v1783_v19 }
0x115f   : > { %5586 = vmatprep.mubr.msk.f32.mxu0 %vm936_vm2, %v1784_v20  ;;  %5925 = vmatpush3.bf16.msra.mxu0 %v6649_v50 }
0x1160   : > { %5932 = vmatprep.subr.bf16.mxu0 %v6269_v22 }
0x1162   : > { %5587 = vmatmul.mubr.msk.f32.gmra.mrb[24].mxu0 %vm936_vm2, %v1785_v21 }
0x1225   : > { %v1638_v24 = vpop.f32.mrb[18].mxu0 }
0x1226   : > { %v1649_v25 = vadd.f32 %v1638_v24, %v6497_v60  ;;  %v5560_v58 = vpop.f32.mrb[19].mxu0  ;;  %v1642_v34 = vadd.f32 %v1638_v24, %v928_v32 }
0x1228   : > { %1651 = vrot.lane.b32.xlu1 %v1649_v25, %s6273_s26  ;;  %v5170_v35 = vmul.f32 -1.442695, %v1642_v34 }
0x122a   : > { %6089 = vpow2.f32 %v5170_v35 }
0x122d   : > { %v6612_v26 = vpop.f32.mrb[20].mxu0 }
0x122e   : > { %v1893_v27 = vpop.f32.mrb[21].mxu0  ;;  %v1899_v49 = vadd.f32 %v6612_v26, %v6629_v3 }
0x122f   : > { %v1894_v59 = vadd.f32 %v6629_v3, %v1893_v27 }
0x1231   : > { %v6614_v28 = vpop.f32.mrb[22].mxu0 }
0x1232   : > { %v6616_v29 = vpop.f32.mrb[23].mxu0 }
0x1234   : > { %v6090_v36 = vpop.eup %6089 }
0x1235   : > { %v6618_v30 = vpop.f32.mrb[24].mxu0  ;;  %v1646_v37 = vadd.f32 1.0, %v6090_v36 }
0x1236   : > { %v6620_v31 = vpop.f32.mrb[25].mxu0 }
0x1237   : > { %6091 = vrcp.f32 %v1646_v37 }
0x1241   : > { %v6092_v38 = vpop.eup %6091 }
0x1242   : > { %v1661_v51 = vsub.f32 1.0, %v6092_v38  ;;  %v1667_v53 = vmul.f32 %v6092_v38, %v6591_v11 }
0x129a   : > { %v1652_v39 = vpop.permute.xlu1 %1651 }
0x129b   : > { %v1654_v40 = vmul.f32 %v6092_v38, %v1652_v39 }
0x129d   : > { %1656 = vrot.lane.b32.xlu0 %v1654_v40, %s6273_s26 }
0x130f   : > { %v1657_v42 = vpop.permute.xlu0 %1656 }
0x1310   : > { %v1659_v43 = vadd.f32 %v1657_v42, %v928_v32 }
0x1312   : > { %6093 = vtanh.f32 %v1659_v43 }
0x131c   : > { %v6094_v44 = vpop.eup %6093 }
0x131d   : > { %1663 = vrot.lane.b32.xlu1 %v6094_v44, %s6270_s2 }
0x1321   : > { %2009 = vrot.lane.b32.xlu1 %v6629_v3, %s6270_s2 }
0x138f   : > { %v1664_v52 = vpop.permute.xlu1 %1663 }
0x1390   : > { %v1666_v54 = vmul.f32 %v1664_v52, %v1661_v51 }
0x1392   : > { %v6654_v55 = vadd.f32 %v1667_v53, %v1666_v54 }
0x1393   : > { %v6674_v63 = vpop.permute.xlu1 %2009 }
0x1394   : > { %1670 = vrot.lane.b32.xlu0 %v6654_v55, %s6270_s2 }
0x1406   : > { %v1671_v33 = vpop.permute.xlu0 %1670 }
0x1407   : > { %1674 = vst.msk [vmem:[#allocation2 + $0x30] sm:$0xff] %vm936_vm2, %v1671_v33  ;;  %5570 = vmatmul.mubr.msk.f32.vlgmr.msra.gmra.mrb[10].mxu1 %vm936_vm2, %v1671_v33 }
0x1408   : > { %5910 = vmatpush3.bf16.msra.mxu1 %v6639_v1  ;;  %5600 = vmatprep.mubr.msk.f32.mxu1 %vm6271_vm1, %v6272_v48 }
0x1409   : > { %5911 = vmatprep.subr.bf16.mxu1 %v6269_v22 }
0x140c   : > { %5913 = vmatpush3.bf16.msra.mxu1 %v6649_v50 }
0x140d   : > { %5914 = vmatprep.subr.bf16.mxu1 %v6269_v22 }
0x140e   : > { %v1786_v56 = vld [vmem:[#allocation2 + $0x30] sm:$0xff] }
0x140f   : > { %5601 = vmatmul.mubr.f32.vlgmr.msra.gmra.mrb[12].mxu1 %v6272_v48  ;;  %5589 = vmatprep.mubr.msk.f32.mxu0 %vm936_vm2, %v1786_v56 }
0x1410   : > { %5916 = vmatpush3.bf16.msra.mxu1 %v6639_v1  ;;  %5611 = vmatprep.mubr.msk.f32.mxu1 %vm6271_vm1, %v6272_v48 }
0x1411   : > { %5917 = vmatprep.subr.bf16.mxu1 %v6269_v22 }
0x1414   : > { %5919 = vmatpush3.bf16.msra.mxu1 %v6649_v50 }
0x1415   : > { %5926 = vmatprep.subr.bf16.mxu1 %v6269_v22 }
0x14da   : > { %v1743_v57 = vpop.f32.mrb[10].mxu1 }
0x14db   : > { %v5571_v61 = vpop.f32.mrb[11].mxu1  ;;  %v1754_v14 = vadd.f32 %v1743_v57, %v6497_v60  ;;  %v1747_v16 = vadd.f32 %v1743_v57, %v933_v15 }
0x14dd   : > { %v5172_v17 = vmul.f32 -1.442695, %v1747_v16 }
0x14e2   : > { %v1998_v41 = vpop.f32.mrb[12].mxu1 }
0x14e3   : > { %v2012_v0 = vadd.f32 %v6674_v63, %v1998_v41  ;;  %v5602_v4 = vpop.f32.mrb[13].mxu1  ;;  %v2002_v62 = vadd.f32 %v1998_v41, %v1894_v59 }
0x14e5   : > { %2014 = vrot.lane.b32.xlu0 %v2012_v0, %s6273_s26  ;;  %v5182_v5 = vmul.f32 -1.442695, %v2002_v62 }
0x14e7   : > { %6095 = vpow2.f32 %v5182_v5 }
0x14f1   : > { %v6096_v6 = vpop.eup %6095 }
0x14f2   : > { %v2006_v7 = vadd.f32 1.0, %v6096_v6 }
0x14f4   : > { %6097 = vrcp.f32 %v2006_v7 }
0x14fe   : > { %v6098_v8 = vpop.eup %6097 }
0x14ff   : > { %v2024_v20 = vsub.f32 1.0, %v6098_v8  ;;  %v2030_v24 = vmul.f32 0.0, %v6098_v8 }
0x1557   : > { %v2015_v9 = vpop.permute.xlu0 %2014 }
0x1558   : > { %v2017_v10 = vmul.f32 %v6098_v8, %v2015_v9 }
0x155a   : > { %2019 = vrot.lane.b32.xlu1 %v2017_v10, %s6273_s26 }
0x15cc   : > { %v2020_v11 = vpop.permute.xlu1 %2019 }
0x15cd   : > { %v2022_v12 = vadd.f32 %v2020_v11, %v1894_v59 }
0x15cf   : > { %6099 = vtanh.f32 %v2022_v12  ;;  %v1904_v12 = vadd.f32 %v6629_v3, %v6616_v29 }
0x15d0   : > { %6101 = vpow2.f32 %v5172_v17 }
0x15d9   : > { %v6100_v13 = vpop.eup %6099 }
0x15da   : > { %2026 = vrot.lane.b32.xlu0 %v6100_v13, %s6270_s2  ;;  %v6102_v18 = vpop.eup %6101 }
0x15db   : > { %v1751_v19 = vadd.f32 1.0, %v6102_v18 }
0x15dd   : > { %6103 = vrcp.f32 %v1751_v19 }
0x15de   : > { %1756 = vrot.lane.b32.xlu0 %v1754_v14, %s6273_s26 }
0x15e7   : > { %v6104_v27 = vpop.eup %6103 }
0x15e8   : > { %v1766_v37 = vsub.f32 1.0, %v6104_v27  ;;  %v1772_v39 = vmul.f32 %v6104_v27, %v6654_v55 }
0x164c   : > { %v2027_v21 = vpop.permute.xlu0 %2026 }
0x164d   : > { %v2029_v25 = vmul.f32 %v2027_v21, %v2024_v20 }
0x164f   : > { %v2031_v58 = vadd.f32 %v2030_v24, %v2029_v25 }
0x1650   : > { %v1757_v32 = vpop.permute.xlu0 %1756 }
0x1651   : > { %v1759_v60 = vmul.f32 %v6104_v27, %v1757_v32  ;;  %2033 = vrot.lane.b32.xlu1 %v2031_v58, %s6270_s2 }
0x1653   : > { %1761 = vrot.lane.b32.xlu0 %v1759_v60, %s6273_s26 }
0x16c3   : > { %v2034_v23 = vpop.permute.xlu1 %2033 }
0x16c4   : > { %2036 = vst.msk [vmem:[#allocation2] sm:$0xff] %vm936_vm2, %v2034_v23  ;;  %5612 = vmatmul.mubr.msk.f32.vlgmr.msra.gmra.mrb[14].mxu1 %vm936_vm2, %v2034_v23 }
0x16c5   : > { %v1762_v2 = vpop.permute.xlu0 %1761  ;;  %5928 = vmatpush3.bf16.msra.mxu1 %v6639_v1  ;;  %5633 = vmatprep.mubr.msk.f32.mxu1 %vm6271_vm1, %v6272_v48 }
0x16c6   : > { %v1764_v34 = vadd.f32 %v1762_v2, %v933_v15  ;;  %5929 = vmatprep.subr.bf16.mxu1 %v6269_v22 }
0x16c8   : > { %6105 = vtanh.f32 %v1764_v34 }
0x16c9   : > { %5931 = vmatpush3.bf16.msra.mxu1 %v6649_v50 }
0x16ca   : > { %5938 = vmatprep.subr.bf16.mxu1 %v6269_v22 }
0x16cb   : > { %v6695_v35 = vld [vmem:[#allocation2] sm:$0xff] }
0x16cc   : > { %2773 = vst.msk [vmem:[%s6698_s29] sm:$0xff] %vm936_vm2, %v6695_v35 }
0x16d2   : > { %v6106_v36 = vpop.eup %6105 }
0x16d3   : > { %1768 = vrot.lane.b32.xlu0 %v6106_v36, %s6270_s2 }
0x1745   : > { %v1769_v38 = vpop.permute.xlu0 %1768 }
0x1746   : > { %v1771_v40 = vmul.f32 %v1769_v38, %v1766_v37  ;;  %v1909_v37 = vadd.f32 %v6614_v28, %v6629_v3 }
0x1748   : > { %v1773_v42 = vadd.f32 %v1772_v39, %v1771_v40 }
0x174a   : > { %1775 = vrot.lane.b32.xlu0 %v1773_v42, %s6270_s2 }
0x1797   : > { %v2105_v43 = vpop.f32.mrb[14].mxu1 }
0x1798   : > { %v2116_v44 = vadd.f32 %v2105_v43, %v6674_v63  ;;  %v5613_v45 = vpop.f32.mrb[15].mxu1  ;;  %v2109_v51 = vadd.f32 %v2105_v43, %v1899_v49 }
0x179a   : > { %2118 = vrot.lane.b32.xlu1 %v2116_v44, %s6273_s26  ;;  %v5184_v52 = vmul.f32 -1.442695, %v2109_v51 }
0x179c   : > { %6107 = vpow2.f32 %v5184_v52 }
0x17a6   : > { %v6108_v53 = vpop.eup %6107 }
0x17a7   : > { %v2113_v54 = vadd.f32 1.0, %v6108_v53 }
0x17a9   : > { %6109 = vrcp.f32 %v2113_v54 }
0x17b3   : > { %v6110_v55 = vpop.eup %6109 }
0x17b4   : > { %v2128_v4 = vsub.f32 1.0, %v6110_v55  ;;  %v2134_v62 = vmul.f32 %v6110_v55, %v2031_v58 }
0x17bc   : > { %v1776_v46 = vpop.permute.xlu0 %1775 }
0x17bd   : > { %1779 = vst.msk [vmem:[#allocation2 + $0x38] sm:$0xff] %vm936_vm2, %v1776_v46 }
0x17c4   : > { %v1787_v47 = vld [vmem:[#allocation2 + $0x38] sm:$0xff] }
0x17c5   : > { %5590 = vmatmul.mubr.msk.f32.gmra.mrb[26].mxu0 %vm936_vm2, %v1787_v47 }
0x17c6   : > { %5622 = vmatprep.mubr.msk.f32.mxu0 %vm6271_vm1, %v6272_v48 }
0x180c   : > { %v2119_v33 = vpop.permute.xlu1 %2118 }
0x180d   : > { %v2121_v56 = vmul.f32 %v6110_v55, %v2119_v33 }
0x180f   : > { %2123 = vrot.lane.b32.xlu1 %v2121_v56, %s6273_s26 }
0x1881   : > { %v2124_v57 = vpop.permute.xlu1 %2123 }
0x1882   : > { %v2126_v61 = vadd.f32 %v2124_v57, %v1899_v49 }
0x1884   : > { %6111 = vtanh.f32 %v2126_v61 }
0x188e   : > { %v6112_v41 = vpop.eup %6111 }
0x188f   : > { %2130 = vrot.lane.b32.xlu1 %v6112_v41, %s6270_s2  ;;  %v1914_v41 = vadd.f32 %v6629_v3, %v6620_v31 }
0x1898   : > { %v6716_v0 = vpop.f32.mrb[26].mxu0 }
0x1899   : > { %v6718_v26 = vpop.f32.mrb[27].mxu0 }
0x1901   : > { %v2131_v59 = vpop.permute.xlu1 %2130 }
0x1902   : > { %v2133_v5 = vmul.f32 %v2131_v59, %v2128_v4 }
0x1904   : > { %v2135_v6 = vadd.f32 %v2134_v62, %v2133_v5 }
0x1906   : > { %2137 = vrot.lane.b32.xlu1 %v2135_v6, %s6270_s2 }
0x1978   : > { %v2138_v7 = vpop.permute.xlu1 %2137 }
0x1979   : > { %2140 = vst.msk [vmem:[#allocation2 + $0x8] sm:$0xff] %vm936_vm2, %v2138_v7  ;;  %5623 = vmatmul.mubr.msk.f32.vlgmr.msra.gmra.mrb[28].mxu0 %vm936_vm2, %v2138_v7 }
0x197a   : > { %5934 = vmatpush3.bf16.msra.mxu0 %v6639_v1  ;;  %5644 = vmatprep.mubr.msk.f32.mxu0 %vm6271_vm1, %v6272_v48 }
0x197b   : > { %5935 = vmatprep.subr.bf16.mxu0 %v6269_v22 }
0x197e   : > { %5937 = vmatpush3.bf16.msra.mxu0 %v6649_v50 }
0x197f   : > { %5944 = vmatprep.subr.bf16.mxu0 %v6269_v22 }
0x1980   : > { %v6729_v8 = vld [vmem:[#allocation2 + $0x8] sm:$0xff] }
0x1981   : > { %2774 = vst.msk [vmem:[%s6698_s29 + $0x8] sm:$0xff] %vm936_vm2, %v6729_v8 }
0x1a4c   : > { %v2209_v9 = vpop.f32.mrb[28].mxu0 }
0x1a4d   : > { %v2220_v10 = vadd.f32 %v2209_v9, %v6674_v63  ;;  %v5624_v11 = vpop.f32.mrb[29].mxu0  ;;  %v2213_v13 = vadd.f32 %v2209_v9, %v1904_v12 }
0x1a4f   : > { %2222 = vrot.lane.b32.xlu0 %v2220_v10, %s6273_s26  ;;  %v5186_v14 = vmul.f32 -1.442695, %v2213_v13 }
0x1a51   : > { %6113 = vpow2.f32 %v5186_v14 }
0x1a5b   : > { %v6114_v15 = vpop.eup %6113 }
0x1a5c   : > { %v2217_v16 = vadd.f32 1.0, %v6114_v15 }
0x1a5e   : > { %6115 = vrcp.f32 %v2217_v16 }
0x1a68   : > { %v6116_v17 = vpop.eup %6115 }
0x1a69   : > { %v2232_v25 = vsub.f32 1.0, %v6116_v17  ;;  %v2238_v58 = vmul.f32 %v6116_v17, %v2135_v6 }
0x1ac1   : > { %v2223_v18 = vpop.permute.xlu0 %2222 }
0x1ac2   : > { %v2225_v19 = vmul.f32 %v6116_v17, %v2223_v18 }
0x1ac4   : > { %2227 = vrot.lane.b32.xlu1 %v2225_v19, %s6273_s26 }
0x1b36   : > { %v2228_v20 = vpop.permute.xlu1 %2227 }
0x1b37   : > { %v2230_v21 = vadd.f32 %v2228_v20, %v1904_v12 }
0x1b39   : > { %6117 = vtanh.f32 %v2230_v21 }
0x1b43   : > { %v6118_v24 = vpop.eup %6117 }
0x1b44   : > { %2234 = vrot.lane.b32.xlu0 %v6118_v24, %s6270_s2 }
0x1bb6   : > { %v2235_v29 = vpop.permute.xlu0 %2234 }
0x1bb7   : > { %v2237_v27 = vmul.f32 %v2235_v29, %v2232_v25 }
0x1bb9   : > { %v2239_v32 = vadd.f32 %v2238_v58, %v2237_v27 }
0x1bbb   : > { %2241 = vrot.lane.b32.xlu1 %v2239_v32, %s6270_s2 }
0x1c2d   : > { %v2242_v60 = vpop.permute.xlu1 %2241 }
0x1c2e   : > { %2244 = vst.msk [vmem:[#allocation2 + $0x10] sm:$0xff] %vm936_vm2, %v2242_v60  ;;  %5634 = vmatmul.mubr.msk.f32.vlgmr.msra.gmra.mrb[16].mxu1 %vm936_vm2, %v2242_v60 }
0x1c2f   : > { %5940 = vmatpush3.bf16.msra.mxu1 %v6639_v1  ;;  %5655 = vmatprep.mubr.msk.f32.mxu1 %vm6271_vm1, %v6272_v48 }
0x1c30   : > { %5941 = vmatprep.subr.bf16.mxu1 %v6269_v22 }
0x1c33   : > { %5943 = vmatpush3.bf16.msra.mxu1 %v6649_v50 }
0x1c34   : > { %5950 = vmatprep.subr.bf16.mxu1 %v6269_v22 }
0x1c35   : > { %v6749_v23 = vld [vmem:[#allocation2 + $0x10] sm:$0xff] }
0x1c36   : > { %2775 = vst.msk [vmem:[%s6698_s29 + $0x10] sm:$0xff] %vm936_vm2, %v6749_v23 }
0x1d01   : > { %v2313_v2 = vpop.f32.mrb[16].mxu1 }
0x1d02   : > { %v2324_v34 = vadd.f32 %v2313_v2, %v6674_v63  ;;  %v5635_v36 = vpop.f32.mrb[17].mxu1  ;;  %v2317_v38 = vadd.f32 %v2313_v2, %v1909_v37 }
0x1d04   : > { %2326 = vrot.lane.b32.xlu0 %v2324_v34, %s6273_s26  ;;  %v5188_v39 = vmul.f32 -1.442695, %v2317_v38  ;;  %v2781_v34 = vld [vmem:[%s7240_s9] sm:$0xff] }
0x1d06   : > { %6119 = vpow2.f32 %v5188_v39 }
0x1d10   : > { %v6120_v40 = vpop.eup %6119 }
0x1d11   : > { %v2321_v42 = vadd.f32 1.0, %v6120_v40 }
0x1d13   : > { %6121 = vrcp.f32 %v2321_v42 }
0x1d1d   : > { %v6122_v43 = vpop.eup %6121 }
0x1d1e   : > { %v2336_v51 = vsub.f32 1.0, %v6122_v43  ;;  %v2342_v52 = vmul.f32 %v6122_v43, %v2239_v32 }
0x1d76   : > { %v2327_v44 = vpop.permute.xlu0 %2326 }
0x1d77   : > { %v2329_v45 = vmul.f32 %v6122_v43, %v2327_v44  ;;  %v2783_v44 = vld [vmem:[%s7240_s9 + $0x10] sm:$0xff] }
0x1d79   : > { %2331 = vrot.lane.b32.xlu1 %v2329_v45, %s6273_s26  ;;  %v2784_v45 = vld [vmem:[%s7240_s9 + $0x18] sm:$0xff] }
0x1deb   : > { %v2332_v46 = vpop.permute.xlu1 %2331 }
0x1dec   : > { %v2334_v47 = vadd.f32 %v2332_v46, %v1909_v37  ;;  %v5960_v46 = vpack.c.bf16 %v2784_v45, %v2783_v44 }
0x1dee   : > { %6123 = vtanh.f32 %v2334_v47 }
0x1df8   : > { %v6124_v49 = vpop.eup %6123 }
0x1df9   : > { %2338 = vrot.lane.b32.xlu0 %v6124_v49, %s6270_s2 }
0x1e6b   : > { %v2339_v28 = vpop.permute.xlu0 %2338 }
0x1e6c   : > { %v2341_v53 = vmul.f32 %v2339_v28, %v2336_v51 }
0x1e6e   : > { %v2343_v54 = vadd.f32 %v2342_v52, %v2341_v53 }
0x1e70   : > { %2345 = vrot.lane.b32.xlu1 %v2343_v54, %s6270_s2 }
0x1ee2   : > { %v2346_v55 = vpop.permute.xlu1 %2345 }
0x1ee3   : > { %2348 = vst.msk [vmem:[#allocation2 + $0x18] sm:$0xff] %vm936_vm2, %v2346_v55  ;;  %5645 = vmatmul.mubr.msk.f32.vlgmr.msra.gmra.mrb[30].mxu0 %vm936_vm2, %v2346_v55 }
0x1ee4   : > { %5946 = vmatpush3.bf16.msra.mxu0 %v6639_v1  ;;  %5666 = vmatprep.mubr.msk.f32.mxu0 %vm6271_vm1, %v6272_v48 }
0x1ee5   : > { %5947 = vmatprep.subr.bf16.mxu0 %v6269_v22 }
0x1ee8   : > { %5949 = vmatpush3.bf16.msra.mxu0 %v6649_v50 }
0x1eea   : > { %v6768_v33 = vld [vmem:[#allocation2 + $0x18] sm:$0xff] }
0x1eeb   : > { %2776 = vst.msk [vmem:[%s6698_s29 + $0x18] sm:$0xff] %vm936_vm2, %v6768_v33 }
0x1fb6   : > { %v2417_v56 = vpop.f32.mrb[30].mxu0 }
0x1fb7   : > { %v2428_v57 = vadd.f32 %v2417_v56, %v6674_v63  ;;  %v5646_v61 = vpop.f32.mrb[31].mxu0  ;;  %v2421_v4 = vadd.f32 %v2417_v56, %v1914_v41 }
0x1fb9   : > { %2430 = vrot.lane.b32.xlu0 %v2428_v57, %s6273_s26  ;;  %v5190_v59 = vmul.f32 -1.442695, %v2421_v4 }
0x1fbb   : > { %6125 = vpow2.f32 %v5190_v59 }
0x1fc5   : > { %v6126_v62 = vpop.eup %6125 }
0x1fc6   : > { %v2425_v5 = vadd.f32 1.0, %v6126_v62 }
0x1fc8   : > { %6127 = vrcp.f32 %v2425_v5 }
0x1fd2   : > { %v6128_v6 = vpop.eup %6127 }
0x1fd3   : > { %v2440_v13 = vsub.f32 1.0, %v6128_v6  ;;  %v2446_v14 = vmul.f32 %v6128_v6, %v2343_v54 }
0x202b   : > { %v2431_v7 = vpop.permute.xlu0 %2430 }
0x202c   : > { %v2433_v9 = vmul.f32 %v6128_v6, %v2431_v7 }
0x202e   : > { %2435 = vrot.lane.b32.xlu1 %v2433_v9, %s6273_s26  ;;  %v2786_v9 = vld [vmem:[%s7241_s10 + $0x8] sm:$0xff] }
0x20a0   : > { %v2436_v10 = vpop.permute.xlu1 %2435 }
0x20a1   : > { %v2438_v11 = vadd.f32 %v2436_v10, %v1914_v41 }
0x20a3   : > { %6129 = vtanh.f32 %v2438_v11 }
0x20ad   : > { %v6130_v12 = vpop.eup %6129 }
0x20ae   : > { %2442 = vrot.lane.b32.xlu0 %v6130_v12, %s6270_s2  ;;  %v6853_v12 = vld [vmem:[%s7242_s11] ss:$0 sm:$0xff] }
0x2120   : > { %v2443_v31 = vpop.permute.xlu0 %2442 }
0x2121   : > { %v2445_v15 = vmul.f32 %v2443_v31, %v2440_v13 }
0x2123   : > { %v2447_v16 = vadd.f32 %v2446_v14, %v2445_v15 }
0x2125   : > { %2449 = vrot.lane.b32.xlu1 %v2447_v16, %s6270_s2 }
0x2197   : > { %v2450_v17 = vpop.permute.xlu1 %2449 }
0x2198   : > { %2452 = vst.msk [vmem:[#allocation2 + $0x20] sm:$0xff] %vm936_vm2, %v2450_v17  ;;  %5656 = vmatmul.mubr.msk.f32.vlgmr.msra.gmra.mrb[18].mxu1 %vm936_vm2, %v2450_v17 }
0x2199   : > { %5952 = vmatpush3.bf16.msra.mxu1 %v6639_v1  ;;  %5677 = vmatprep.mubr.msk.f32.mxu1 %vm6271_vm1, %v6272_v48  ;;  %v1919_v1 = vadd.f32 %v6618_v30, %v6629_v3  ;;  %v2782_v30 = vld [vmem:[%s7240_s9 + $0x8] sm:$0xff] }
0x219a   : > { %5953 = vmatprep.subr.bf16.mxu1 %v6269_v22  ;;  %v5956_v36 = vpack.c.bf16 %v2782_v30, %v2781_v34 }
0x219c   : > { %5957 = vmatprep.subr.bf16.mxu0 %v5956_v36 }
0x219d   : > { %5955 = vmatpush3.bf16.msra.mxu1 %v6649_v50 }
0x219e   : > { %5964 = vmatprep.subr.bf16.mxu1 %v6269_v22 }
0x219f   : > { %v2769_v18 = vld [vmem:[#allocation2 + $0x20] sm:$0xff] }
0x21a0   : > { %2777 = vst.msk [vmem:[%s6698_s29 + $0x20] sm:$0xff] %vm936_vm2, %v2769_v18 }
0x226b   : > { %v2521_v19 = vpop.f32.mrb[18].mxu1 }
0x226c   : > { %v2532_v20 = vadd.f32 %v2521_v19, %v6674_v63  ;;  %v5657_v21 = vpop.f32.mrb[19].mxu1  ;;  %v2525_v24 = vadd.f32 %v2521_v19, %v1919_v1 }
0x226e   : > { %2534 = vrot.lane.b32.xlu0 %v2532_v20, %s6273_s26  ;;  %v5192_v25 = vmul.f32 -1.442695, %v2525_v24 }
0x2270   : > { %6131 = vpow2.f32 %v5192_v25 }
0x227a   : > { %v6132_v29 = vpop.eup %6131 }
0x227b   : > { %v2529_v58 = vadd.f32 1.0, %v6132_v29 }
0x227d   : > { %6133 = vrcp.f32 %v2529_v58 }
0x2287   : > { %v6134_v50 = vpop.eup %6133 }
0x2288   : > { %v2544_v38 = vsub.f32 1.0, %v6134_v50  ;;  %v2550_v40 = vmul.f32 %v6134_v50, %v2447_v16 }
0x22e0   : > { %v2535_v27 = vpop.permute.xlu0 %2534 }
0x22e1   : > { %v2537_v32 = vmul.f32 %v6134_v50, %v2535_v27 }
0x22e3   : > { %2539 = vrot.lane.b32.xlu1 %v2537_v32, %s6273_s26 }
0x2355   : > { %v2540_v60 = vpop.permute.xlu1 %2539 }
0x2356   : > { %v2542_v2 = vadd.f32 %v2540_v60, %v1919_v1 }
0x2358   : > { %6135 = vtanh.f32 %v2542_v2 }
0x2362   : > { %v6136_v37 = vpop.eup %6135 }
0x2363   : > { %2546 = vrot.lane.b32.xlu0 %v6136_v37, %s6270_s2 }
0x23d5   : > { %v2547_v39 = vpop.permute.xlu0 %2546 }
0x23d6   : > { %v2549_v42 = vmul.f32 %v2547_v39, %v2544_v38 }
0x23d8   : > { %v2551_v43 = vadd.f32 %v2550_v40, %v2549_v42 }
0x23da   : > { %2553 = vrot.lane.b32.xlu1 %v2551_v43, %s6270_s2 }
0x244c   : > { %v2554_v47 = vpop.permute.xlu1 %2553 }
0x244d   : > { %2556 = vst.msk [vmem:[#allocation2 + $0x28] sm:$0xff] %vm936_vm2, %v2554_v47  ;;  %5667 = vmatmul.mubr.msk.f32.vlgmr.msra.gmra.mrb[32].mxu0 %vm936_vm2, %v2554_v47 }
0x244e   : > { %5959 = vmatpush3.bf16.msra.mxu0 %v5956_v36  ;;  %5688 = vmatprep.mubr.msk.f32.mxu0 %vm936_vm2, %v6695_v35 }
0x244f   : > { %5961 = vmatprep.subr.bf16.mxu0 %v5960_v46 }
0x2452   : > { %5963 = vmatpush3.bf16.msra.mxu0 %v5960_v46 }
0x2453   : > { %5979 = vmatprep.subr.bf16.mxu0 %v6269_v22 }
0x2454   : > { %v2770_v49 = vld [vmem:[#allocation2 + $0x28] sm:$0xff] }
0x2455   : > { %5689 = vmatmul.mubr.msk.f32.vlgmr.msra.gmra.mrb[34].mxu0 %vm936_vm2, %v6729_v8  ;;  %2778 = vst.msk [vmem:[%s6698_s29 + $0x28] sm:$0xff] %vm936_vm2, %v2770_v49 }
0x2456   : > { %5691 = vmatprep.mubr.msk.f32.mxu0 %vm936_vm2, %v6749_v23 }
0x2459   : > { %5692 = vmatmul.mubr.msk.f32.gmra.mrb[36].mxu0 %vm936_vm2, %v6768_v33  ;;  %v1924_v33 = vadd.f32 %v6629_v3, %v6718_v26  ;;  %v2785_v26 = vld [vmem:[%s7241_s10] sm:$0xff] }
0x245a   : > { %5694 = vmatprep.mubr.msk.f32.mxu0 %vm936_vm2, %v2769_v18  ;;  %v6846_v10 = vpack.c.bf16 %v2786_v9, %v2785_v26 }
0x245c   : > { %5981 = vmatpush3.bf16.msra.mxu0 %v6846_v10 }
0x245d   : > { %5695 = vmatmul.mubr.msk.f32.gmra.mrb[38].mxu0 %vm936_vm2, %v2770_v49  ;;  %5985 = vmatprep.subr.bf16.mxu0 %v6269_v22 }
0x2520   : > { %v2625_v35 = vpop.f32.mrb[32].mxu0 }
0x2521   : > { %v2636_v51 = vadd.f32 %v2625_v35, %v6674_v63  ;;  %v5668_v28 = vpop.f32.mrb[33].mxu0  ;;  %v2629_v56 = vadd.f32 %v2625_v35, %v1924_v33 }
0x2523   : > { %2638 = vrot.lane.b32.xlu0 %v2636_v51, %s6273_s26  ;;  %v5194_v57 = vmul.f32 -1.442695, %v2629_v56 }
0x2525   : > { %6137 = vpow2.f32 %v5194_v57 }
0x2528   : > { %v6826_v52 = vpop.f32.mrb[34].mxu0 }
0x2529   : > { %v2884_v8 = vpop.f32.mrb[35].mxu0  ;;  %v2890_v47 = vadd.f32 %v6826_v52, %v6853_v12 }
0x252a   : > { %v2885_v25 = vadd.f32 %v6853_v12, %v2884_v8 }
0x252c   : > { %v6828_v53 = vpop.f32.mrb[36].mxu0 }
0x252d   : > { %v6830_v54 = vpop.f32.mrb[37].mxu0 }
0x252f   : > { %v6138_v61 = vpop.eup %6137 }
0x2530   : > { %v6832_v23 = vpop.f32.mrb[38].mxu0  ;;  %v2633_v41 = vadd.f32 1.0, %v6138_v61 }
0x2531   : > { %v6834_v55 = vpop.f32.mrb[39].mxu0 }
0x2532   : > { %6139 = vrcp.f32 %v2633_v41 }
0x253c   : > { %v6140_v4 = vpop.eup %6139 }
0x253d   : > { %v2648_v11 = vsub.f32 1.0, %v6140_v4  ;;  %v2654_v31 = vmul.f32 %v6140_v4, %v2551_v43 }
0x2595   : > { %v2639_v59 = vpop.permute.xlu0 %2638 }
0x2596   : > { %v2641_v62 = vmul.f32 %v6140_v4, %v2639_v59 }
0x2598   : > { %2643 = vrot.lane.b32.xlu1 %v2641_v62, %s6273_s26 }
0x260a   : > { %v2644_v5 = vpop.permute.xlu1 %2643 }
0x260b   : > { %v2646_v6 = vadd.f32 %v2644_v5, %v1924_v33 }
0x260d   : > { %6141 = vtanh.f32 %v2646_v6 }
0x2617   : > { %v6142_v7 = vpop.eup %6141 }
0x2618   : > { %2650 = vrot.lane.b32.xlu0 %v6142_v7, %s6270_s2 }
0x261c   : > { %3002 = vrot.lane.b32.xlu0 %v6853_v12, %s6274_s22 }
0x268a   : > { %v2651_v13 = vpop.permute.xlu0 %2650 }
0x268b   : > { %v2653_v14 = vmul.f32 %v2651_v13, %v2648_v11  ;;  %v2895_v11 = vadd.f32 %v6853_v12, %v6830_v54 }
0x268d   : > { %v6857_v15 = vadd.f32 %v2654_v31, %v2653_v14 }
0x268e   : > { %v6877_v20 = vpop.permute.xlu0 %3002 }
0x268f   : > { %2657 = vrot.lane.b32.xlu1 %v6857_v15, %s6270_s2 }
0x2701   : > { %v2658_v16 = vpop.permute.xlu1 %2657 }
0x2702   : > { %2660 = vst.msk [vmem:[#allocation2 + $0x30] sm:$0xff] %vm936_vm2, %v2658_v16  ;;  %5678 = vmatmul.mubr.msk.f32.vlgmr.msra.gmra.mrb[20].mxu1 %vm936_vm2, %v2658_v16 }
0x2703   : > { %5966 = vmatpush3.bf16.msra.mxu1 %v6846_v10  ;;  %5704 = vmatprep.mubr.msk.f32.mxu1 %vm6271_vm1, %v6272_v48 }
0x2704   : > { %5967 = vmatprep.subr.bf16.mxu1 %v6269_v22 }
0x2706   : > { %5705 = vmatmul.mubr.f32.vlgmr.msra.gmra.mrb[22].mxu1 %v6272_v48 }
0x2707   : > { %5969 = vmatpush3.bf16.msra.mxu1 %v6846_v10  ;;  %5711 = vmatprep.mubr.msk.f32.mxu1 %vm6271_vm1, %v6272_v48 }
0x2708   : > { %5970 = vmatprep.subr.bf16.mxu1 %v6269_v22 }
0x2709   : > { %v2771_v17 = vld [vmem:[#allocation2 + $0x30] sm:$0xff] }
0x270a   : > { %2779 = vst.msk [vmem:[%s6698_s29 + $0x30] sm:$0xff] %vm936_vm2, %v2771_v17  ;;  %5697 = vmatprep.mubr.msk.f32.mxu0 %vm936_vm2, %v2771_v17 }
0x27d5   : > { %v6875_v18 = vpop.f32.mrb[20].mxu1 }
0x27d6   : > { %v5679_v19 = vpop.f32.mrb[21].mxu1 }
0x27d9   : > { %v2991_v21 = vpop.f32.mrb[22].mxu1 }
0x27da   : > { %v5706_v1 = vpop.f32.mrb[23].mxu1  ;;  %v3005_v24 = vadd.f32 %v6877_v20, %v2991_v21  ;;  %v2995_v29 = vadd.f32 %v2991_v21, %v2885_v25 }
0x27dc   : > { %3007 = vrot.lane.b32.xlu1 %v3005_v24, %s6270_s2  ;;  %v5206_v58 = vmul.f32 -1.442695, %v2995_v29 }
0x27de   : > { %6143 = vpow2.f32 %v5206_v58 }
0x27e8   : > { %v6144_v50 = vpop.eup %6143 }
0x27e9   : > { %v2999_v27 = vadd.f32 1.0, %v6144_v50 }
0x27eb   : > { %6145 = vrcp.f32 %v2999_v27 }
0x27f5   : > { %v6146_v32 = vpop.eup %6145 }
0x27f6   : > { %v3017_v37 = vsub.f32 1.0, %v6146_v32  ;;  %v3023_v39 = vmul.f32 0.0, %v6146_v32 }
0x284e   : > { %v3008_v60 = vpop.permute.xlu1 %3007 }
0x284f   : > { %v3010_v2 = vmul.f32 %v6146_v32, %v3008_v60 }
0x2851   : > { %3012 = vrot.lane.b32.xlu0 %v3010_v2, %s6275_s27 }
0x28c3   : > { %v3013_v34 = vpop.permute.xlu0 %3012 }
0x28c4   : > { %v3015_v30 = vadd.f32 %v3013_v34, %v2885_v25 }
0x28c6   : > { %6147 = vtanh.f32 %v3015_v30  ;;  %v2900_v30 = vadd.f32 %v6828_v53, %v6853_v12  ;;  %v2740_v53 = vadd.f32 %v6875_v18, %v6674_v63 }
0x28d0   : > { %v6148_v36 = vpop.eup %6147 }
0x28d1   : > { %3019 = vrot.lane.b32.xlu1 %v6148_v36, %s6274_s22 }
0x2943   : > { %v3020_v38 = vpop.permute.xlu1 %3019 }
0x2944   : > { %v3022_v40 = vmul.f32 %v3020_v38, %v3017_v37 }
0x2946   : > { %v3024_v42 = vadd.f32 %v3023_v39, %v3022_v40 }
0x2948   : > { %3026 = vrot.lane.b32.xlu0 %v3024_v42, %s6274_s22 }
0x29ba   : > { %v3027_v43 = vpop.permute.xlu0 %3026 }
0x29bb   : > { %3029 = vst.msk [vmem:[#allocation3] sm:$0xff] %vm656_vm0, %v3027_v43  ;;  %5712 = vmatmul.mubr.msk.f32.vlgmr.msra.gmra.mrb[24].mxu1 %vm656_vm0, %v3027_v43 }
0x29bc   : > { %5972 = vmatpush3.bf16.msra.mxu1 %v6846_v10  ;;  %5718 = vmatprep.mubr.msk.f32.mxu1 %vm6271_vm1, %v6272_v48 }
0x29bd   : > { %5973 = vmatprep.subr.bf16.mxu1 %v6269_v22 }
0x2a8e   : > { %v3098_v44 = vpop.f32.mrb[24].mxu1 }
0x2a8f   : > { %v3109_v45 = vadd.f32 %v3098_v44, %v6877_v20  ;;  %v5713_v46 = vpop.f32.mrb[25].mxu1  ;;  %v3102_v49 = vadd.f32 %v3098_v44, %v2890_v47 }
0x2a91   : > { %3111 = vrot.lane.b32.xlu1 %v3109_v45, %s6270_s2  ;;  %v5208_v35 = vmul.f32 -1.442695, %v3102_v49 }
0x2a93   : > { %6149 = vpow2.f32 %v5208_v35 }
0x2a9d   : > { %v6150_v51 = vpop.eup %6149 }
0x2a9e   : > { %v3106_v28 = vadd.f32 1.0, %v6150_v51 }
0x2aa0   : > { %6151 = vrcp.f32 %v3106_v28 }
0x2aaa   : > { %v6152_v8 = vpop.eup %6151 }
0x2aab   : > { %v3121_v4 = vsub.f32 1.0, %v6152_v8  ;;  %v3127_v52 = vmul.f32 %v6152_v8, %v3024_v42 }
0x2b03   : > { %v3112_v33 = vpop.permute.xlu1 %3111 }
0x2b04   : > { %v3114_v56 = vmul.f32 %v6152_v8, %v3112_v33 }
0x2b06   : > { %3116 = vrot.lane.b32.xlu0 %v3114_v56, %s6275_s27 }
0x2b78   : > { %v3117_v57 = vpop.permute.xlu0 %3116 }
0x2b79   : > { %v3119_v61 = vadd.f32 %v3117_v57, %v2890_v47  ;;  %v1929_v47 = vadd.f32 %v6716_v0, %v6629_v3 }
0x2b7b   : > { %6153 = vtanh.f32 %v3119_v61  ;;  %v2733_v49 = vadd.f32 %v6875_v18, %v1929_v47 }
0x2b7d   : > { %v5196_v35 = vmul.f32 -1.442695, %v2733_v49  ;;  %v3774_v49 = vld [vmem:[%s7243_s12 + $0x8] sm:$0xff] }
0x2b85   : > { %v6154_v41 = vpop.eup %6153 }
0x2b86   : > { %3123 = vrot.lane.b32.xlu1 %v6154_v41, %s6274_s22 }
0x2bf8   : > { %v3124_v59 = vpop.permute.xlu1 %3123 }
0x2bf9   : > { %v3126_v62 = vmul.f32 %v3124_v59, %v3121_v4 }
0x2bfb   : > { %v3128_v5 = vadd.f32 %v3127_v52, %v3126_v62 }
0x2bfd   : > { %3130 = vrot.lane.b32.xlu0 %v3128_v5, %s6274_s22 }
0x2c6f   : > { %v3131_v6 = vpop.permute.xlu0 %3130 }
0x2c70   : > { %3134 = vst.msk [vmem:[#allocation3 + $0x8] sm:$0xff] %vm656_vm0, %v3131_v6  ;;  %5719 = vmatmul.mubr.msk.f32.vlgmr.msra.gmra.mrb[26].mxu1 %vm656_vm0, %v3131_v6 }
0x2c71   : > { %5975 = vmatpush3.bf16.msra.mxu1 %v6846_v10  ;;  %5725 = vmatprep.mubr.msk.f32.mxu1 %vm6271_vm1, %v6272_v48 }
0x2c72   : > { %5976 = vmatprep.subr.bf16.mxu1 %v6269_v22 }
0x2d43   : > { %v3203_v7 = vpop.f32.mrb[26].mxu1 }
0x2d44   : > { %v3214_v26 = vadd.f32 %v3203_v7, %v6877_v20  ;;  %v5720_v9 = vpop.f32.mrb[27].mxu1  ;;  %v3207_v13 = vadd.f32 %v3203_v7, %v2895_v11 }
0x2d46   : > { %3216 = vrot.lane.b32.xlu1 %v3214_v26, %s6270_s2  ;;  %v5210_v31 = vmul.f32 -1.442695, %v3207_v13 }
0x2d48   : > { %6155 = vpow2.f32 %v5210_v31 }
0x2d52   : > { %v6156_v14 = vpop.eup %6155 }
0x2d53   : > { %v3211_v16 = vadd.f32 1.0, %v6156_v14 }
0x2d55   : > { %6157 = vrcp.f32 %v3211_v16 }
0x2d5f   : > { %v6158_v17 = vpop.eup %6157 }
0x2d60   : > { %v3226_v29 = vsub.f32 1.0, %v6158_v17  ;;  %v3232_v54 = vmul.f32 %v6158_v17, %v3128_v5 }
0x2db8   : > { %v3217_v19 = vpop.permute.xlu1 %3216 }
0x2db9   : > { %v3219_v21 = vmul.f32 %v6158_v17, %v3217_v19 }
0x2dbb   : > { %3221 = vrot.lane.b32.xlu0 %v3219_v21, %s6275_s27 }
0x2e2d   : > { %v3222_v1 = vpop.permute.xlu0 %3221 }
0x2e2e   : > { %v3224_v24 = vadd.f32 %v3222_v1, %v2895_v11 }
0x2e30   : > { %6159 = vtanh.f32 %v3224_v24 }
0x2e3a   : > { %v6160_v25 = vpop.eup %6159 }
0x2e3b   : > { %3228 = vrot.lane.b32.xlu1 %v6160_v25, %s6274_s22 }
0x2ead   : > { %v3229_v58 = vpop.permute.xlu1 %3228 }
0x2eae   : > { %v3231_v50 = vmul.f32 %v3229_v58, %v3226_v29 }
0x2eb0   : > { %v3233_v27 = vadd.f32 %v3232_v54, %v3231_v50 }
0x2eb2   : > { %3235 = vrot.lane.b32.xlu0 %v3233_v27, %s6274_s22 }
0x2f24   : > { %v3236_v32 = vpop.permute.xlu0 %3235 }
0x2f25   : > { %3239 = vst.msk [vmem:[#allocation3 + $0x10] sm:$0xff] %vm656_vm0, %v3236_v32  ;;  %5726 = vmatmul.mubr.msk.f32.vlgmr.msra.gmra.mrb[28].mxu1 %vm656_vm0, %v3236_v32 }
0x2f26   : > { %5978 = vmatpush3.bf16.msra.mxu1 %v6846_v10  ;;  %5732 = vmatprep.mubr.msk.f32.mxu1 %vm6271_vm1, %v6272_v48 }
0x2f27   : > { %5982 = vmatprep.subr.bf16.mxu1 %v6269_v22 }
0x2ff8   : > { %v3308_v60 = vpop.f32.mrb[28].mxu1 }
0x2ff9   : > { %v3319_v2 = vadd.f32 %v3308_v60, %v6877_v20  ;;  %v5727_v34 = vpop.f32.mrb[29].mxu1  ;;  %v3312_v36 = vadd.f32 %v3308_v60, %v2900_v30 }
0x2ffb   : > { %3321 = vrot.lane.b32.xlu1 %v3319_v2, %s6270_s2  ;;  %v5212_v37 = vmul.f32 -1.442695, %v3312_v36 }
0x2ffd   : > { %6161 = vpow2.f32 %v5212_v37 }
0x3007   : > { %v6162_v38 = vpop.eup %6161 }
0x3008   : > { %v3316_v39 = vadd.f32 1.0, %v6162_v38  ;;  %v2910_v38 = vadd.f32 %v6832_v23, %v6853_v12  ;;  %v3773_v23 = vld [vmem:[%s7243_s12] sm:$0xff] }
0x300a   : > { %6163 = vrcp.f32 %v3316_v39 }
0x3014   : > { %v6164_v40 = vpop.eup %6163 }
0x3015   : > { %v3331_v8 = vsub.f32 1.0, %v6164_v40  ;;  %v3337_v56 = vmul.f32 %v6164_v40, %v3233_v27 }
0x306d   : > { %v3322_v42 = vpop.permute.xlu1 %3321 }
0x306e   : > { %v3324_v43 = vmul.f32 %v6164_v40, %v3322_v42 }
0x3070   : > { %3326 = vrot.lane.b32.xlu0 %v3324_v43, %s6275_s27 }
0x30e2   : > { %v3327_v44 = vpop.permute.xlu0 %3326 }
0x30e3   : > { %v3329_v45 = vadd.f32 %v3327_v44, %v2900_v30 }
0x30e5   : > { %6165 = vtanh.f32 %v3329_v45 }
0x30e6   : > { %6167 = vpow2.f32 %v5196_v35  ;;  %v5988_v35 = vpack.c.bf16 %v3774_v49, %v3773_v23 }
0x30ef   : > { %v6166_v46 = vpop.eup %6165 }
0x30f0   : > { %3333 = vrot.lane.b32.xlu1 %v6166_v46, %s6274_s22  ;;  %v6168_v51 = vpop.eup %6167 }
0x30f1   : > { %v2737_v28 = vadd.f32 1.0, %v6168_v51 }
0x30f3   : > { %6169 = vrcp.f32 %v2737_v28 }
0x30f4   : > { %2742 = vrot.lane.b32.xlu1 %v2740_v53, %s6273_s26 }
0x30fd   : > { %v6170_v41 = vpop.eup %6169 }
0x30fe   : > { %v2752_v52 = vsub.f32 1.0, %v6170_v41  ;;  %v2758_v5 = vmul.f32 %v6170_v41, %v6857_v15  ;;  %v2905_v15 = vadd.f32 %v6853_v12, %v6834_v55 }
0x3162   : > { %v3334_v33 = vpop.permute.xlu1 %3333 }
0x3163   : > { %v3336_v57 = vmul.f32 %v3334_v33, %v3331_v8 }
0x3165   : > { %v3338_v61 = vadd.f32 %v3337_v56, %v3336_v57 }
0x3166   : > { %v2743_v4 = vpop.permute.xlu1 %2742 }
0x3167   : > { %v2745_v63 = vmul.f32 %v6170_v41, %v2743_v4  ;;  %3340 = vrot.lane.b32.xlu0 %v3338_v61, %s6274_s22  ;;  %v3766_v41 = vld [vmem:[#allocation3 + $0x8] sm:$0xff]  ;;  %v3767_v4 = vld [vmem:[#allocation3 + $0x10] sm:$0xff] }
0x3169   : > { %2747 = vrot.lane.b32.xlu1 %v2745_v63, %s6273_s26 }
0x31d9   : > { %v3341_v3 = vpop.permute.xlu0 %3340 }
0x31da   : > { %3344 = vst.msk [vmem:[#allocation3 + $0x18] sm:$0xff] %vm656_vm0, %v3341_v3  ;;  %5733 = vmatmul.mubr.msk.f32.vlgmr.msra.gmra.mrb[30].mxu1 %vm656_vm0, %v3341_v3 }
0x31db   : > { %v2748_v0 = vpop.permute.xlu1 %2747  ;;  %5984 = vmatpush3.bf16.msra.mxu1 %v6846_v10  ;;  %5746 = vmatprep.mubr.msk.f32.mxu1 %vm6271_vm1, %v6272_v48 }
0x31dc   : > { %v2750_v18 = vadd.f32 %v2748_v0, %v1929_v47  ;;  %5989 = vmatprep.subr.bf16.mxu1 %v5988_v35 }
0x31de   : > { %6171 = vtanh.f32 %v2750_v18 }
0x31e1   : > { %v3768_v63 = vld [vmem:[#allocation3 + $0x18] sm:$0xff] }
0x31e8   : > { %v6172_v59 = vpop.eup %6171 }
0x31e9   : > { %2754 = vrot.lane.b32.xlu1 %v6172_v59, %s6270_s2 }
0x325b   : > { %v2755_v62 = vpop.permute.xlu1 %2754 }
0x325c   : > { %v2757_v6 = vmul.f32 %v2755_v62, %v2752_v52 }
0x325e   : > { %v2759_v7 = vadd.f32 %v2758_v5, %v2757_v6 }
0x3260   : > { %2761 = vrot.lane.b32.xlu1 %v2759_v7, %s6270_s2 }
0x32ad   : > { %v3413_v26 = vpop.f32.mrb[30].mxu1 }
0x32ae   : > { %v3424_v9 = vadd.f32 %v3413_v26, %v6877_v20  ;;  %v5734_v11 = vpop.f32.mrb[31].mxu1  ;;  %v3417_v14 = vadd.f32 %v3413_v26, %v2905_v15 }
0x32b0   : > { %3426 = vrot.lane.b32.xlu0 %v3424_v9, %s6270_s2  ;;  %v5214_v16 = vmul.f32 -1.442695, %v3417_v14 }
0x32b2   : > { %6173 = vpow2.f32 %v5214_v16 }
0x32bc   : > { %v6174_v17 = vpop.eup %6173 }
0x32bd   : > { %v3421_v19 = vadd.f32 1.0, %v6174_v17 }
0x32bf   : > { %6175 = vrcp.f32 %v3421_v19 }
0x32c9   : > { %v6176_v21 = vpop.eup %6175 }
0x32ca   : > { %v3436_v50 = vsub.f32 1.0, %v6176_v21  ;;  %v3442_v32 = vmul.f32 %v6176_v21, %v3338_v61  ;;  %v3765_v61 = vld [vmem:[#allocation3] sm:$0xff] }
0x32d2   : > { %v2762_v13 = vpop.permute.xlu1 %2761 }
0x32d3   : > { %2764 = vst.msk [vmem:[#allocation2 + $0x38] sm:$0xff] %vm936_vm2, %v2762_v13 }
0x32da   : > { %v2772_v31 = vld [vmem:[#allocation2 + $0x38] sm:$0xff] }
0x32db   : > { %2780 = vst.msk [vmem:[%s6698_s29 + $0x38] sm:$0xff] %vm936_vm2, %v2772_v31  ;;  %5698 = vmatmul.mubr.msk.f32.gmra.mrb[40].mxu0 %vm936_vm2, %v2772_v31 }
0x32dc   : > { %5739 = vmatprep.mubr.msk.f32.mxu0 %vm6271_vm1, %v6272_v48 }
0x3322   : > { %v3427_v1 = vpop.permute.xlu0 %3426 }
0x3323   : > { %v3429_v24 = vmul.f32 %v6176_v21, %v3427_v1 }
0x3325   : > { %3431 = vrot.lane.b32.xlu0 %v3429_v24, %s6275_s27 }
0x3397   : > { %v3432_v25 = vpop.permute.xlu0 %3431 }
0x3398   : > { %v3434_v29 = vadd.f32 %v3432_v25, %v2905_v15  ;;  %v7003_v25 = vld [vmem:[%s7245_s14] ss:$0 sm:$0xff] }
0x339a   : > { %6177 = vtanh.f32 %v3434_v29  ;;  %v3775_v29 = vld [vmem:[%s7244_s13] sm:$0xff] }
0x33a4   : > { %v6178_v58 = vpop.eup %6177 }
0x33a5   : > { %3438 = vrot.lane.b32.xlu0 %v6178_v58, %s6274_s22  ;;  %v3776_v58 = vld [vmem:[%s7244_s13 + $0x8] sm:$0xff] }
0x33ae   : > { %v6951_v54 = vpop.f32.mrb[40].mxu0 }
0x33af   : > { %v6953_v55 = vpop.f32.mrb[41].mxu0 }
0x33b0   : > { %v2915_v11 = vadd.f32 %v6853_v12, %v6953_v55  ;;  %v7013_v55 = vpack.c.bf16 %v3776_v58, %v3775_v29 }
0x3417   : > { %v3439_v27 = vpop.permute.xlu0 %3438 }
0x3418   : > { %v3441_v60 = vmul.f32 %v3439_v27, %v3436_v50 }
0x341a   : > { %v3443_v2 = vadd.f32 %v3442_v32, %v3441_v60 }
0x341c   : > { %3445 = vrot.lane.b32.xlu0 %v3443_v2, %s6274_s22 }
0x348e   : > { %v3446_v34 = vpop.permute.xlu0 %3445 }
0x348f   : > { %3449 = vst.msk [vmem:[#allocation3 + $0x20] sm:$0xff] %vm656_vm0, %v3446_v34  ;;  %5740 = vmatmul.mubr.msk.f32.vlgmr.msra.gmra.mrb[42].mxu0 %vm656_vm0, %v3446_v34 }
0x3490   : > { %5987 = vmatpush3.bf16.msra.mxu0 %v6846_v10  ;;  %5753 = vmatprep.mubr.msk.f32.mxu0 %vm6271_vm1, %v6272_v48 }
0x3491   : > { %5992 = vmatprep.subr.bf16.mxu0 %v6269_v22 }
0x3496   : > { %v3769_v3 = vld [vmem:[#allocation3 + $0x20] sm:$0xff] }
0x3562   : > { %v3518_v30 = vpop.f32.mrb[42].mxu0 }
0x3563   : > { %v3529_v36 = vadd.f32 %v3518_v30, %v6877_v20  ;;  %v5741_v37 = vpop.f32.mrb[43].mxu0  ;;  %v3522_v39 = vadd.f32 %v3518_v30, %v2910_v38 }
0x3565   : > { %3531 = vrot.lane.b32.xlu1 %v3529_v36, %s6270_s2  ;;  %v5216_v40 = vmul.f32 -1.442695, %v3522_v39 }
0x3567   : > { %6179 = vpow2.f32 %v5216_v40 }
0x3571   : > { %v6180_v42 = vpop.eup %6179 }
0x3572   : > { %v3526_v43 = vadd.f32 1.0, %v6180_v42 }
0x3574   : > { %6181 = vrcp.f32 %v3526_v43 }
0x357e   : > { %v6182_v10 = vpop.eup %6181 }
0x357f   : > { %v3541_v51 = vsub.f32 1.0, %v6182_v10  ;;  %v3547_v8 = vmul.f32 %v6182_v10, %v3443_v2 }
0x35d7   : > { %v3532_v44 = vpop.permute.xlu1 %3531 }
0x35d8   : > { %v3534_v45 = vmul.f32 %v6182_v10, %v3532_v44 }
0x35da   : > { %3536 = vrot.lane.b32.xlu0 %v3534_v45, %s6275_s27 }
0x364c   : > { %v3537_v46 = vpop.permute.xlu0 %3536 }
0x364d   : > { %v3539_v53 = vadd.f32 %v3537_v46, %v2910_v38 }
0x364f   : > { %6183 = vtanh.f32 %v3539_v53 }
0x3659   : > { %v6184_v47 = vpop.eup %6183 }
0x365a   : > { %3543 = vrot.lane.b32.xlu1 %v6184_v47, %s6274_s22 }
0x36cc   : > { %v3544_v28 = vpop.permute.xlu1 %3543 }
0x36cd   : > { %v3546_v33 = vmul.f32 %v3544_v28, %v3541_v51 }
0x36cf   : > { %v3548_v56 = vadd.f32 %v3547_v8, %v3546_v33 }
0x36d1   : > { %3550 = vrot.lane.b32.xlu0 %v3548_v56, %s6274_s22 }
0x3743   : > { %v3551_v57 = vpop.permute.xlu0 %3550 }
0x3744   : > { %3554 = vst.msk [vmem:[#allocation3 + $0x28] sm:$0xff] %vm656_vm0, %v3551_v57  ;;  %5747 = vmatmul.mubr.msk.f32.vlgmr.msra.gmra.mrb[32].mxu1 %vm656_vm0, %v3551_v57 }
0x3745   : > { %5991 = vmatpush3.bf16.msra.mxu1 %v5988_v35  ;;  %5760 = vmatprep.mubr.msk.f32.mxu1 %vm656_vm0, %v3765_v61 }
0x3746   : > { %6004 = vmatprep.subr.bf16.mxu1 %v6269_v22 }
0x3748   : > { %5761 = vmatmul.mubr.msk.f32.vlgmr.msra.gmra.mrb[34].mxu1 %vm656_vm0, %v3766_v41 }
0x3749   : > { %5763 = vmatprep.mubr.msk.f32.mxu1 %vm656_vm0, %v3767_v4  ;;  %6006 = vmatpush3.bf16.msra.mxu1 %v7013_v55 }
0x374a   : > { %6010 = vmatprep.subr.bf16.mxu1 %v6269_v22 }
0x374b   : > { %v3770_v0 = vld [vmem:[#allocation3 + $0x28] sm:$0xff] }
0x374c   : > { %5764 = vmatmul.mubr.msk.f32.gmra.mrb[36].mxu1 %vm656_vm0, %v3768_v63 }
0x374d   : > { %5766 = vmatprep.mubr.msk.f32.mxu1 %vm656_vm0, %v3769_v3 }
0x3750   : > { %5767 = vmatmul.mubr.msk.f32.gmra.mrb[38].mxu1 %vm656_vm0, %v3770_v0 }
0x3817   : > { %v3623_v18 = vpop.f32.mrb[32].mxu1 }
0x3818   : > { %v3634_v59 = vadd.f32 %v3623_v18, %v6877_v20  ;;  %v5748_v52 = vpop.f32.mrb[33].mxu1  ;;  %v3627_v13 = vadd.f32 %v3623_v18, %v2915_v11 }
0x381a   : > { %3636 = vrot.lane.b32.xlu1 %v3634_v59, %s6270_s2  ;;  %v5218_v31 = vmul.f32 -1.442695, %v3627_v13 }
0x381b   : > { %v6986_v62 = vpop.f32.mrb[34].mxu1 }
0x381c   : > { %v3874_v5 = vpop.f32.mrb[35].mxu1  ;;  %6185 = vpow2.f32 %v5218_v31  ;;  %v3880_v3 = vadd.f32 %v6986_v62, %v7003_v25 }
0x381d   : > { %v3875_v43 = vadd.f32 %v7003_v25, %v3874_v5 }
0x381f   : > { %v6988_v6 = vpop.f32.mrb[36].mxu1 }
0x3820   : > { %v6990_v7 = vpop.f32.mrb[37].mxu1 }
0x3823   : > { %v6992_v26 = vpop.f32.mrb[38].mxu1 }
0x3824   : > { %v6994_v9 = vpop.f32.mrb[39].mxu1 }
0x3826   : > { %v6186_v15 = vpop.eup %6185 }
0x3827   : > { %v3631_v14 = vadd.f32 1.0, %v6186_v15 }
0x3829   : > { %6187 = vrcp.f32 %v3631_v14 }
0x3833   : > { %v6188_v16 = vpop.eup %6187 }
0x3834   : > { %v3646_v50 = vsub.f32 1.0, %v6188_v16  ;;  %v3652_v32 = vmul.f32 %v6188_v16, %v3548_v56 }
0x388c   : > { %v3637_v17 = vpop.permute.xlu1 %3636 }
0x388d   : > { %v3639_v19 = vmul.f32 %v6188_v16, %v3637_v17 }
0x388f   : > { %3641 = vrot.lane.b32.xlu0 %v3639_v19, %s6275_s27 }
0x3901   : > { %v3642_v21 = vpop.permute.xlu0 %3641 }
0x3902   : > { %v3644_v1 = vadd.f32 %v3642_v21, %v2915_v11 }
0x3904   : > { %6189 = vtanh.f32 %v3644_v1 }
0x390e   : > { %v6190_v24 = vpop.eup %6189 }
0x390f   : > { %3648 = vrot.lane.b32.xlu1 %v6190_v24, %s6274_s22 }
0x3913   : > { %3990 = vrot.lane.b32.xlu1 %v7003_v25, %s6274_s22 }
0x3981   : > { %v3649_v27 = vpop.permute.xlu1 %3648 }
0x3982   : > { %v3651_v60 = vmul.f32 %v3649_v27, %v3646_v50  ;;  %v3885_v50 = vadd.f32 %v7003_v25, %v6990_v7 }
0x3984   : > { %v7017_v2 = vadd.f32 %v3652_v32, %v3651_v60 }
0x3985   : > { %v7035_v38 = vpop.permute.xlu1 %3990 }
0x3986   : > { %3655 = vrot.lane.b32.xlu0 %v7017_v2, %s6274_s22 }
0x39f8   : > { %v3656_v34 = vpop.permute.xlu0 %3655 }
0x39f9   : > { %3659 = vst.msk [vmem:[#allocation3 + $0x30] sm:$0xff] %vm656_vm0, %v3656_v34  ;;  %5754 = vmatmul.mubr.msk.f32.vlgmr.msra.gmra.mrb[44].mxu0 %vm656_vm0, %v3656_v34 }
0x39fa   : > { %5994 = vmatpush3.bf16.msra.mxu0 %v7013_v55  ;;  %5776 = vmatprep.mubr.msk.f32.mxu0 %vm6271_vm1, %v6272_v48 }
0x39fb   : > { %5995 = vmatprep.subr.bf16.mxu0 %v6269_v22 }
0x39fd   : > { %5777 = vmatmul.mubr.f32.vlgmr.msra.gmra.mrb[46].mxu0 %v6272_v48 }
0x39fe   : > { %5997 = vmatpush3.bf16.msra.mxu0 %v7013_v55  ;;  %5783 = vmatprep.mubr.msk.f32.mxu0 %vm6271_vm1, %v6272_v48 }
0x39ff   : > { %5998 = vmatprep.subr.bf16.mxu0 %v6269_v22 }
0x3a00   : > { %v3771_v30 = vld [vmem:[#allocation3 + $0x30] sm:$0xff] }
0x3a01   : > { %5769 = vmatprep.mubr.msk.f32.mxu1 %vm656_vm0, %v3771_v30 }
0x3acc   : > { %v7033_v36 = vpop.f32.mrb[44].mxu0 }
0x3acd   : > { %v5755_v37 = vpop.f32.mrb[45].mxu0  ;;  %v3739_v7 = vadd.f32 %v7033_v36, %v6877_v20 }
0x3ad0   : > { %v3979_v39 = vpop.f32.mrb[46].mxu0 }
0x3ad1   : > { %v5778_v40 = vpop.f32.mrb[47].mxu0  ;;  %v3993_v42 = vadd.f32 %v7035_v38, %v3979_v39  ;;  %v3983_v10 = vadd.f32 %v3979_v39, %v3875_v43 }
0x3ad3   : > { %3995 = vrot.lane.b32.xlu0 %v3993_v42, %s6270_s2  ;;  %v5230_v44 = vmul.f32 -1.442695, %v3983_v10  ;;  %v2920_v10 = vadd.f32 %v6951_v54, %v6853_v12 }
0x3ad5   : > { %6191 = vpow2.f32 %v5230_v44  ;;  %v3732_v44 = vadd.f32 %v7033_v36, %v2920_v10 }
0x3adf   : > { %v6192_v45 = vpop.eup %6191 }
0x3ae0   : > { %v3987_v46 = vadd.f32 1.0, %v6192_v45  ;;  %v5220_v45 = vmul.f32 -1.442695, %v3732_v44 }
0x3ae2   : > { %6193 = vrcp.f32 %v3987_v46 }
0x3aec   : > { %v6194_v53 = vpop.eup %6193 }
0x3aed   : > { %v4005_v28 = vsub.f32 1.0, %v6194_v53  ;;  %v4011_v33 = vmul.f32 0.0, %v6194_v53 }
0x3b45   : > { %v3996_v47 = vpop.permute.xlu0 %3995 }
0x3b46   : > { %v3998_v23 = vmul.f32 %v6194_v53, %v3996_v47 }
0x3b48   : > { %4000 = vrot.lane.b32.xlu1 %v3998_v23, %s6275_s27 }
0x3bba   : > { %v4001_v49 = vpop.permute.xlu1 %4000 }
0x3bbb   : > { %v4003_v35 = vadd.f32 %v4001_v49, %v3875_v43 }
0x3bbd   : > { %6195 = vtanh.f32 %v4003_v35 }
0x3bc7   : > { %v6196_v51 = vpop.eup %6195 }
0x3bc8   : > { %4007 = vrot.lane.b32.xlu0 %v6196_v51, %s6274_s22 }
0x3c3a   : > { %v4008_v8 = vpop.permute.xlu0 %4007 }
0x3c3b   : > { %v4010_v56 = vmul.f32 %v4008_v8, %v4005_v28 }
0x3c3d   : > { %v4012_v57 = vadd.f32 %v4011_v33, %v4010_v56 }
0x3c3f   : > { %4014 = vrot.lane.b32.xlu1 %v4012_v57, %s6274_s22 }
0x3cb1   : > { %v4015_v61 = vpop.permute.xlu1 %4014 }
0x3cb2   : > { %4017 = vst.msk [vmem:[#allocation3] sm:$0xff] %vm656_vm0, %v4015_v61  ;;  %5784 = vmatmul.mubr.msk.f32.vlgmr.msra.gmra.mrb[48].mxu0 %vm656_vm0, %v4015_v61 }
0x3cb3   : > { %6000 = vmatpush3.bf16.msra.mxu0 %v7013_v55  ;;  %5790 = vmatprep.mubr.msk.f32.mxu0 %vm6271_vm1, %v6272_v48 }
0x3cb4   : > { %6001 = vmatprep.subr.bf16.mxu0 %v6269_v22 }
0x3d85   : > { %v4086_v41 = vpop.f32.mrb[48].mxu0 }
0x3d86   : > { %v4097_v4 = vadd.f32 %v4086_v41, %v7035_v38  ;;  %v5785_v63 = vpop.f32.mrb[49].mxu0  ;;  %v4090_v0 = vadd.f32 %v4086_v41, %v3880_v3 }
0x3d88   : > { %4099 = vrot.lane.b32.xlu0 %v4097_v4, %s6270_s2  ;;  %v5232_v18 = vmul.f32 -1.442695, %v4090_v0 }
0x3d8a   : > { %6197 = vpow2.f32 %v5232_v18 }
0x3d94   : > { %v6198_v59 = vpop.eup %6197 }
0x3d95   : > { %v4094_v52 = vadd.f32 1.0, %v6198_v59 }
0x3d97   : > { %6199 = vrcp.f32 %v4094_v52 }
0x3da1   : > { %v6200_v5 = vpop.eup %6199 }
0x3da2   : > { %v4109_v16 = vsub.f32 1.0, %v6200_v5  ;;  %v4115_v62 = vmul.f32 %v6200_v5, %v4012_v57 }
0x3dfa   : > { %v4100_v11 = vpop.permute.xlu0 %4099 }
0x3dfb   : > { %v4102_v13 = vmul.f32 %v6200_v5, %v4100_v11 }
0x3dfd   : > { %4104 = vrot.lane.b32.xlu1 %v4102_v13, %s6275_s27 }
0x3e6f   : > { %v4105_v31 = vpop.permute.xlu1 %4104 }
0x3e70   : > { %v4107_v15 = vadd.f32 %v4105_v31, %v3880_v3 }
0x3e72   : > { %6201 = vtanh.f32 %v4107_v15 }
0x3e7c   : > { %v6202_v14 = vpop.eup %6201 }
0x3e7d   : > { %4111 = vrot.lane.b32.xlu0 %v6202_v14, %s6274_s22 }
0x3eef   : > { %v4112_v17 = vpop.permute.xlu0 %4111 }
0x3ef0   : > { %v4114_v19 = vmul.f32 %v4112_v17, %v4109_v16 }
0x3ef2   : > { %v4116_v21 = vadd.f32 %v4115_v62, %v4114_v19 }
0x3ef4   : > { %4118 = vrot.lane.b32.xlu1 %v4116_v21, %s6274_s22 }
0x3f66   : > { %v4119_v1 = vpop.permute.xlu1 %4118 }
0x3f67   : > { %4121 = vst.msk [vmem:[#allocation3 + $0x8] sm:$0xff] %vm656_vm0, %v4119_v1  ;;  %5791 = vmatmul.mubr.msk.f32.vlgmr.msra.gmra.mrb[50].mxu0 %vm656_vm0, %v4119_v1 }
0x3f68   : > { %6003 = vmatpush3.bf16.msra.mxu0 %v7013_v55  ;;  %5797 = vmatprep.mubr.msk.f32.mxu0 %vm6271_vm1, %v6272_v48 }
0x3f69   : > { %6007 = vmatprep.subr.bf16.mxu0 %v6269_v22 }
0x403a   : > { %v4190_v24 = vpop.f32.mrb[50].mxu0 }
0x403b   : > { %v4201_v29 = vadd.f32 %v4190_v24, %v7035_v38  ;;  %v5792_v58 = vpop.f32.mrb[51].mxu0  ;;  %v4194_v27 = vadd.f32 %v4190_v24, %v3885_v50 }
0x403d   : > { %4203 = vrot.lane.b32.xlu0 %v4201_v29, %s6270_s2  ;;  %v5234_v32 = vmul.f32 -1.442695, %v4194_v27 }
0x403f   : > { %6203 = vpow2.f32 %v5234_v32 }
0x4049   : > { %v6204_v60 = vpop.eup %6203 }
0x404a   : > { %v4198_v34 = vadd.f32 1.0, %v6204_v60  ;;  %v3895_v60 = vadd.f32 %v7003_v25, %v6994_v9 }
0x404c   : > { %6205 = vrcp.f32 %v4198_v34 }
0x4056   : > { %v6206_v30 = vpop.eup %6205 }
0x4057   : > { %v4213_v47 = vsub.f32 1.0, %v6206_v30  ;;  %v4219_v49 = vmul.f32 %v6206_v30, %v4116_v21 }
0x40af   : > { %v4204_v37 = vpop.permute.xlu0 %4203 }
0x40b0   : > { %v4206_v39 = vmul.f32 %v6206_v30, %v4204_v37 }
0x40b2   : > { %4208 = vrot.lane.b32.xlu1 %v4206_v39, %s6275_s27 }
0x4124   : > { %v4209_v40 = vpop.permute.xlu1 %4208 }
0x4125   : > { %v4211_v42 = vadd.f32 %v4209_v40, %v3885_v50 }
0x4127   : > { %6207 = vtanh.f32 %v4211_v42 }
0x4128   : > { %6209 = vpow2.f32 %v5220_v45 }
0x4131   : > { %v6208_v43 = vpop.eup %6207 }
0x4132   : > { %4215 = vrot.lane.b32.xlu0 %v6208_v43, %s6274_s22  ;;  %v6210_v46 = vpop.eup %6209 }
0x4133   : > { %v3736_v53 = vadd.f32 1.0, %v6210_v46 }
0x4135   : > { %6211 = vrcp.f32 %v3736_v53 }
0x4136   : > { %3741 = vrot.lane.b32.xlu0 %v3739_v7, %s6270_s2 }
0x413f   : > { %v6212_v28 = vpop.eup %6211 }
0x4140   : > { %v3751_v56 = vsub.f32 1.0, %v6212_v28  ;;  %v3757_v61 = vmul.f32 %v6212_v28, %v7017_v2  ;;  %v3890_v2 = vadd.f32 %v6988_v6, %v7003_v25 }
0x41a4   : > { %v4216_v23 = vpop.permute.xlu0 %4215 }
0x41a5   : > { %v4218_v35 = vmul.f32 %v4216_v23, %v4213_v47 }
0x41a7   : > { %v4220_v51 = vadd.f32 %v4219_v49, %v4218_v35 }
0x41a8   : > { %v3742_v8 = vpop.permute.xlu0 %3741 }
0x41a9   : > { %v3744_v20 = vmul.f32 %v6212_v28, %v3742_v8  ;;  %4222 = vrot.lane.b32.xlu1 %v4220_v51, %s6274_s22  ;;  %v3900_v28 = vadd.f32 %v6992_v26, %v7003_v25  ;;  %v4754_v26 = vld [vmem:[%s7246_s15] sm:$0xff] }
0x41ab   : > { %3746 = vrot.lane.b32.xlu0 %v3744_v20, %s6275_s27 }
0x421b   : > { %v4223_v12 = vpop.permute.xlu1 %4222 }
0x421c   : > { %4225 = vst.msk [vmem:[#allocation3 + $0x10] sm:$0xff] %vm656_vm0, %v4223_v12  ;;  %5798 = vmatmul.mubr.msk.f32.vlgmr.msra.gmra.mrb[52].mxu0 %vm656_vm0, %v4223_v12 }
0x421d   : > { %v3747_v54 = vpop.permute.xlu0 %3746  ;;  %6009 = vmatpush3.bf16.msra.mxu0 %v7013_v55  ;;  %5811 = vmatprep.mubr.msk.f32.mxu0 %vm6271_vm1, %v6272_v48 }
0x421e   : > { %v3749_v36 = vadd.f32 %v3747_v54, %v2920_v10  ;;  %6013 = vmatprep.subr.bf16.mxu0 %v6269_v22 }
0x4220   : > { %6213 = vtanh.f32 %v3749_v36 }
0x422a   : > { %v6214_v33 = vpop.eup %6213 }
0x422b   : > { %3753 = vrot.lane.b32.xlu0 %v6214_v33, %s6274_s22 }
0x429d   : > { %v3754_v57 = vpop.permute.xlu0 %3753 }
0x429e   : > { %v3756_v41 = vmul.f32 %v3754_v57, %v3751_v56 }
0x42a0   : > { %v3758_v4 = vadd.f32 %v3757_v61, %v3756_v41  ;;  %v4755_v61 = vld [vmem:[%s7246_s15 + $0x8] sm:$0xff] }
0x42a1   : > { %v6016_v41 = vpack.c.bf16 %v4755_v61, %v4754_v26 }
0x42a2   : > { %3760 = vrot.lane.b32.xlu0 %v3758_v4, %s6274_s22 }
0x42ef   : > { %v4294_v63 = vpop.f32.mrb[52].mxu0 }
0x42f0   : > { %v4305_v3 = vadd.f32 %v4294_v63, %v7035_v38  ;;  %v5799_v0 = vpop.f32.mrb[53].mxu0  ;;  %v4298_v59 = vadd.f32 %v4294_v63, %v3890_v2 }
0x42f2   : > { %4307 = vrot.lane.b32.xlu1 %v4305_v3, %s6270_s2  ;;  %v5236_v52 = vmul.f32 -1.442695, %v4298_v59  ;;  %v4747_v59 = vld [vmem:[#allocation3 + $0x8] sm:$0xff] }
0x42f4   : > { %6215 = vpow2.f32 %v5236_v52  ;;  %v4748_v52 = vld [vmem:[#allocation3 + $0x10] sm:$0xff] }
0x42fe   : > { %v6216_v5 = vpop.eup %6215 }
0x42ff   : > { %v4302_v11 = vadd.f32 1.0, %v6216_v5 }
0x4301   : > { %6217 = vrcp.f32 %v4302_v11 }
0x430b   : > { %v6218_v13 = vpop.eup %6217 }
0x430c   : > { %v4317_v19 = vsub.f32 1.0, %v6218_v13  ;;  %v4323_v1 = vmul.f32 %v6218_v13, %v4220_v51 }
0x4314   : > { %v3761_v18 = vpop.permute.xlu0 %3760 }
0x4315   : > { %3764 = vst.msk [vmem:[#allocation3 + $0x38] sm:$0xff] %vm656_vm0, %v3761_v18 }
0x431c   : > { %v3772_v22 = vld [vmem:[#allocation3 + $0x38] sm:$0xff] }
0x431d   : > { %5770 = vmatmul.mubr.msk.f32.gmra.mrb[40].mxu1 %vm656_vm0, %v3772_v22 }
0x431e   : > { %5804 = vmatprep.mubr.msk.f32.mxu1 %vm6271_vm1, %v6272_v48 }
0x4364   : > { %v4308_v31 = vpop.permute.xlu1 %4307 }
0x4365   : > { %v4310_v15 = vmul.f32 %v6218_v13, %v4308_v31 }
0x4367   : > { %4312 = vrot.lane.b32.xlu1 %v4310_v15, %s6275_s27 }
0x43d9   : > { %v4313_v14 = vpop.permute.xlu1 %4312 }
0x43da   : > { %v4315_v16 = vadd.f32 %v4313_v14, %v3890_v2  ;;  %v4746_v2 = vld [vmem:[#allocation3] sm:$0xff] }
0x43dc   : > { %6219 = vtanh.f32 %v4315_v16  ;;  %v7145_v16 = vld [vmem:[%s7247_s16] ss:$0 sm:$0xff] }
0x43e6   : > { %v6220_v17 = vpop.eup %6219 }
0x43e7   : > { %4319 = vrot.lane.b32.xlu1 %v6220_v17, %s6274_s22 }
0x43f0   : > { %v7095_v62 = vpop.f32.mrb[40].mxu1 }
0x43f1   : > { %v7097_v6 = vpop.f32.mrb[41].mxu1 }
0x4459   : > { %v4320_v21 = vpop.permute.xlu1 %4319 }
0x445a   : > { %v4322_v24 = vmul.f32 %v4320_v21, %v4317_v19 }
0x445c   : > { %v4324_v29 = vadd.f32 %v4323_v1, %v4322_v24 }
0x445e   : > { %4326 = vrot.lane.b32.xlu1 %v4324_v29, %s6274_s22 }
0x44d0   : > { %v4327_v58 = vpop.permute.xlu1 %4326 }
0x44d1   : > { %4329 = vst.msk [vmem:[#allocation3 + $0x18] sm:$0xff] %vm656_vm0, %v4327_v58  ;;  %5805 = vmatmul.mubr.msk.f32.vlgmr.msra.gmra.mrb[42].mxu1 %vm656_vm0, %v4327_v58 }
0x44d2   : > { %6012 = vmatpush3.bf16.msra.mxu1 %v7013_v55  ;;  %5818 = vmatprep.mubr.msk.f32.mxu1 %vm6271_vm1, %v6272_v48 }
0x44d3   : > { %6017 = vmatprep.subr.bf16.mxu1 %v6016_v41 }
0x44d8   : > { %v4749_v5 = vld [vmem:[#allocation3 + $0x18] sm:$0xff] }
0x45a4   : > { %v4398_v50 = vpop.f32.mrb[42].mxu1 }
0x45a5   : > { %v4409_v27 = vadd.f32 %v4398_v50, %v7035_v38  ;;  %v5806_v32 = vpop.f32.mrb[43].mxu1  ;;  %v4402_v34 = vadd.f32 %v4398_v50, %v3895_v60 }
0x45a7   : > { %4411 = vrot.lane.b32.xlu0 %v4409_v27, %s6270_s2  ;;  %v5238_v30 = vmul.f32 -1.442695, %v4402_v34 }
0x45a9   : > { %6221 = vpow2.f32 %v5238_v30 }
0x45b3   : > { %v6222_v37 = vpop.eup %6221 }
0x45b4   : > { %v4406_v39 = vadd.f32 1.0, %v6222_v37 }
0x45b6   : > { %6223 = vrcp.f32 %v4406_v39 }
0x45c0   : > { %v6224_v40 = vpop.eup %6223 }
0x45c1   : > { %v4421_v45 = vsub.f32 1.0, %v6224_v40  ;;  %v4427_v9 = vmul.f32 %v6224_v40, %v4324_v29 }
0x4619   : > { %v4412_v42 = vpop.permute.xlu0 %4411 }
0x461a   : > { %v4414_v43 = vmul.f32 %v6224_v40, %v4412_v42 }
0x461c   : > { %4416 = vrot.lane.b32.xlu1 %v4414_v43, %s6275_s27 }
0x468e   : > { %v4417_v7 = vpop.permute.xlu1 %4416 }
0x468f   : > { %v4419_v10 = vadd.f32 %v4417_v7, %v3895_v60  ;;  %v3905_v7 = vadd.f32 %v7003_v25, %v7097_v6 }
0x4691   : > { %6225 = vtanh.f32 %v4419_v10 }
0x469b   : > { %v6226_v44 = vpop.eup %6225 }
0x469c   : > { %4423 = vrot.lane.b32.xlu0 %v6226_v44, %s6274_s22 }
0x470e   : > { %v4424_v46 = vpop.permute.xlu0 %4423 }
0x470f   : > { %v4426_v53 = vmul.f32 %v4424_v46, %v4421_v45 }
0x4711   : > { %v4428_v47 = vadd.f32 %v4427_v9, %v4426_v53 }
0x4713   : > { %4430 = vrot.lane.b32.xlu1 %v4428_v47, %s6274_s22 }
0x4785   : > { %v4431_v23 = vpop.permute.xlu1 %4430 }
0x4786   : > { %4433 = vst.msk [vmem:[#allocation3 + $0x20] sm:$0xff] %vm656_vm0, %v4431_v23  ;;  %5812 = vmatmul.mubr.msk.f32.vlgmr.msra.gmra.mrb[54].mxu0 %vm656_vm0, %v4431_v23 }
0x4787   : > { %6015 = vmatpush3.bf16.msra.mxu0 %v7013_v55  ;;  %5825 = vmatprep.mubr.msk.f32.mxu0 %vm6271_vm1, %v6272_v48 }
0x478d   : > { %v4750_v11 = vld [vmem:[#allocation3 + $0x20] sm:$0xff] }
0x4859   : > { %v4502_v49 = vpop.f32.mrb[54].mxu0 }
0x485a   : > { %v4513_v35 = vadd.f32 %v4502_v49, %v7035_v38  ;;  %v5813_v51 = vpop.f32.mrb[55].mxu0  ;;  %v4506_v8 = vadd.f32 %v4502_v49, %v3900_v28 }
0x485c   : > { %4515 = vrot.lane.b32.xlu0 %v4513_v35, %s6270_s2  ;;  %v5240_v20 = vmul.f32 -1.442695, %v4506_v8 }
0x485e   : > { %6227 = vpow2.f32 %v5240_v20 }
0x4868   : > { %v6228_v12 = vpop.eup %6227 }
0x4869   : > { %v4510_v54 = vadd.f32 1.0, %v6228_v12 }
0x486b   : > { %6229 = vrcp.f32 %v4510_v54 }
0x4875   : > { %v6230_v36 = vpop.eup %6229 }
0x4876   : > { %v4525_v4 = vsub.f32 1.0, %v6230_v36  ;;  %v4531_v3 = vmul.f32 %v6230_v36, %v4428_v47 }
0x48ce   : > { %v4516_v55 = vpop.permute.xlu0 %4515 }
0x48cf   : > { %v4518_v33 = vmul.f32 %v6230_v36, %v4516_v55 }
0x48d1   : > { %4520 = vrot.lane.b32.xlu1 %v4518_v33, %s6275_s27 }
0x4943   : > { %v4521_v48 = vpop.permute.xlu1 %4520 }
0x4944   : > { %v4523_v56 = vadd.f32 %v4521_v48, %v3900_v28  ;;  %v3910_v48 = vadd.f32 %v7095_v62, %v7003_v25 }
0x4946   : > { %6231 = vtanh.f32 %v4523_v56 }
0x4950   : > { %v6232_v57 = vpop.eup %6231 }
0x4951   : > { %4527 = vrot.lane.b32.xlu0 %v6232_v57, %s6274_s22 }
0x49c3   : > { %v4528_v63 = vpop.permute.xlu0 %4527 }
0x49c4   : > { %v4530_v0 = vmul.f32 %v4528_v63, %v4525_v4 }
0x49c6   : > { %v7129_v18 = vadd.f32 %v4531_v3, %v4530_v0 }
0x49c8   : > { %4534 = vrot.lane.b32.xlu1 %v7129_v18, %s6274_s22 }
0x4a3a   : > { %v4535_v22 = vpop.permute.xlu1 %4534 }
0x4a3b   : > { %4537 = vst.msk [vmem:[#allocation3 + $0x28] sm:$0xff] %vm656_vm0, %v4535_v22  ;;  %5819 = vmatmul.mubr.msk.f32.vlgmr.msra.gmra.mrb[44].mxu1 %vm656_vm0, %v4535_v22 }
0x4a3c   : > { %6019 = vmatpush3.bf16.msra.mxu1 %v6016_v41  ;;  %5832 = vmatprep.mubr.msk.f32.mxu1 %vm656_vm0, %v4746_v2 }
0x4a3f   : > { %5833 = vmatmul.mubr.msk.f32.vlgmr.msra.gmra.mrb[46].mxu1 %vm656_vm0, %v4747_v59 }
0x4a40   : > { %5835 = vmatprep.mubr.msk.f32.mxu1 %vm656_vm0, %v4748_v52 }
0x4a42   : > { %v4751_v13 = vld [vmem:[#allocation3 + $0x28] sm:$0xff] }
0x4a43   : > { %5836 = vmatmul.mubr.msk.f32.gmra.mrb[48].mxu1 %vm656_vm0, %v4749_v5 }
0x4a44   : > { %5838 = vmatprep.mubr.msk.f32.mxu1 %vm656_vm0, %v4750_v11 }
0x4a47   : > { %5839 = vmatmul.mubr.msk.f32.gmra.mrb[50].mxu1 %vm656_vm0, %v4751_v13 }
0x4b0e   : > { %v4606_v31 = vpop.f32.mrb[44].mxu1 }
0x4b0f   : > { %v4617_v15 = vadd.f32 %v4606_v31, %v7035_v38  ;;  %v5820_v14 = vpop.f32.mrb[45].mxu1  ;;  %v4610_v10 = vadd.f32 %v4606_v31, %v3905_v7 }
0x4b11   : > { %4619 = vrot.lane.b32.xlu0 %v4617_v15, %s6270_s2  ;;  %v5242_v44 = vmul.f32 -1.442695, %v4610_v10 }
0x4b12   : > { %v5834_v17 = vpop.f32.mrb[46].mxu1 }
0x4b13   : > { %v4859_v19 = vadd.f32 %v5834_v17, %v7145_v16  ;;  %v4853_v21 = vpop.f32.mrb[47].mxu1  ;;  %6233 = vpow2.f32 %v5242_v44  ;;  %v4964_v17 = vld [vmem:[%s6698_s29 + $0x8] sm:$0xff] (%p6402_p5) }
0x4b14   : > { %v4854_v1 = vadd.f32 %v7145_v16, %v4853_v21  ;;  %v4968_v21 = vld [vmem:[%s6698_s29 + $0x18] sm:$0xff] (%p6402_p5) }
0x4b15   : > { %v4893_v24 = vmax.f32 %v4859_v19, 0.0  ;;  %v4966_v19 = vld [vmem:[%s6698_s29 + $0x10] sm:$0xff] (%p6402_p5) }
0x4b16   : > { %v4892_v29 = vmax.f32 %v4854_v1, 0.0  ;;  %v5837_v58 = vpop.f32.mrb[48].mxu1  ;;  %v4970_v1 = vld [vmem:[%s6698_s29 + $0x20] sm:$0xff] (%p6402_p5) }
0x4b17   : > { %4901 = vst.msk [vmem:[%s7151_s19 + $0x8] sm:$0xff] %vm656_vm0, %v4893_v24  ;;  %v4869_v50 = vadd.f32 %v5837_v58, %v7145_v16  ;;  %v4863_v27 = vpop.f32.mrb[49].mxu1  ;;  %v4972_v24 = vld [vmem:[%s6698_s29 + $0x28] sm:$0xff] (%p6402_p5)  ;;  %v4976_v58 = vld [vmem:[%s6698_s29 + $0x38] sm:$0xff] (%p6402_p5) }
0x4b18   : > { %4900 = vst.msk [vmem:[%s7151_s19] sm:$0xff] %vm656_vm0, %v4892_v29  ;;  %v4864_v32 = vadd.f32 %v7145_v16, %v4863_v27  ;;  %v4974_v29 = vld [vmem:[%s6698_s29 + $0x30] sm:$0xff] (%p6402_p5) }
0x4b19   : > { %v4895_v60 = vmax.f32 %v4869_v50, 0.0 }
0x4b1a   : > { %v4894_v34 = vmax.f32 %v4864_v32, 0.0  ;;  %v5840_v30 = vpop.f32.mrb[50].mxu1 }
0x4b1b   : > { %4903 = vst.msk [vmem:[%s7151_s19 + $0x18] sm:$0xff] %vm656_vm0, %v4895_v60  ;;  %v4879_v37 = vadd.f32 %v5840_v30, %v7145_v16  ;;  %v4873_v39 = vpop.f32.mrb[51].mxu1 }
0x4b1c   : > { %4902 = vst.msk [vmem:[%s7151_s19 + $0x10] sm:$0xff] %vm656_vm0, %v4894_v34  ;;  %v4874_v40 = vadd.f32 %v7145_v16, %v4873_v39 }
0x4b1d   : > { %v4897_v42 = vmax.f32 %v4879_v37, 0.0  ;;  %v6234_v45 = vpop.eup %6233 }
0x4b1e   : > { %v4896_v43 = vmax.f32 %v4874_v40, 0.0  ;;  %v4614_v46 = vadd.f32 1.0, %v6234_v45 }
0x4b1f   : > { %4905 = vst.msk [vmem:[%s7151_s19 + $0x28] sm:$0xff] %vm656_vm0, %v4897_v42 }
0x4b20   : > { %4904 = vst.msk [vmem:[%s7151_s19 + $0x20] sm:$0xff] %vm656_vm0, %v4896_v43  ;;  %6235 = vrcp.f32 %v4614_v46 }
0x4b2a   : > { %v6236_v9 = vpop.eup %6235 }
0x4b2b   : > { %v4629_v51 = vsub.f32 1.0, %v6236_v9  ;;  %v4635_v6 = vmul.f32 %v6236_v9, %v7129_v18 }
0x4b83   : > { %v4620_v53 = vpop.permute.xlu0 %4619 }
0x4b84   : > { %v4622_v47 = vmul.f32 %v6236_v9, %v4620_v53 }
0x4b86   : > { %4624 = vrot.lane.b32.xlu1 %v4622_v47, %s6275_s27 }
0x4bf8   : > { %v4625_v23 = vpop.permute.xlu1 %4624 }
0x4bf9   : > { %v4627_v49 = vadd.f32 %v4625_v23, %v3905_v7 }
0x4bfb   : > { %6237 = vtanh.f32 %v4627_v49 }
0x4c05   : > { %v6238_v35 = vpop.eup %6237 }
0x4c06   : > { %4631 = vrot.lane.b32.xlu0 %v6238_v35, %s6274_s22 }
0x4c78   : > { %v4632_v28 = vpop.permute.xlu0 %4631 }
0x4c79   : > { %v4634_v8 = vmul.f32 %v4632_v28, %v4629_v51 }
0x4c7b   : > { %v4636_v20 = vadd.f32 %v4635_v6, %v4634_v8 }
0x4c7d   : > { %4638 = vrot.lane.b32.xlu1 %v4636_v20, %s6274_s22 }
0x4cef   : > { %v4639_v12 = vpop.permute.xlu1 %4638 }
0x4cf0   : > { %4641 = vst.msk [vmem:[#allocation3 + $0x30] sm:$0xff] %vm656_vm0, %v4639_v12  ;;  %5826 = vmatmul.mubr.msk.f32.vlgmr.msra.gmra.mrb[56].mxu0 %vm656_vm0, %v4639_v12 }
0x4cf7   : > { %v4752_v54 = vld [vmem:[#allocation3 + $0x30] sm:$0xff] }
0x4cf8   : > { %5841 = vmatprep.mubr.msk.f32.mxu1 %vm656_vm0, %v4752_v54 }
0x4dc3   : > { %v4710_v36 = vpop.f32.mrb[56].mxu0 }
0x4dc4   : > { %v4721_v55 = vadd.f32 %v4710_v36, %v7035_v38  ;;  %v5827_v33 = vpop.f32.mrb[57].mxu0  ;;  %v4714_v56 = vadd.f32 %v4710_v36, %v3910_v48 }
0x4dc6   : > { %4723 = vrot.lane.b32.xlu0 %v4721_v55, %s6270_s2  ;;  %v5244_v57 = vmul.f32 -1.442695, %v4714_v56 }
0x4dc8   : > { %6239 = vpow2.f32 %v5244_v57 }
0x4dd2   : > { %v6240_v26 = vpop.eup %6239 }
0x4dd3   : > { %v4718_v61 = vadd.f32 1.0, %v6240_v26 }
0x4dd5   : > { %6241 = vrcp.f32 %v4718_v61 }
0x4ddf   : > { %v6242_v41 = vpop.eup %6241 }
0x4de0   : > { %v4733_v18 = vsub.f32 1.0, %v6242_v41  ;;  %v4739_v62 = vmul.f32 %v6242_v41, %v4636_v20 }
0x4e38   : > { %v4724_v4 = vpop.permute.xlu0 %4723 }
0x4e39   : > { %v4726_v63 = vmul.f32 %v6242_v41, %v4724_v4 }
0x4e3b   : > { %4728 = vrot.lane.b32.xlu1 %v4726_v63, %s6275_s27  ;;  %s4920_s27 = scalar_lea.vmem (%p6402_p5), %s7248_s17, %s5256_s20 }
0x4e3c   : > { %4965 = vst [vmem:[%s4920_s27 + $0x10] sm:$0xff] (%p6402_p5), %v4964_v17  ;;  %4967 = vst [vmem:[%s4920_s27 + $0x20] sm:$0xff] (%p6402_p5), %v4966_v19 }
0x4e3d   : > { %4969 = vst [vmem:[%s4920_s27 + $0x30] sm:$0xff] (%p6402_p5), %v4968_v21  ;;  %4971 = vst [vmem:[%s4920_s27 + $0x40] sm:$0xff] (%p6402_p5), %v4970_v1 }
0x4e3e   : > { %4973 = vst [vmem:[%s4920_s27 + $0x50] sm:$0xff] (%p6402_p5), %v4972_v24  ;;  %4975 = vst [vmem:[%s4920_s27 + $0x60] sm:$0xff] (%p6402_p5), %v4974_v29 }
0x4e3f   : > { %4977 = vst [vmem:[%s4920_s27 + $0x70] sm:$0xff] (%p6402_p5), %v4976_v58 }
0x4ead   : > { %v4729_v3 = vpop.permute.xlu1 %4728 }
0x4eae   : > { %v4731_v0 = vadd.f32 %v4729_v3, %v3910_v48 }
0x4eb0   : > { %6243 = vtanh.f32 %v4731_v0 }
0x4eba   : > { %v6244_v38 = vpop.eup %6243 }
0x4ebb   : > { %4735 = vrot.lane.b32.xlu0 %v6244_v38, %s6274_s22 }
0x4f2d   : > { %v4736_v25 = vpop.permute.xlu0 %4735 }
0x4f2e   : > { %v4738_v22 = vmul.f32 %v4736_v25, %v4733_v18 }
0x4f30   : > { %v4740_v2 = vadd.f32 %v4739_v62, %v4738_v22 }
0x4f32   : > { %4742 = vrot.lane.b32.xlu1 %v4740_v2, %s6274_s22 }
0x4fa4   : > { %v4743_v59 = vpop.permute.xlu1 %4742 }
0x4fa5   : > { %4745 = vst.msk [vmem:[#allocation3 + $0x38] sm:$0xff] %vm656_vm0, %v4743_v59 }
0x4fac   : > { %v4753_v52 = vld [vmem:[#allocation3 + $0x38] sm:$0xff] }
0x4fad   : > { %5842 = vmatmul.mubr.msk.f32.gmra.mrb[52].mxu1 %vm656_vm0, %v4753_v52 }
0x5080   : > { %v5843_v5 = vpop.f32.mrb[52].mxu1  ;;  %4918 = sbr.rel (!%p6402_p5) target bundleno = 20615 (0x5087), region = 130 }
0x5081   : > { %v4889_v11 = vadd.f32 %v5843_v5, %v7145_v16  ;;  %v4883_v13 = vpop.f32.mrb[53].mxu1 }
0x5082   : > { %v4884_v31 = vadd.f32 %v7145_v16, %v4883_v13  ;;  %v4962_v16 = vld [vmem:[%s6698_s29] sm:$0xff] (%p6402_p5) }
0x5083   : > { %v4899_v15 = vmax.f32 %v4889_v11, 0.0  ;;  %4963 = vst [vmem:[%s4920_s27] sm:$0xff] (%p6402_p5), %v4962_v16 }
0x5084   : > { %v4898_v14 = vmax.f32 %v4884_v31, 0.0 }
0x5085   : > { %4907 = vst.msk [vmem:[%s7151_s19 + $0x38] sm:$0xff] %vm656_vm0, %v4899_v15 }
0x5086   : > { %4906 = vst.msk [vmem:[%s7151_s19 + $0x30] sm:$0xff] %vm656_vm0, %v4898_v14 }
0x5087 PF: > { %4983 = sbr.rel (!%p6402_p5) target bundleno = 20623 (0x508f), region = 168  ;;  %s5257_s1 = sshll.u32 (%p6402_p5), %s6387_s30, 3  ;;  %v5027_v50 = vld [vmem:[%s7151_s19] sm:$0xff] (%p6402_p5)  ;;  %v5029_v27 = vld [vmem:[%s7151_s19 + $0x8] sm:$0xff] (%p6402_p5)  ;;  %v5031_v32 = vld [vmem:[%s7151_s19 + $0x10] sm:$0xff] (%p6402_p5) }
0x5088   : > { %s4985_s28 = scalar_lea.vmem (%p6402_p5), %s7249_s18, %s5257_s1  ;;  %v5033_v60 = vld [vmem:[%s7151_s19 + $0x18] sm:$0xff] (%p6402_p5)  ;;  %v5035_v34 = vld [vmem:[%s7151_s19 + $0x20] sm:$0xff] (%p6402_p5)  ;;  %v5037_v30 = vld [vmem:[%s7151_s19 + $0x28] sm:$0xff] (%p6402_p5) }
0x5089   : > { %5028 = vst [vmem:[%s4985_s28] sm:$0xff] (%p6402_p5), %v5027_v50  ;;  %5030 = vst [vmem:[%s4985_s28 + $0x10] sm:$0xff] (%p6402_p5), %v5029_v27 }
0x508a   : > { %5032 = vst [vmem:[%s4985_s28 + $0x20] sm:$0xff] (%p6402_p5), %v5031_v32  ;;  %5034 = vst [vmem:[%s4985_s28 + $0x30] sm:$0xff] (%p6402_p5), %v5033_v60 }
0x508b   : > { %5036 = vst [vmem:[%s4985_s28 + $0x40] sm:$0xff] (%p6402_p5), %v5035_v34  ;;  %5038 = vst [vmem:[%s4985_s28 + $0x50] sm:$0xff] (%p6402_p5), %v5037_v30 }
0x508c   : > { %v5041_v39 = vld [vmem:[%s7151_s19 + $0x38] sm:$0xff] (%p6402_p5) }
0x508d   : > { %v5039_v37 = vld [vmem:[%s7151_s19 + $0x30] sm:$0xff] (%p6402_p5)  ;;  %5042 = vst [vmem:[%s4985_s28 + $0x70] sm:$0xff] (%p6402_p5), %v5041_v39 }
0x508e   : > { %5040 = vst [vmem:[%s4985_s28 + $0x60] sm:$0xff] %v5039_v37 }
0x508f PF: > { %s7261_s27 = sld [smem:[#allocation7_spill]]  ;;  %s7262_s28 = sld [smem:[#allocation8_spill]] }
0x5090   : > { %p26_p10 = scmp.ge.s32.totalorder %s6390_s0, 4   ;;  %s7263_s29 = smov %s6390_s0 }
0x5092   :  { %28 = sbr.rel (!%p26_p10) target bundleno = 6 (0x6), region = 263 }

</bundles_post_ra>
